<compile_context>
chip_gen: v6e
topology: v6e:2x2x1
jax: 0.10.0
libtpu: 0.0.40
codegen_flags: <defaults>
</compile_context>

<pallas_src>
import functools

import jax
import jax.numpy as jnp
from jax.experimental import pallas as pl
from jax.experimental.pallas import tpu as pltpu

BN_EPS = 1e-5


def _round_up(x, m):
    return (x + m - 1) // m * m


@functools.lru_cache(maxsize=None)
def _vmem_limit():
    # generation-dependent scoped-VMEM limit (v7x: 48 MiB, v5e/v6e: 96 MiB)
    try:
        cap = int(pltpu.get_tpu_info().vmem_capacity_bytes)
        return int(max(32 * 1024 * 1024, min(cap * 3 // 4, 96 * 1024 * 1024)))
    except Exception:
        return 48 * 1024 * 1024


def _k_pad(k):
    """Padded K (256-aligned when large enough for full 256-wide MXU passes)."""
    align = 256 if _round_up(k, 128) >= 256 else 128
    return _round_up(k, align)


def _tk_for(kp):
    align = 256 if kp % 256 == 0 else 128
    tk = min(768, kp)
    tk -= tk % align
    while tk and kp % tk:
        tk -= align
    return tk if tk else kp


def _tn_for(npad):
    # <=256 wide tiles; prefer >=2 column blocks (v7x megacore) when possible
    tn = 128 if npad <= 256 else 256
    while npad % tn:
        tn -= 128
    return tn


def _pick_tile_m(m):
    mp = _round_up(m, 16)
    if mp <= 16:
        return mp, mp
    tm = min(512, _round_up(mp // 2, 16))   # >=2 row blocks when possible
    while mp % tm:
        tm -= 16
    return tm, mp


def _row_tile(mp):
    if mp <= 16:
        return mp
    t = min(512, _round_up(mp // 2, 16))
    while mp % t:
        t -= 16
    return t


# ----------------------------------------------------------------------------
# Pallas kernel 1a: tiled matmul with fused BN partial statistics (no bias --
# conv bias cancels exactly in training-mode BatchNorm).
# ----------------------------------------------------------------------------
def _matmul_stats_kernel(a_ref, b_ref, o_ref, sum_ref, ssq_ref, acc_ref):
    @pl.when(pl.program_id(2) == 0)
    def _():
        acc_ref[...] = jnp.zeros_like(acc_ref)

    acc_ref[...] += jnp.dot(a_ref[...], b_ref[...],
                            preferred_element_type=jnp.float32)

    @pl.when(pl.program_id(2) == pl.num_programs(2) - 1)
    def _():
        acc = acc_ref[...]
        o_ref[...] = acc.astype(o_ref.dtype)
        # Padded rows of `a` are zero -> contribute nothing; no masking needed.
        s = jnp.sum(acc, axis=0, keepdims=True)
        sq = jnp.sum(acc * acc, axis=0, keepdims=True)
        sum_ref[...] = jnp.broadcast_to(s, sum_ref.shape)
        ssq_ref[...] = jnp.broadcast_to(sq, ssq_ref.shape)


def matmul_stats(a, b_packed):
    """(M,K) @ prepacked (Kp,Np) bf16 weights; bf16 out + f32 channel stats."""
    m, k = a.shape
    kp, npad = b_packed.shape
    tm, mp = _pick_tile_m(m)
    tn = _tn_for(npad)
    tk = _tk_for(kp)
    a_p = jnp.pad(a.astype(jnp.bfloat16), ((0, mp - m), (0, kp - k)))
    ni, nj, nk = mp // tm, npad // tn, kp // tk

    out, psum, pssq = pl.pallas_call(
        _matmul_stats_kernel,
        out_shape=(jax.ShapeDtypeStruct((mp, npad), jnp.bfloat16),
                   jax.ShapeDtypeStruct((ni * 8, npad), jnp.float32),
                   jax.ShapeDtypeStruct((ni * 8, npad), jnp.float32)),
        grid_spec=pltpu.PrefetchScalarGridSpec(
            num_scalar_prefetch=0,
            grid=(ni, nj, nk),
            in_specs=[
                pl.BlockSpec((tm, tk), lambda i, j, kk: (i, kk)),
                pl.BlockSpec((tk, tn), lambda i, j, kk: (kk, j)),
            ],
            out_specs=(
                pl.BlockSpec((tm, tn), lambda i, j, kk: (i, j)),
                pl.BlockSpec((8, tn), lambda i, j, kk: (i, j)),
                pl.BlockSpec((8, tn), lambda i, j, kk: (i, j)),
            ),
            scratch_shapes=[pltpu.VMEM((tm, tn), jnp.float32)],
        ),
        compiler_params=pltpu.CompilerParams(
            dimension_semantics=("parallel", "parallel", "arbitrary"),
            vmem_limit_bytes=_vmem_limit()),
    )(a_p, b_packed)

    ch_sum = jnp.sum(psum[0::8], axis=0)    # one meaningful row per row-block
    ch_ssq = jnp.sum(pssq[0::8], axis=0)
    return out, ch_sum, ch_ssq, mp, npad


# ----------------------------------------------------------------------------
# Pallas kernel 1b: tiled matmul + fused bias + activation (output layer, no BN)
# ----------------------------------------------------------------------------
def _apply_act(y, act):
    if act == "relu":
        return jnp.maximum(y, 0.0)
    if act == "tanh":
        return jnp.tanh(y)
    return y


def _matmul_bias_act_kernel(a_ref, b_ref, bias_ref, o_ref, acc_ref, *, act):
    @pl.when(pl.program_id(2) == 0)
    def _():
        acc_ref[...] = jnp.zeros_like(acc_ref)

    acc_ref[...] += jnp.dot(a_ref[...], b_ref[...],
                            preferred_element_type=jnp.float32)

    @pl.when(pl.program_id(2) == pl.num_programs(2) - 1)
    def _():
        o_ref[...] = _apply_act(acc_ref[...] + bias_ref[...], act).astype(o_ref.dtype)


def matmul_bias_act(a, b_packed, bias, act):
    m, k = a.shape
    kp, npad = b_packed.shape
    tm, mp = _pick_tile_m(m)
    tn = _tn_for(npad)
    tk = _tk_for(kp)
    a_p = jnp.pad(a.astype(jnp.bfloat16), ((0, mp - m), (0, kp - k)))
    bias_p = jnp.pad(bias.astype(jnp.float32).reshape(1, -1),
                     ((0, 0), (0, npad - bias.shape[0])))
    ni, nj, nk = mp // tm, npad // tn, kp // tk

    out = pl.pallas_call(
        functools.partial(_matmul_bias_act_kernel, act=act),
        out_shape=jax.ShapeDtypeStruct((mp, npad), jnp.float32),
        grid_spec=pltpu.PrefetchScalarGridSpec(
            num_scalar_prefetch=0,
            grid=(ni, nj, nk),
            in_specs=[
                pl.BlockSpec((tm, tk), lambda i, j, kk: (i, kk)),
                pl.BlockSpec((tk, tn), lambda i, j, kk: (kk, j)),
                pl.BlockSpec((1, tn), lambda i, j, kk: (0, j)),
            ],
            out_specs=pl.BlockSpec((tm, tn), lambda i, j, kk: (i, j)),
            scratch_shapes=[pltpu.VMEM((tm, tn), jnp.float32)],
        ),
        compiler_params=pltpu.CompilerParams(
            dimension_semantics=("parallel", "parallel", "arbitrary"),
            vmem_limit_bytes=_vmem_limit()),
    )(a_p, b_packed, bias_p)
    return out, mp, npad


# ----------------------------------------------------------------------------
# Pallas kernel 2: folded-BN affine + optional residual + activation
# ----------------------------------------------------------------------------
def _affine_act_kernel(x_ref, scale_ref, shift_ref, o_ref, *, act):
    y = x_ref[...].astype(jnp.float32) * scale_ref[...] + shift_ref[...]
    o_ref[...] = _apply_act(y, act).astype(o_ref.dtype)


def _affine_act_res_kernel(x_ref, res_ref, scale_ref, shift_ref, o_ref, *, act,
                           res_after_act):
    y = x_ref[...].astype(jnp.float32) * scale_ref[...] + shift_ref[...]
    r = res_ref[...].astype(jnp.float32)
    if res_after_act:
        o_ref[...] = (_apply_act(y, act) + r).astype(o_ref.dtype)
    else:
        o_ref[...] = _apply_act(y + r, act).astype(o_ref.dtype)


def bn_act(x2d, scale, shift, act="relu", residual=None, res_after_act=False):
    """Per-channel affine (+residual) (+act); bf16 in / bf16 out, row-tiled."""
    mp, cp = x2d.shape
    c = scale.shape[0]
    scale2 = jnp.pad(scale.astype(jnp.float32).reshape(1, c), ((0, 0), (0, cp - c)))
    shift2 = jnp.pad(shift.astype(jnp.float32).reshape(1, c), ((0, 0), (0, cp - c)))
    tmr = _row_tile(mp)
    row_spec = pl.BlockSpec((tmr, cp), lambda i: (i, 0))
    vec_spec = pl.BlockSpec((1, cp), lambda i: (0, 0))
    if residual is None:
        kernel = functools.partial(_affine_act_kernel, act=act)
        in_specs = [row_spec, vec_spec, vec_spec]
        args = (x2d, scale2, shift2)
    else:
        kernel = functools.partial(_affine_act_res_kernel, act=act,
                                   res_after_act=res_after_act)
        in_specs = [row_spec, row_spec, vec_spec, vec_spec]
        args = (x2d, residual, scale2, shift2)
    return pl.pallas_call(
        kernel,
        out_shape=jax.ShapeDtypeStruct((mp, cp), jnp.bfloat16),
        grid=(mp // tmr,),
        in_specs=in_specs,
        out_specs=row_spec,
        compiler_params=pltpu.CompilerParams(
            dimension_semantics=("parallel",),
            vmem_limit_bytes=_vmem_limit()),
    )(*args)


# ----------------------------------------------------------------------------
# Convolution glue (NHWC im2col) around the Pallas matmuls
# ----------------------------------------------------------------------------
# TODO(synk): fold im2col into the matmul via shifted BlockSpec index_maps so the
# kh*kw-expanded patch tensor never hits HBM (dominant HBM term at large images).
def _im2col_nhwc(x, kh, kw, stride, pad):
    n, h, w, c = x.shape
    ho = (h + 2 * pad - kh) // stride + 1
    wo = (w + 2 * pad - kw) // stride + 1
    xp = jnp.pad(x, ((0, 0), (pad, pad), (pad, pad), (0, 0)))
    cols = []
    for dy in range(kh):
        for dx in range(kw):
            cols.append(xp[:, dy:dy + stride * ho:stride,
                           dx:dx + stride * wo:stride, :])
    patches = jnp.concatenate(cols, axis=-1).reshape(n * ho * wo, kh * kw * c)
    return patches, ho, wo


def conv_bn_layer(x, p, *, k, stride, pad, act="relu", residual2d=None,
                  res_after_act=False):
    """Conv2d + BatchNorm (training-mode batch stats) (+residual) (+act)."""
    n = x.shape[0]
    patches, ho, wo = _im2col_nhwc(x, k, k, stride, pad)
    cout = p["gamma"].shape[0]
    y_p, s, sq, mp, npad = matmul_stats(patches, p["w"])
    m = n * ho * wo
    mean = s[:cout] / m
    var = jnp.maximum(sq[:cout] / m - mean * mean, 0.0)
    scale = p["gamma"] * jax.lax.rsqrt(var + BN_EPS)
    shift = p["beta"] - mean * scale
    res_p = None
    if residual2d is not None:
        res_p = jnp.pad(residual2d.astype(jnp.bfloat16),
                        ((0, mp - residual2d.shape[0]),
                         (0, npad - residual2d.shape[1])))
    out_p = bn_act(y_p, scale, shift, act=act, residual=res_p,
                   res_after_act=res_after_act)
    return out_p[:m, :cout].reshape(n, ho, wo, cout)


def conv_bias_act_layer(x, p, *, k, stride, pad, act):
    """Conv2d + bias + activation fused into the matmul epilogue (no BN)."""
    n = x.shape[0]
    patches, ho, wo = _im2col_nhwc(x, k, k, stride, pad)
    cout = p["b"].shape[0]
    m = n * ho * wo
    out_p, _, _ = matmul_bias_act(patches, p["w"], p["b"], act=act)
    return out_p[:m, :cout].reshape(n, ho, wo, cout)


def residual_block(x, p):
    n, h, w, c = x.shape
    h1 = conv_bn_layer(x, p["c1"], k=3, stride=1, pad=1, act="relu")
    res2d = x.reshape(n * h * w, c)
    # relu(bn2(conv2(h1)) + residual)
    return conv_bn_layer(h1, p["c2"], k=3, stride=1, pad=1, act="relu",
                         residual2d=res2d, res_after_act=False)


def convT_bn_layer(x, p, act="relu"):
    """ConvTranspose2d(k=3, s=2, p=1, output_padding=1) + BN + act via ONE
    matmul over the shared [x, x(j+1), x(i+1), x(i+1,j+1)] LHS with the 4
    sub-pixel sub-conv weights concatenated along N, then pixel shuffle."""
    n, h, w, ci = x.shape
    co = p["gamma"].shape[0]
    m = n * h * w

    def shifted(arr, axis):
        pads = [(0, 0)] * 4
        pads[axis] = (0, 1)
        sl = [slice(None)] * 4
        sl[axis] = slice(1, None)
        return jnp.pad(arr, pads)[tuple(sl)]

    xw = shifted(x, 2)
    xh = shifted(x, 1)
    xhw = shifted(xw, 1)
    lhs = jnp.concatenate([x, xw, xh, xhw], axis=-1).reshape(m, 4 * ci)

    y_p, s, sq, mp, npad = matmul_stats(lhs, p["w"])
    # BN stats over the full 2Hx2W output: sum the 4 sub-pixel column groups
    cnt = 4.0 * m
    s4 = s[:4 * co].reshape(4, co).sum(axis=0)
    sq4 = sq[:4 * co].reshape(4, co).sum(axis=0)
    mean = s4 / cnt
    var = jnp.maximum(sq4 / cnt - mean * mean, 0.0)
    scale = p["gamma"] * jax.lax.rsqrt(var + BN_EPS)
    shift = p["beta"] - mean * scale
    out_p = bn_act(y_p, jnp.tile(scale, 4), jnp.tile(shift, 4), act=act)

    y = out_p[:m, :4 * co].reshape(n, h, w, 2, 2, co)          # (ry, rx) groups
    return y.transpose(0, 1, 3, 2, 4, 5).reshape(n, 2 * h, 2 * w, co)


# ----------------------------------------------------------------------------
# Generator forward (consumes pre-packed params)
# ----------------------------------------------------------------------------
def generator_forward(params, x_nchw, noise_nchw):
    x = jnp.transpose(x_nchw, (0, 2, 3, 1)).astype(jnp.bfloat16)     # NHWC
    z = jnp.transpose(noise_nchw, (0, 2, 3, 1)).astype(jnp.bfloat16)
    n, h, w, _ = x.shape

    z_feat = conv_bn_layer(z, params["noise"], k=3, stride=1, pad=1, act="relu")
    z2d = z_feat.reshape(n * h * w, z_feat.shape[-1])
    # sketch branch: relu(bn(conv(x))) + noise_features (add fused into bn_act)
    hcur = conv_bn_layer(x, params["enc"], k=7, stride=1, pad=3, act="relu",
                         residual2d=z2d, res_after_act=True)
    hcur = conv_bn_layer(hcur, params["down1"], k=3, stride=2, pad=1, act="relu")
    hcur = conv_bn_layer(hcur, params["down2"], k=3, stride=2, pad=1, act="relu")
    for rp in params["res"]:
        hcur = residual_block(hcur, rp)
    hcur = convT_bn_layer(hcur, params["up1"], act="relu")
    hcur = convT_bn_layer(hcur, params["up2"], act="relu")
    out = conv_bias_act_layer(hcur, params["out"], k=7, stride=1, pad=3, act="tanh")
    return jnp.transpose(out, (0, 3, 1, 2)).astype(jnp.float32)      # NCHW


# ----------------------------------------------------------------------------
# Parameter init (PyTorch layout) and one-time packing (bf16, im2col layout,
# padded to matmul tiles).  Conv biases before BatchNorm cancel exactly under
# training-mode batch statistics and are therefore dropped at pack time.
# ----------------------------------------------------------------------------
def init_params(key, input_channels=1, output_channels=3,
                num_residual_blocks=3, noise_dim=64):
    keys = iter(jax.random.split(key, 64))

    def conv(cout, cin, k):
        w = jax.random.normal(next(keys), (cout, cin, k, k), jnp.float32) * 0.05
        b = jax.random.normal(next(keys), (cout,), jnp.float32) * 0.01
        return w, b

    def convT(cin, cout, k):
        w = jax.random.normal(next(keys), (cin, cout, k, k), jnp.float32) * 0.05
        b = jax.random.normal(next(keys), (cout,), jnp.float32) * 0.01
        return w, b

    def bn(c):  # PyTorch default: weight=1, bias=0
        return jnp.ones((c,), jnp.float32), jnp.zeros((c,), jnp.float32)

    def conv_bn(cout, cin, k, transpose=False):
        w, b = (convT(cin, cout, k) if transpose else conv(cout, cin, k))
        g, be = bn(cout)
        return {"w": w, "b": b, "gamma": g, "beta": be}

    params = {
        "enc": conv_bn(64, input_channels, 7),
        "noise": conv_bn(64, noise_dim, 3),
        "down1": conv_bn(128, 64, 3),
        "down2": conv_bn(256, 128, 3),
        "res": [],
        "up1": conv_bn(128, 256, 3, transpose=True),
        "up2": conv_bn(64, 128, 3, transpose=True),
    }
    for _ in range(num_residual_blocks):
        w1, b1 = conv(256, 256, 3)
        w2, b2 = conv(256, 256, 3)
        g1, be1 = bn(256)
        g2, be2 = bn(256)
        params["res"].append({"w1": w1, "b1": b1, "g1": g1, "be1": be1,
                              "w2": w2, "b2": b2, "g2": g2, "be2": be2})
    wo, bo = conv(output_channels, 64, 7)
    params["out"] = {"w": wo, "b": bo}
    return params


def pack_generator_params(raw):
    def pack_mat(wm):                       # (K, N) f32 -> bf16, tile-padded
        k, n = wm.shape
        kp = _k_pad(k)
        npad = _round_up(n, 128)
        return jnp.pad(wm.astype(jnp.bfloat16), ((0, kp - k), (0, npad - n)))

    def pack_conv(w, gamma, beta):          # w: (Cout, Cin, k, k)
        cout, cin, kh, kw = w.shape
        wm = jnp.transpose(w, (2, 3, 1, 0)).reshape(kh * kw * cin, cout)
        return {"w": pack_mat(wm), "gamma": gamma, "beta": beta}

    def pack_convT(w, gamma, beta):         # w: (Cin, Cout, 3, 3)
        ci, co = w.shape[0], w.shape[1]
        z = jnp.zeros((ci, co), jnp.float32)
        t = lambda a, b: w[:, :, a, b]
        # rows: [x, x(j+1), x(i+1), x(i+1,j+1)]; cols: (ry,rx)=(0,0),(0,1),(1,0),(1,1)
        wm = jnp.block([[t(1, 1), t(1, 2), t(2, 1), t(2, 2)],
                        [z,       t(1, 0), z,       t(2, 0)],
                        [z,       z,       t(0, 1), t(0, 2)],
                        [z,       z,       z,       t(0, 0)]])
        return {"w": pack_mat(wm), "gamma": gamma, "beta": beta}

    packed = {
        "enc": pack_conv(raw["enc"]["w"], raw["enc"]["gamma"], raw["enc"]["beta"]),
        "noise": pack_conv(raw["noise"]["w"], raw["noise"]["gamma"], raw["noise"]["beta"]),
        "down1": pack_conv(raw["down1"]["w"], raw["down1"]["gamma"], raw["down1"]["beta"]),
        "down2": pack_conv(raw["down2"]["w"], raw["down2"]["gamma"], raw["down2"]["beta"]),
        "res": [{"c1": pack_conv(rp["w1"], rp["g1"], rp["be1"]),
                 "c2": pack_conv(rp["w2"], rp["g2"], rp["be2"])}
                for rp in raw["res"]],
        "up1": pack_convT(raw["up1"]["w"], raw["up1"]["gamma"], raw["up1"]["beta"]),
        "up2": pack_convT(raw["up2"]["w"], raw["up2"]["gamma"], raw["up2"]["beta"]),
    }
    wo = raw["out"]["w"]
    cout, cin, kh, kw = wo.shape
    wm = jnp.transpose(wo, (2, 3, 1, 0)).reshape(kh * kw * cin, cout)
    packed["out"] = {"w": pack_mat(wm), "b": raw["out"]["b"].astype(jnp.float32)}
    return packed


if __name__ == "__main__":
    key = jax.random.PRNGKey(0)
    k_param, k_x, k_noise = jax.random.split(key, 3)

    B, H, W = 2, 16, 16
    # num_residual_blocks kept small (3) for compile time; per-block semantics identical.
    raw_params = init_params(k_param, num_residual_blocks=3)
    packed_params = pack_generator_params(raw_params)     # one-time, outside jit

    x = jax.random.normal(k_x, (B, 1, H, W), jnp.float32)          # sketch, NCHW
    noise = jax.random.normal(k_noise, (B, 64, H, W), jnp.float32)

    fwd = jax.jit(generator_forward)
    out = jax.block_until_ready(fwd(packed_params, x, noise))

    assert out.shape == (B, 3, H, W), out.shape
    assert bool(jnp.all(jnp.isfinite(out)))
    assert bool(jnp.max(jnp.abs(out)) <= 1.0 + 1e-6)  # tanh range
    print("KERNEL_OK")
</pallas_src>

<mosaic_0001>
module attributes {stable_mosaic.version = 11 : i64} {
  func.func @_matmul_stats_kernel(%arg0: i32, %arg1: i32, %arg2: i32, %arg3: memref<256x128xbf16, #tpu.memory_space<vmem>>, %arg4: memref<128x128xbf16, #tpu.memory_space<vmem>>, %arg5: memref<256x128xbf16, #tpu.memory_space<vmem>>, %arg6: memref<8x128xf32, #tpu.memory_space<vmem>>, %arg7: memref<8x128xf32, #tpu.memory_space<vmem>>, %arg8: memref<256x128xf32, #tpu.memory_space<vmem>>) attributes {dimension_semantics = [#tpu.dimension_semantics<parallel>, #tpu.dimension_semantics<parallel>, #tpu.dimension_semantics<arbitrary>], iteration_bounds = array<i64: 2, 1, 1>, scalar_prefetch = 0 : i64, scratch_operands = 1 : i64, tpu.core_type = #tpu.core_type<tc>, window_params = [{transform_indices = @transform_0, window_bounds = array<i64: 256, 128>}, {transform_indices = @transform_1, window_bounds = array<i64: 128, 128>}, {transform_indices = @transform_2, window_bounds = array<i64: 256, 128>}, {transform_indices = @transform_3, window_bounds = array<i64: 8, 128>}, {transform_indices = @transform_4, window_bounds = array<i64: 8, 128>}]} {
    %c0_i32 = arith.constant 0 : i32
    %0 = arith.cmpi eq, %arg2, %c0_i32 : i32
    %1 = arith.extui %0 : i1 to i32
    %c0_i32_0 = arith.constant 0 : i32
    %2 = arith.cmpi ne, %1, %c0_i32_0 : i32
    scf.if %2 {
      %cst_10 = arith.constant 0.000000e+00 : f32
      %12 = vector.broadcast %cst_10 : f32 to vector<256x128xf32>
      %c0_11 = arith.constant 0 : index
      %c0_12 = arith.constant 0 : index
      %13 = vector.load %arg8[%c0_11, %c0_12] : memref<256x128xf32, #tpu.memory_space<vmem>>, vector<256x128xf32>
      tpu.vector_store %arg8[%c0_11, %c0_12], %12 {strides = array<i32>} : memref<256x128xf32, #tpu.memory_space<vmem>>, vector<256x128xf32>,
    } else {
    }
    %c0 = arith.constant 0 : index
    %c0_1 = arith.constant 0 : index
    %3 = vector.load %arg8[%c0, %c0_1] : memref<256x128xf32, #tpu.memory_space<vmem>>, vector<256x128xf32>
    %c0_2 = arith.constant 0 : index
    %c0_3 = arith.constant 0 : index
    %4 = vector.load %arg3[%c0_2, %c0_3] : memref<256x128xbf16, #tpu.memory_space<vmem>>, vector<256x128xbf16>
    %c0_4 = arith.constant 0 : index
    %c0_5 = arith.constant 0 : index
    %5 = vector.load %arg4[%c0_4, %c0_5] : memref<128x128xbf16, #tpu.memory_space<vmem>>, vector<128x128xbf16>
    %cst = arith.constant dense<0.000000e+00> : vector<256x128xf32>
    %6 = tpu.matmul %4, %5, %cst {dimension_numbers = #tpu.dot_dimension_numbers<[1], [0], [0], [1], [0, 0, 1, 1], [], []>} : vector<256x128xbf16>, vector<128x128xbf16>, vector<256x128xf32> -> vector<256x128xf32>
    %7 = arith.addf %3, %6 : vector<256x128xf32>
    %c0_6 = arith.constant 0 : index
    %c0_7 = arith.constant 0 : index
    %8 = vector.load %arg8[%c0_6, %c0_7] : memref<256x128xf32, #tpu.memory_space<vmem>>, vector<256x128xf32>
    tpu.vector_store %arg8[%c0_6, %c0_7], %7 {strides = array<i32>} : memref<256x128xf32, #tpu.memory_space<vmem>>, vector<256x128xf32>,
    %c0_i32_8 = arith.constant 0 : i32
    %9 = arith.cmpi eq, %arg2, %c0_i32_8 : i32
    %10 = arith.extui %9 : i1 to i32
    %c0_i32_9 = arith.constant 0 : i32
    %11 = arith.cmpi ne, %10, %c0_i32_9 : i32
    scf.if %11 {
      %c0_10 = arith.constant 0 : index
      %c0_11 = arith.constant 0 : index
      %12 = vector.load %arg8[%c0_10, %c0_11] : memref<256x128xf32, #tpu.memory_space<vmem>>, vector<256x128xf32>
      %13 = arith.truncf %12 : vector<256x128xf32> to vector<256x128xbf16>
      %c0_12 = arith.constant 0 : index
      %c0_13 = arith.constant 0 : index
      %14 = vector.load %arg5[%c0_12, %c0_13] : memref<256x128xbf16, #tpu.memory_space<vmem>>, vector<256x128xbf16>
      tpu.vector_store %arg5[%c0_12, %c0_13], %13 {strides = array<i32>} : memref<256x128xbf16, #tpu.memory_space<vmem>>, vector<256x128xbf16>,
      %cst_14 = arith.constant dense<0.000000e+00> : vector<128xf32>
      %15 = vector.multi_reduction <add>, %12, %cst_14 [0] : vector<256x128xf32> to vector<128xf32>
      %16 = vector.shape_cast %15 : vector<128xf32> to vector<1x128xf32>
      %17 = arith.mulf %12, %12 : vector<256x128xf32>
      %cst_15 = arith.constant dense<0.000000e+00> : vector<128xf32>
      %18 = vector.multi_reduction <add>, %17, %cst_15 [0] : vector<256x128xf32> to vector<128xf32>
      %19 = vector.shape_cast %18 : vector<128xf32> to vector<1x128xf32>
      %20 = vector.shape_cast %16 : vector<1x128xf32> to vector<1x128xf32>
      %21 = vector.broadcast %20 : vector<1x128xf32> to vector<8x128xf32>
      %c0_16 = arith.constant 0 : index
      %c0_17 = arith.constant 0 : index
      %22 = vector.load %arg6[%c0_16, %c0_17] : memref<8x128xf32, #tpu.memory_space<vmem>>, vector<8x128xf32>
      tpu.vector_store %arg6[%c0_16, %c0_17], %21 {strides = array<i32>} : memref<8x128xf32, #tpu.memory_space<vmem>>, vector<8x128xf32>,
      %23 = vector.shape_cast %19 : vector<1x128xf32> to vector<1x128xf32>
      %24 = vector.broadcast %23 : vector<1x128xf32> to vector<8x128xf32>
      %c0_18 = arith.constant 0 : index
      %c0_19 = arith.constant 0 : index
      %25 = vector.load %arg7[%c0_18, %c0_19] : memref<8x128xf32, #tpu.memory_space<vmem>>, vector<8x128xf32>
      tpu.vector_store %arg7[%c0_18, %c0_19], %24 {strides = array<i32>} : memref<8x128xf32, #tpu.memory_space<vmem>>, vector<8x128xf32>,
    } else {
    }
    return
  }
  func.func @transform_0(%arg0: i32, %arg1: i32, %arg2: i32) -> (i32, i32) {
    %c0_i32 = arith.constant 0 : i32
    return %arg0, %arg2 : i32, i32
  }
  func.func @transform_1(%arg0: i32, %arg1: i32, %arg2: i32) -> (i32, i32) {
    %c0_i32 = arith.constant 0 : i32
    return %arg2, %arg1 : i32, i32
  }
  func.func @transform_2(%arg0: i32, %arg1: i32, %arg2: i32) -> (i32, i32) {
    %c0_i32 = arith.constant 0 : i32
    return %arg0, %arg1 : i32, i32
  }
  func.func @transform_3(%arg0: i32, %arg1: i32, %arg2: i32) -> (i32, i32) {
    %c0_i32 = arith.constant 0 : i32
    return %arg0, %arg1 : i32, i32
  }
  func.func @transform_4(%arg0: i32, %arg1: i32, %arg2: i32) -> (i32, i32) {
    %c0_i32 = arith.constant 0 : i32
    return %arg0, %arg1 : i32, i32
  }
}

module attributes {stable_mosaic.version = 11 : i64} {
  func.func @_matmul_stats_kernel(%arg0: i32, %arg1: i32, %arg2: i32, %arg3: memref<256x768xbf16, #tpu.memory_space<vmem>>, %arg4: memref<768x128xbf16, #tpu.memory_space<vmem>>, %arg5: memref<256x128xbf16, #tpu.memory_space<vmem>>, %arg6: memref<8x128xf32, #tpu.memory_space<vmem>>, %arg7: memref<8x128xf32, #tpu.memory_space<vmem>>, %arg8: memref<256x128xf32, #tpu.memory_space<vmem>>) attributes {dimension_semantics = [#tpu.dimension_semantics<parallel>, #tpu.dimension_semantics<parallel>, #tpu.dimension_semantics<arbitrary>], iteration_bounds = array<i64: 2, 1, 1>, scalar_prefetch = 0 : i64, scratch_operands = 1 : i64, tpu.core_type = #tpu.core_type<tc>, window_params = [{transform_indices = @transform_0, window_bounds = array<i64: 256, 768>}, {transform_indices = @transform_1, window_bounds = array<i64: 768, 128>}, {transform_indices = @transform_2, window_bounds = array<i64: 256, 128>}, {transform_indices = @transform_3, window_bounds = array<i64: 8, 128>}, {transform_indices = @transform_4, window_bounds = array<i64: 8, 128>}]} {
    %c0_i32 = arith.constant 0 : i32
    %0 = arith.cmpi eq, %arg2, %c0_i32 : i32
    %1 = arith.extui %0 : i1 to i32
    %c0_i32_0 = arith.constant 0 : i32
    %2 = arith.cmpi ne, %1, %c0_i32_0 : i32
    scf.if %2 {
      %cst_10 = arith.constant 0.000000e+00 : f32
      %12 = vector.broadcast %cst_10 : f32 to vector<256x128xf32>
      %c0_11 = arith.constant 0 : index
      %c0_12 = arith.constant 0 : index
      %13 = vector.load %arg8[%c0_11, %c0_12] : memref<256x128xf32, #tpu.memory_space<vmem>>, vector<256x128xf32>
      tpu.vector_store %arg8[%c0_11, %c0_12], %12 {strides = array<i32>} : memref<256x128xf32, #tpu.memory_space<vmem>>, vector<256x128xf32>,
    } else {
    }
    %c0 = arith.constant 0 : index
    %c0_1 = arith.constant 0 : index
    %3 = vector.load %arg8[%c0, %c0_1] : memref<256x128xf32, #tpu.memory_space<vmem>>, vector<256x128xf32>
    %c0_2 = arith.constant 0 : index
    %c0_3 = arith.constant 0 : index
    %4 = vector.load %arg3[%c0_2, %c0_3] : memref<256x768xbf16, #tpu.memory_space<vmem>>, vector<256x768xbf16>
    %c0_4 = arith.constant 0 : index
    %c0_5 = arith.constant 0 : index
    %5 = vector.load %arg4[%c0_4, %c0_5] : memref<768x128xbf16, #tpu.memory_space<vmem>>, vector<768x128xbf16>
    %cst = arith.constant dense<0.000000e+00> : vector<256x128xf32>
    %6 = tpu.matmul %4, %5, %cst {dimension_numbers = #tpu.dot_dimension_numbers<[1], [0], [0], [1], [0, 0, 1, 1], [], []>} : vector<256x768xbf16>, vector<768x128xbf16>, vector<256x128xf32> -> vector<256x128xf32>
    %7 = arith.addf %3, %6 : vector<256x128xf32>
    %c0_6 = arith.constant 0 : index
    %c0_7 = arith.constant 0 : index
    %8 = vector.load %arg8[%c0_6, %c0_7] : memref<256x128xf32, #tpu.memory_space<vmem>>, vector<256x128xf32>
    tpu.vector_store %arg8[%c0_6, %c0_7], %7 {strides = array<i32>} : memref<256x128xf32, #tpu.memory_space<vmem>>, vector<256x128xf32>,
    %c0_i32_8 = arith.constant 0 : i32
    %9 = arith.cmpi eq, %arg2, %c0_i32_8 : i32
    %10 = arith.extui %9 : i1 to i32
    %c0_i32_9 = arith.constant 0 : i32
    %11 = arith.cmpi ne, %10, %c0_i32_9 : i32
    scf.if %11 {
      %c0_10 = arith.constant 0 : index
      %c0_11 = arith.constant 0 : index
      %12 = vector.load %arg8[%c0_10, %c0_11] : memref<256x128xf32, #tpu.memory_space<vmem>>, vector<256x128xf32>
      %13 = arith.truncf %12 : vector<256x128xf32> to vector<256x128xbf16>
      %c0_12 = arith.constant 0 : index
      %c0_13 = arith.constant 0 : index
      %14 = vector.load %arg5[%c0_12, %c0_13] : memref<256x128xbf16, #tpu.memory_space<vmem>>, vector<256x128xbf16>
      tpu.vector_store %arg5[%c0_12, %c0_13], %13 {strides = array<i32>} : memref<256x128xbf16, #tpu.memory_space<vmem>>, vector<256x128xbf16>,
      %cst_14 = arith.constant dense<0.000000e+00> : vector<128xf32>
      %15 = vector.multi_reduction <add>, %12, %cst_14 [0] : vector<256x128xf32> to vector<128xf32>
      %16 = vector.shape_cast %15 : vector<128xf32> to vector<1x128xf32>
      %17 = arith.mulf %12, %12 : vector<256x128xf32>
      %cst_15 = arith.constant dense<0.000000e+00> : vector<128xf32>
      %18 = vector.multi_reduction <add>, %17, %cst_15 [0] : vector<256x128xf32> to vector<128xf32>
      %19 = vector.shape_cast %18 : vector<128xf32> to vector<1x128xf32>
      %20 = vector.shape_cast %16 : vector<1x128xf32> to vector<1x128xf32>
      %21 = vector.broadcast %20 : vector<1x128xf32> to vector<8x128xf32>
      %c0_16 = arith.constant 0 : index
      %c0_17 = arith.constant 0 : index
      %22 = vector.load %arg6[%c0_16, %c0_17] : memref<8x128xf32, #tpu.memory_space<vmem>>, vector<8x128xf32>
      tpu.vector_store %arg6[%c0_16, %c0_17], %21 {strides = array<i32>} : memref<8x128xf32, #tpu.memory_space<vmem>>, vector<8x128xf32>,
      %23 = vector.shape_cast %19 : vector<1x128xf32> to vector<1x128xf32>
      %24 = vector.broadcast %23 : vector<1x128xf32> to vector<8x128xf32>
      %c0_18 = arith.constant 0 : index
      %c0_19 = arith.constant 0 : index
      %25 = vector.load %arg7[%c0_18, %c0_19] : memref<8x128xf32, #tpu.memory_space<vmem>>, vector<8x128xf32>
      tpu.vector_store %arg7[%c0_18, %c0_19], %24 {strides = array<i32>} : memref<8x128xf32, #tpu.memory_space<vmem>>, vector<8x128xf32>,
    } else {
    }
    return
  }
  func.func @transform_0(%arg0: i32, %arg1: i32, %arg2: i32) -> (i32, i32) {
    %c0_i32 = arith.constant 0 : i32
    return %arg0, %arg2 : i32, i32
  }
  func.func @transform_1(%arg0: i32, %arg1: i32, %arg2: i32) -> (i32, i32) {
    %c0_i32 = arith.constant 0 : i32
    return %arg2, %arg1 : i32, i32
  }
  func.func @transform_2(%arg0: i32, %arg1: i32, %arg2: i32) -> (i32, i32) {
    %c0_i32 = arith.constant 0 : i32
    return %arg0, %arg1 : i32, i32
  }
  func.func @transform_3(%arg0: i32, %arg1: i32, %arg2: i32) -> (i32, i32) {
    %c0_i32 = arith.constant 0 : i32
    return %arg0, %arg1 : i32, i32
  }
  func.func @transform_4(%arg0: i32, %arg1: i32, %arg2: i32) -> (i32, i32) {
    %c0_i32 = arith.constant 0 : i32
    return %arg0, %arg1 : i32, i32
  }
}

module attributes {stable_mosaic.version = 11 : i64} {
  func.func @_affine_act_kernel(%arg0: i32, %arg1: memref<256x128xbf16, #tpu.memory_space<vmem>>, %arg2: memref<1x128xf32, #tpu.memory_space<vmem>>, %arg3: memref<1x128xf32, #tpu.memory_space<vmem>>, %arg4: memref<256x128xbf16, #tpu.memory_space<vmem>>) attributes {dimension_semantics = [#tpu.dimension_semantics<parallel>], iteration_bounds = array<i64: 2>, scalar_prefetch = 0 : i64, scratch_operands = 0 : i64, tpu.core_type = #tpu.core_type<tc>, window_params = [{transform_indices = @transform_0, window_bounds = array<i64: 256, 128>}, {pipeline_mode = #tpu.pipeline_mode<synchronous>, transform_indices = @transform_1, window_bounds = array<i64: 1, 128>}, {pipeline_mode = #tpu.pipeline_mode<synchronous>, transform_indices = @transform_2, window_bounds = array<i64: 1, 128>}, {transform_indices = @transform_3, window_bounds = array<i64: 256, 128>}]} {
    %c0 = arith.constant 0 : index
    %c0_0 = arith.constant 0 : index
    %0 = vector.load %arg1[%c0, %c0_0] : memref<256x128xbf16, #tpu.memory_space<vmem>>, vector<256x128xbf16>
    %1 = arith.extf %0 : vector<256x128xbf16> to vector<256x128xf32>
    %c0_1 = arith.constant 0 : index
    %c0_2 = arith.constant 0 : index
    %2 = vector.load %arg2[%c0_1, %c0_2] : memref<1x128xf32, #tpu.memory_space<vmem>>, vector<1x128xf32>
    %3 = vector.broadcast %2 : vector<1x128xf32> to vector<256x128xf32>
    %4 = arith.mulf %1, %3 : vector<256x128xf32>
    %c0_3 = arith.constant 0 : index
    %c0_4 = arith.constant 0 : index
    %5 = vector.load %arg3[%c0_3, %c0_4] : memref<1x128xf32, #tpu.memory_space<vmem>>, vector<1x128xf32>
    %6 = vector.broadcast %5 : vector<1x128xf32> to vector<256x128xf32>
    %7 = arith.addf %4, %6 : vector<256x128xf32>
    %cst = arith.constant 0.000000e+00 : f32
    %8 = vector.broadcast %cst : f32 to vector<256x128xf32>
    %9 = arith.maximumf %7, %8 : vector<256x128xf32>
    %10 = arith.truncf %9 : vector<256x128xf32> to vector<256x128xbf16>
    %c0_5 = arith.constant 0 : index
    %c0_6 = arith.constant 0 : index
    %11 = vector.load %arg4[%c0_5, %c0_6] : memref<256x128xbf16, #tpu.memory_space<vmem>>, vector<256x128xbf16>
    tpu.vector_store %arg4[%c0_5, %c0_6], %10 {strides = array<i32>} : memref<256x128xbf16, #tpu.memory_space<vmem>>, vector<256x128xbf16>,
    return
  }
  func.func @transform_0(%arg0: i32) -> (i32, i32) {
    %c0_i32 = arith.constant 0 : i32
    %c0_i32_0 = arith.constant 0 : i32
    return %arg0, %c0_i32 : i32, i32
  }
  func.func @transform_1(%arg0: i32) -> (i32, i32) {
    %c0_i32 = arith.constant 0 : i32
    %c0_i32_0 = arith.constant 0 : i32
    %c0_i32_1 = arith.constant 0 : i32
    return %c0_i32, %c0_i32_0 : i32, i32
  }
  func.func @transform_2(%arg0: i32) -> (i32, i32) {
    %c0_i32 = arith.constant 0 : i32
    %c0_i32_0 = arith.constant 0 : i32
    %c0_i32_1 = arith.constant 0 : i32
    return %c0_i32, %c0_i32_0 : i32, i32
  }
  func.func @transform_3(%arg0: i32) -> (i32, i32) {
    %c0_i32 = arith.constant 0 : i32
    %c0_i32_0 = arith.constant 0 : i32
    return %arg0, %c0_i32 : i32, i32
  }
}

module attributes {stable_mosaic.version = 11 : i64} {
  func.func @_affine_act_res_kernel(%arg0: i32, %arg1: memref<256x128xbf16, #tpu.memory_space<vmem>>, %arg2: memref<256x128xbf16, #tpu.memory_space<vmem>>, %arg3: memref<1x128xf32, #tpu.memory_space<vmem>>, %arg4: memref<1x128xf32, #tpu.memory_space<vmem>>, %arg5: memref<256x128xbf16, #tpu.memory_space<vmem>>) attributes {dimension_semantics = [#tpu.dimension_semantics<parallel>], iteration_bounds = array<i64: 2>, scalar_prefetch = 0 : i64, scratch_operands = 0 : i64, tpu.core_type = #tpu.core_type<tc>, window_params = [{transform_indices = @transform_0, window_bounds = array<i64: 256, 128>}, {transform_indices = @transform_1, window_bounds = array<i64: 256, 128>}, {pipeline_mode = #tpu.pipeline_mode<synchronous>, transform_indices = @transform_2, window_bounds = array<i64: 1, 128>}, {pipeline_mode = #tpu.pipeline_mode<synchronous>, transform_indices = @transform_3, window_bounds = array<i64: 1, 128>}, {transform_indices = @transform_4, window_bounds = array<i64: 256, 128>}]} {
    %c0 = arith.constant 0 : index
    %c0_0 = arith.constant 0 : index
    %0 = vector.load %arg1[%c0, %c0_0] : memref<256x128xbf16, #tpu.memory_space<vmem>>, vector<256x128xbf16>
    %1 = arith.extf %0 : vector<256x128xbf16> to vector<256x128xf32>
    %c0_1 = arith.constant 0 : index
    %c0_2 = arith.constant 0 : index
    %2 = vector.load %arg3[%c0_1, %c0_2] : memref<1x128xf32, #tpu.memory_space<vmem>>, vector<1x128xf32>
    %3 = vector.broadcast %2 : vector<1x128xf32> to vector<256x128xf32>
    %4 = arith.mulf %1, %3 : vector<256x128xf32>
    %c0_3 = arith.constant 0 : index
    %c0_4 = arith.constant 0 : index
    %5 = vector.load %arg4[%c0_3, %c0_4] : memref<1x128xf32, #tpu.memory_space<vmem>>, vector<1x128xf32>
    %6 = vector.broadcast %5 : vector<1x128xf32> to vector<256x128xf32>
    %7 = arith.addf %4, %6 : vector<256x128xf32>
    %c0_5 = arith.constant 0 : index
    %c0_6 = arith.constant 0 : index
    %8 = vector.load %arg2[%c0_5, %c0_6] : memref<256x128xbf16, #tpu.memory_space<vmem>>, vector<256x128xbf16>
    %9 = arith.extf %8 : vector<256x128xbf16> to vector<256x128xf32>
    %cst = arith.constant 0.000000e+00 : f32
    %10 = vector.broadcast %cst : f32 to vector<256x128xf32>
    %11 = arith.maximumf %7, %10 : vector<256x128xf32>
    %12 = arith.addf %11, %9 : vector<256x128xf32>
    %13 = arith.truncf %12 : vector<256x128xf32> to vector<256x128xbf16>
    %c0_7 = arith.constant 0 : index
    %c0_8 = arith.constant 0 : index
    %14 = vector.load %arg5[%c0_7, %c0_8] : memref<256x128xbf16, #tpu.memory_space<vmem>>, vector<256x128xbf16>
    tpu.vector_store %arg5[%c0_7, %c0_8], %13 {strides = array<i32>} : memref<256x128xbf16, #tpu.memory_space<vmem>>, vector<256x128xbf16>,
    return
  }
  func.func @transform_0(%arg0: i32) -> (i32, i32) {
    %c0_i32 = arith.constant 0 : i32
    %c0_i32_0 = arith.constant 0 : i32
    return %arg0, %c0_i32 : i32, i32
  }
  func.func @transform_1(%arg0: i32) -> (i32, i32) {
    %c0_i32 = arith.constant 0 : i32
    %c0_i32_0 = arith.constant 0 : i32
    return %arg0, %c0_i32 : i32, i32
  }
  func.func @transform_2(%arg0: i32) -> (i32, i32) {
    %c0_i32 = arith.constant 0 : i32
    %c0_i32_0 = arith.constant 0 : i32
    %c0_i32_1 = arith.constant 0 : i32
    return %c0_i32, %c0_i32_0 : i32, i32
  }
  func.func @transform_3(%arg0: i32) -> (i32, i32) {
    %c0_i32 = arith.constant 0 : i32
    %c0_i32_0 = arith.constant 0 : i32
    %c0_i32_1 = arith.constant 0 : i32
    return %c0_i32, %c0_i32_0 : i32, i32
  }
  func.func @transform_4(%arg0: i32) -> (i32, i32) {
    %c0_i32 = arith.constant 0 : i32
    %c0_i32_0 = arith.constant 0 : i32
    return %arg0, %c0_i32 : i32, i32
  }
}

module attributes {stable_mosaic.version = 11 : i64} {
  func.func @_matmul_stats_kernel(%arg0: i32, %arg1: i32, %arg2: i32, %arg3: memref<64x768xbf16, #tpu.memory_space<vmem>>, %arg4: memref<768x128xbf16, #tpu.memory_space<vmem>>, %arg5: memref<64x128xbf16, #tpu.memory_space<vmem>>, %arg6: memref<8x128xf32, #tpu.memory_space<vmem>>, %arg7: memref<8x128xf32, #tpu.memory_space<vmem>>, %arg8: memref<64x128xf32, #tpu.memory_space<vmem>>) attributes {dimension_semantics = [#tpu.dimension_semantics<parallel>, #tpu.dimension_semantics<parallel>, #tpu.dimension_semantics<arbitrary>], iteration_bounds = array<i64: 2, 1, 1>, scalar_prefetch = 0 : i64, scratch_operands = 1 : i64, tpu.core_type = #tpu.core_type<tc>, window_params = [{transform_indices = @transform_0, window_bounds = array<i64: 64, 768>}, {transform_indices = @transform_1, window_bounds = array<i64: 768, 128>}, {transform_indices = @transform_2, window_bounds = array<i64: 64, 128>}, {transform_indices = @transform_3, window_bounds = array<i64: 8, 128>}, {transform_indices = @transform_4, window_bounds = array<i64: 8, 128>}]} {
    %c0_i32 = arith.constant 0 : i32
    %0 = arith.cmpi eq, %arg2, %c0_i32 : i32
    %1 = arith.extui %0 : i1 to i32
    %c0_i32_0 = arith.constant 0 : i32
    %2 = arith.cmpi ne, %1, %c0_i32_0 : i32
    scf.if %2 {
      %cst_10 = arith.constant 0.000000e+00 : f32
      %12 = vector.broadcast %cst_10 : f32 to vector<64x128xf32>
      %c0_11 = arith.constant 0 : index
      %c0_12 = arith.constant 0 : index
      %13 = vector.load %arg8[%c0_11, %c0_12] : memref<64x128xf32, #tpu.memory_space<vmem>>, vector<64x128xf32>
      tpu.vector_store %arg8[%c0_11, %c0_12], %12 {strides = array<i32>} : memref<64x128xf32, #tpu.memory_space<vmem>>, vector<64x128xf32>,
    } else {
    }
    %c0 = arith.constant 0 : index
    %c0_1 = arith.constant 0 : index
    %3 = vector.load %arg8[%c0, %c0_1] : memref<64x128xf32, #tpu.memory_space<vmem>>, vector<64x128xf32>
    %c0_2 = arith.constant 0 : index
    %c0_3 = arith.constant 0 : index
    %4 = vector.load %arg3[%c0_2, %c0_3] : memref<64x768xbf16, #tpu.memory_space<vmem>>, vector<64x768xbf16>
    %c0_4 = arith.constant 0 : index
    %c0_5 = arith.constant 0 : index
    %5 = vector.load %arg4[%c0_4, %c0_5] : memref<768x128xbf16, #tpu.memory_space<vmem>>, vector<768x128xbf16>
    %cst = arith.constant dense<0.000000e+00> : vector<64x128xf32>
    %6 = tpu.matmul %4, %5, %cst {dimension_numbers = #tpu.dot_dimension_numbers<[1], [0], [0], [1], [0, 0, 1, 1], [], []>} : vector<64x768xbf16>, vector<768x128xbf16>, vector<64x128xf32> -> vector<64x128xf32>
    %7 = arith.addf %3, %6 : vector<64x128xf32>
    %c0_6 = arith.constant 0 : index
    %c0_7 = arith.constant 0 : index
    %8 = vector.load %arg8[%c0_6, %c0_7] : memref<64x128xf32, #tpu.memory_space<vmem>>, vector<64x128xf32>
    tpu.vector_store %arg8[%c0_6, %c0_7], %7 {strides = array<i32>} : memref<64x128xf32, #tpu.memory_space<vmem>>, vector<64x128xf32>,
    %c0_i32_8 = arith.constant 0 : i32
    %9 = arith.cmpi eq, %arg2, %c0_i32_8 : i32
    %10 = arith.extui %9 : i1 to i32
    %c0_i32_9 = arith.constant 0 : i32
    %11 = arith.cmpi ne, %10, %c0_i32_9 : i32
    scf.if %11 {
      %c0_10 = arith.constant 0 : index
      %c0_11 = arith.constant 0 : index
      %12 = vector.load %arg8[%c0_10, %c0_11] : memref<64x128xf32, #tpu.memory_space<vmem>>, vector<64x128xf32>
      %13 = arith.truncf %12 : vector<64x128xf32> to vector<64x128xbf16>
      %c0_12 = arith.constant 0 : index
      %c0_13 = arith.constant 0 : index
      %14 = vector.load %arg5[%c0_12, %c0_13] : memref<64x128xbf16, #tpu.memory_space<vmem>>, vector<64x128xbf16>
      tpu.vector_store %arg5[%c0_12, %c0_13], %13 {strides = array<i32>} : memref<64x128xbf16, #tpu.memory_space<vmem>>, vector<64x128xbf16>,
      %cst_14 = arith.constant dense<0.000000e+00> : vector<128xf32>
      %15 = vector.multi_reduction <add>, %12, %cst_14 [0] : vector<64x128xf32> to vector<128xf32>
      %16 = vector.shape_cast %15 : vector<128xf32> to vector<1x128xf32>
      %17 = arith.mulf %12, %12 : vector<64x128xf32>
      %cst_15 = arith.constant dense<0.000000e+00> : vector<128xf32>
      %18 = vector.multi_reduction <add>, %17, %cst_15 [0] : vector<64x128xf32> to vector<128xf32>
      %19 = vector.shape_cast %18 : vector<128xf32> to vector<1x128xf32>
      %20 = vector.shape_cast %16 : vector<1x128xf32> to vector<1x128xf32>
      %21 = vector.broadcast %20 : vector<1x128xf32> to vector<8x128xf32>
      %c0_16 = arith.constant 0 : index
      %c0_17 = arith.constant 0 : index
      %22 = vector.load %arg6[%c0_16, %c0_17] : memref<8x128xf32, #tpu.memory_space<vmem>>, vector<8x128xf32>
      tpu.vector_store %arg6[%c0_16, %c0_17], %21 {strides = array<i32>} : memref<8x128xf32, #tpu.memory_space<vmem>>, vector<8x128xf32>,
      %23 = vector.shape_cast %19 : vector<1x128xf32> to vector<1x128xf32>
      %24 = vector.broadcast %23 : vector<1x128xf32> to vector<8x128xf32>
      %c0_18 = arith.constant 0 : index
      %c0_19 = arith.constant 0 : index
      %25 = vector.load %arg7[%c0_18, %c0_19] : memref<8x128xf32, #tpu.memory_space<vmem>>, vector<8x128xf32>
      tpu.vector_store %arg7[%c0_18, %c0_19], %24 {strides = array<i32>} : memref<8x128xf32, #tpu.memory_space<vmem>>, vector<8x128xf32>,
    } else {
    }
    return
  }
  func.func @transform_0(%arg0: i32, %arg1: i32, %arg2: i32) -> (i32, i32) {
    %c0_i32 = arith.constant 0 : i32
    return %arg0, %arg2 : i32, i32
  }
  func.func @transform_1(%arg0: i32, %arg1: i32, %arg2: i32) -> (i32, i32) {
    %c0_i32 = arith.constant 0 : i32
    return %arg2, %arg1 : i32, i32
  }
  func.func @transform_2(%arg0: i32, %arg1: i32, %arg2: i32) -> (i32, i32) {
    %c0_i32 = arith.constant 0 : i32
    return %arg0, %arg1 : i32, i32
  }
  func.func @transform_3(%arg0: i32, %arg1: i32, %arg2: i32) -> (i32, i32) {
    %c0_i32 = arith.constant 0 : i32
    return %arg0, %arg1 : i32, i32
  }
  func.func @transform_4(%arg0: i32, %arg1: i32, %arg2: i32) -> (i32, i32) {
    %c0_i32 = arith.constant 0 : i32
    return %arg0, %arg1 : i32, i32
  }
}

module attributes {stable_mosaic.version = 11 : i64} {
  func.func @_affine_act_kernel(%arg0: i32, %arg1: memref<64x128xbf16, #tpu.memory_space<vmem>>, %arg2: memref<1x128xf32, #tpu.memory_space<vmem>>, %arg3: memref<1x128xf32, #tpu.memory_space<vmem>>, %arg4: memref<64x128xbf16, #tpu.memory_space<vmem>>) attributes {dimension_semantics = [#tpu.dimension_semantics<parallel>], iteration_bounds = array<i64: 2>, scalar_prefetch = 0 : i64, scratch_operands = 0 : i64, tpu.core_type = #tpu.core_type<tc>, window_params = [{transform_indices = @transform_0, window_bounds = array<i64: 64, 128>}, {pipeline_mode = #tpu.pipeline_mode<synchronous>, transform_indices = @transform_1, window_bounds = array<i64: 1, 128>}, {pipeline_mode = #tpu.pipeline_mode<synchronous>, transform_indices = @transform_2, window_bounds = array<i64: 1, 128>}, {transform_indices = @transform_3, window_bounds = array<i64: 64, 128>}]} {
    %c0 = arith.constant 0 : index
    %c0_0 = arith.constant 0 : index
    %0 = vector.load %arg1[%c0, %c0_0] : memref<64x128xbf16, #tpu.memory_space<vmem>>, vector<64x128xbf16>
    %1 = arith.extf %0 : vector<64x128xbf16> to vector<64x128xf32>
    %c0_1 = arith.constant 0 : index
    %c0_2 = arith.constant 0 : index
    %2 = vector.load %arg2[%c0_1, %c0_2] : memref<1x128xf32, #tpu.memory_space<vmem>>, vector<1x128xf32>
    %3 = vector.broadcast %2 : vector<1x128xf32> to vector<64x128xf32>
    %4 = arith.mulf %1, %3 : vector<64x128xf32>
    %c0_3 = arith.constant 0 : index
    %c0_4 = arith.constant 0 : index
    %5 = vector.load %arg3[%c0_3, %c0_4] : memref<1x128xf32, #tpu.memory_space<vmem>>, vector<1x128xf32>
    %6 = vector.broadcast %5 : vector<1x128xf32> to vector<64x128xf32>
    %7 = arith.addf %4, %6 : vector<64x128xf32>
    %cst = arith.constant 0.000000e+00 : f32
    %8 = vector.broadcast %cst : f32 to vector<64x128xf32>
    %9 = arith.maximumf %7, %8 : vector<64x128xf32>
    %10 = arith.truncf %9 : vector<64x128xf32> to vector<64x128xbf16>
    %c0_5 = arith.constant 0 : index
    %c0_6 = arith.constant 0 : index
    %11 = vector.load %arg4[%c0_5, %c0_6] : memref<64x128xbf16, #tpu.memory_space<vmem>>, vector<64x128xbf16>
    tpu.vector_store %arg4[%c0_5, %c0_6], %10 {strides = array<i32>} : memref<64x128xbf16, #tpu.memory_space<vmem>>, vector<64x128xbf16>,
    return
  }
  func.func @transform_0(%arg0: i32) -> (i32, i32) {
    %c0_i32 = arith.constant 0 : i32
    %c0_i32_0 = arith.constant 0 : i32
    return %arg0, %c0_i32 : i32, i32
  }
  func.func @transform_1(%arg0: i32) -> (i32, i32) {
    %c0_i32 = arith.constant 0 : i32
    %c0_i32_0 = arith.constant 0 : i32
    %c0_i32_1 = arith.constant 0 : i32
    return %c0_i32, %c0_i32_0 : i32, i32
  }
  func.func @transform_2(%arg0: i32) -> (i32, i32) {
    %c0_i32 = arith.constant 0 : i32
    %c0_i32_0 = arith.constant 0 : i32
    %c0_i32_1 = arith.constant 0 : i32
    return %c0_i32, %c0_i32_0 : i32, i32
  }
  func.func @transform_3(%arg0: i32) -> (i32, i32) {
    %c0_i32 = arith.constant 0 : i32
    %c0_i32_0 = arith.constant 0 : i32
    return %arg0, %c0_i32 : i32, i32
  }
}

module attributes {stable_mosaic.version = 11 : i64} {
  func.func @_matmul_stats_kernel(%arg0: i32, %arg1: i32, %arg2: i32, %arg3: memref<16x256xbf16, #tpu.memory_space<vmem>>, %arg4: memref<256x128xbf16, #tpu.memory_space<vmem>>, %arg5: memref<16x128xbf16, #tpu.memory_space<vmem>>, %arg6: memref<8x128xf32, #tpu.memory_space<vmem>>, %arg7: memref<8x128xf32, #tpu.memory_space<vmem>>, %arg8: memref<16x128xf32, #tpu.memory_space<vmem>>) attributes {dimension_semantics = [#tpu.dimension_semantics<parallel>, #tpu.dimension_semantics<parallel>, #tpu.dimension_semantics<arbitrary>], iteration_bounds = array<i64: 2, 2, 5>, scalar_prefetch = 0 : i64, scratch_operands = 1 : i64, tpu.core_type = #tpu.core_type<tc>, window_params = [{transform_indices = @transform_0, window_bounds = array<i64: 16, 256>}, {transform_indices = @transform_1, window_bounds = array<i64: 256, 128>}, {transform_indices = @transform_2, window_bounds = array<i64: 16, 128>}, {transform_indices = @transform_3, window_bounds = array<i64: 8, 128>}, {transform_indices = @transform_4, window_bounds = array<i64: 8, 128>}]} {
    %c0_i32 = arith.constant 0 : i32
    %0 = arith.cmpi eq, %arg2, %c0_i32 : i32
    %1 = arith.extui %0 : i1 to i32
    %c0_i32_0 = arith.constant 0 : i32
    %2 = arith.cmpi ne, %1, %c0_i32_0 : i32
    scf.if %2 {
      %cst_9 = arith.constant 0.000000e+00 : f32
      %12 = vector.broadcast %cst_9 : f32 to vector<16x128xf32>
      %c0_10 = arith.constant 0 : index
      %c0_11 = arith.constant 0 : index
      %13 = vector.load %arg8[%c0_10, %c0_11] : memref<16x128xf32, #tpu.memory_space<vmem>>, vector<16x128xf32>
      tpu.vector_store %arg8[%c0_10, %c0_11], %12 {strides = array<i32>} : memref<16x128xf32, #tpu.memory_space<vmem>>, vector<16x128xf32>,
    } else {
    }
    %c0 = arith.constant 0 : index
    %c0_1 = arith.constant 0 : index
    %3 = vector.load %arg8[%c0, %c0_1] : memref<16x128xf32, #tpu.memory_space<vmem>>, vector<16x128xf32>
    %c0_2 = arith.constant 0 : index
    %c0_3 = arith.constant 0 : index
    %4 = vector.load %arg3[%c0_2, %c0_3] : memref<16x256xbf16, #tpu.memory_space<vmem>>, vector<16x256xbf16>
    %c0_4 = arith.constant 0 : index
    %c0_5 = arith.constant 0 : index
    %5 = vector.load %arg4[%c0_4, %c0_5] : memref<256x128xbf16, #tpu.memory_space<vmem>>, vector<256x128xbf16>
    %cst = arith.constant dense<0.000000e+00> : vector<16x128xf32>
    %6 = tpu.matmul %4, %5, %cst {dimension_numbers = #tpu.dot_dimension_numbers<[1], [0], [0], [1], [0, 0, 1, 1], [], []>} : vector<16x256xbf16>, vector<256x128xbf16>, vector<16x128xf32> -> vector<16x128xf32>
    %7 = arith.addf %3, %6 : vector<16x128xf32>
    %c0_6 = arith.constant 0 : index
    %c0_7 = arith.constant 0 : index
    %8 = vector.load %arg8[%c0_6, %c0_7] : memref<16x128xf32, #tpu.memory_space<vmem>>, vector<16x128xf32>
    tpu.vector_store %arg8[%c0_6, %c0_7], %7 {strides = array<i32>} : memref<16x128xf32, #tpu.memory_space<vmem>>, vector<16x128xf32>,
    %c4_i32 = arith.constant 4 : i32
    %9 = arith.cmpi eq, %arg2, %c4_i32 : i32
    %10 = arith.extui %9 : i1 to i32
    %c0_i32_8 = arith.constant 0 : i32
    %11 = arith.cmpi ne, %10, %c0_i32_8 : i32
    scf.if %11 {
      %c0_9 = arith.constant 0 : index
      %c0_10 = arith.constant 0 : index
      %12 = vector.load %arg8[%c0_9, %c0_10] : memref<16x128xf32, #tpu.memory_space<vmem>>, vector<16x128xf32>
      %13 = arith.truncf %12 : vector<16x128xf32> to vector<16x128xbf16>
      %c0_11 = arith.constant 0 : index
      %c0_12 = arith.constant 0 : index
      %14 = vector.load %arg5[%c0_11, %c0_12] : memref<16x128xbf16, #tpu.memory_space<vmem>>, vector<16x128xbf16>
      tpu.vector_store %arg5[%c0_11, %c0_12], %13 {strides = array<i32>} : memref<16x128xbf16, #tpu.memory_space<vmem>>, vector<16x128xbf16>,
      %cst_13 = arith.constant dense<0.000000e+00> : vector<128xf32>
      %15 = vector.multi_reduction <add>, %12, %cst_13 [0] : vector<16x128xf32> to vector<128xf32>
      %16 = vector.shape_cast %15 : vector<128xf32> to vector<1x128xf32>
      %17 = arith.mulf %12, %12 : vector<16x128xf32>
      %cst_14 = arith.constant dense<0.000000e+00> : vector<128xf32>
      %18 = vector.multi_reduction <add>, %17, %cst_14 [0] : vector<16x128xf32> to vector<128xf32>
      %19 = vector.shape_cast %18 : vector<128xf32> to vector<1x128xf32>
      %20 = vector.shape_cast %16 : vector<1x128xf32> to vector<1x128xf32>
      %21 = vector.broadcast %20 : vector<1x128xf32> to vector<8x128xf32>
      %c0_15 = arith.constant 0 : index
      %c0_16 = arith.constant 0 : index
      %22 = vector.load %arg6[%c0_15, %c0_16] : memref<8x128xf32, #tpu.memory_space<vmem>>, vector<8x128xf32>
      tpu.vector_store %arg6[%c0_15, %c0_16], %21 {strides = array<i32>} : memref<8x128xf32, #tpu.memory_space<vmem>>, vector<8x128xf32>,
      %23 = vector.shape_cast %19 : vector<1x128xf32> to vector<1x128xf32>
      %24 = vector.broadcast %23 : vector<1x128xf32> to vector<8x128xf32>
      %c0_17 = arith.constant 0 : index
      %c0_18 = arith.constant 0 : index
      %25 = vector.load %arg7[%c0_17, %c0_18] : memref<8x128xf32, #tpu.memory_space<vmem>>, vector<8x128xf32>
      tpu.vector_store %arg7[%c0_17, %c0_18], %24 {strides = array<i32>} : memref<8x128xf32, #tpu.memory_space<vmem>>, vector<8x128xf32>,
    } else {
    }
    return
  }
  func.func @transform_0(%arg0: i32, %arg1: i32, %arg2: i32) -> (i32, i32) {
    %c0_i32 = arith.constant 0 : i32
    return %arg0, %arg2 : i32, i32
  }
  func.func @transform_1(%arg0: i32, %arg1: i32, %arg2: i32) -> (i32, i32) {
    %c0_i32 = arith.constant 0 : i32
    return %arg2, %arg1 : i32, i32
  }
  func.func @transform_2(%arg0: i32, %arg1: i32, %arg2: i32) -> (i32, i32) {
    %c0_i32 = arith.constant 0 : i32
    return %arg0, %arg1 : i32, i32
  }
  func.func @transform_3(%arg0: i32, %arg1: i32, %arg2: i32) -> (i32, i32) {
    %c0_i32 = arith.constant 0 : i32
    return %arg0, %arg1 : i32, i32
  }
  func.func @transform_4(%arg0: i32, %arg1: i32, %arg2: i32) -> (i32, i32) {
    %c0_i32 = arith.constant 0 : i32
    return %arg0, %arg1 : i32, i32
  }
}

module attributes {stable_mosaic.version = 11 : i64} {
  func.func @_affine_act_kernel(%arg0: i32, %arg1: memref<16x256xbf16, #tpu.memory_space<vmem>>, %arg2: memref<1x256xf32, #tpu.memory_space<vmem>>, %arg3: memref<1x256xf32, #tpu.memory_space<vmem>>, %arg4: memref<16x256xbf16, #tpu.memory_space<vmem>>) attributes {dimension_semantics = [#tpu.dimension_semantics<parallel>], iteration_bounds = array<i64: 2>, scalar_prefetch = 0 : i64, scratch_operands = 0 : i64, tpu.core_type = #tpu.core_type<tc>, window_params = [{transform_indices = @transform_0, window_bounds = array<i64: 16, 256>}, {pipeline_mode = #tpu.pipeline_mode<synchronous>, transform_indices = @transform_1, window_bounds = array<i64: 1, 256>}, {pipeline_mode = #tpu.pipeline_mode<synchronous>, transform_indices = @transform_2, window_bounds = array<i64: 1, 256>}, {transform_indices = @transform_3, window_bounds = array<i64: 16, 256>}]} {
    %c0 = arith.constant 0 : index
    %c0_0 = arith.constant 0 : index
    %0 = vector.load %arg1[%c0, %c0_0] : memref<16x256xbf16, #tpu.memory_space<vmem>>, vector<16x256xbf16>
    %1 = arith.extf %0 : vector<16x256xbf16> to vector<16x256xf32>
    %c0_1 = arith.constant 0 : index
    %c0_2 = arith.constant 0 : index
    %2 = vector.load %arg2[%c0_1, %c0_2] : memref<1x256xf32, #tpu.memory_space<vmem>>, vector<1x256xf32>
    %3 = vector.broadcast %2 : vector<1x256xf32> to vector<16x256xf32>
    %4 = arith.mulf %1, %3 : vector<16x256xf32>
    %c0_3 = arith.constant 0 : index
    %c0_4 = arith.constant 0 : index
    %5 = vector.load %arg3[%c0_3, %c0_4] : memref<1x256xf32, #tpu.memory_space<vmem>>, vector<1x256xf32>
    %6 = vector.broadcast %5 : vector<1x256xf32> to vector<16x256xf32>
    %7 = arith.addf %4, %6 : vector<16x256xf32>
    %cst = arith.constant 0.000000e+00 : f32
    %8 = vector.broadcast %cst : f32 to vector<16x256xf32>
    %9 = arith.maximumf %7, %8 : vector<16x256xf32>
    %10 = arith.truncf %9 : vector<16x256xf32> to vector<16x256xbf16>
    %c0_5 = arith.constant 0 : index
    %c0_6 = arith.constant 0 : index
    %11 = vector.load %arg4[%c0_5, %c0_6] : memref<16x256xbf16, #tpu.memory_space<vmem>>, vector<16x256xbf16>
    tpu.vector_store %arg4[%c0_5, %c0_6], %10 {strides = array<i32>} : memref<16x256xbf16, #tpu.memory_space<vmem>>, vector<16x256xbf16>,
    return
  }
  func.func @transform_0(%arg0: i32) -> (i32, i32) {
    %c0_i32 = arith.constant 0 : i32
    %c0_i32_0 = arith.constant 0 : i32
    return %arg0, %c0_i32 : i32, i32
  }
  func.func @transform_1(%arg0: i32) -> (i32, i32) {
    %c0_i32 = arith.constant 0 : i32
    %c0_i32_0 = arith.constant 0 : i32
    %c0_i32_1 = arith.constant 0 : i32
    return %c0_i32, %c0_i32_0 : i32, i32
  }
  func.func @transform_2(%arg0: i32) -> (i32, i32) {
    %c0_i32 = arith.constant 0 : i32
    %c0_i32_0 = arith.constant 0 : i32
    %c0_i32_1 = arith.constant 0 : i32
    return %c0_i32, %c0_i32_0 : i32, i32
  }
  func.func @transform_3(%arg0: i32) -> (i32, i32) {
    %c0_i32 = arith.constant 0 : i32
    %c0_i32_0 = arith.constant 0 : i32
    return %arg0, %c0_i32 : i32, i32
  }
}

module attributes {stable_mosaic.version = 11 : i64} {
  func.func @_affine_act_res_kernel(%arg0: i32, %arg1: memref<16x256xbf16, #tpu.memory_space<vmem>>, %arg2: memref<16x256xbf16, #tpu.memory_space<vmem>>, %arg3: memref<1x256xf32, #tpu.memory_space<vmem>>, %arg4: memref<1x256xf32, #tpu.memory_space<vmem>>, %arg5: memref<16x256xbf16, #tpu.memory_space<vmem>>) attributes {dimension_semantics = [#tpu.dimension_semantics<parallel>], iteration_bounds = array<i64: 2>, scalar_prefetch = 0 : i64, scratch_operands = 0 : i64, tpu.core_type = #tpu.core_type<tc>, window_params = [{transform_indices = @transform_0, window_bounds = array<i64: 16, 256>}, {transform_indices = @transform_1, window_bounds = array<i64: 16, 256>}, {pipeline_mode = #tpu.pipeline_mode<synchronous>, transform_indices = @transform_2, window_bounds = array<i64: 1, 256>}, {pipeline_mode = #tpu.pipeline_mode<synchronous>, transform_indices = @transform_3, window_bounds = array<i64: 1, 256>}, {transform_indices = @transform_4, window_bounds = array<i64: 16, 256>}]} {
    %c0 = arith.constant 0 : index
    %c0_0 = arith.constant 0 : index
    %0 = vector.load %arg1[%c0, %c0_0] : memref<16x256xbf16, #tpu.memory_space<vmem>>, vector<16x256xbf16>
    %1 = arith.extf %0 : vector<16x256xbf16> to vector<16x256xf32>
    %c0_1 = arith.constant 0 : index
    %c0_2 = arith.constant 0 : index
    %2 = vector.load %arg3[%c0_1, %c0_2] : memref<1x256xf32, #tpu.memory_space<vmem>>, vector<1x256xf32>
    %3 = vector.broadcast %2 : vector<1x256xf32> to vector<16x256xf32>
    %4 = arith.mulf %1, %3 : vector<16x256xf32>
    %c0_3 = arith.constant 0 : index
    %c0_4 = arith.constant 0 : index
    %5 = vector.load %arg4[%c0_3, %c0_4] : memref<1x256xf32, #tpu.memory_space<vmem>>, vector<1x256xf32>
    %6 = vector.broadcast %5 : vector<1x256xf32> to vector<16x256xf32>
    %7 = arith.addf %4, %6 : vector<16x256xf32>
    %c0_5 = arith.constant 0 : index
    %c0_6 = arith.constant 0 : index
    %8 = vector.load %arg2[%c0_5, %c0_6] : memref<16x256xbf16, #tpu.memory_space<vmem>>, vector<16x256xbf16>
    %9 = arith.extf %8 : vector<16x256xbf16> to vector<16x256xf32>
    %10 = arith.addf %7, %9 : vector<16x256xf32>
    %cst = arith.constant 0.000000e+00 : f32
    %11 = vector.broadcast %cst : f32 to vector<16x256xf32>
    %12 = arith.maximumf %10, %11 : vector<16x256xf32>
    %13 = arith.truncf %12 : vector<16x256xf32> to vector<16x256xbf16>
    %c0_7 = arith.constant 0 : index
    %c0_8 = arith.constant 0 : index
    %14 = vector.load %arg5[%c0_7, %c0_8] : memref<16x256xbf16, #tpu.memory_space<vmem>>, vector<16x256xbf16>
    tpu.vector_store %arg5[%c0_7, %c0_8], %13 {strides = array<i32>} : memref<16x256xbf16, #tpu.memory_space<vmem>>, vector<16x256xbf16>,
    return
  }
  func.func @transform_0(%arg0: i32) -> (i32, i32) {
    %c0_i32 = arith.constant 0 : i32
    %c0_i32_0 = arith.constant 0 : i32
    return %arg0, %c0_i32 : i32, i32
  }
  func.func @transform_1(%arg0: i32) -> (i32, i32) {
    %c0_i32 = arith.constant 0 : i32
    %c0_i32_0 = arith.constant 0 : i32
    return %arg0, %c0_i32 : i32, i32
  }
  func.func @transform_2(%arg0: i32) -> (i32, i32) {
    %c0_i32 = arith.constant 0 : i32
    %c0_i32_0 = arith.constant 0 : i32
    %c0_i32_1 = arith.constant 0 : i32
    return %c0_i32, %c0_i32_0 : i32, i32
  }
  func.func @transform_3(%arg0: i32) -> (i32, i32) {
    %c0_i32 = arith.constant 0 : i32
    %c0_i32_0 = arith.constant 0 : i32
    %c0_i32_1 = arith.constant 0 : i32
    return %c0_i32, %c0_i32_0 : i32, i32
  }
  func.func @transform_4(%arg0: i32) -> (i32, i32) {
    %c0_i32 = arith.constant 0 : i32
    %c0_i32_0 = arith.constant 0 : i32
    return %arg0, %c0_i32 : i32, i32
  }
}

module attributes {stable_mosaic.version = 11 : i64} {
  func.func @_matmul_stats_kernel(%arg0: i32, %arg1: i32, %arg2: i32, %arg3: memref<16x768xbf16, #tpu.memory_space<vmem>>, %arg4: memref<768x128xbf16, #tpu.memory_space<vmem>>, %arg5: memref<16x128xbf16, #tpu.memory_space<vmem>>, %arg6: memref<8x128xf32, #tpu.memory_space<vmem>>, %arg7: memref<8x128xf32, #tpu.memory_space<vmem>>, %arg8: memref<16x128xf32, #tpu.memory_space<vmem>>) attributes {dimension_semantics = [#tpu.dimension_semantics<parallel>, #tpu.dimension_semantics<parallel>, #tpu.dimension_semantics<arbitrary>], iteration_bounds = array<i64: 2, 2, 3>, scalar_prefetch = 0 : i64, scratch_operands = 1 : i64, tpu.core_type = #tpu.core_type<tc>, window_params = [{transform_indices = @transform_0, window_bounds = array<i64: 16, 768>}, {transform_indices = @transform_1, window_bounds = array<i64: 768, 128>}, {transform_indices = @transform_2, window_bounds = array<i64: 16, 128>}, {transform_indices = @transform_3, window_bounds = array<i64: 8, 128>}, {transform_indices = @transform_4, window_bounds = array<i64: 8, 128>}]} {
    %c0_i32 = arith.constant 0 : i32
    %0 = arith.cmpi eq, %arg2, %c0_i32 : i32
    %1 = arith.extui %0 : i1 to i32
    %c0_i32_0 = arith.constant 0 : i32
    %2 = arith.cmpi ne, %1, %c0_i32_0 : i32
    scf.if %2 {
      %cst_9 = arith.constant 0.000000e+00 : f32
      %12 = vector.broadcast %cst_9 : f32 to vector<16x128xf32>
      %c0_10 = arith.constant 0 : index
      %c0_11 = arith.constant 0 : index
      %13 = vector.load %arg8[%c0_10, %c0_11] : memref<16x128xf32, #tpu.memory_space<vmem>>, vector<16x128xf32>
      tpu.vector_store %arg8[%c0_10, %c0_11], %12 {strides = array<i32>} : memref<16x128xf32, #tpu.memory_space<vmem>>, vector<16x128xf32>,
    } else {
    }
    %c0 = arith.constant 0 : index
    %c0_1 = arith.constant 0 : index
    %3 = vector.load %arg8[%c0, %c0_1] : memref<16x128xf32, #tpu.memory_space<vmem>>, vector<16x128xf32>
    %c0_2 = arith.constant 0 : index
    %c0_3 = arith.constant 0 : index
    %4 = vector.load %arg3[%c0_2, %c0_3] : memref<16x768xbf16, #tpu.memory_space<vmem>>, vector<16x768xbf16>
    %c0_4 = arith.constant 0 : index
    %c0_5 = arith.constant 0 : index
    %5 = vector.load %arg4[%c0_4, %c0_5] : memref<768x128xbf16, #tpu.memory_space<vmem>>, vector<768x128xbf16>
    %cst = arith.constant dense<0.000000e+00> : vector<16x128xf32>
    %6 = tpu.matmul %4, %5, %cst {dimension_numbers = #tpu.dot_dimension_numbers<[1], [0], [0], [1], [0, 0, 1, 1], [], []>} : vector<16x768xbf16>, vector<768x128xbf16>, vector<16x128xf32> -> vector<16x128xf32>
    %7 = arith.addf %3, %6 : vector<16x128xf32>
    %c0_6 = arith.constant 0 : index
    %c0_7 = arith.constant 0 : index
    %8 = vector.load %arg8[%c0_6, %c0_7] : memref<16x128xf32, #tpu.memory_space<vmem>>, vector<16x128xf32>
    tpu.vector_store %arg8[%c0_6, %c0_7], %7 {strides = array<i32>} : memref<16x128xf32, #tpu.memory_space<vmem>>, vector<16x128xf32>,
    %c2_i32 = arith.constant 2 : i32
    %9 = arith.cmpi eq, %arg2, %c2_i32 : i32
    %10 = arith.extui %9 : i1 to i32
    %c0_i32_8 = arith.constant 0 : i32
    %11 = arith.cmpi ne, %10, %c0_i32_8 : i32
    scf.if %11 {
      %c0_9 = arith.constant 0 : index
      %c0_10 = arith.constant 0 : index
      %12 = vector.load %arg8[%c0_9, %c0_10] : memref<16x128xf32, #tpu.memory_space<vmem>>, vector<16x128xf32>
      %13 = arith.truncf %12 : vector<16x128xf32> to vector<16x128xbf16>
      %c0_11 = arith.constant 0 : index
      %c0_12 = arith.constant 0 : index
      %14 = vector.load %arg5[%c0_11, %c0_12] : memref<16x128xbf16, #tpu.memory_space<vmem>>, vector<16x128xbf16>
      tpu.vector_store %arg5[%c0_11, %c0_12], %13 {strides = array<i32>} : memref<16x128xbf16, #tpu.memory_space<vmem>>, vector<16x128xbf16>,
      %cst_13 = arith.constant dense<0.000000e+00> : vector<128xf32>
      %15 = vector.multi_reduction <add>, %12, %cst_13 [0] : vector<16x128xf32> to vector<128xf32>
      %16 = vector.shape_cast %15 : vector<128xf32> to vector<1x128xf32>
      %17 = arith.mulf %12, %12 : vector<16x128xf32>
      %cst_14 = arith.constant dense<0.000000e+00> : vector<128xf32>
      %18 = vector.multi_reduction <add>, %17, %cst_14 [0] : vector<16x128xf32> to vector<128xf32>
      %19 = vector.shape_cast %18 : vector<128xf32> to vector<1x128xf32>
      %20 = vector.shape_cast %16 : vector<1x128xf32> to vector<1x128xf32>
      %21 = vector.broadcast %20 : vector<1x128xf32> to vector<8x128xf32>
      %c0_15 = arith.constant 0 : index
      %c0_16 = arith.constant 0 : index
      %22 = vector.load %arg6[%c0_15, %c0_16] : memref<8x128xf32, #tpu.memory_space<vmem>>, vector<8x128xf32>
      tpu.vector_store %arg6[%c0_15, %c0_16], %21 {strides = array<i32>} : memref<8x128xf32, #tpu.memory_space<vmem>>, vector<8x128xf32>,
      %23 = vector.shape_cast %19 : vector<1x128xf32> to vector<1x128xf32>
      %24 = vector.broadcast %23 : vector<1x128xf32> to vector<8x128xf32>
      %c0_17 = arith.constant 0 : index
      %c0_18 = arith.constant 0 : index
      %25 = vector.load %arg7[%c0_17, %c0_18] : memref<8x128xf32, #tpu.memory_space<vmem>>, vector<8x128xf32>
      tpu.vector_store %arg7[%c0_17, %c0_18], %24 {strides = array<i32>} : memref<8x128xf32, #tpu.memory_space<vmem>>, vector<8x128xf32>,
    } else {
    }
    return
  }
  func.func @transform_0(%arg0: i32, %arg1: i32, %arg2: i32) -> (i32, i32) {
    %c0_i32 = arith.constant 0 : i32
    return %arg0, %arg2 : i32, i32
  }
  func.func @transform_1(%arg0: i32, %arg1: i32, %arg2: i32) -> (i32, i32) {
    %c0_i32 = arith.constant 0 : i32
    return %arg2, %arg1 : i32, i32
  }
  func.func @transform_2(%arg0: i32, %arg1: i32, %arg2: i32) -> (i32, i32) {
    %c0_i32 = arith.constant 0 : i32
    return %arg0, %arg1 : i32, i32
  }
  func.func @transform_3(%arg0: i32, %arg1: i32, %arg2: i32) -> (i32, i32) {
    %c0_i32 = arith.constant 0 : i32
    return %arg0, %arg1 : i32, i32
  }
  func.func @transform_4(%arg0: i32, %arg1: i32, %arg2: i32) -> (i32, i32) {
    %c0_i32 = arith.constant 0 : i32
    return %arg0, %arg1 : i32, i32
  }
}

module attributes {stable_mosaic.version = 11 : i64} {
  func.func @_matmul_stats_kernel(%arg0: i32, %arg1: i32, %arg2: i32, %arg3: memref<16x512xbf16, #tpu.memory_space<vmem>>, %arg4: memref<512x256xbf16, #tpu.memory_space<vmem>>, %arg5: memref<16x256xbf16, #tpu.memory_space<vmem>>, %arg6: memref<8x256xf32, #tpu.memory_space<vmem>>, %arg7: memref<8x256xf32, #tpu.memory_space<vmem>>, %arg8: memref<16x256xf32, #tpu.memory_space<vmem>>) attributes {dimension_semantics = [#tpu.dimension_semantics<parallel>, #tpu.dimension_semantics<parallel>, #tpu.dimension_semantics<arbitrary>], iteration_bounds = array<i64: 2, 2, 2>, scalar_prefetch = 0 : i64, scratch_operands = 1 : i64, tpu.core_type = #tpu.core_type<tc>, window_params = [{transform_indices = @transform_0, window_bounds = array<i64: 16, 512>}, {transform_indices = @transform_1, window_bounds = array<i64: 512, 256>}, {transform_indices = @transform_2, window_bounds = array<i64: 16, 256>}, {transform_indices = @transform_3, window_bounds = array<i64: 8, 256>}, {transform_indices = @transform_4, window_bounds = array<i64: 8, 256>}]} {
    %c0_i32 = arith.constant 0 : i32
    %0 = arith.cmpi eq, %arg2, %c0_i32 : i32
    %1 = arith.extui %0 : i1 to i32
    %c0_i32_0 = arith.constant 0 : i32
    %2 = arith.cmpi ne, %1, %c0_i32_0 : i32
    scf.if %2 {
      %cst_9 = arith.constant 0.000000e+00 : f32
      %12 = vector.broadcast %cst_9 : f32 to vector<16x256xf32>
      %c0_10 = arith.constant 0 : index
      %c0_11 = arith.constant 0 : index
      %13 = vector.load %arg8[%c0_10, %c0_11] : memref<16x256xf32, #tpu.memory_space<vmem>>, vector<16x256xf32>
      tpu.vector_store %arg8[%c0_10, %c0_11], %12 {strides = array<i32>} : memref<16x256xf32, #tpu.memory_space<vmem>>, vector<16x256xf32>,
    } else {
    }
    %c0 = arith.constant 0 : index
    %c0_1 = arith.constant 0 : index
    %3 = vector.load %arg8[%c0, %c0_1] : memref<16x256xf32, #tpu.memory_space<vmem>>, vector<16x256xf32>
    %c0_2 = arith.constant 0 : index
    %c0_3 = arith.constant 0 : index
    %4 = vector.load %arg3[%c0_2, %c0_3] : memref<16x512xbf16, #tpu.memory_space<vmem>>, vector<16x512xbf16>
    %c0_4 = arith.constant 0 : index
    %c0_5 = arith.constant 0 : index
    %5 = vector.load %arg4[%c0_4, %c0_5] : memref<512x256xbf16, #tpu.memory_space<vmem>>, vector<512x256xbf16>
    %cst = arith.constant dense<0.000000e+00> : vector<16x256xf32>
    %6 = tpu.matmul %4, %5, %cst {dimension_numbers = #tpu.dot_dimension_numbers<[1], [0], [0], [1], [0, 0, 1, 1], [], []>} : vector<16x512xbf16>, vector<512x256xbf16>, vector<16x256xf32> -> vector<16x256xf32>
    %7 = arith.addf %3, %6 : vector<16x256xf32>
    %c0_6 = arith.constant 0 : index
    %c0_7 = arith.constant 0 : index
    %8 = vector.load %arg8[%c0_6, %c0_7] : memref<16x256xf32, #tpu.memory_space<vmem>>, vector<16x256xf32>
    tpu.vector_store %arg8[%c0_6, %c0_7], %7 {strides = array<i32>} : memref<16x256xf32, #tpu.memory_space<vmem>>, vector<16x256xf32>,
    %c1_i32 = arith.constant 1 : i32
    %9 = arith.cmpi eq, %arg2, %c1_i32 : i32
    %10 = arith.extui %9 : i1 to i32
    %c0_i32_8 = arith.constant 0 : i32
    %11 = arith.cmpi ne, %10, %c0_i32_8 : i32
    scf.if %11 {
      %c0_9 = arith.constant 0 : index
      %c0_10 = arith.constant 0 : index
      %12 = vector.load %arg8[%c0_9, %c0_10] : memref<16x256xf32, #tpu.memory_space<vmem>>, vector<16x256xf32>
      %13 = arith.truncf %12 : vector<16x256xf32> to vector<16x256xbf16>
      %c0_11 = arith.constant 0 : index
      %c0_12 = arith.constant 0 : index
      %14 = vector.load %arg5[%c0_11, %c0_12] : memref<16x256xbf16, #tpu.memory_space<vmem>>, vector<16x256xbf16>
      tpu.vector_store %arg5[%c0_11, %c0_12], %13 {strides = array<i32>} : memref<16x256xbf16, #tpu.memory_space<vmem>>, vector<16x256xbf16>,
      %cst_13 = arith.constant dense<0.000000e+00> : vector<256xf32>
      %15 = vector.multi_reduction <add>, %12, %cst_13 [0] : vector<16x256xf32> to vector<256xf32>
      %16 = vector.shape_cast %15 : vector<256xf32> to vector<1x256xf32>
      %17 = arith.mulf %12, %12 : vector<16x256xf32>
      %cst_14 = arith.constant dense<0.000000e+00> : vector<256xf32>
      %18 = vector.multi_reduction <add>, %17, %cst_14 [0] : vector<16x256xf32> to vector<256xf32>
      %19 = vector.shape_cast %18 : vector<256xf32> to vector<1x256xf32>
      %20 = vector.shape_cast %16 : vector<1x256xf32> to vector<1x256xf32>
      %21 = vector.broadcast %20 : vector<1x256xf32> to vector<8x256xf32>
      %c0_15 = arith.constant 0 : index
      %c0_16 = arith.constant 0 : index
      %22 = vector.load %arg6[%c0_15, %c0_16] : memref<8x256xf32, #tpu.memory_space<vmem>>, vector<8x256xf32>
      tpu.vector_store %arg6[%c0_15, %c0_16], %21 {strides = array<i32>} : memref<8x256xf32, #tpu.memory_space<vmem>>, vector<8x256xf32>,
      %23 = vector.shape_cast %19 : vector<1x256xf32> to vector<1x256xf32>
      %24 = vector.broadcast %23 : vector<1x256xf32> to vector<8x256xf32>
      %c0_17 = arith.constant 0 : index
      %c0_18 = arith.constant 0 : index
      %25 = vector.load %arg7[%c0_17, %c0_18] : memref<8x256xf32, #tpu.memory_space<vmem>>, vector<8x256xf32>
      tpu.vector_store %arg7[%c0_17, %c0_18], %24 {strides = array<i32>} : memref<8x256xf32, #tpu.memory_space<vmem>>, vector<8x256xf32>,
    } else {
    }
    return
  }
  func.func @transform_0(%arg0: i32, %arg1: i32, %arg2: i32) -> (i32, i32) {
    %c0_i32 = arith.constant 0 : i32
    return %arg0, %arg2 : i32, i32
  }
  func.func @transform_1(%arg0: i32, %arg1: i32, %arg2: i32) -> (i32, i32) {
    %c0_i32 = arith.constant 0 : i32
    return %arg2, %arg1 : i32, i32
  }
  func.func @transform_2(%arg0: i32, %arg1: i32, %arg2: i32) -> (i32, i32) {
    %c0_i32 = arith.constant 0 : i32
    return %arg0, %arg1 : i32, i32
  }
  func.func @transform_3(%arg0: i32, %arg1: i32, %arg2: i32) -> (i32, i32) {
    %c0_i32 = arith.constant 0 : i32
    return %arg0, %arg1 : i32, i32
  }
  func.func @transform_4(%arg0: i32, %arg1: i32, %arg2: i32) -> (i32, i32) {
    %c0_i32 = arith.constant 0 : i32
    return %arg0, %arg1 : i32, i32
  }
}

module attributes {stable_mosaic.version = 11 : i64} {
  func.func @_affine_act_kernel(%arg0: i32, %arg1: memref<16x512xbf16, #tpu.memory_space<vmem>>, %arg2: memref<1x512xf32, #tpu.memory_space<vmem>>, %arg3: memref<1x512xf32, #tpu.memory_space<vmem>>, %arg4: memref<16x512xbf16, #tpu.memory_space<vmem>>) attributes {dimension_semantics = [#tpu.dimension_semantics<parallel>], iteration_bounds = array<i64: 2>, scalar_prefetch = 0 : i64, scratch_operands = 0 : i64, tpu.core_type = #tpu.core_type<tc>, window_params = [{transform_indices = @transform_0, window_bounds = array<i64: 16, 512>}, {pipeline_mode = #tpu.pipeline_mode<synchronous>, transform_indices = @transform_1, window_bounds = array<i64: 1, 512>}, {pipeline_mode = #tpu.pipeline_mode<synchronous>, transform_indices = @transform_2, window_bounds = array<i64: 1, 512>}, {transform_indices = @transform_3, window_bounds = array<i64: 16, 512>}]} {
    %c0 = arith.constant 0 : index
    %c0_0 = arith.constant 0 : index
    %0 = vector.load %arg1[%c0, %c0_0] : memref<16x512xbf16, #tpu.memory_space<vmem>>, vector<16x512xbf16>
    %1 = arith.extf %0 : vector<16x512xbf16> to vector<16x512xf32>
    %c0_1 = arith.constant 0 : index
    %c0_2 = arith.constant 0 : index
    %2 = vector.load %arg2[%c0_1, %c0_2] : memref<1x512xf32, #tpu.memory_space<vmem>>, vector<1x512xf32>
    %3 = vector.broadcast %2 : vector<1x512xf32> to vector<16x512xf32>
    %4 = arith.mulf %1, %3 : vector<16x512xf32>
    %c0_3 = arith.constant 0 : index
    %c0_4 = arith.constant 0 : index
    %5 = vector.load %arg3[%c0_3, %c0_4] : memref<1x512xf32, #tpu.memory_space<vmem>>, vector<1x512xf32>
    %6 = vector.broadcast %5 : vector<1x512xf32> to vector<16x512xf32>
    %7 = arith.addf %4, %6 : vector<16x512xf32>
    %cst = arith.constant 0.000000e+00 : f32
    %8 = vector.broadcast %cst : f32 to vector<16x512xf32>
    %9 = arith.maximumf %7, %8 : vector<16x512xf32>
    %10 = arith.truncf %9 : vector<16x512xf32> to vector<16x512xbf16>
    %c0_5 = arith.constant 0 : index
    %c0_6 = arith.constant 0 : index
    %11 = vector.load %arg4[%c0_5, %c0_6] : memref<16x512xbf16, #tpu.memory_space<vmem>>, vector<16x512xbf16>
    tpu.vector_store %arg4[%c0_5, %c0_6], %10 {strides = array<i32>} : memref<16x512xbf16, #tpu.memory_space<vmem>>, vector<16x512xbf16>,
    return
  }
  func.func @transform_0(%arg0: i32) -> (i32, i32) {
    %c0_i32 = arith.constant 0 : i32
    %c0_i32_0 = arith.constant 0 : i32
    return %arg0, %c0_i32 : i32, i32
  }
  func.func @transform_1(%arg0: i32) -> (i32, i32) {
    %c0_i32 = arith.constant 0 : i32
    %c0_i32_0 = arith.constant 0 : i32
    %c0_i32_1 = arith.constant 0 : i32
    return %c0_i32, %c0_i32_0 : i32, i32
  }
  func.func @transform_2(%arg0: i32) -> (i32, i32) {
    %c0_i32 = arith.constant 0 : i32
    %c0_i32_0 = arith.constant 0 : i32
    %c0_i32_1 = arith.constant 0 : i32
    return %c0_i32, %c0_i32_0 : i32, i32
  }
  func.func @transform_3(%arg0: i32) -> (i32, i32) {
    %c0_i32 = arith.constant 0 : i32
    %c0_i32_0 = arith.constant 0 : i32
    return %arg0, %c0_i32 : i32, i32
  }
}

module attributes {stable_mosaic.version = 11 : i64} {
  func.func @_matmul_stats_kernel(%arg0: i32, %arg1: i32, %arg2: i32, %arg3: memref<64x512xbf16, #tpu.memory_space<vmem>>, %arg4: memref<512x128xbf16, #tpu.memory_space<vmem>>, %arg5: memref<64x128xbf16, #tpu.memory_space<vmem>>, %arg6: memref<8x128xf32, #tpu.memory_space<vmem>>, %arg7: memref<8x128xf32, #tpu.memory_space<vmem>>, %arg8: memref<64x128xf32, #tpu.memory_space<vmem>>) attributes {dimension_semantics = [#tpu.dimension_semantics<parallel>, #tpu.dimension_semantics<parallel>, #tpu.dimension_semantics<arbitrary>], iteration_bounds = array<i64: 2, 2, 1>, scalar_prefetch = 0 : i64, scratch_operands = 1 : i64, tpu.core_type = #tpu.core_type<tc>, window_params = [{transform_indices = @transform_0, window_bounds = array<i64: 64, 512>}, {transform_indices = @transform_1, window_bounds = array<i64: 512, 128>}, {transform_indices = @transform_2, window_bounds = array<i64: 64, 128>}, {transform_indices = @transform_3, window_bounds = array<i64: 8, 128>}, {transform_indices = @transform_4, window_bounds = array<i64: 8, 128>}]} {
    %c0_i32 = arith.constant 0 : i32
    %0 = arith.cmpi eq, %arg2, %c0_i32 : i32
    %1 = arith.extui %0 : i1 to i32
    %c0_i32_0 = arith.constant 0 : i32
    %2 = arith.cmpi ne, %1, %c0_i32_0 : i32
    scf.if %2 {
      %cst_10 = arith.constant 0.000000e+00 : f32
      %12 = vector.broadcast %cst_10 : f32 to vector<64x128xf32>
      %c0_11 = arith.constant 0 : index
      %c0_12 = arith.constant 0 : index
      %13 = vector.load %arg8[%c0_11, %c0_12] : memref<64x128xf32, #tpu.memory_space<vmem>>, vector<64x128xf32>
      tpu.vector_store %arg8[%c0_11, %c0_12], %12 {strides = array<i32>} : memref<64x128xf32, #tpu.memory_space<vmem>>, vector<64x128xf32>,
    } else {
    }
    %c0 = arith.constant 0 : index
    %c0_1 = arith.constant 0 : index
    %3 = vector.load %arg8[%c0, %c0_1] : memref<64x128xf32, #tpu.memory_space<vmem>>, vector<64x128xf32>
    %c0_2 = arith.constant 0 : index
    %c0_3 = arith.constant 0 : index
    %4 = vector.load %arg3[%c0_2, %c0_3] : memref<64x512xbf16, #tpu.memory_space<vmem>>, vector<64x512xbf16>
    %c0_4 = arith.constant 0 : index
    %c0_5 = arith.constant 0 : index
    %5 = vector.load %arg4[%c0_4, %c0_5] : memref<512x128xbf16, #tpu.memory_space<vmem>>, vector<512x128xbf16>
    %cst = arith.constant dense<0.000000e+00> : vector<64x128xf32>
    %6 = tpu.matmul %4, %5, %cst {dimension_numbers = #tpu.dot_dimension_numbers<[1], [0], [0], [1], [0, 0, 1, 1], [], []>} : vector<64x512xbf16>, vector<512x128xbf16>, vector<64x128xf32> -> vector<64x128xf32>
    %7 = arith.addf %3, %6 : vector<64x128xf32>
    %c0_6 = arith.constant 0 : index
    %c0_7 = arith.constant 0 : index
    %8 = vector.load %arg8[%c0_6, %c0_7] : memref<64x128xf32, #tpu.memory_space<vmem>>, vector<64x128xf32>
    tpu.vector_store %arg8[%c0_6, %c0_7], %7 {strides = array<i32>} : memref<64x128xf32, #tpu.memory_space<vmem>>, vector<64x128xf32>,
    %c0_i32_8 = arith.constant 0 : i32
    %9 = arith.cmpi eq, %arg2, %c0_i32_8 : i32
    %10 = arith.extui %9 : i1 to i32
    %c0_i32_9 = arith.constant 0 : i32
    %11 = arith.cmpi ne, %10, %c0_i32_9 : i32
    scf.if %11 {
      %c0_10 = arith.constant 0 : index
      %c0_11 = arith.constant 0 : index
      %12 = vector.load %arg8[%c0_10, %c0_11] : memref<64x128xf32, #tpu.memory_space<vmem>>, vector<64x128xf32>
      %13 = arith.truncf %12 : vector<64x128xf32> to vector<64x128xbf16>
      %c0_12 = arith.constant 0 : index
      %c0_13 = arith.constant 0 : index
      %14 = vector.load %arg5[%c0_12, %c0_13] : memref<64x128xbf16, #tpu.memory_space<vmem>>, vector<64x128xbf16>
      tpu.vector_store %arg5[%c0_12, %c0_13], %13 {strides = array<i32>} : memref<64x128xbf16, #tpu.memory_space<vmem>>, vector<64x128xbf16>,
      %cst_14 = arith.constant dense<0.000000e+00> : vector<128xf32>
      %15 = vector.multi_reduction <add>, %12, %cst_14 [0] : vector<64x128xf32> to vector<128xf32>
      %16 = vector.shape_cast %15 : vector<128xf32> to vector<1x128xf32>
      %17 = arith.mulf %12, %12 : vector<64x128xf32>
      %cst_15 = arith.constant dense<0.000000e+00> : vector<128xf32>
      %18 = vector.multi_reduction <add>, %17, %cst_15 [0] : vector<64x128xf32> to vector<128xf32>
      %19 = vector.shape_cast %18 : vector<128xf32> to vector<1x128xf32>
      %20 = vector.shape_cast %16 : vector<1x128xf32> to vector<1x128xf32>
      %21 = vector.broadcast %20 : vector<1x128xf32> to vector<8x128xf32>
      %c0_16 = arith.constant 0 : index
      %c0_17 = arith.constant 0 : index
      %22 = vector.load %arg6[%c0_16, %c0_17] : memref<8x128xf32, #tpu.memory_space<vmem>>, vector<8x128xf32>
      tpu.vector_store %arg6[%c0_16, %c0_17], %21 {strides = array<i32>} : memref<8x128xf32, #tpu.memory_space<vmem>>, vector<8x128xf32>,
      %23 = vector.shape_cast %19 : vector<1x128xf32> to vector<1x128xf32>
      %24 = vector.broadcast %23 : vector<1x128xf32> to vector<8x128xf32>
      %c0_18 = arith.constant 0 : index
      %c0_19 = arith.constant 0 : index
      %25 = vector.load %arg7[%c0_18, %c0_19] : memref<8x128xf32, #tpu.memory_space<vmem>>, vector<8x128xf32>
      tpu.vector_store %arg7[%c0_18, %c0_19], %24 {strides = array<i32>} : memref<8x128xf32, #tpu.memory_space<vmem>>, vector<8x128xf32>,
    } else {
    }
    return
  }
  func.func @transform_0(%arg0: i32, %arg1: i32, %arg2: i32) -> (i32, i32) {
    %c0_i32 = arith.constant 0 : i32
    return %arg0, %arg2 : i32, i32
  }
  func.func @transform_1(%arg0: i32, %arg1: i32, %arg2: i32) -> (i32, i32) {
    %c0_i32 = arith.constant 0 : i32
    return %arg2, %arg1 : i32, i32
  }
  func.func @transform_2(%arg0: i32, %arg1: i32, %arg2: i32) -> (i32, i32) {
    %c0_i32 = arith.constant 0 : i32
    return %arg0, %arg1 : i32, i32
  }
  func.func @transform_3(%arg0: i32, %arg1: i32, %arg2: i32) -> (i32, i32) {
    %c0_i32 = arith.constant 0 : i32
    return %arg0, %arg1 : i32, i32
  }
  func.func @transform_4(%arg0: i32, %arg1: i32, %arg2: i32) -> (i32, i32) {
    %c0_i32 = arith.constant 0 : i32
    return %arg0, %arg1 : i32, i32
  }
}

module attributes {stable_mosaic.version = 11 : i64} {
  func.func @_affine_act_kernel(%arg0: i32, %arg1: memref<64x256xbf16, #tpu.memory_space<vmem>>, %arg2: memref<1x256xf32, #tpu.memory_space<vmem>>, %arg3: memref<1x256xf32, #tpu.memory_space<vmem>>, %arg4: memref<64x256xbf16, #tpu.memory_space<vmem>>) attributes {dimension_semantics = [#tpu.dimension_semantics<parallel>], iteration_bounds = array<i64: 2>, scalar_prefetch = 0 : i64, scratch_operands = 0 : i64, tpu.core_type = #tpu.core_type<tc>, window_params = [{transform_indices = @transform_0, window_bounds = array<i64: 64, 256>}, {pipeline_mode = #tpu.pipeline_mode<synchronous>, transform_indices = @transform_1, window_bounds = array<i64: 1, 256>}, {pipeline_mode = #tpu.pipeline_mode<synchronous>, transform_indices = @transform_2, window_bounds = array<i64: 1, 256>}, {transform_indices = @transform_3, window_bounds = array<i64: 64, 256>}]} {
    %c0 = arith.constant 0 : index
    %c0_0 = arith.constant 0 : index
    %0 = vector.load %arg1[%c0, %c0_0] : memref<64x256xbf16, #tpu.memory_space<vmem>>, vector<64x256xbf16>
    %1 = arith.extf %0 : vector<64x256xbf16> to vector<64x256xf32>
    %c0_1 = arith.constant 0 : index
    %c0_2 = arith.constant 0 : index
    %2 = vector.load %arg2[%c0_1, %c0_2] : memref<1x256xf32, #tpu.memory_space<vmem>>, vector<1x256xf32>
    %3 = vector.broadcast %2 : vector<1x256xf32> to vector<64x256xf32>
    %4 = arith.mulf %1, %3 : vector<64x256xf32>
    %c0_3 = arith.constant 0 : index
    %c0_4 = arith.constant 0 : index
    %5 = vector.load %arg3[%c0_3, %c0_4] : memref<1x256xf32, #tpu.memory_space<vmem>>, vector<1x256xf32>
    %6 = vector.broadcast %5 : vector<1x256xf32> to vector<64x256xf32>
    %7 = arith.addf %4, %6 : vector<64x256xf32>
    %cst = arith.constant 0.000000e+00 : f32
    %8 = vector.broadcast %cst : f32 to vector<64x256xf32>
    %9 = arith.maximumf %7, %8 : vector<64x256xf32>
    %10 = arith.truncf %9 : vector<64x256xf32> to vector<64x256xbf16>
    %c0_5 = arith.constant 0 : index
    %c0_6 = arith.constant 0 : index
    %11 = vector.load %arg4[%c0_5, %c0_6] : memref<64x256xbf16, #tpu.memory_space<vmem>>, vector<64x256xbf16>
    tpu.vector_store %arg4[%c0_5, %c0_6], %10 {strides = array<i32>} : memref<64x256xbf16, #tpu.memory_space<vmem>>, vector<64x256xbf16>,
    return
  }
  func.func @transform_0(%arg0: i32) -> (i32, i32) {
    %c0_i32 = arith.constant 0 : i32
    %c0_i32_0 = arith.constant 0 : i32
    return %arg0, %c0_i32 : i32, i32
  }
  func.func @transform_1(%arg0: i32) -> (i32, i32) {
    %c0_i32 = arith.constant 0 : i32
    %c0_i32_0 = arith.constant 0 : i32
    %c0_i32_1 = arith.constant 0 : i32
    return %c0_i32, %c0_i32_0 : i32, i32
  }
  func.func @transform_2(%arg0: i32) -> (i32, i32) {
    %c0_i32 = arith.constant 0 : i32
    %c0_i32_0 = arith.constant 0 : i32
    %c0_i32_1 = arith.constant 0 : i32
    return %c0_i32, %c0_i32_0 : i32, i32
  }
  func.func @transform_3(%arg0: i32) -> (i32, i32) {
    %c0_i32 = arith.constant 0 : i32
    %c0_i32_0 = arith.constant 0 : i32
    return %arg0, %c0_i32 : i32, i32
  }
}

module attributes {stable_mosaic.version = 11 : i64} {
  func.func @_matmul_bias_act_kernel(%arg0: i32, %arg1: i32, %arg2: i32, %arg3: memref<256x256xbf16, #tpu.memory_space<vmem>>, %arg4: memref<256x128xbf16, #tpu.memory_space<vmem>>, %arg5: memref<1x128xf32, #tpu.memory_space<vmem>>, %arg6: memref<256x128xf32, #tpu.memory_space<vmem>>, %arg7: memref<256x128xf32, #tpu.memory_space<vmem>>) attributes {dimension_semantics = [#tpu.dimension_semantics<parallel>, #tpu.dimension_semantics<parallel>, #tpu.dimension_semantics<arbitrary>], iteration_bounds = array<i64: 2, 1, 13>, scalar_prefetch = 0 : i64, scratch_operands = 1 : i64, tpu.core_type = #tpu.core_type<tc>, window_params = [{transform_indices = @transform_0, window_bounds = array<i64: 256, 256>}, {transform_indices = @transform_1, window_bounds = array<i64: 256, 128>}, {transform_indices = @transform_2, window_bounds = array<i64: 1, 128>}, {transform_indices = @transform_3, window_bounds = array<i64: 256, 128>}]} {
    %c0_i32 = arith.constant 0 : i32
    %0 = arith.cmpi eq, %arg2, %c0_i32 : i32
    %1 = arith.extui %0 : i1 to i32
    %c0_i32_0 = arith.constant 0 : i32
    %2 = arith.cmpi ne, %1, %c0_i32_0 : i32
    scf.if %2 {
      %cst_9 = arith.constant 0.000000e+00 : f32
      %12 = vector.broadcast %cst_9 : f32 to vector<256x128xf32>
      %c0_10 = arith.constant 0 : index
      %c0_11 = arith.constant 0 : index
      %13 = vector.load %arg7[%c0_10, %c0_11] : memref<256x128xf32, #tpu.memory_space<vmem>>, vector<256x128xf32>
      tpu.vector_store %arg7[%c0_10, %c0_11], %12 {strides = array<i32>} : memref<256x128xf32, #tpu.memory_space<vmem>>, vector<256x128xf32>,
    } else {
    }
    %c0 = arith.constant 0 : index
    %c0_1 = arith.constant 0 : index
    %3 = vector.load %arg7[%c0, %c0_1] : memref<256x128xf32, #tpu.memory_space<vmem>>, vector<256x128xf32>
    %c0_2 = arith.constant 0 : index
    %c0_3 = arith.constant 0 : index
    %4 = vector.load %arg3[%c0_2, %c0_3] : memref<256x256xbf16, #tpu.memory_space<vmem>>, vector<256x256xbf16>
    %c0_4 = arith.constant 0 : index
    %c0_5 = arith.constant 0 : index
    %5 = vector.load %arg4[%c0_4, %c0_5] : memref<256x128xbf16, #tpu.memory_space<vmem>>, vector<256x128xbf16>
    %cst = arith.constant dense<0.000000e+00> : vector<256x128xf32>
    %6 = tpu.matmul %4, %5, %cst {dimension_numbers = #tpu.dot_dimension_numbers<[1], [0], [0], [1], [0, 0, 1, 1], [], []>} : vector<256x256xbf16>, vector<256x128xbf16>, vector<256x128xf32> -> vector<256x128xf32>
    %7 = arith.addf %3, %6 : vector<256x128xf32>
    %c0_6 = arith.constant 0 : index
    %c0_7 = arith.constant 0 : index
    %8 = vector.load %arg7[%c0_6, %c0_7] : memref<256x128xf32, #tpu.memory_space<vmem>>, vector<256x128xf32>
    tpu.vector_store %arg7[%c0_6, %c0_7], %7 {strides = array<i32>} : memref<256x128xf32, #tpu.memory_space<vmem>>, vector<256x128xf32>,
    %c12_i32 = arith.constant 12 : i32
    %9 = arith.cmpi eq, %arg2, %c12_i32 : i32
    %10 = arith.extui %9 : i1 to i32
    %c0_i32_8 = arith.constant 0 : i32
    %11 = arith.cmpi ne, %10, %c0_i32_8 : i32
    scf.if %11 {
      %c0_9 = arith.constant 0 : index
      %c0_10 = arith.constant 0 : index
      %12 = vector.load %arg7[%c0_9, %c0_10] : memref<256x128xf32, #tpu.memory_space<vmem>>, vector<256x128xf32>
      %c0_11 = arith.constant 0 : index
      %c0_12 = arith.constant 0 : index
      %13 = vector.load %arg5[%c0_11, %c0_12] : memref<1x128xf32, #tpu.memory_space<vmem>>, vector<1x128xf32>
      %14 = vector.broadcast %13 : vector<1x128xf32> to vector<256x128xf32>
      %15 = arith.addf %12, %14 : vector<256x128xf32>
      %16 = math.tanh %15 : vector<256x128xf32>
      %c0_13 = arith.constant 0 : index
      %c0_14 = arith.constant 0 : index
      %17 = vector.load %arg6[%c0_13, %c0_14] : memref<256x128xf32, #tpu.memory_space<vmem>>, vector<256x128xf32>
      tpu.vector_store %arg6[%c0_13, %c0_14], %16 {strides = array<i32>} : memref<256x128xf32, #tpu.memory_space<vmem>>, vector<256x128xf32>,
    } else {
    }
    return
  }
  func.func @transform_0(%arg0: i32, %arg1: i32, %arg2: i32) -> (i32, i32) {
    %c0_i32 = arith.constant 0 : i32
    return %arg0, %arg2 : i32, i32
  }
  func.func @transform_1(%arg0: i32, %arg1: i32, %arg2: i32) -> (i32, i32) {
    %c0_i32 = arith.constant 0 : i32
    return %arg2, %arg1 : i32, i32
  }
  func.func @transform_2(%arg0: i32, %arg1: i32, %arg2: i32) -> (i32, i32) {
    %c0_i32 = arith.constant 0 : i32
    %c0_i32_0 = arith.constant 0 : i32
    return %c0_i32, %arg1 : i32, i32
  }
  func.func @transform_3(%arg0: i32, %arg1: i32, %arg2: i32) -> (i32, i32) {
    %c0_i32 = arith.constant 0 : i32
    return %arg0, %arg1 : i32, i32
  }
}

</mosaic_0001>

<bundles_post_ra>
// kernel: generator_forward.27
= control target key start
LH: loop header
LB: loop body
LE: loop exit
PB: predicated region body
PF: predicated region fallthrough
CT: control target
= control target key end

     0   :  { %s1661_s15 = smov 0   ;;  %s1663_s16 = smov 0   ;;  %s1862_s0 = inlined_call_operand.vmem [shape: bf16[512,128], index: 0, kind: input, shape index: {}]   ;;  %s1863_s1 = inlined_call_operand.vmem [shape: bf16[128,128], index: 1, kind: input, shape index: {}]   ;;  %s1864_s2 = inlined_call_operand.vmem [shape: bf16[512,128], index: 2, kind: output, shape index: {0}]   ;;  %s1865_s3 = inlined_call_operand.vmem [shape: f32[16,128], index: 3, kind: output, shape index: {1}]   ;;  %s1866_s4 = inlined_call_operand.vmem [shape: f32[16,128], index: 4, kind: output, shape index: {2}]  }
   0x1   :  { %s1665_s17 = smov 0  }
   0x2 LB: > { %s34_s18 = sadd.s32 1, %s1630_s16  ;;  %p1284_p0 = scmp.ge.s32.totalorder %s1634_s17, 1  ;;  %s1634_s17 = sphi %s1665_s17, %s15_s17   ;;  %s1630_s16 = sphi %s1663_s16, %s1868_s16   ;;  %s1626_s15 = sphi %s1661_s15, %s1867_s15  }
   0x3   : > { %p36_p1 = scmp.ge.s32.totalorder %s34_s18, 2  ;;  %p214_p2 = scmp.lt.s32.totalorder %s1634_s17, 3 }
   0x5   : > { %s1870_s18 = smov (%p36_p1, %s34_s18), 0  ;;  %p215_p3 = pnand %p1284_p0, %p214_p2 }
   0x6   : > { %s1285_s21 = sshll.u32 (!%p215_p3), %s1626_s15, 5  ;;  %p295_p5 = scmp.lt.s32.totalorder (!%p215_p3), %s1626_s15, 1 }
   0x7   : > { %218 = sbr.rel (%p215_p3) target bundleno = 321 (0x141), region = 28  ;;  %p269_p4 = scmp.lt.s32.totalorder (!%p215_p3), %s1285_s21, 63 }
   0xc   : > { %v1588_v0 = vld [vmem:[%s1863_s1 + $0x38] sm:$0xff]   ;;  %v1589_v1 = vld [vmem:[%s1863_s1 + $0x30] sm:$0xff]   ;;  %s1872_s21 = smov (!%p269_p4, %s1285_s21), 63  ;;  %v1590_v2 = vld [vmem:[%s1863_s1 + $0x28] sm:$0xff]   ;;  %s1874_s15 = smov (!%p295_p5, %s1626_s15), 1 }
   0xd   : > { %1500 = vmatprep.subr.bf16.mxu0 %v1588_v0  ;;  %1548 = vmatprep.subr.bf16.mxu1 %v1588_v0  ;;  %s1286_s26 = sshll.u32 %s1872_s21, 2  ;;  %v1591_v3 = vld [vmem:[%s1863_s1 + $0x20] sm:$0xff]   ;;  %v1592_v5 = vld [vmem:[%s1863_s1 + $0x18] sm:$0xff]   ;;  %v1593_v6 = vld [vmem:[%s1863_s1 + $0x10] sm:$0xff]   ;;  %s1289_s21 = sshll.u32 %s1874_s15, 3 }
   0xe   : > { %1501 = vmatpush3.bf16.msra.mxu0 %v1588_v0  ;;  %1556 = vmatpush3.bf16.msra.mxu1 %v1588_v0  ;;  %s1699_s29 = scalar_lea.vmem %s1862_s0, %s1286_s26  ;;  %v1594_v8 = vld [vmem:[%s1863_s1 + $0x8] sm:$0xff]   ;;  %v1595_v9 = vld [vmem:[%s1863_s1] sm:$0xff]   ;;  %s1741_s20 = scalar_lea.vmem %s1864_s2, %s1286_s26 }
   0xf   : > { %1502 = vmatprep.subr.bf16.mxu0 %v1589_v1  ;;  %1549 = vmatprep.subr.bf16.mxu1 %v1589_v1  ;;  %v1596_v4 = vld [vmem:[%s1699_s29] sm:$0xff]   ;;  %v1597_v10 = vld [vmem:[%s1699_s29 + $0x8] sm:$0xff]   ;;  %v1598_v12 = vld [vmem:[%s1699_s29 + $0x10] sm:$0xff]   ;;  %s301_s24 = scalar_lea.vmem %s1865_s3, %s1289_s21  ;;  %s308_s27 = scalar_lea.vmem %s1866_s4, %s1289_s21 }
  0x10   : > { %1516 = vmatprep.mubr.bf16.mxu0 %v1596_v4  ;;  %v1604_v7 = vld [vmem:[%s1699_s29 + $0x40] sm:$0xff]   ;;  %v1605_v11 = vld [vmem:[%s1699_s29 + $0x48] sm:$0xff]   ;;  %v1606_v13 = vld [vmem:[%s1699_s29 + $0x50] sm:$0xff]  }
  0x11   : > { %1532 = vmatprep.mubr.bf16.mxu1 %v1604_v7  ;;  %v1599_v14 = vld [vmem:[%s1699_s29 + $0x18] sm:$0xff]   ;;  %v1600_v16 = vld [vmem:[%s1699_s29 + $0x20] sm:$0xff]   ;;  %v1601_v18 = vld [vmem:[%s1699_s29 + $0x28] sm:$0xff]  }
  0x12   : > { %1503 = vmatpush3.bf16.msra.mxu0 %v1589_v1  ;;  %1557 = vmatpush3.bf16.msra.mxu1 %v1589_v1  ;;  %v1607_v15 = vld [vmem:[%s1699_s29 + $0x58] sm:$0xff]   ;;  %v1608_v17 = vld [vmem:[%s1699_s29 + $0x60] sm:$0xff]   ;;  %v1609_v19 = vld [vmem:[%s1699_s29 + $0x68] sm:$0xff]  }
  0x13   : > { %1504 = vmatprep.subr.bf16.mxu0 %v1590_v2  ;;  %1550 = vmatprep.subr.bf16.mxu1 %v1590_v2  ;;  %v1602_v20 = vld [vmem:[%s1699_s29 + $0x30] sm:$0xff]   ;;  %v1603_v22 = vld [vmem:[%s1699_s29 + $0x38] sm:$0xff]  }
  0x14   : > { %v1610_v21 = vld [vmem:[%s1699_s29 + $0x70] sm:$0xff]   ;;  %v1611_v23 = vld [vmem:[%s1699_s29 + $0x78] sm:$0xff]  }
  0x16   : > { %1505 = vmatpush3.bf16.msra.mxu0 %v1590_v2  ;;  %1558 = vmatpush3.bf16.msra.mxu1 %v1590_v2 }
  0x17   : > { %1506 = vmatprep.subr.bf16.mxu0 %v1591_v3  ;;  %1551 = vmatprep.subr.bf16.mxu1 %v1591_v3 }
  0x1a   : > { %1507 = vmatpush3.bf16.msra.mxu0 %v1591_v3  ;;  %1559 = vmatpush3.bf16.msra.mxu1 %v1591_v3 }
  0x1b   : > { %1508 = vmatprep.subr.bf16.mxu0 %v1592_v5  ;;  %1552 = vmatprep.subr.bf16.mxu1 %v1592_v5 }
  0x1e   : > { %1509 = vmatpush3.bf16.msra.mxu0 %v1592_v5  ;;  %1560 = vmatpush3.bf16.msra.mxu1 %v1592_v5 }
  0x1f   : > { %1510 = vmatprep.subr.bf16.mxu0 %v1593_v6  ;;  %1553 = vmatprep.subr.bf16.mxu1 %v1593_v6 }
  0x22   : > { %1511 = vmatpush3.bf16.msra.mxu0 %v1593_v6  ;;  %1561 = vmatpush3.bf16.msra.mxu1 %v1593_v6 }
  0x23   : > { %1512 = vmatprep.subr.bf16.mxu0 %v1594_v8  ;;  %1554 = vmatprep.subr.bf16.mxu1 %v1594_v8 }
  0x26   : > { %1513 = vmatpush3.bf16.msra.mxu0 %v1594_v8  ;;  %1562 = vmatpush3.bf16.msra.mxu1 %v1594_v8 }
  0x27   : > { %1514 = vmatprep.subr.bf16.mxu0 %v1595_v9  ;;  %1555 = vmatprep.subr.bf16.mxu1 %v1595_v9 }
  0x2a   : > { %1515 = vmatpush3.bf16.msra.mxu0 %v1595_v9  ;;  %1563 = vmatpush3.bf16.msra.mxu1 %v1595_v9 }
  0x2d   : > { %1517 = vmatmul.mubr.bf16.vlgmr.msra.gmra.mxu0 %v1597_v10  ;;  %1533 = vmatmul.mubr.bf16.vlgmr.msra.gmra.mxu1 %v1605_v11 }
  0x2e   : > { %1520 = vmatprep.mubr.bf16.mxu0 %v1598_v12  ;;  %1536 = vmatprep.mubr.bf16.mxu1 %v1606_v13 }
  0x35   : > { %1521 = vmatmul.mubr.bf16.gmra.mxu0 %v1599_v14  ;;  %1537 = vmatmul.mubr.bf16.gmra.mxu1 %v1607_v15 }
  0x36   : > { %1524 = vmatprep.mubr.bf16.mxu0 %v1600_v16  ;;  %1540 = vmatprep.mubr.bf16.mxu1 %v1608_v17 }
  0x3d   : > { %1525 = vmatmul.mubr.bf16.gmra.mxu0 %v1601_v18  ;;  %1541 = vmatmul.mubr.bf16.gmra.mxu1 %v1609_v19 }
  0x3e   : > { %1528 = vmatprep.mubr.bf16.mxu0 %v1602_v20  ;;  %1544 = vmatprep.mubr.bf16.mxu1 %v1610_v21 }
  0x45   : > { %1529 = vmatmul.mubr.bf16.gmra.mxu0 %v1603_v22  ;;  %1545 = vmatmul.mubr.bf16.gmra.mxu1 %v1611_v23 }
  0xed   : > { %v1518_v24 = vpop.f32.mrf.mxu0  ;;  %v1732_v25 = vpop.f32.mrf.mxu1 }
  0xee   : > { %v1029_v41 = vmul.f32 %v1518_v24, %v1518_v24 }
  0xef   : > { %v604_v26 = vpop.f32.mrf.mxu0  ;;  %v1734_v27 = vpop.f32.mrf.mxu1 }
  0xf0   : > { %v1027_v32 = vmul.f32 %v604_v26, %v604_v26 }
  0xf1   : > { %v1519_v28 = vpop.f32.mrf.mxu0  ;;  %v1743_v29 = vpop.f32.mrf.mxu1 }
  0xf2   : > { %v1389_v30 = vpack.c.bf16 %v1519_v28, %v1518_v24  ;;  %v1429_v31 = vpack.c.bf16 %v1743_v29, %v1732_v25  ;;  %v1030_v46 = vmul.f32 %v1519_v28, %v1519_v28 }
  0xf3   : > { %v607_v33 = vpop.f32.mrf.mxu0  ;;  %v1747_v34 = vpop.f32.mrf.mxu1 }
  0xf4   : > { %1461 = vst [vmem:[%s1741_s20 + $0x8] sm:$0xff] %v1389_v30   ;;  %v1384_v35 = vpack.c.bf16 %v607_v33, %v604_v26  ;;  %v990_v36 = vadd.f32 %v607_v33, %v604_v26  ;;  %v1028_v37 = vmul.f32 %v607_v33, %v607_v33  ;;  %1469 = vst [vmem:[%s1741_s20 + $0x48] sm:$0xff] %v1429_v31  }
  0xf5   : > { %v1424_v38 = vpack.c.bf16 %v1747_v34, %v1734_v27  ;;  %v1522_v39 = vpop.f32.mrf.mxu0  ;;  %v1753_v40 = vpop.f32.mrf.mxu1 }
  0xf6   : > { %1385 = vst [vmem:[%s1741_s20] sm:$0xff] %v1384_v35   ;;  %v991_v42 = vadd.f32 %v1518_v24, %v990_v36  ;;  %v1059_v43 = vadd.f32 %v1028_v37, %v1027_v32  ;;  %v1033_v1 = vmul.f32 %v1522_v39, %v1522_v39 }
  0xf7   : > { %1468 = vst [vmem:[%s1741_s20 + $0x40] sm:$0xff] %v1424_v38   ;;  %v620_v44 = vpop.f32.mrf.mxu0  ;;  %v1757_v45 = vpop.f32.mrf.mxu1 }
  0xf8   : > { %v1060_v47 = vadd.f32 %v1059_v43, %v1029_v41  ;;  %v992_v48 = vadd.f32 %v1519_v28, %v991_v42  ;;  %v1031_v52 = vmul.f32 %v620_v44, %v620_v44 }
  0xf9   : > { %v1523_v49 = vpop.f32.mrf.mxu0  ;;  %v1759_v50 = vpop.f32.mrf.mxu1 }
  0xfa   : > { %v993_v51 = vadd.f32 %v992_v48, %v620_v44  ;;  %v1061_v53 = vadd.f32 %v1060_v47, %v1030_v46  ;;  %v1399_v54 = vpack.c.bf16 %v1523_v49, %v1522_v39  ;;  %v1439_v56 = vpack.c.bf16 %v1759_v50, %v1753_v40 }
  0xfb   : > { %v623_v55 = vpop.f32.mrf.mxu0  ;;  %v1763_v57 = vpop.f32.mrf.mxu1  ;;  %v1034_v6 = vmul.f32 %v1523_v49, %v1523_v49 }
  0xfc   : > { %v1062_v58 = vadd.f32 %v1061_v53, %v1031_v52  ;;  %1463 = vst [vmem:[%s1741_s20 + $0x18] sm:$0xff] %v1399_v54   ;;  %v1394_v59 = vpack.c.bf16 %v623_v55, %v620_v44  ;;  %v994_v60 = vadd.f32 %v993_v51, %v623_v55  ;;  %v1032_v61 = vmul.f32 %v623_v55, %v623_v55 }
  0xfd   : > { %v1526_v62 = vpop.f32.mrf.mxu0  ;;  %1471 = vst [vmem:[%s1741_s20 + $0x58] sm:$0xff] %v1439_v56   ;;  %v1434_v63 = vpack.c.bf16 %v1763_v57, %v1757_v45  ;;  %v1769_v0 = vpop.f32.mrf.mxu1 }
  0xfe   : > { %1462 = vst [vmem:[%s1741_s20 + $0x10] sm:$0xff] %v1394_v59   ;;  %v995_v2 = vadd.f32 %v1522_v39, %v994_v60  ;;  %v1063_v3 = vadd.f32 %v1062_v58, %v1032_v61  ;;  %v1037_v26 = vmul.f32 %v1526_v62, %v1526_v62  ;;  %v1043_v61 = vmul.f32 %v1734_v27, %v1734_v27 }
  0xff   : > { %v636_v4 = vpop.f32.mrf.mxu0  ;;  %1470 = vst [vmem:[%s1741_s20 + $0x50] sm:$0xff] %v1434_v63   ;;  %v1773_v5 = vpop.f32.mrf.mxu1 }
 0x100   : > { %v1064_v7 = vadd.f32 %v1063_v3, %v1033_v1  ;;  %v996_v8 = vadd.f32 %v1523_v49, %v995_v2  ;;  %v1035_v12 = vmul.f32 %v636_v4, %v636_v4  ;;  %v1044_v2 = vmul.f32 %v1747_v34, %v1747_v34 }
 0x101   : > { %v1527_v9 = vpop.f32.mrf.mxu0  ;;  %v1775_v10 = vpop.f32.mrf.mxu1 }
 0x102   : > { %v997_v11 = vadd.f32 %v996_v8, %v636_v4  ;;  %v1065_v13 = vadd.f32 %v1064_v7, %v1034_v6  ;;  %v1409_v14 = vpack.c.bf16 %v1527_v9, %v1526_v62  ;;  %v1449_v16 = vpack.c.bf16 %v1775_v10, %v1769_v0 }
 0x103   : > { %v639_v15 = vpop.f32.mrf.mxu0  ;;  %v1779_v17 = vpop.f32.mrf.mxu1  ;;  %v1038_v33 = vmul.f32 %v1527_v9, %v1527_v9  ;;  %v1046_v8 = vmul.f32 %v1743_v29, %v1743_v29 }
 0x104   : > { %v1066_v18 = vadd.f32 %v1065_v13, %v1035_v12  ;;  %1465 = vst [vmem:[%s1741_s20 + $0x28] sm:$0xff] %v1409_v14   ;;  %v1404_v19 = vpack.c.bf16 %v639_v15, %v636_v4  ;;  %v998_v20 = vadd.f32 %v997_v11, %v639_v15  ;;  %v1036_v21 = vmul.f32 %v639_v15, %v639_v15 }
 0x105   : > { %v1530_v22 = vpop.f32.mrf.mxu0  ;;  %1473 = vst [vmem:[%s1741_s20 + $0x68] sm:$0xff] %v1449_v16   ;;  %v1444_v23 = vpack.c.bf16 %v1779_v17, %v1773_v5  ;;  %v1785_v24 = vpop.f32.mrf.mxu1  ;;  %v1045_v4 = vmul.f32 %v1732_v25, %v1732_v25  ;;  %v1047_v12 = vmul.f32 %v1757_v45, %v1757_v45  ;;  %v1048_v15 = vmul.f32 %v1763_v57, %v1763_v57 }
 0x106   : > { %1464 = vst [vmem:[%s1741_s20 + $0x20] sm:$0xff] %v1404_v19   ;;  %v999_v28 = vadd.f32 %v1526_v62, %v998_v20  ;;  %v1067_v30 = vadd.f32 %v1066_v18, %v1036_v21  ;;  %v1041_v54 = vmul.f32 %v1530_v22, %v1530_v22  ;;  %v1051_v21 = vmul.f32 %v1773_v5, %v1773_v5 }
 0x107   : > { %v652_v31 = vpop.f32.mrf.mxu0  ;;  %1472 = vst [vmem:[%s1741_s20 + $0x60] sm:$0xff] %v1444_v23   ;;  %v1789_v32 = vpop.f32.mrf.mxu1 }
 0x108   : > { %v1068_v35 = vadd.f32 %v1067_v30, %v1037_v26  ;;  %v1000_v36 = vadd.f32 %v1527_v9, %v999_v28  ;;  %v1039_v41 = vmul.f32 %v652_v31, %v652_v31  ;;  %v1052_v26 = vmul.f32 %v1779_v17, %v1779_v17 }
 0x109   : > { %v1531_v37 = vpop.f32.mrf.mxu0  ;;  %v1791_v38 = vpop.f32.mrf.mxu1 }
 0x10a   : > { %v1001_v39 = vadd.f32 %v1000_v36, %v652_v31  ;;  %v1069_v42 = vadd.f32 %v1068_v35, %v1038_v33  ;;  %v1419_v43 = vpack.c.bf16 %v1531_v37, %v1530_v22  ;;  %v1459_v46 = vpack.c.bf16 %v1791_v38, %v1785_v24 }
 0x10b   : > { %v655_v44 = vpop.f32.mrf.mxu0  ;;  %v719_v47 = vpop.f32.mrf.mxu1  ;;  %v1042_v58 = vmul.f32 %v1531_v37, %v1531_v37  ;;  %v1055_v35 = vmul.f32 %v1789_v32, %v1789_v32 }
 0x10c   : > { %v1070_v48 = vadd.f32 %v1069_v42, %v1039_v41  ;;  %1467 = vst [vmem:[%s1741_s20 + $0x38] sm:$0xff] %v1419_v43   ;;  %v1414_v49 = vpack.c.bf16 %v655_v44, %v652_v31  ;;  %v1002_v51 = vadd.f32 %v1001_v39, %v655_v44  ;;  %v1040_v52 = vmul.f32 %v655_v44, %v655_v44 }
 0x10d   : > { %1475 = vst [vmem:[%s1741_s20 + $0x78] sm:$0xff] %v1459_v46   ;;  %v1454_v53 = vpack.c.bf16 %v719_v47, %v1789_v32  ;;  %v1056_v39 = vmul.f32 %v719_v47, %v719_v47  ;;  %v1058_v43 = vmul.f32 %v1791_v38, %v1791_v38 }
 0x10e   : > { %1466 = vst [vmem:[%s1741_s20 + $0x30] sm:$0xff] %v1414_v49   ;;  %v1003_v55 = vadd.f32 %v1530_v22, %v1002_v51  ;;  %v1071_v56 = vadd.f32 %v1070_v48, %v1040_v52 }
 0x10f   : > { %1474 = vst [vmem:[%s1741_s20 + $0x70] sm:$0xff] %v1454_v53  }
 0x110   : > { %v1004_v59 = vadd.f32 %v1531_v37, %v1003_v55  ;;  %v1072_v60 = vadd.f32 %v1071_v56, %v1041_v54 }
 0x112   : > { %v1073_v62 = vadd.f32 %v1072_v60, %v1042_v58  ;;  %v1005_v63 = vadd.f32 %v1004_v59, %v1734_v27 }
 0x114   : > { %v1006_v1 = vadd.f32 %v1005_v63, %v1747_v34  ;;  %v1074_v3 = vadd.f32 %v1073_v62, %v1043_v61 }
 0x116   : > { %v1007_v6 = vadd.f32 %v1732_v25, %v1006_v1  ;;  %v1075_v7 = vadd.f32 %v1074_v3, %v1044_v2  ;;  %v1049_v25 = vmul.f32 %v1753_v40, %v1753_v40 }
 0x118   : > { %v1076_v9 = vadd.f32 %v1075_v7, %v1045_v4  ;;  %v1008_v11 = vadd.f32 %v1743_v29, %v1007_v6  ;;  %v1050_v29 = vmul.f32 %v1759_v50, %v1759_v50 }
 0x11a   : > { %v1009_v27 = vadd.f32 %v1008_v11, %v1757_v45  ;;  %v1077_v13 = vadd.f32 %v1076_v9, %v1046_v8 }
 0x11c   : > { %v1078_v34 = vadd.f32 %v1077_v13, %v1047_v12  ;;  %v1010_v14 = vadd.f32 %v1009_v27, %v1763_v57 }
 0x11e   : > { %v1011_v16 = vadd.f32 %v1753_v40, %v1010_v14  ;;  %v1079_v18 = vadd.f32 %v1078_v34, %v1048_v15  ;;  %v1053_v40 = vmul.f32 %v1769_v0, %v1769_v0 }
 0x120   : > { %v1080_v19 = vadd.f32 %v1079_v18, %v1049_v25  ;;  %v1012_v20 = vadd.f32 %v1759_v50, %v1011_v16  ;;  %v1054_v50 = vmul.f32 %v1775_v10, %v1775_v10 }
 0x122   : > { %v1013_v45 = vadd.f32 %v1012_v20, %v1773_v5  ;;  %v1081_v22 = vadd.f32 %v1080_v19, %v1050_v29 }
 0x124   : > { %v1082_v23 = vadd.f32 %v1081_v22, %v1051_v21  ;;  %v1014_v57 = vadd.f32 %v1013_v45, %v1779_v17 }
 0x126   : > { %v1015_v28 = vadd.f32 %v1769_v0, %v1014_v57  ;;  %v1083_v30 = vadd.f32 %v1082_v23, %v1052_v26  ;;  %v1057_v0 = vmul.f32 %v1785_v24, %v1785_v24 }
 0x128   : > { %v1084_v31 = vadd.f32 %v1083_v30, %v1053_v40  ;;  %v1016_v5 = vadd.f32 %v1775_v10, %v1015_v28 }
 0x12a   : > { %v1017_v33 = vadd.f32 %v1016_v5, %v1789_v32  ;;  %v1085_v17 = vadd.f32 %v1084_v31, %v1054_v50 }
 0x12c   : > { %v1086_v36 = vadd.f32 %v1085_v17, %v1055_v35  ;;  %v1018_v37 = vadd.f32 %v1017_v33, %v719_v47 }
 0x12e   : > { %v1019_v41 = vadd.f32 %v1785_v24, %v1018_v37  ;;  %v1087_v42 = vadd.f32 %v1086_v36, %v1056_v39 }
 0x130   : > { %v1020_v10 = vadd.f32 %v1791_v38, %v1019_v41  ;;  %v1088_v44 = vadd.f32 %v1087_v42, %v1057_v0 }
 0x132   : > { %v1021_v46 = vrot.slane %v1020_v10, 4  ;;  %v1089_v48 = vadd.f32 %v1088_v44, %v1058_v43 }
 0x134   : > { %v1022_v32 = vadd.f32 %v1021_v46, %v1020_v10  ;;  %v1090_v49 = vrot.slane %v1089_v48, 4 }
 0x136   : > { %v1023_v51 = vrot.slane %v1022_v32, 2  ;;  %v1091_v47 = vadd.f32 %v1090_v49, %v1089_v48 }
 0x138   : > { %v1024_v52 = vadd.f32 %v1023_v51, %v1022_v32  ;;  %v1092_v53 = vrot.slane %v1091_v47, 2 }
 0x13a   : > { %v1025_v54 = vrot.slane %v1024_v52, 1  ;;  %v1093_v24 = vadd.f32 %v1092_v53, %v1091_v47 }
 0x13c   : > { %v1026_v55 = vadd.f32 %v1025_v54, %v1024_v52  ;;  %v1094_v56 = vrot.slane %v1093_v24, 1 }
 0x13e   : > { %v1095_v38 = vadd.f32 %v1094_v56, %v1093_v24  ;;  %1096 = vst [vmem:[%s301_s24] sm:$0xff] %v1026_v55 }
 0x140   : > { %1097 = vst [vmem:[%s308_s27] sm:$0xff] %v1095_v38 }
 0x141 PF: > { %s15_s17 = sadd.s32 1, %s1634_s17   ;;  %s1867_s15 = smov %s1630_s16 }
 0x142   : > { %p12_p6 = scmp.ge.s32.totalorder %s15_s17, 4   ;;  %s1868_s16 = smov %s1870_s18 }
 0x144   :  { %14 = sbr.rel (!%p12_p6) target bundleno = 2 (0x2), region = 93 }

// kernel: generator_forward.26
= control target key start
LH: loop header
LB: loop body
LE: loop exit
PB: predicated region body
PF: predicated region fallthrough
CT: control target
= control target key end

     0   :  { %s851_s12 = smov 0   ;;  %s985_s0 = inlined_call_operand.vmem [shape: bf16[512,128], index: 0, kind: input, shape index: {}]   ;;  %s986_s1 = inlined_call_operand.vmem [shape: f32[1,128], index: 1, kind: input, shape index: {}]   ;;  %s987_s2 = inlined_call_operand.vmem [shape: f32[1,128], index: 2, kind: input, shape index: {}]   ;;  %s988_s3 = inlined_call_operand.vmem [shape: bf16[512,128], index: 3, kind: output, shape index: {}]  }
   0x1 LB: > { %s564_s13 = sadd.s32 4294967295, %s829_s12   ;;  %p568_p0 = scmp.ge.s32.totalorder %s829_s12, 1  ;;  %s829_s12 = sphi %s851_s12, %s13_s12  }
   0x2   : > { %p138_p1 = scmp.lt.s32.totalorder %s829_s12, 3 }
   0x4   : > { %p139_p2 = pnand %p568_p0, %p138_p1 }
   0x5   : > { %s569_s14 = sshll.u32 (!%p139_p2), %s564_s13, 5 }
   0x6   : > { %142 = sbr.rel (%p139_p2) target bundleno = 57 (0x39), region = 32  ;;  %p163_p3 = scmp.lt.s32.totalorder (!%p139_p2), %s569_s14, 63 }
   0xb   : > { %s990_s14 = smov (!%p163_p3, %s569_s14), 63  ;;  %v872_v0 = vld [vmem:[%s986_s1] ss:$0 sm:$0xff] }
   0xc   : > { %s570_s15 = sshll.u32 %s990_s14, 2  ;;  %v881_v9 = vld [vmem:[%s987_s2] ss:$0 sm:$0xff] }
   0xd   : > { %s867_s18 = scalar_lea.vmem %s985_s0, %s570_s15  ;;  %s906_s25 = scalar_lea.vmem %s988_s3, %s570_s15 }
   0xe   : > { %v642_v1 = vld [vmem:[%s867_s18] sm:$0xff]   ;;  %v785_v2 = vld [vmem:[%s867_s18 + $0x8] sm:$0xff]   ;;  %v786_v3 = vld [vmem:[%s867_s18 + $0x10] sm:$0xff]  }
   0xf   : > { %v643_v4 = vunpack.c.l.bf16 %v642_v1  ;;  %v644_v5 = vunpack.c.h.bf16 %v642_v1  ;;  %v647_v6 = vunpack.c.l.bf16 %v785_v2  ;;  %v648_v7 = vunpack.c.h.bf16 %v785_v2  ;;  %v787_v8 = vld [vmem:[%s867_s18 + $0x18] sm:$0xff]   ;;  %v788_v30 = vld [vmem:[%s867_s18 + $0x20] sm:$0xff]   ;;  %v789_v35 = vld [vmem:[%s867_s18 + $0x28] sm:$0xff]  }
  0x10   : > { %v651_v10 = vunpack.c.l.bf16 %v786_v3  ;;  %v652_v11 = vunpack.c.h.bf16 %v786_v3  ;;  %v655_v12 = vunpack.c.l.bf16 %v787_v8  ;;  %v656_v13 = vunpack.c.h.bf16 %v787_v8  ;;  %v790_v40 = vld [vmem:[%s867_s18 + $0x30] sm:$0xff]   ;;  %v791_v45 = vld [vmem:[%s867_s18 + $0x38] sm:$0xff]   ;;  %v792_v3 = vld [vmem:[%s867_s18 + $0x40] sm:$0xff]  }
  0x11   : > { %v245_v14 = vmul.f32 %v643_v4, %v872_v0  ;;  %v246_v15 = vmul.f32 %v644_v5, %v872_v0  ;;  %v247_v16 = vmul.f32 %v647_v6, %v872_v0  ;;  %v248_v17 = vmul.f32 %v648_v7, %v872_v0 }
  0x12   : > { %v249_v18 = vmul.f32 %v651_v10, %v872_v0  ;;  %v250_v19 = vmul.f32 %v652_v11, %v872_v0  ;;  %v251_v20 = vmul.f32 %v655_v12, %v872_v0  ;;  %v252_v21 = vmul.f32 %v656_v13, %v872_v0  ;;  %v793_v13 = vld [vmem:[%s867_s18 + $0x48] sm:$0xff]  }
  0x13   : > { %v284_v22 = vadd.f32 %v881_v9, %v245_v14  ;;  %v285_v23 = vadd.f32 %v881_v9, %v246_v15  ;;  %v286_v24 = vadd.f32 %v881_v9, %v247_v16  ;;  %v287_v25 = vadd.f32 %v881_v9, %v248_v17 }
  0x14   : > { %v288_v26 = vadd.f32 %v881_v9, %v249_v18  ;;  %v289_v27 = vadd.f32 %v881_v9, %v250_v19  ;;  %v290_v28 = vadd.f32 %v881_v9, %v251_v20  ;;  %v291_v29 = vadd.f32 %v881_v9, %v252_v21  ;;  %v794_v18 = vld [vmem:[%s867_s18 + $0x50] sm:$0xff]  }
  0x15   : > { %v316_v31 = vmax.f32 %v284_v22, 0.0  ;;  %v317_v32 = vmax.f32 %v285_v23, 0.0  ;;  %v318_v33 = vmax.f32 %v286_v24, 0.0  ;;  %v319_v34 = vmax.f32 %v287_v25, 0.0  ;;  %v795_v23 = vld [vmem:[%s867_s18 + $0x58] sm:$0xff]  }
  0x16   : > { %v320_v36 = vmax.f32 %v288_v26, 0.0  ;;  %v321_v37 = vmax.f32 %v289_v27, 0.0  ;;  %v322_v38 = vmax.f32 %v290_v28, 0.0  ;;  %v323_v39 = vmax.f32 %v291_v29, 0.0 }
  0x17   : > { %v708_v41 = vpack.c.bf16 %v317_v32, %v316_v31  ;;  %v713_v42 = vpack.c.bf16 %v319_v34, %v318_v33  ;;  %v659_v43 = vunpack.c.l.bf16 %v788_v30  ;;  %v660_v44 = vunpack.c.h.bf16 %v788_v30 }
  0x18   : > { %v718_v46 = vpack.c.bf16 %v321_v37, %v320_v36  ;;  %v723_v47 = vpack.c.bf16 %v323_v39, %v322_v38  ;;  %v663_v48 = vunpack.c.l.bf16 %v789_v35  ;;  %v664_v49 = vunpack.c.h.bf16 %v789_v35 }
  0x19   : > { %709 = vst [vmem:[%s906_s25] sm:$0xff] %v708_v41   ;;  %800 = vst [vmem:[%s906_s25 + $0x8] sm:$0xff] %v713_v42   ;;  %v253_v50 = vmul.f32 %v659_v43, %v872_v0  ;;  %v254_v51 = vmul.f32 %v660_v44, %v872_v0  ;;  %v667_v52 = vunpack.c.l.bf16 %v790_v40  ;;  %v668_v53 = vunpack.c.h.bf16 %v790_v40  ;;  %v796_v40 = vld [vmem:[%s867_s18 + $0x60] sm:$0xff]  }
  0x1a   : > { %801 = vst [vmem:[%s906_s25 + $0x10] sm:$0xff] %v718_v46   ;;  %802 = vst [vmem:[%s906_s25 + $0x18] sm:$0xff] %v723_v47   ;;  %v255_v54 = vmul.f32 %v663_v48, %v872_v0  ;;  %v256_v55 = vmul.f32 %v664_v49, %v872_v0  ;;  %v671_v56 = vunpack.c.l.bf16 %v791_v45  ;;  %v672_v57 = vunpack.c.h.bf16 %v791_v45 }
  0x1b   : > { %v292_v58 = vadd.f32 %v881_v9, %v253_v50  ;;  %v293_v59 = vadd.f32 %v881_v9, %v254_v51  ;;  %v257_v60 = vmul.f32 %v667_v52, %v872_v0  ;;  %v258_v61 = vmul.f32 %v668_v53, %v872_v0  ;;  %v797_v53 = vld [vmem:[%s867_s18 + $0x68] sm:$0xff]  }
  0x1c   : > { %v294_v62 = vadd.f32 %v881_v9, %v255_v54  ;;  %v295_v63 = vadd.f32 %v881_v9, %v256_v55  ;;  %v259_v1 = vmul.f32 %v671_v56, %v872_v0  ;;  %v260_v2 = vmul.f32 %v672_v57, %v872_v0 }
  0x1d   : > { %v324_v4 = vmax.f32 %v292_v58, 0.0  ;;  %v325_v5 = vmax.f32 %v293_v59, 0.0  ;;  %v296_v6 = vadd.f32 %v881_v9, %v257_v60  ;;  %v297_v7 = vadd.f32 %v881_v9, %v258_v61  ;;  %v798_v58 = vld [vmem:[%s867_s18 + $0x70] sm:$0xff]  }
  0x1e   : > { %v326_v8 = vmax.f32 %v294_v62, 0.0  ;;  %v327_v10 = vmax.f32 %v295_v63, 0.0  ;;  %v298_v11 = vadd.f32 %v881_v9, %v259_v1  ;;  %v299_v12 = vadd.f32 %v881_v9, %v260_v2  ;;  %v799_v63 = vld [vmem:[%s867_s18 + $0x78] sm:$0xff]  }
  0x1f   : > { %v728_v14 = vpack.c.bf16 %v325_v5, %v324_v4  ;;  %v328_v15 = vmax.f32 %v296_v6, 0.0  ;;  %v329_v16 = vmax.f32 %v297_v7, 0.0  ;;  %v675_v17 = vunpack.c.l.bf16 %v792_v3 }
  0x20   : > { %v733_v19 = vpack.c.bf16 %v327_v10, %v326_v8  ;;  %v330_v20 = vmax.f32 %v298_v11, 0.0  ;;  %v331_v21 = vmax.f32 %v299_v12, 0.0  ;;  %v676_v22 = vunpack.c.h.bf16 %v792_v3 }
  0x21   : > { %803 = vst [vmem:[%s906_s25 + $0x20] sm:$0xff] %v728_v14   ;;  %v738_v24 = vpack.c.bf16 %v329_v16, %v328_v15  ;;  %v261_v25 = vmul.f32 %v675_v17, %v872_v0  ;;  %v679_v26 = vunpack.c.l.bf16 %v793_v13  ;;  %v680_v27 = vunpack.c.h.bf16 %v793_v13 }
  0x22   : > { %804 = vst [vmem:[%s906_s25 + $0x28] sm:$0xff] %v733_v19   ;;  %v743_v28 = vpack.c.bf16 %v331_v21, %v330_v20  ;;  %v262_v29 = vmul.f32 %v676_v22, %v872_v0  ;;  %v683_v30 = vunpack.c.l.bf16 %v794_v18  ;;  %v684_v31 = vunpack.c.h.bf16 %v794_v18 }
  0x23   : > { %805 = vst [vmem:[%s906_s25 + $0x30] sm:$0xff] %v738_v24   ;;  %v300_v32 = vadd.f32 %v881_v9, %v261_v25  ;;  %v263_v33 = vmul.f32 %v679_v26, %v872_v0  ;;  %v264_v34 = vmul.f32 %v680_v27, %v872_v0  ;;  %v687_v35 = vunpack.c.l.bf16 %v795_v23 }
  0x24   : > { %806 = vst [vmem:[%s906_s25 + $0x38] sm:$0xff] %v743_v28   ;;  %v301_v36 = vadd.f32 %v881_v9, %v262_v29  ;;  %v265_v37 = vmul.f32 %v683_v30, %v872_v0  ;;  %v266_v38 = vmul.f32 %v684_v31, %v872_v0  ;;  %v688_v39 = vunpack.c.h.bf16 %v795_v23 }
  0x25   : > { %v332_v41 = vmax.f32 %v300_v32, 0.0  ;;  %v302_v42 = vadd.f32 %v881_v9, %v263_v33  ;;  %v303_v43 = vadd.f32 %v881_v9, %v264_v34  ;;  %v267_v44 = vmul.f32 %v687_v35, %v872_v0 }
  0x26   : > { %v333_v45 = vmax.f32 %v301_v36, 0.0  ;;  %v304_v46 = vadd.f32 %v881_v9, %v265_v37  ;;  %v305_v47 = vadd.f32 %v881_v9, %v266_v38  ;;  %v268_v48 = vmul.f32 %v688_v39, %v872_v0 }
  0x27   : > { %v334_v49 = vmax.f32 %v302_v42, 0.0  ;;  %v335_v50 = vmax.f32 %v303_v43, 0.0  ;;  %v306_v51 = vadd.f32 %v881_v9, %v267_v44  ;;  %v691_v52 = vunpack.c.l.bf16 %v796_v40 }
  0x28   : > { %v748_v54 = vpack.c.bf16 %v333_v45, %v332_v41  ;;  %v336_v55 = vmax.f32 %v304_v46, 0.0  ;;  %v337_v56 = vmax.f32 %v305_v47, 0.0  ;;  %v307_v57 = vadd.f32 %v881_v9, %v268_v48 }
  0x29   : > { %v753_v59 = vpack.c.bf16 %v335_v50, %v334_v49  ;;  %v338_v60 = vmax.f32 %v306_v51, 0.0  ;;  %v692_v61 = vunpack.c.h.bf16 %v796_v40  ;;  %v269_v62 = vmul.f32 %v691_v52, %v872_v0 }
  0x2a   : > { %807 = vst [vmem:[%s906_s25 + $0x40] sm:$0xff] %v748_v54   ;;  %v758_v1 = vpack.c.bf16 %v337_v56, %v336_v55  ;;  %v339_v2 = vmax.f32 %v307_v57, 0.0  ;;  %v695_v3 = vunpack.c.l.bf16 %v797_v53  ;;  %v696_v4 = vunpack.c.h.bf16 %v797_v53 }
  0x2b   : > { %808 = vst [vmem:[%s906_s25 + $0x48] sm:$0xff] %v753_v59   ;;  %v270_v5 = vmul.f32 %v692_v61, %v872_v0  ;;  %v308_v6 = vadd.f32 %v881_v9, %v269_v62  ;;  %v699_v7 = vunpack.c.l.bf16 %v798_v58  ;;  %v700_v8 = vunpack.c.h.bf16 %v798_v58 }
  0x2c   : > { %809 = vst [vmem:[%s906_s25 + $0x50] sm:$0xff] %v758_v1   ;;  %v763_v10 = vpack.c.bf16 %v339_v2, %v338_v60  ;;  %v271_v11 = vmul.f32 %v695_v3, %v872_v0  ;;  %v272_v12 = vmul.f32 %v696_v4, %v872_v0  ;;  %v703_v13 = vunpack.c.l.bf16 %v799_v63 }
  0x2d   : > { %v309_v14 = vadd.f32 %v881_v9, %v270_v5  ;;  %v340_v15 = vmax.f32 %v308_v6, 0.0  ;;  %v273_v16 = vmul.f32 %v699_v7, %v872_v0  ;;  %v274_v17 = vmul.f32 %v700_v8, %v872_v0 }
  0x2e   : > { %810 = vst [vmem:[%s906_s25 + $0x58] sm:$0xff] %v763_v10   ;;  %v310_v18 = vadd.f32 %v881_v9, %v271_v11  ;;  %v311_v19 = vadd.f32 %v881_v9, %v272_v12  ;;  %v704_v20 = vunpack.c.h.bf16 %v799_v63  ;;  %v275_v21 = vmul.f32 %v703_v13, %v872_v0 }
  0x2f   : > { %v341_v22 = vmax.f32 %v309_v14, 0.0  ;;  %v312_v23 = vadd.f32 %v881_v9, %v273_v16  ;;  %v313_v24 = vadd.f32 %v881_v9, %v274_v17 }
  0x30   : > { %v342_v25 = vmax.f32 %v310_v18, 0.0  ;;  %v343_v26 = vmax.f32 %v311_v19, 0.0  ;;  %v276_v27 = vmul.f32 %v704_v20, %v872_v0  ;;  %v314_v28 = vadd.f32 %v881_v9, %v275_v21 }
  0x31   : > { %v768_v29 = vpack.c.bf16 %v341_v22, %v340_v15  ;;  %v344_v30 = vmax.f32 %v312_v23, 0.0  ;;  %v345_v31 = vmax.f32 %v313_v24, 0.0 }
  0x32   : > { %v773_v32 = vpack.c.bf16 %v343_v26, %v342_v25  ;;  %v315_v33 = vadd.f32 %v881_v9, %v276_v27  ;;  %v346_v34 = vmax.f32 %v314_v28, 0.0 }
  0x33   : > { %811 = vst [vmem:[%s906_s25 + $0x60] sm:$0xff] %v768_v29   ;;  %v778_v35 = vpack.c.bf16 %v345_v31, %v344_v30 }
  0x34   : > { %812 = vst [vmem:[%s906_s25 + $0x68] sm:$0xff] %v773_v32   ;;  %v347_v36 = vmax.f32 %v315_v33, 0.0 }
  0x35   : > { %813 = vst [vmem:[%s906_s25 + $0x70] sm:$0xff] %v778_v35  }
  0x36   : > { %v783_v37 = vpack.c.bf16 %v347_v36, %v346_v34 }
  0x38   : > { %814 = vst [vmem:[%s906_s25 + $0x78] sm:$0xff] %v783_v37  }
  0x39 PF: > { %s13_s12 = sadd.s32 1, %s829_s12  }
  0x3a   : > { %p10_p4 = scmp.ge.s32.totalorder %s13_s12, 4  }
  0x3c   :  { %12 = sbr.rel (!%p10_p4) target bundleno = 1 (0x1), region = 62 }

// kernel: generator_forward.25
= control target key start
LH: loop header
LB: loop body
LE: loop exit
PB: predicated region body
PF: predicated region fallthrough
CT: control target
= control target key end

     0   :  { %s3315_s15 = smov 0   ;;  %s3317_s16 = smov 0   ;;  %s3743_s0 = inlined_call_operand.vmem [shape: bf16[512,768], index: 0, kind: input, shape index: {}]   ;;  %s3744_s1 = inlined_call_operand.vmem [shape: bf16[768,128], index: 1, kind: input, shape index: {}]   ;;  %s3745_s2 = inlined_call_operand.vmem [shape: bf16[512,128], index: 2, kind: output, shape index: {0}]   ;;  %s3746_s3 = inlined_call_operand.vmem [shape: f32[16,128], index: 3, kind: output, shape index: {1}]   ;;  %s3747_s4 = inlined_call_operand.vmem [shape: f32[16,128], index: 4, kind: output, shape index: {2}]  }
   0x1   :  { %s3319_s17 = smov 0  }
   0x2 LB: > { %s34_s18 = sadd.s32 1, %s3284_s16  ;;  %p2385_p0 = scmp.ge.s32.totalorder %s3288_s17, 1  ;;  %s3288_s17 = sphi %s3319_s17, %s15_s17   ;;  %s3284_s16 = sphi %s3317_s16, %s3749_s16   ;;  %s3280_s15 = sphi %s3315_s15, %s3748_s15  }
   0x3   : > { %p36_p1 = scmp.ge.s32.totalorder %s34_s18, 2  ;;  %p217_p2 = scmp.lt.s32.totalorder %s3288_s17, 3 }
   0x5   : > { %s3751_s18 = smov (%p36_p1, %s34_s18), 0  ;;  %p218_p3 = pnand %p2385_p0, %p217_p2 }
   0x6   : > { %s2386_s21 = sshll.u32 (!%p218_p3), %s3280_s15, 5  ;;  %p303_p5 = scmp.lt.s32.totalorder (!%p218_p3), %s3280_s15, 1 }
   0x7   : > { %221 = sbr.rel (%p218_p3) target bundleno = 451 (0x1c3), region = 28  ;;  %p275_p4 = scmp.lt.s32.totalorder (!%p218_p3), %s2386_s21, 63 }
   0xc   : > { %v3074_v0 = vld [vmem:[%s3744_s1 + $0x78] sm:$0xff]   ;;  %v3076_v2 = vld [vmem:[%s3744_s1 + $0x70] sm:$0xff]   ;;  %v3078_v4 = vld [vmem:[%s3744_s1 + $0x68] sm:$0xff]   ;;  %s3753_s21 = smov (!%p275_p4, %s2386_s21), 63  ;;  %s3755_s15 = smov (!%p303_p5, %s3280_s15), 1 }
   0xd   : > { %v3075_v1 = vld [vmem:[%s3744_s1 + $0x38] sm:$0xff]   ;;  %2697 = vmatprep.subr.bf16.mxu0 %v3074_v0  ;;  %3033 = vmatprep.subr.bf16.mxu1 %v3074_v0  ;;  %v3077_v3 = vld [vmem:[%s3744_s1 + $0x30] sm:$0xff]   ;;  %v3079_v5 = vld [vmem:[%s3744_s1 + $0x28] sm:$0xff]   ;;  %s3049_s8 = smul.u32 24, %s3753_s21 }
   0xe   : > { %2698 = vmatpush3.bf16.msra.mxu0 %v3075_v1  ;;  %3041 = vmatpush3.bf16.msra.mxu1 %v3075_v1  ;;  %v3080_v6 = vld [vmem:[%s3744_s1 + $0x60] sm:$0xff]   ;;  %v3082_v8 = vld [vmem:[%s3744_s1 + $0x58] sm:$0xff]   ;;  %v3084_v10 = vld [vmem:[%s3744_s1 + $0x50] sm:$0xff]  }
   0xf   : > { %2699 = vmatprep.subr.bf16.mxu0 %v3076_v2  ;;  %3034 = vmatprep.subr.bf16.mxu1 %v3076_v2  ;;  %v3081_v7 = vld [vmem:[%s3744_s1 + $0x20] sm:$0xff]   ;;  %s3369_s19 = scalar_lea.vmem %s3743_s0, %s3049_s8  ;;  %v3083_v9 = vld [vmem:[%s3744_s1 + $0x18] sm:$0xff]   ;;  %v3085_v13 = vld [vmem:[%s3744_s1 + $0x10] sm:$0xff]  }
  0x10   : > { %v3092_v11 = vld [vmem:[%s3369_s19 + $0x4] ss:$24 sps:$4 sm:$0xff]   ;;  %v3086_v14 = vld [vmem:[%s3744_s1 + $0x48] sm:$0xff]   ;;  %v3090_v19 = vld [vmem:[%s3369_s19] ss:$24 sps:$4 sm:$0xff]  }
  0x11   : > { %v3095_v12 = vld [vmem:[%s3369_s19 + $0x184] ss:$24 sps:$4 sm:$0xff]   ;;  %1378 = vmatprep.mubr.bf16.mxu0 %v3092_v11  ;;  %v3087_v15 = vld [vmem:[%s3744_s1 + $0x8] sm:$0xff]   ;;  %v3093_v21 = vld [vmem:[%s3369_s19 + $0x180] ss:$24 sps:$4 sm:$0xff]  }
  0x12   : > { %2700 = vmatpush3.bf16.msra.mxu0 %v3077_v3  ;;  %3042 = vmatpush3.bf16.msra.mxu1 %v3077_v3  ;;  %v3088_v16 = vld [vmem:[%s3744_s1 + $0x40] sm:$0xff]   ;;  %v3096_v18 = vld [vmem:[%s3744_s1 + $0xf8] sm:$0xff]   ;;  %v3100_v24 = vld [vmem:[%s3369_s19 + $0x34] ss:$24 sps:$4 sm:$0xff]  }
  0x13   : > { %2701 = vmatprep.subr.bf16.mxu0 %v3078_v4  ;;  %3035 = vmatprep.subr.bf16.mxu1 %v3078_v4  ;;  %v3089_v17 = vld [vmem:[%s3744_s1] sm:$0xff]   ;;  %v3098_v20 = vld [vmem:[%s3744_s1 + $0x178] sm:$0xff]   ;;  %v3102_v25 = vld [vmem:[%s3369_s19 + $0x1b4] ss:$24 sps:$4 sm:$0xff]  }
  0x14   : > { %1442 = vmatprep.mubr.bf16.mxu1 %v3095_v12  ;;  %v3097_v22 = vld [vmem:[%s3744_s1 + $0xb8] sm:$0xff]   ;;  %v3106_v26 = vld [vmem:[%s3744_s1 + $0xf0] sm:$0xff]   ;;  %v3116_v30 = vld [vmem:[%s3744_s1 + $0xe8] sm:$0xff]  }
  0x15   : > { %v3099_v23 = vld [vmem:[%s3744_s1 + $0x138] sm:$0xff]   ;;  %v3107_v27 = vld [vmem:[%s3744_s1 + $0xb0] sm:$0xff]   ;;  %v3118_v33 = vld [vmem:[%s3744_s1 + $0x168] sm:$0xff]  }
  0x16   : > { %2702 = vmatpush3.bf16.msra.mxu0 %v3079_v5  ;;  %3043 = vmatpush3.bf16.msra.mxu1 %v3079_v5  ;;  %v3108_v28 = vld [vmem:[%s3744_s1 + $0x170] sm:$0xff]   ;;  %v3110_v34 = vld [vmem:[%s3369_s19 + $0x64] ss:$24 sps:$4 sm:$0xff]   ;;  %v3117_v36 = vld [vmem:[%s3744_s1 + $0xa8] sm:$0xff]  }
  0x17   : > { %2703 = vmatprep.subr.bf16.mxu0 %v3080_v6  ;;  %3036 = vmatprep.subr.bf16.mxu1 %v3080_v6  ;;  %v3109_v29 = vld [vmem:[%s3744_s1 + $0x130] sm:$0xff]   ;;  %v3112_v35 = vld [vmem:[%s3369_s19 + $0x1e4] ss:$24 sps:$4 sm:$0xff]   ;;  %v3119_v37 = vld [vmem:[%s3744_s1 + $0x128] sm:$0xff]  }
  0x18   : > { %v3104_v31 = vld [vmem:[%s3369_s19 + $0x30] ss:$24 sps:$4 sm:$0xff]   ;;  %v3126_v38 = vld [vmem:[%s3744_s1 + $0xe0] sm:$0xff]   ;;  %v3120_v44 = vld [vmem:[%s3369_s19 + $0x94] ss:$24 sps:$4 sm:$0xff]  }
  0x19   : > { %v3105_v32 = vld [vmem:[%s3369_s19 + $0x1b0] ss:$24 sps:$4 sm:$0xff]   ;;  %v3128_v39 = vld [vmem:[%s3744_s1 + $0x160] sm:$0xff]   ;;  %v3122_v45 = vld [vmem:[%s3369_s19 + $0x214] ss:$24 sps:$4 sm:$0xff]  }
  0x1a   : > { %2704 = vmatpush3.bf16.msra.mxu0 %v3081_v7  ;;  %3044 = vmatpush3.bf16.msra.mxu1 %v3081_v7  ;;  %v3114_v40 = vld [vmem:[%s3369_s19 + $0x60] ss:$24 sps:$4 sm:$0xff]   ;;  %v3124_v50 = vld [vmem:[%s3369_s19 + $0x90] ss:$24 sps:$4 sm:$0xff]   ;;  %v3130_v53 = vld [vmem:[%s3369_s19 + $0xc4] ss:$24 sps:$4 sm:$0xff]  }
  0x1b   : > { %2705 = vmatprep.subr.bf16.mxu0 %v3082_v8  ;;  %3037 = vmatprep.subr.bf16.mxu1 %v3082_v8  ;;  %v3115_v41 = vld [vmem:[%s3369_s19 + $0x1e0] ss:$24 sps:$4 sm:$0xff]   ;;  %v3125_v51 = vld [vmem:[%s3369_s19 + $0x210] ss:$24 sps:$4 sm:$0xff]   ;;  %v3132_v54 = vld [vmem:[%s3369_s19 + $0x244] ss:$24 sps:$4 sm:$0xff]  }
  0x1c   : > { %v3127_v42 = vld [vmem:[%s3744_s1 + $0xa0] sm:$0xff]   ;;  %v3136_v46 = vld [vmem:[%s3744_s1 + $0xd8] sm:$0xff]   ;;  %v3146_v52 = vld [vmem:[%s3744_s1 + $0xd0] sm:$0xff]  }
  0x1d   : > { %v3129_v43 = vld [vmem:[%s3744_s1 + $0x120] sm:$0xff]   ;;  %v3137_v47 = vld [vmem:[%s3744_s1 + $0x98] sm:$0xff]   ;;  %v3147_v55 = vld [vmem:[%s3744_s1 + $0x90] sm:$0xff]  }
  0x1e   : > { %2706 = vmatpush3.bf16.msra.mxu0 %v3083_v9  ;;  %3045 = vmatpush3.bf16.msra.mxu1 %v3083_v9  ;;  %v3138_v48 = vld [vmem:[%s3744_s1 + $0x158] sm:$0xff]   ;;  %v3148_v56 = vld [vmem:[%s3744_s1 + $0x150] sm:$0xff]   ;;  %v3156_v58 = vld [vmem:[%s3744_s1 + $0xc8] sm:$0xff]  }
  0x1f   : > { %2707 = vmatprep.subr.bf16.mxu0 %v3084_v10  ;;  %3038 = vmatprep.subr.bf16.mxu1 %v3084_v10  ;;  %v3139_v49 = vld [vmem:[%s3744_s1 + $0x118] sm:$0xff]   ;;  %v3149_v57 = vld [vmem:[%s3744_s1 + $0x110] sm:$0xff]   ;;  %v3157_v61 = vld [vmem:[%s3744_s1 + $0x88] sm:$0xff]  }
  0x20   : > { %v3134_v59 = vld [vmem:[%s3369_s19 + $0xc0] ss:$24 sps:$4 sm:$0xff]   ;;  %v3140_v62 = vld [vmem:[%s3369_s19 + $0xf4] ss:$24 sps:$4 sm:$0xff]   ;;  %v3144_v6 = vld [vmem:[%s3369_s19 + $0xf0] ss:$24 sps:$4 sm:$0xff]  }
  0x21   : > { %v3135_v60 = vld [vmem:[%s3369_s19 + $0x240] ss:$24 sps:$4 sm:$0xff]   ;;  %v3158_v63 = vld [vmem:[%s3744_s1 + $0x148] sm:$0xff]   ;;  %v3150_v8 = vld [vmem:[%s3369_s19 + $0x124] ss:$24 sps:$4 sm:$0xff]  }
  0x22   : > { %2708 = vmatpush3.bf16.msra.mxu0 %v3085_v13  ;;  %3046 = vmatpush3.bf16.msra.mxu1 %v3085_v13  ;;  %v3159_v0 = vld [vmem:[%s3744_s1 + $0x108] sm:$0xff]   ;;  %v3166_v2 = vld [vmem:[%s3744_s1 + $0xc0] sm:$0xff]  }
  0x23   : > { %2709 = vmatprep.subr.bf16.mxu0 %v3086_v14  ;;  %3039 = vmatprep.subr.bf16.mxu1 %v3086_v14  ;;  %v3142_v1 = vld [vmem:[%s3369_s19 + $0x274] ss:$24 sps:$4 sm:$0xff]   ;;  %v3167_v3 = vld [vmem:[%s3744_s1 + $0x80] sm:$0xff]   ;;  %v3145_v7 = vld [vmem:[%s3369_s19 + $0x270] ss:$24 sps:$4 sm:$0xff]  }
  0x24   : > { %v3168_v4 = vld [vmem:[%s3744_s1 + $0x140] sm:$0xff]   ;;  %v3160_v12 = vld [vmem:[%s3369_s19 + $0x154] ss:$24 sps:$4 sm:$0xff]   ;;  %v3164_v14 = vld [vmem:[%s3369_s19 + $0x150] ss:$24 sps:$4 sm:$0xff]  }
  0x25   : > { %v3169_v5 = vld [vmem:[%s3744_s1 + $0x100] sm:$0xff]   ;;  %v3162_v13 = vld [vmem:[%s3369_s19 + $0x2d4] ss:$24 sps:$4 sm:$0xff]  }
  0x26   : > { %2710 = vmatpush3.bf16.msra.mxu0 %v3087_v15  ;;  %3047 = vmatpush3.bf16.msra.mxu1 %v3087_v15  ;;  %v3152_v9 = vld [vmem:[%s3369_s19 + $0x2a4] ss:$24 sps:$4 sm:$0xff]   ;;  %v3154_v10 = vld [vmem:[%s3369_s19 + $0x120] ss:$24 sps:$4 sm:$0xff]   ;;  %v3165_v15 = vld [vmem:[%s3369_s19 + $0x2d0] ss:$24 sps:$4 sm:$0xff]  }
  0x27   : > { %2711 = vmatprep.subr.bf16.mxu0 %v3088_v16  ;;  %3040 = vmatprep.subr.bf16.mxu1 %v3088_v16  ;;  %v3155_v11 = vld [vmem:[%s3369_s19 + $0x2a0] ss:$24 sps:$4 sm:$0xff]   ;;  %v3172_v16 = vld [vmem:[%s3369_s19 + $0xc] ss:$24 sps:$4 sm:$0xff]  }
  0x2a   : > { %2712 = vmatpush3.bf16.msra.mxu0 %v3089_v17  ;;  %3048 = vmatpush3.bf16.msra.mxu1 %v3089_v17  ;;  %v3175_v17 = vld [vmem:[%s3369_s19 + $0x14] ss:$24 sps:$4 sm:$0xff]  }
  0x2b   : > { %2809 = vmatprep.subr.bf16.mxu1 %v3096_v18  ;;  %2921 = vmatprep.subr.bf16.mxu0 %v3098_v20  ;;  %v3170_v18 = vld [vmem:[%s3369_s19 + $0x8] ss:$24 sps:$4 sm:$0xff]   ;;  %v3176_v20 = vld [vmem:[%s3369_s19 + $0x3c] ss:$24 sps:$4 sm:$0xff]  }
  0x2d   : > { %1379 = vmatmul.mubr.bf16.vlgmr.msra.gmra.mxu0 %v3090_v19  ;;  %1443 = vmatmul.mubr.bf16.vlgmr.msra.gmra.mxu1 %v3093_v21  ;;  %v3173_v19 = vld [vmem:[%s3369_s19 + $0x10] ss:$24 sps:$4 sm:$0xff]   ;;  %v3178_v21 = vld [vmem:[%s3369_s19 + $0x44] ss:$24 sps:$4 sm:$0xff]  }
  0x2e   : > { %2810 = vmatpush3.bf16.msra.mxu1 %v3097_v22  ;;  %2922 = vmatpush3.bf16.msra.mxu0 %v3099_v23  ;;  %v3180_v22 = vld [vmem:[%s3369_s19 + $0x38] ss:$24 sps:$4 sm:$0xff]  }
  0x2f   : > { %1386 = vmatprep.mubr.bf16.mxu0 %v3100_v24  ;;  %1450 = vmatprep.mubr.bf16.mxu1 %v3102_v25  ;;  %v3181_v23 = vld [vmem:[%s3369_s19 + $0x40] ss:$24 sps:$4 sm:$0xff]   ;;  %v3182_v24 = vld [vmem:[%s3369_s19 + $0x6c] ss:$24 sps:$4 sm:$0xff]  }
  0x30   : > { %2811 = vmatprep.subr.bf16.mxu1 %v3106_v26  ;;  %2923 = vmatprep.subr.bf16.mxu0 %v3108_v28  ;;  %v3184_v25 = vld [vmem:[%s3369_s19 + $0x74] ss:$24 sps:$4 sm:$0xff]   ;;  %v3186_v26 = vld [vmem:[%s3369_s19 + $0x68] ss:$24 sps:$4 sm:$0xff]  }
  0x31   : > { %v3188_v28 = vld [vmem:[%s3369_s19 + $0x9c] ss:$24 sps:$4 sm:$0xff]  }
  0x32   : > { %2812 = vmatpush3.bf16.msra.mxu1 %v3107_v27  ;;  %2924 = vmatpush3.bf16.msra.mxu0 %v3109_v29  ;;  %v3187_v27 = vld [vmem:[%s3369_s19 + $0x70] ss:$24 sps:$4 sm:$0xff]   ;;  %v3190_v29 = vld [vmem:[%s3369_s19 + $0xa4] ss:$24 sps:$4 sm:$0xff]  }
  0x33   : > { %2813 = vmatprep.subr.bf16.mxu1 %v3116_v30  ;;  %2925 = vmatprep.subr.bf16.mxu0 %v3118_v33  ;;  %v3192_v30 = vld [vmem:[%s3369_s19 + $0x98] ss:$24 sps:$4 sm:$0xff]   ;;  %v3196_v33 = vld [vmem:[%s3369_s19 + $0xd4] ss:$24 sps:$4 sm:$0xff]  }
  0x35   : > { %1387 = vmatmul.mubr.bf16.gmra.mxu0 %v3104_v31  ;;  %1451 = vmatmul.mubr.bf16.gmra.mxu1 %v3105_v32  ;;  %v3193_v31 = vld [vmem:[%s3369_s19 + $0xa0] ss:$24 sps:$4 sm:$0xff]   ;;  %v3194_v32 = vld [vmem:[%s3369_s19 + $0xcc] ss:$24 sps:$4 sm:$0xff]  }
  0x36   : > { %1394 = vmatprep.mubr.bf16.mxu0 %v3110_v34  ;;  %1458 = vmatprep.mubr.bf16.mxu1 %v3112_v35  ;;  %v3198_v34 = vld [vmem:[%s3369_s19 + $0xc8] ss:$24 sps:$4 sm:$0xff]  }
  0x37   : > { %2814 = vmatpush3.bf16.msra.mxu1 %v3117_v36  ;;  %2926 = vmatpush3.bf16.msra.mxu0 %v3119_v37  ;;  %v3199_v35 = vld [vmem:[%s3369_s19 + $0xd0] ss:$24 sps:$4 sm:$0xff]   ;;  %v3200_v36 = vld [vmem:[%s3369_s19 + $0xfc] ss:$24 sps:$4 sm:$0xff]  }
  0x38   : > { %2815 = vmatprep.subr.bf16.mxu1 %v3126_v38  ;;  %2927 = vmatprep.subr.bf16.mxu0 %v3128_v39  ;;  %v3202_v37 = vld [vmem:[%s3369_s19 + $0x104] ss:$24 sps:$4 sm:$0xff]   ;;  %v3204_v38 = vld [vmem:[%s3369_s19 + $0xf8] ss:$24 sps:$4 sm:$0xff]  }
  0x39   : > { %v3205_v39 = vld [vmem:[%s3369_s19 + $0x100] ss:$24 sps:$4 sm:$0xff]  }
  0x3b   : > { %2816 = vmatpush3.bf16.msra.mxu1 %v3127_v42  ;;  %2928 = vmatpush3.bf16.msra.mxu0 %v3129_v43  ;;  %v3210_v42 = vld [vmem:[%s3369_s19 + $0x128] ss:$24 sps:$4 sm:$0xff]  }
  0x3c   : > { %2817 = vmatprep.subr.bf16.mxu1 %v3136_v46  ;;  %2929 = vmatprep.subr.bf16.mxu0 %v3138_v48  ;;  %v3211_v43 = vld [vmem:[%s3369_s19 + $0x130] ss:$24 sps:$4 sm:$0xff]   ;;  %v3218_v48 = vld [vmem:[%s3369_s19 + $0x18c] ss:$24 sps:$4 sm:$0xff]  }
  0x3d   : > { %1395 = vmatmul.mubr.bf16.gmra.mxu0 %v3114_v40  ;;  %1459 = vmatmul.mubr.bf16.gmra.mxu1 %v3115_v41  ;;  %v3206_v40 = vld [vmem:[%s3369_s19 + $0x12c] ss:$24 sps:$4 sm:$0xff]   ;;  %v3216_v46 = vld [vmem:[%s3369_s19 + $0x158] ss:$24 sps:$4 sm:$0xff]  }
  0x3e   : > { %1402 = vmatprep.mubr.bf16.mxu0 %v3120_v44  ;;  %1466 = vmatprep.mubr.bf16.mxu1 %v3122_v45  ;;  %v3208_v41 = vld [vmem:[%s3369_s19 + $0x134] ss:$24 sps:$4 sm:$0xff]   ;;  %v3214_v45 = vld [vmem:[%s3369_s19 + $0x164] ss:$24 sps:$4 sm:$0xff]  }
  0x3f   : > { %2818 = vmatpush3.bf16.msra.mxu1 %v3137_v47  ;;  %2930 = vmatpush3.bf16.msra.mxu0 %v3139_v49  ;;  %v3212_v44 = vld [vmem:[%s3369_s19 + $0x15c] ss:$24 sps:$4 sm:$0xff]   ;;  %v3217_v47 = vld [vmem:[%s3369_s19 + $0x160] ss:$24 sps:$4 sm:$0xff]  }
  0x40   : > { %2819 = vmatprep.subr.bf16.mxu1 %v3146_v52  ;;  %2931 = vmatprep.subr.bf16.mxu0 %v3148_v56  ;;  %v3220_v49 = vld [vmem:[%s3369_s19 + $0x194] ss:$24 sps:$4 sm:$0xff]  }
  0x41   : > { %v3224_v52 = vld [vmem:[%s3369_s19 + $0x1bc] ss:$24 sps:$4 sm:$0xff]   ;;  %v3230_v56 = vld [vmem:[%s3369_s19 + $0x1ec] ss:$24 sps:$4 sm:$0xff]  }
  0x43   : > { %2820 = vmatpush3.bf16.msra.mxu1 %v3147_v55  ;;  %2932 = vmatpush3.bf16.msra.mxu0 %v3149_v57  ;;  %v3229_v55 = vld [vmem:[%s3369_s19 + $0x1c0] ss:$24 sps:$4 sm:$0xff]   ;;  %v3232_v57 = vld [vmem:[%s3369_s19 + $0x1f4] ss:$24 sps:$4 sm:$0xff]  }
  0x44   : > { %2821 = vmatprep.subr.bf16.mxu1 %v3156_v58  ;;  %2933 = vmatprep.subr.bf16.mxu0 %v3158_v63  ;;  %v3234_v58 = vld [vmem:[%s3369_s19 + $0x1e8] ss:$24 sps:$4 sm:$0xff]  }
  0x45   : > { %1403 = vmatmul.mubr.bf16.gmra.mxu0 %v3124_v50  ;;  %1467 = vmatmul.mubr.bf16.gmra.mxu1 %v3125_v51  ;;  %v3222_v50 = vld [vmem:[%s3369_s19 + $0x188] ss:$24 sps:$4 sm:$0xff]  }
  0x46   : > { %1410 = vmatprep.mubr.bf16.mxu0 %v3130_v53  ;;  %1474 = vmatprep.mubr.bf16.mxu1 %v3132_v54  ;;  %v3223_v51 = vld [vmem:[%s3369_s19 + $0x190] ss:$24 sps:$4 sm:$0xff]   ;;  %v3226_v53 = vld [vmem:[%s3369_s19 + $0x1c4] ss:$24 sps:$4 sm:$0xff]   ;;  %v3241_v63 = vld [vmem:[%s3369_s19 + $0x220] ss:$24 sps:$4 sm:$0xff]  }
  0x47   : > { %2822 = vmatpush3.bf16.msra.mxu1 %v3157_v61  ;;  %2934 = vmatpush3.bf16.msra.mxu0 %v3159_v0  ;;  %v3228_v54 = vld [vmem:[%s3369_s19 + $0x1b8] ss:$24 sps:$4 sm:$0xff]   ;;  %v3238_v61 = vld [vmem:[%s3369_s19 + $0x224] ss:$24 sps:$4 sm:$0xff]  }
  0x48   : > { %2823 = vmatprep.subr.bf16.mxu1 %v3166_v2  ;;  %2935 = vmatprep.subr.bf16.mxu0 %v3168_v4  ;;  %v3242_v0 = vld [vmem:[%s3369_s19 + $0x24c] ss:$24 sps:$4 sm:$0xff]   ;;  %v3246_v2 = vld [vmem:[%s3369_s19 + $0x248] ss:$24 sps:$4 sm:$0xff]   ;;  %v3248_v4 = vld [vmem:[%s3369_s19 + $0x27c] ss:$24 sps:$4 sm:$0xff]  }
  0x4b   : > { %2824 = vmatpush3.bf16.msra.mxu1 %v3167_v3  ;;  %2936 = vmatpush3.bf16.msra.mxu0 %v3169_v5  ;;  %v3247_v3 = vld [vmem:[%s3369_s19 + $0x250] ss:$24 sps:$4 sm:$0xff]   ;;  %v3250_v5 = vld [vmem:[%s3369_s19 + $0x284] ss:$24 sps:$4 sm:$0xff]  }
  0x4d   : > { %1411 = vmatmul.mubr.bf16.gmra.mxu0 %v3134_v59  ;;  %1475 = vmatmul.mubr.bf16.gmra.mxu1 %v3135_v60  ;;  %v3235_v59 = vld [vmem:[%s3369_s19 + $0x1f0] ss:$24 sps:$4 sm:$0xff]   ;;  %v3236_v60 = vld [vmem:[%s3369_s19 + $0x21c] ss:$24 sps:$4 sm:$0xff]  }
  0x4e   : > { %1418 = vmatprep.mubr.bf16.mxu0 %v3140_v62  ;;  %1482 = vmatprep.mubr.bf16.mxu1 %v3142_v1  ;;  %v3240_v62 = vld [vmem:[%s3369_s19 + $0x218] ss:$24 sps:$4 sm:$0xff]   ;;  %v3244_v1 = vld [vmem:[%s3369_s19 + $0x254] ss:$24 sps:$4 sm:$0xff]  }
  0x55   : > { %1419 = vmatmul.mubr.bf16.gmra.mxu0 %v3144_v6  ;;  %1483 = vmatmul.mubr.bf16.gmra.mxu1 %v3145_v7  ;;  %v3252_v6 = vld [vmem:[%s3369_s19 + $0x278] ss:$24 sps:$4 sm:$0xff]  }
  0x56   : > { %1426 = vmatprep.mubr.bf16.mxu0 %v3150_v8  ;;  %1490 = vmatprep.mubr.bf16.mxu1 %v3152_v9  ;;  %v3253_v7 = vld [vmem:[%s3369_s19 + $0x280] ss:$24 sps:$4 sm:$0xff]   ;;  %v3254_v8 = vld [vmem:[%s3369_s19 + $0x2ac] ss:$24 sps:$4 sm:$0xff]  }
  0x57   : > { %v3256_v9 = vld [vmem:[%s3369_s19 + $0x2b4] ss:$24 sps:$4 sm:$0xff]  }
  0x5d   : > { %1427 = vmatmul.mubr.bf16.gmra.mxu0 %v3154_v10  ;;  %1491 = vmatmul.mubr.bf16.gmra.mxu1 %v3155_v11  ;;  %v3258_v10 = vld [vmem:[%s3369_s19 + $0x2a8] ss:$24 sps:$4 sm:$0xff]  }
  0x5e   : > { %1434 = vmatprep.mubr.bf16.mxu0 %v3160_v12  ;;  %1498 = vmatprep.mubr.bf16.mxu1 %v3162_v13  ;;  %v3259_v11 = vld [vmem:[%s3369_s19 + $0x2b0] ss:$24 sps:$4 sm:$0xff]   ;;  %v3260_v12 = vld [vmem:[%s3369_s19 + $0x2dc] ss:$24 sps:$4 sm:$0xff]  }
  0x5f   : > { %v3262_v13 = vld [vmem:[%s3369_s19 + $0x2e4] ss:$24 sps:$4 sm:$0xff]  }
  0x65   : > { %1435 = vmatmul.mubr.bf16.gmra.mxu0 %v3164_v14  ;;  %1499 = vmatmul.mubr.bf16.gmra.mxu1 %v3165_v15  ;;  %v3264_v14 = vld [vmem:[%s3369_s19 + $0x2d8] ss:$24 sps:$4 sm:$0xff]  }
  0x66   : > { %1539 = vmatprep.mubr.bf16.mxu1 %v3172_v16  ;;  %1700 = vmatprep.mubr.bf16.mxu0 %v3175_v17  ;;  %v3265_v15 = vld [vmem:[%s3369_s19 + $0x2e0] ss:$24 sps:$4 sm:$0xff]   ;;  %s2389_s19 = sshll.u32 %s3753_s21, 2  ;;  %s2390_s21 = sshll.u32 %s3755_s15, 3 }
  0x67   : > { %s3671_s20 = scalar_lea.vmem %s3745_s2, %s2389_s19  ;;  %s309_s24 = scalar_lea.vmem %s3746_s3, %s2390_s21 }
  0x68   : > { %s316_s27 = scalar_lea.vmem %s3747_s4, %s2390_s21 }
  0x6d   : > { %1540 = vmatmul.mubr.bf16.vlgmr.msra.gmra.mxu1 %v3170_v18  ;;  %1701 = vmatmul.mubr.bf16.vlgmr.msra.gmra.mxu0 %v3173_v19 }
  0x6e   : > { %1547 = vmatprep.mubr.bf16.mxu1 %v3176_v20  ;;  %1708 = vmatprep.mubr.bf16.mxu0 %v3178_v21 }
  0x75   : > { %1548 = vmatmul.mubr.bf16.gmra.mxu1 %v3180_v22  ;;  %1709 = vmatmul.mubr.bf16.gmra.mxu0 %v3181_v23 }
  0x76   : > { %1555 = vmatprep.mubr.bf16.mxu1 %v3182_v24  ;;  %1716 = vmatprep.mubr.bf16.mxu0 %v3184_v25 }
  0x7d   : > { %1556 = vmatmul.mubr.bf16.gmra.mxu1 %v3186_v26  ;;  %1717 = vmatmul.mubr.bf16.gmra.mxu0 %v3187_v27 }
  0x7e   : > { %1563 = vmatprep.mubr.bf16.mxu1 %v3188_v28  ;;  %1724 = vmatprep.mubr.bf16.mxu0 %v3190_v29 }
  0x85   : > { %1564 = vmatmul.mubr.bf16.gmra.mxu1 %v3192_v30  ;;  %1725 = vmatmul.mubr.bf16.gmra.mxu0 %v3193_v31 }
  0x86   : > { %1571 = vmatprep.mubr.bf16.mxu1 %v3194_v32  ;;  %1732 = vmatprep.mubr.bf16.mxu0 %v3196_v33 }
  0x8d   : > { %1572 = vmatmul.mubr.bf16.gmra.mxu1 %v3198_v34  ;;  %1733 = vmatmul.mubr.bf16.gmra.mxu0 %v3199_v35 }
  0x8e   : > { %1579 = vmatprep.mubr.bf16.mxu1 %v3200_v36  ;;  %1740 = vmatprep.mubr.bf16.mxu0 %v3202_v37 }
  0x95   : > { %1580 = vmatmul.mubr.bf16.gmra.mxu1 %v3204_v38  ;;  %1741 = vmatmul.mubr.bf16.gmra.mxu0 %v3205_v39 }
  0x96   : > { %1587 = vmatprep.mubr.bf16.mxu1 %v3206_v40  ;;  %1748 = vmatprep.mubr.bf16.mxu0 %v3208_v41 }
  0x9d   : > { %1588 = vmatmul.mubr.bf16.gmra.mxu1 %v3210_v42  ;;  %1749 = vmatmul.mubr.bf16.gmra.mxu0 %v3211_v43 }
  0x9e   : > { %1595 = vmatprep.mubr.bf16.mxu1 %v3212_v44  ;;  %1756 = vmatprep.mubr.bf16.mxu0 %v3214_v45 }
  0xa5   : > { %1596 = vmatmul.mubr.bf16.gmra.mxu1 %v3216_v46  ;;  %1757 = vmatmul.mubr.bf16.gmra.mxu0 %v3217_v47 }
  0xa6   : > { %1603 = vmatprep.mubr.bf16.mxu1 %v3218_v48  ;;  %1764 = vmatprep.mubr.bf16.mxu0 %v3220_v49 }
  0xad   : > { %1604 = vmatmul.mubr.bf16.gmra.mxu1 %v3222_v50  ;;  %1765 = vmatmul.mubr.bf16.gmra.mxu0 %v3223_v51 }
  0xae   : > { %1611 = vmatprep.mubr.bf16.mxu1 %v3224_v52  ;;  %1772 = vmatprep.mubr.bf16.mxu0 %v3226_v53 }
  0xb5   : > { %1612 = vmatmul.mubr.bf16.gmra.mxu1 %v3228_v54  ;;  %1773 = vmatmul.mubr.bf16.gmra.mxu0 %v3229_v55 }
  0xb6   : > { %1619 = vmatprep.mubr.bf16.mxu1 %v3230_v56  ;;  %1780 = vmatprep.mubr.bf16.mxu0 %v3232_v57 }
  0xbd   : > { %1620 = vmatmul.mubr.bf16.gmra.mxu1 %v3234_v58  ;;  %1781 = vmatmul.mubr.bf16.gmra.mxu0 %v3235_v59 }
  0xbe   : > { %1627 = vmatprep.mubr.bf16.mxu1 %v3236_v60  ;;  %1788 = vmatprep.mubr.bf16.mxu0 %v3238_v61 }
  0xc5   : > { %1628 = vmatmul.mubr.bf16.gmra.mxu1 %v3240_v62  ;;  %1789 = vmatmul.mubr.bf16.gmra.mxu0 %v3241_v63 }
  0xc6   : > { %1635 = vmatprep.mubr.bf16.mxu1 %v3242_v0  ;;  %1796 = vmatprep.mubr.bf16.mxu0 %v3244_v1 }
  0xcd   : > { %1636 = vmatmul.mubr.bf16.gmra.mxu1 %v3246_v2  ;;  %1797 = vmatmul.mubr.bf16.gmra.mxu0 %v3247_v3 }
  0xce   : > { %1643 = vmatprep.mubr.bf16.mxu1 %v3248_v4  ;;  %1804 = vmatprep.mubr.bf16.mxu0 %v3250_v5 }
  0xd5   : > { %1644 = vmatmul.mubr.bf16.gmra.mxu1 %v3252_v6  ;;  %1805 = vmatmul.mubr.bf16.gmra.mxu0 %v3253_v7 }
  0xd6   : > { %1651 = vmatprep.mubr.bf16.mxu1 %v3254_v8  ;;  %1812 = vmatprep.mubr.bf16.mxu0 %v3256_v9 }
  0xdd   : > { %1652 = vmatmul.mubr.bf16.gmra.mxu1 %v3258_v10  ;;  %1813 = vmatmul.mubr.bf16.gmra.mxu0 %v3259_v11 }
  0xde   : > { %1659 = vmatprep.mubr.bf16.mxu1 %v3260_v12  ;;  %1820 = vmatprep.mubr.bf16.mxu0 %v3262_v13 }
  0xe5   : > { %1660 = vmatmul.mubr.bf16.gmra.mxu1 %v3264_v14  ;;  %1821 = vmatmul.mubr.bf16.gmra.mxu0 %v3265_v15 }
  0xed   : > { %v2713_v16 = vpop.f32.mrf.mxu0  ;;  %v2761_v17 = vpop.f32.mrf.mxu1 }
  0xef   : > { %v2714_v18 = vpop.f32.mrf.mxu0  ;;  %v2762_v19 = vpop.f32.mrf.mxu1 }
  0xf0   : > { %v3584_v20 = vadd.f32 %v2714_v18, %v2713_v16  ;;  %v3586_v21 = vadd.f32 %v2762_v19, %v2761_v17 }
  0xf1   : > { %v3588_v22 = vpop.f32.mrf.mxu0  ;;  %v2764_v23 = vpop.f32.mrf.mxu1 }
  0xf3   : > { %v3590_v24 = vpop.f32.mrf.mxu0  ;;  %v2765_v25 = vpop.f32.mrf.mxu1 }
  0xf4   : > { %v3592_v26 = vadd.f32 %v2765_v25, %v2764_v23 }
  0xf5   : > { %v2719_v27 = vpop.f32.mrf.mxu0  ;;  %v2767_v28 = vpop.f32.mrf.mxu1 }
  0xf7   : > { %v2720_v29 = vpop.f32.mrf.mxu0  ;;  %v2768_v30 = vpop.f32.mrf.mxu1 }
  0xf8   : > { %v3594_v31 = vadd.f32 %v2720_v29, %v2719_v27  ;;  %v3596_v32 = vadd.f32 %v2768_v30, %v2767_v28 }
  0xf9   : > { %v3598_v33 = vpop.f32.mrf.mxu0  ;;  %v2770_v34 = vpop.f32.mrf.mxu1 }
  0xfb   : > { %v3600_v35 = vpop.f32.mrf.mxu0  ;;  %v2771_v36 = vpop.f32.mrf.mxu1 }
  0xfc   : > { %v3602_v37 = vadd.f32 %v2771_v36, %v2770_v34 }
  0xfd   : > { %v2725_v38 = vpop.f32.mrf.mxu0  ;;  %v2773_v39 = vpop.f32.mrf.mxu1 }
  0xff   : > { %v2726_v40 = vpop.f32.mrf.mxu0  ;;  %v2774_v41 = vpop.f32.mrf.mxu1 }
 0x100   : > { %v3604_v42 = vadd.f32 %v2726_v40, %v2725_v38  ;;  %v3606_v43 = vadd.f32 %v2774_v41, %v2773_v39 }
 0x101   : > { %v3608_v44 = vpop.f32.mrf.mxu0  ;;  %v2776_v45 = vpop.f32.mrf.mxu1 }
 0x103   : > { %v3610_v46 = vpop.f32.mrf.mxu0  ;;  %v2777_v47 = vpop.f32.mrf.mxu1 }
 0x104   : > { %v3612_v48 = vadd.f32 %v2777_v47, %v2776_v45 }
 0x105   : > { %v2731_v49 = vpop.f32.mrf.mxu0  ;;  %v2779_v50 = vpop.f32.mrf.mxu1 }
 0x107   : > { %v2732_v51 = vpop.f32.mrf.mxu0  ;;  %v2780_v52 = vpop.f32.mrf.mxu1 }
 0x108   : > { %v3614_v53 = vadd.f32 %v2732_v51, %v2731_v49  ;;  %v3616_v54 = vadd.f32 %v2780_v52, %v2779_v50 }
 0x109   : > { %v3618_v55 = vpop.f32.mrf.mxu0  ;;  %v2782_v56 = vpop.f32.mrf.mxu1 }
 0x10b   : > { %v3620_v57 = vpop.f32.mrf.mxu0  ;;  %v2783_v58 = vpop.f32.mrf.mxu1 }
 0x10c   : > { %v3622_v59 = vadd.f32 %v2783_v58, %v2782_v56 }
 0x10d   : > { %v2737_v60 = vpop.f32.mrf.mxu0  ;;  %v2785_v61 = vpop.f32.mrf.mxu1 }
 0x10f   : > { %v2738_v62 = vpop.f32.mrf.mxu0  ;;  %v2786_v63 = vpop.f32.mrf.mxu1 }
 0x110   : > { %v3624_v0 = vadd.f32 %v2738_v62, %v2737_v60  ;;  %v3626_v1 = vadd.f32 %v2786_v63, %v2785_v61 }
 0x111   : > { %v3628_v2 = vpop.f32.mrf.mxu0  ;;  %v2788_v3 = vpop.f32.mrf.mxu1 }
 0x113   : > { %v3630_v4 = vpop.f32.mrf.mxu0  ;;  %v2789_v5 = vpop.f32.mrf.mxu1 }
 0x114   : > { %v3632_v6 = vadd.f32 %v2789_v5, %v2788_v3 }
 0x115   : > { %v2743_v7 = vpop.f32.mrf.mxu0  ;;  %v2791_v8 = vpop.f32.mrf.mxu1 }
 0x117   : > { %v2744_v9 = vpop.f32.mrf.mxu0  ;;  %v2792_v10 = vpop.f32.mrf.mxu1 }
 0x118   : > { %v3634_v11 = vadd.f32 %v2744_v9, %v2743_v7  ;;  %v3636_v12 = vadd.f32 %v2792_v10, %v2791_v8 }
 0x119   : > { %v3638_v13 = vpop.f32.mrf.mxu0  ;;  %v2794_v14 = vpop.f32.mrf.mxu1 }
 0x11b   : > { %v3640_v15 = vpop.f32.mrf.mxu0  ;;  %v2795_v16 = vpop.f32.mrf.mxu1 }
 0x11c   : > { %v3642_v17 = vadd.f32 %v2795_v16, %v2794_v14  ;;  %v2718_v16 = vadd.f32 %v3590_v24, %v3588_v22 }
 0x11d   : > { %v2749_v18 = vpop.f32.mrf.mxu0  ;;  %v2797_v19 = vpop.f32.mrf.mxu1 }
 0x11f   : > { %v2750_v23 = vpop.f32.mrf.mxu0  ;;  %v2798_v25 = vpop.f32.mrf.mxu1 }
 0x120   : > { %v3644_v27 = vadd.f32 %v2750_v23, %v2749_v18  ;;  %v3646_v28 = vadd.f32 %v2798_v25, %v2797_v19 }
 0x121   : > { %v3648_v29 = vpop.f32.mrf.mxu0  ;;  %v2800_v30 = vpop.f32.mrf.mxu1 }
 0x123   : > { %v3650_v34 = vpop.f32.mrf.mxu0  ;;  %v2801_v36 = vpop.f32.mrf.mxu1 }
 0x124   : > { %v3652_v38 = vadd.f32 %v2801_v36, %v2800_v30 }
 0x125   : > { %v2755_v39 = vpop.f32.mrf.mxu0  ;;  %v2803_v40 = vpop.f32.mrf.mxu1 }
 0x127   : > { %v2756_v41 = vpop.f32.mrf.mxu0  ;;  %v2804_v45 = vpop.f32.mrf.mxu1 }
 0x128   : > { %v3654_v47 = vadd.f32 %v2756_v41, %v2755_v39  ;;  %v3656_v49 = vadd.f32 %v2804_v45, %v2803_v40 }
 0x129   : > { %v3658_v50 = vpop.f32.mrf.mxu0  ;;  %v2806_v51 = vpop.f32.mrf.mxu1 }
 0x12b   : > { %v3660_v52 = vpop.f32.mrf.mxu0  ;;  %v2807_v56 = vpop.f32.mrf.mxu1 }
 0x12c   : > { %v3662_v58 = vadd.f32 %v2807_v56, %v2806_v51 }
 0x12d   : > { %v2825_v60 = vpop.f32.mrf.mxu1  ;;  %v2937_v61 = vpop.f32.mrf.mxu0 }
 0x12f   : > { %v2826_v62 = vpop.f32.mrf.mxu1  ;;  %v2938_v63 = vpop.f32.mrf.mxu0 }
 0x130   : > { %v2827_v3 = vadd.f32 %v2826_v62, %v2825_v60  ;;  %v2939_v9 = vadd.f32 %v2938_v63, %v2937_v61 }
 0x131   : > { %v2828_v5 = vpop.f32.mrf.mxu1  ;;  %v2940_v7 = vpop.f32.mrf.mxu0 }
 0x132   : > { %v1542_v8 = vadd.f32 %v2827_v3, %v3584_v20 }
 0x133   : > { %v2829_v10 = vpop.f32.mrf.mxu1  ;;  %v2941_v14 = vpop.f32.mrf.mxu0 }
 0x134   : > { %v2830_v18 = vadd.f32 %v2829_v10, %v2828_v5  ;;  %v1703_v19 = vadd.f32 %v2939_v9, %v1542_v8  ;;  %v2942_v36 = vadd.f32 %v2941_v14, %v2940_v7  ;;  %v2724_v5 = vadd.f32 %v3600_v35, %v3598_v33 }
 0x135   : > { %v2831_v23 = vpop.f32.mrf.mxu1  ;;  %v2943_v25 = vpop.f32.mrf.mxu0 }
 0x136   : > { %v1545_v30 = vadd.f32 %v2830_v18, %v2718_v16  ;;  %v2125_v51 = vmul.f32 %v1703_v19, %v1703_v19 }
 0x137   : > { %v2832_v39 = vpop.f32.mrf.mxu1  ;;  %v2944_v40 = vpop.f32.mrf.mxu0 }
 0x138   : > { %v1706_v41 = vadd.f32 %v2942_v36, %v1545_v30  ;;  %v2833_v45 = vadd.f32 %v2832_v39, %v2831_v23  ;;  %v2945_v20 = vadd.f32 %v2944_v40, %v2943_v25 }
 0x139   : > { %v2834_v22 = vpop.f32.mrf.mxu1  ;;  %v2946_v24 = vpop.f32.mrf.mxu0 }
 0x13a   : > { %v2605_v56 = vpack.c.bf16 %v1706_v41, %v1703_v19  ;;  %v2088_v60 = vadd.f32 %v1706_v41, %v1703_v19  ;;  %v2126_v61 = vmul.f32 %v1706_v41, %v1706_v41  ;;  %v1550_v62 = vadd.f32 %v2833_v45, %v3594_v31 }
 0x13b   : > { %v2835_v63 = vpop.f32.mrf.mxu1  ;;  %v2947_v3 = vpop.f32.mrf.mxu0 }
 0x13c   : > { %2606 = vst [vmem:[%s3671_s20] sm:$0xff] %v2605_v56   ;;  %v2157_v7 = vadd.f32 %v2126_v61, %v2125_v51  ;;  %v1711_v8 = vadd.f32 %v2945_v20, %v1550_v62  ;;  %v2836_v9 = vadd.f32 %v2835_v63, %v2834_v22  ;;  %v2948_v25 = vadd.f32 %v2947_v3, %v2946_v24 }
 0x13d   : > { %v2837_v10 = vpop.f32.mrf.mxu1  ;;  %v2949_v14 = vpop.f32.mrf.mxu0 }
 0x13e   : > { %v2089_v16 = vadd.f32 %v2088_v60, %v1711_v8  ;;  %v2127_v18 = vmul.f32 %v1711_v8, %v1711_v8  ;;  %v1553_v23 = vadd.f32 %v2836_v9, %v2724_v5  ;;  %v2730_v60 = vadd.f32 %v3610_v46, %v3608_v44 }
 0x13f   : > { %v2838_v19 = vpop.f32.mrf.mxu1  ;;  %v2950_v30 = vpop.f32.mrf.mxu0 }
 0x140   : > { %v2158_v36 = vadd.f32 %v2157_v7, %v2127_v18  ;;  %v1714_v31 = vadd.f32 %v2948_v25, %v1553_v23  ;;  %v2839_v39 = vadd.f32 %v2838_v19, %v2837_v10  ;;  %v2951_v40 = vadd.f32 %v2950_v30, %v2949_v14 }
 0x141   : > { %v2840_v41 = vpop.f32.mrf.mxu1  ;;  %v2952_v45 = vpop.f32.mrf.mxu0 }
 0x142   : > { %v2610_v33 = vpack.c.bf16 %v1714_v31, %v1711_v8  ;;  %v2090_v35 = vadd.f32 %v2089_v16, %v1714_v31  ;;  %v2128_v51 = vmul.f32 %v1714_v31, %v1714_v31  ;;  %v1558_v20 = vadd.f32 %v2839_v39, %v3604_v42 }
 0x143   : > { %v2841_v22 = vpop.f32.mrf.mxu1  ;;  %v2953_v56 = vpop.f32.mrf.mxu0 }
 0x144   : > { %2682 = vst [vmem:[%s3671_s20 + $0x8] sm:$0xff] %v2610_v33   ;;  %v2159_v24 = vadd.f32 %v2158_v36, %v2128_v51  ;;  %v1719_v61 = vadd.f32 %v2951_v40, %v1558_v20  ;;  %v2842_v62 = vadd.f32 %v2841_v22, %v2840_v41  ;;  %v2954_v10 = vadd.f32 %v2953_v56, %v2952_v45 }
 0x145   : > { %v2843_v63 = vpop.f32.mrf.mxu1  ;;  %v2955_v3 = vpop.f32.mrf.mxu0  ;;  %v2736_v40 = vadd.f32 %v3620_v57, %v3618_v55 }
 0x146   : > { %v2091_v5 = vadd.f32 %v2090_v35, %v1719_v61  ;;  %v2129_v7 = vmul.f32 %v1719_v61, %v1719_v61  ;;  %v1561_v9 = vadd.f32 %v2842_v62, %v2730_v60 }
 0x147   : > { %v2844_v8 = vpop.f32.mrf.mxu1  ;;  %v2956_v14 = vpop.f32.mrf.mxu0 }
 0x148   : > { %v2160_v16 = vadd.f32 %v2159_v24, %v2129_v7  ;;  %v1722_v42 = vadd.f32 %v2954_v10, %v1561_v9  ;;  %v2845_v18 = vadd.f32 %v2844_v8, %v2843_v63  ;;  %v2957_v23 = vadd.f32 %v2956_v14, %v2955_v3 }
 0x149   : > { %v2846_v25 = vpop.f32.mrf.mxu1  ;;  %v2958_v19 = vpop.f32.mrf.mxu0 }
 0x14a   : > { %v2615_v44 = vpack.c.bf16 %v1722_v42, %v1719_v61  ;;  %v2092_v46 = vadd.f32 %v2091_v5, %v1722_v42  ;;  %v2130_v30 = vmul.f32 %v1722_v42, %v1722_v42  ;;  %v1566_v36 = vadd.f32 %v2845_v18, %v3614_v53 }
 0x14b   : > { %v2847_v31 = vpop.f32.mrf.mxu1  ;;  %v2959_v39 = vpop.f32.mrf.mxu0 }
 0x14c   : > { %2683 = vst [vmem:[%s3671_s20 + $0x10] sm:$0xff] %v2615_v44   ;;  %v2161_v41 = vadd.f32 %v2160_v16, %v2130_v30  ;;  %v1727_v45 = vadd.f32 %v2957_v23, %v1566_v36  ;;  %v2848_v33 = vadd.f32 %v2847_v31, %v2846_v25  ;;  %v2960_v60 = vadd.f32 %v2959_v39, %v2958_v19 }
 0x14d   : > { %v2849_v35 = vpop.f32.mrf.mxu1  ;;  %v2961_v51 = vpop.f32.mrf.mxu0  ;;  %v2742_v16 = vadd.f32 %v3630_v4, %v3628_v2 }
 0x14e   : > { %v2093_v20 = vadd.f32 %v2092_v46, %v1727_v45  ;;  %v2131_v22 = vmul.f32 %v1727_v45, %v1727_v45  ;;  %v1569_v56 = vadd.f32 %v2848_v33, %v2736_v40 }
 0x14f   : > { %v2850_v24 = vpop.f32.mrf.mxu1  ;;  %v2962_v61 = vpop.f32.mrf.mxu0 }
 0x150   : > { %v2162_v62 = vadd.f32 %v2161_v41, %v2131_v22  ;;  %v1730_v53 = vadd.f32 %v2960_v60, %v1569_v56  ;;  %v2851_v63 = vadd.f32 %v2850_v24, %v2849_v35  ;;  %v2963_v3 = vadd.f32 %v2962_v61, %v2961_v51 }
 0x151   : > { %v2852_v5 = vpop.f32.mrf.mxu1  ;;  %v2964_v7 = vpop.f32.mrf.mxu0  ;;  %v2748_v60 = vadd.f32 %v3640_v15, %v3638_v13 }
 0x152   : > { %v2620_v55 = vpack.c.bf16 %v1730_v53, %v1727_v45  ;;  %v2094_v57 = vadd.f32 %v2093_v20, %v1730_v53  ;;  %v2132_v9 = vmul.f32 %v1730_v53, %v1730_v53  ;;  %v1574_v10 = vadd.f32 %v2851_v63, %v3624_v0 }
 0x153   : > { %v2853_v8 = vpop.f32.mrf.mxu1  ;;  %v2965_v14 = vpop.f32.mrf.mxu0 }
 0x154   : > { %2684 = vst [vmem:[%s3671_s20 + $0x18] sm:$0xff] %v2620_v55   ;;  %v2163_v42 = vadd.f32 %v2162_v62, %v2132_v9  ;;  %v1735_v18 = vadd.f32 %v2963_v3, %v1574_v10  ;;  %v2854_v23 = vadd.f32 %v2853_v8, %v2852_v5  ;;  %v2966_v36 = vadd.f32 %v2965_v14, %v2964_v7 }
 0x155   : > { %v2855_v25 = vpop.f32.mrf.mxu1  ;;  %v2967_v19 = vpop.f32.mrf.mxu0 }
 0x156   : > { %v2095_v44 = vadd.f32 %v2094_v57, %v1735_v18  ;;  %v2133_v46 = vmul.f32 %v1735_v18, %v1735_v18  ;;  %v1577_v30 = vadd.f32 %v2854_v23, %v2742_v16 }
 0x157   : > { %v2856_v31 = vpop.f32.mrf.mxu1  ;;  %v2968_v39 = vpop.f32.mrf.mxu0 }
 0x158   : > { %v2164_v40 = vadd.f32 %v2163_v42, %v2133_v46  ;;  %v1738_v0 = vadd.f32 %v2966_v36, %v1577_v30  ;;  %v2857_v41 = vadd.f32 %v2856_v31, %v2855_v25  ;;  %v2969_v45 = vadd.f32 %v2968_v39, %v2967_v19 }
 0x159   : > { %v2858_v33 = vpop.f32.mrf.mxu1  ;;  %v2970_v35 = vpop.f32.mrf.mxu0 }
 0x15a   : > { %v2625_v2 = vpack.c.bf16 %v1738_v0, %v1735_v18  ;;  %v2096_v4 = vadd.f32 %v2095_v44, %v1738_v0  ;;  %v2134_v51 = vmul.f32 %v1738_v0, %v1738_v0  ;;  %v1582_v20 = vadd.f32 %v2857_v41, %v3634_v11 }
 0x15b   : > { %v2859_v22 = vpop.f32.mrf.mxu1  ;;  %v2971_v56 = vpop.f32.mrf.mxu0  ;;  %v2754_v44 = vadd.f32 %v3650_v34, %v3648_v29 }
 0x15c   : > { %2685 = vst [vmem:[%s3671_s20 + $0x20] sm:$0xff] %v2625_v2   ;;  %v2165_v24 = vadd.f32 %v2164_v40, %v2134_v51  ;;  %v1743_v61 = vadd.f32 %v2969_v45, %v1582_v20  ;;  %v2860_v62 = vadd.f32 %v2859_v22, %v2858_v33  ;;  %v2972_v55 = vadd.f32 %v2971_v56, %v2970_v35 }
 0x15d   : > { %v2861_v53 = vpop.f32.mrf.mxu1  ;;  %v2973_v63 = vpop.f32.mrf.mxu0 }
 0x15e   : > { %v2097_v3 = vadd.f32 %v2096_v4, %v1743_v61  ;;  %v2135_v5 = vmul.f32 %v1743_v61, %v1743_v61  ;;  %v1585_v7 = vadd.f32 %v2860_v62, %v2748_v60  ;;  %v2760_v62 = vadd.f32 %v3660_v52, %v3658_v50 }
 0x15f   : > { %v2862_v57 = vpop.f32.mrf.mxu1  ;;  %v2974_v9 = vpop.f32.mrf.mxu0 }
 0x160   : > { %v2166_v10 = vadd.f32 %v2165_v24, %v2135_v5  ;;  %v1746_v11 = vadd.f32 %v2972_v55, %v1585_v7  ;;  %v2863_v8 = vadd.f32 %v2862_v57, %v2861_v53  ;;  %v2975_v14 = vadd.f32 %v2974_v9, %v2973_v63 }
 0x161   : > { %v2864_v16 = vpop.f32.mrf.mxu1  ;;  %v2976_v42 = vpop.f32.mrf.mxu0 }
 0x162   : > { %v2630_v13 = vpack.c.bf16 %v1746_v11, %v1743_v61  ;;  %v2098_v15 = vadd.f32 %v2097_v3, %v1746_v11  ;;  %v2136_v18 = vmul.f32 %v1746_v11, %v1746_v11  ;;  %v1590_v23 = vadd.f32 %v2863_v8, %v3644_v27 }
 0x163   : > { %v2865_v25 = vpop.f32.mrf.mxu1  ;;  %v2977_v19 = vpop.f32.mrf.mxu0 }
 0x164   : > { %2686 = vst [vmem:[%s3671_s20 + $0x28] sm:$0xff] %v2630_v13   ;;  %v2167_v46 = vadd.f32 %v2166_v10, %v2136_v18  ;;  %v1751_v30 = vadd.f32 %v2975_v14, %v1590_v23  ;;  %v2866_v36 = vadd.f32 %v2865_v25, %v2864_v16  ;;  %v2978_v45 = vadd.f32 %v2977_v19, %v2976_v42 }
 0x165   : > { %v2867_v31 = vpop.f32.mrf.mxu1  ;;  %v2979_v39 = vpop.f32.mrf.mxu0 }
 0x166   : > { %v2099_v40 = vadd.f32 %v2098_v15, %v1751_v30  ;;  %v2137_v0 = vmul.f32 %v1751_v30, %v1751_v30  ;;  %v1593_v41 = vadd.f32 %v2866_v36, %v2754_v44 }
 0x167   : > { %v2868_v33 = vpop.f32.mrf.mxu1  ;;  %v2980_v35 = vpop.f32.mrf.mxu0 }
 0x168   : > { %v2168_v2 = vadd.f32 %v2167_v46, %v2137_v0  ;;  %v1754_v27 = vadd.f32 %v2978_v45, %v1593_v41  ;;  %v2869_v4 = vadd.f32 %v2868_v33, %v2867_v31  ;;  %v2981_v51 = vadd.f32 %v2980_v35, %v2979_v39 }
 0x169   : > { %v2870_v20 = vpop.f32.mrf.mxu1  ;;  %v2982_v22 = vpop.f32.mrf.mxu0 }
 0x16a   : > { %v2635_v29 = vpack.c.bf16 %v1754_v27, %v1751_v30  ;;  %v2100_v34 = vadd.f32 %v2099_v40, %v1754_v27  ;;  %v2138_v56 = vmul.f32 %v1754_v27, %v1754_v27  ;;  %v1598_v60 = vadd.f32 %v2869_v4, %v3654_v47 }
 0x16b   : > { %v2871_v24 = vpop.f32.mrf.mxu1  ;;  %v2983_v61 = vpop.f32.mrf.mxu0 }
 0x16c   : > { %2687 = vst [vmem:[%s3671_s20 + $0x30] sm:$0xff] %v2635_v29   ;;  %v2169_v53 = vadd.f32 %v2168_v2, %v2138_v56  ;;  %v1759_v63 = vadd.f32 %v2981_v51, %v1598_v60  ;;  %v2872_v3 = vadd.f32 %v2871_v24, %v2870_v20  ;;  %v2984_v10 = vadd.f32 %v2983_v61, %v2982_v22 }
 0x16d   : > { %v2873_v5 = vpop.f32.mrf.mxu1  ;;  %v2985_v7 = vpop.f32.mrf.mxu0 }
 0x16e   : > { %v2101_v55 = vadd.f32 %v2100_v34, %v1759_v63  ;;  %v2139_v57 = vmul.f32 %v1759_v63, %v1759_v63  ;;  %v1601_v9 = vadd.f32 %v2872_v3, %v2760_v62 }
 0x16f   : > { %v2874_v11 = vpop.f32.mrf.mxu1  ;;  %v2986_v8 = vpop.f32.mrf.mxu0 }
 0x170   : > { %v2170_v14 = vadd.f32 %v2169_v53, %v2139_v57  ;;  %v1762_v47 = vadd.f32 %v2984_v10, %v1601_v9  ;;  %v2875_v16 = vadd.f32 %v2874_v11, %v2873_v5  ;;  %v2987_v42 = vadd.f32 %v2986_v8, %v2985_v7 }
 0x171   : > { %v2876_v13 = vpop.f32.mrf.mxu1  ;;  %v2988_v15 = vpop.f32.mrf.mxu0 }
 0x172   : > { %v2640_v50 = vpack.c.bf16 %v1762_v47, %v1759_v63  ;;  %v2102_v52 = vadd.f32 %v2101_v55, %v1762_v47  ;;  %v2140_v18 = vmul.f32 %v1762_v47, %v1762_v47  ;;  %v1606_v23 = vadd.f32 %v2875_v16, %v3586_v21 }
 0x173   : > { %v2877_v25 = vpop.f32.mrf.mxu1  ;;  %v2989_v19 = vpop.f32.mrf.mxu0 }
 0x174   : > { %2688 = vst [vmem:[%s3671_s20 + $0x38] sm:$0xff] %v2640_v50   ;;  %v2171_v44 = vadd.f32 %v2170_v14, %v2140_v18  ;;  %v1767_v46 = vadd.f32 %v2987_v42, %v1606_v23  ;;  %v2878_v30 = vadd.f32 %v2877_v25, %v2876_v13  ;;  %v2990_v41 = vadd.f32 %v2989_v19, %v2988_v15 }
 0x175   : > { %v2879_v36 = vpop.f32.mrf.mxu1  ;;  %v2991_v31 = vpop.f32.mrf.mxu0 }
 0x176   : > { %v2103_v39 = vadd.f32 %v2102_v52, %v1767_v46  ;;  %v2141_v40 = vmul.f32 %v1767_v46, %v1767_v46  ;;  %v1609_v0 = vadd.f32 %v2878_v30, %v3592_v26 }
 0x177   : > { %v2880_v45 = vpop.f32.mrf.mxu1  ;;  %v2992_v33 = vpop.f32.mrf.mxu0 }
 0x178   : > { %v2172_v35 = vadd.f32 %v2171_v44, %v2141_v40  ;;  %v1770_v2 = vadd.f32 %v2990_v41, %v1609_v0  ;;  %v2881_v27 = vadd.f32 %v2880_v45, %v2879_v36  ;;  %v2993_v21 = vadd.f32 %v2992_v33, %v2991_v31 }
 0x179   : > { %v2882_v4 = vpop.f32.mrf.mxu1  ;;  %v2994_v51 = vpop.f32.mrf.mxu0 }
 0x17a   : > { %v2645_v20 = vpack.c.bf16 %v1770_v2, %v1767_v46  ;;  %v2104_v22 = vadd.f32 %v2103_v39, %v1770_v2  ;;  %v2142_v29 = vmul.f32 %v1770_v2, %v1770_v2  ;;  %v1614_v34 = vadd.f32 %v2881_v27, %v3596_v32 }
 0x17b   : > { %v2883_v56 = vpop.f32.mrf.mxu1  ;;  %v2995_v60 = vpop.f32.mrf.mxu0 }
 0x17c   : > { %2689 = vst [vmem:[%s3671_s20 + $0x40] sm:$0xff] %v2645_v20   ;;  %v2173_v24 = vadd.f32 %v2172_v35, %v2142_v29  ;;  %v1775_v26 = vadd.f32 %v2993_v21, %v1614_v34  ;;  %v2884_v61 = vadd.f32 %v2883_v56, %v2882_v4  ;;  %v2996_v7 = vadd.f32 %v2995_v60, %v2994_v51 }
 0x17d   : > { %v2885_v62 = vpop.f32.mrf.mxu1  ;;  %v2997_v53 = vpop.f32.mrf.mxu0 }
 0x17e   : > { %v2105_v63 = vadd.f32 %v2104_v22, %v1775_v26  ;;  %v2143_v3 = vmul.f32 %v1775_v26, %v1775_v26  ;;  %v1617_v5 = vadd.f32 %v2884_v61, %v3602_v37 }
 0x17f   : > { %v2886_v55 = vpop.f32.mrf.mxu1  ;;  %v2998_v57 = vpop.f32.mrf.mxu0 }
 0x180   : > { %v2174_v9 = vadd.f32 %v2173_v24, %v2143_v3  ;;  %v1778_v10 = vadd.f32 %v2996_v7, %v1617_v5  ;;  %v2887_v11 = vadd.f32 %v2886_v55, %v2885_v62  ;;  %v2999_v32 = vadd.f32 %v2998_v57, %v2997_v53 }
 0x181   : > { %v2888_v8 = vpop.f32.mrf.mxu1  ;;  %v3000_v14 = vpop.f32.mrf.mxu0 }
 0x182   : > { %v2650_v47 = vpack.c.bf16 %v1778_v10, %v1775_v26  ;;  %v2106_v16 = vadd.f32 %v2105_v63, %v1778_v10  ;;  %v2144_v42 = vmul.f32 %v1778_v10, %v1778_v10  ;;  %v1622_v13 = vadd.f32 %v2887_v11, %v3606_v43 }
 0x183   : > { %v2889_v15 = vpop.f32.mrf.mxu1  ;;  %v3001_v50 = vpop.f32.mrf.mxu0 }
 0x184   : > { %2690 = vst [vmem:[%s3671_s20 + $0x48] sm:$0xff] %v2650_v47   ;;  %v2175_v52 = vadd.f32 %v2174_v9, %v2144_v42  ;;  %v1783_v37 = vadd.f32 %v2999_v32, %v1622_v13  ;;  %v2890_v18 = vadd.f32 %v2889_v15, %v2888_v8  ;;  %v3002_v30 = vadd.f32 %v3001_v50, %v3000_v14 }
 0x185   : > { %v2891_v23 = vpop.f32.mrf.mxu1  ;;  %v3003_v25 = vpop.f32.mrf.mxu0 }
 0x186   : > { %v2107_v19 = vadd.f32 %v2106_v16, %v1783_v37  ;;  %v2145_v44 = vmul.f32 %v1783_v37, %v1783_v37  ;;  %v1625_v46 = vadd.f32 %v2890_v18, %v3612_v48 }
 0x187   : > { %v2892_v36 = vpop.f32.mrf.mxu1  ;;  %v3004_v31 = vpop.f32.mrf.mxu0 }
 0x188   : > { %v2176_v39 = vadd.f32 %v2175_v52, %v2145_v44  ;;  %v1786_v40 = vadd.f32 %v3002_v30, %v1625_v46  ;;  %v2893_v0 = vadd.f32 %v2892_v36, %v2891_v23  ;;  %v3005_v43 = vadd.f32 %v3004_v31, %v3003_v25 }
 0x189   : > { %v2894_v41 = vpop.f32.mrf.mxu1  ;;  %v3006_v45 = vpop.f32.mrf.mxu0 }
 0x18a   : > { %v2655_v33 = vpack.c.bf16 %v1786_v40, %v1783_v37  ;;  %v2108_v35 = vadd.f32 %v2107_v19, %v1786_v40  ;;  %v2146_v2 = vmul.f32 %v1786_v40, %v1786_v40  ;;  %v1630_v27 = vadd.f32 %v2893_v0, %v3616_v54 }
 0x18b   : > { %v2895_v21 = vpop.f32.mrf.mxu1  ;;  %v3007_v4 = vpop.f32.mrf.mxu0 }
 0x18c   : > { %2691 = vst [vmem:[%s3671_s20 + $0x50] sm:$0xff] %v2655_v33   ;;  %v2177_v51 = vadd.f32 %v2176_v39, %v2146_v2  ;;  %v1791_v48 = vadd.f32 %v3005_v43, %v1630_v27  ;;  %v2896_v20 = vadd.f32 %v2895_v21, %v2894_v41  ;;  %v3008_v24 = vadd.f32 %v3007_v4, %v3006_v45 }
 0x18d   : > { %v2897_v22 = vpop.f32.mrf.mxu1  ;;  %v3009_v29 = vpop.f32.mrf.mxu0 }
 0x18e   : > { %v2109_v34 = vadd.f32 %v2108_v35, %v1791_v48  ;;  %v2147_v56 = vmul.f32 %v1791_v48, %v1791_v48  ;;  %v1633_v60 = vadd.f32 %v2896_v20, %v3622_v59 }
 0x18f   : > { %v2898_v26 = vpop.f32.mrf.mxu1  ;;  %v3010_v61 = vpop.f32.mrf.mxu0 }
 0x190   : > { %v2178_v62 = vadd.f32 %v2177_v51, %v2147_v56  ;;  %v1794_v53 = vadd.f32 %v3008_v24, %v1633_v60  ;;  %v2899_v63 = vadd.f32 %v2898_v26, %v2897_v22  ;;  %v3011_v54 = vadd.f32 %v3010_v61, %v3009_v29 }
 0x191   : > { %v2900_v3 = vpop.f32.mrf.mxu1  ;;  %v3012_v5 = vpop.f32.mrf.mxu0 }
 0x192   : > { %v2660_v7 = vpack.c.bf16 %v1794_v53, %v1791_v48  ;;  %v2110_v55 = vadd.f32 %v2109_v34, %v1794_v53  ;;  %v2148_v57 = vmul.f32 %v1794_v53, %v1794_v53  ;;  %v1638_v9 = vadd.f32 %v2899_v63, %v3626_v1 }
 0x193   : > { %v2901_v10 = vpop.f32.mrf.mxu1  ;;  %v3013_v11 = vpop.f32.mrf.mxu0 }
 0x194   : > { %2692 = vst [vmem:[%s3671_s20 + $0x58] sm:$0xff] %v2660_v7   ;;  %v2179_v32 = vadd.f32 %v2178_v62, %v2148_v57  ;;  %v1799_v59 = vadd.f32 %v3011_v54, %v1638_v9  ;;  %v2902_v8 = vadd.f32 %v2901_v10, %v2900_v3  ;;  %v3014_v15 = vadd.f32 %v3013_v11, %v3012_v5 }
 0x195   : > { %v2903_v14 = vpop.f32.mrf.mxu1  ;;  %v3015_v47 = vpop.f32.mrf.mxu0 }
 0x196   : > { %v2111_v16 = vadd.f32 %v2110_v55, %v1799_v59  ;;  %v2149_v42 = vmul.f32 %v1799_v59, %v1799_v59  ;;  %v1641_v13 = vadd.f32 %v2902_v8, %v3632_v6 }
 0x197   : > { %v2904_v50 = vpop.f32.mrf.mxu1  ;;  %v3016_v52 = vpop.f32.mrf.mxu0 }
 0x198   : > { %v2180_v37 = vadd.f32 %v2179_v32, %v2149_v42  ;;  %v1802_v18 = vadd.f32 %v3014_v15, %v1641_v13  ;;  %v2905_v23 = vadd.f32 %v2904_v50, %v2903_v14  ;;  %v3017_v1 = vadd.f32 %v3016_v52, %v3015_v47 }
 0x199   : > { %v2906_v25 = vpop.f32.mrf.mxu1  ;;  %v3018_v19 = vpop.f32.mrf.mxu0 }
 0x19a   : > { %v2665_v44 = vpack.c.bf16 %v1802_v18, %v1799_v59  ;;  %v2112_v46 = vadd.f32 %v2111_v16, %v1802_v18  ;;  %v2150_v30 = vmul.f32 %v1802_v18, %v1802_v18  ;;  %v1646_v36 = vadd.f32 %v2905_v23, %v3636_v12 }
 0x19b   : > { %v2907_v31 = vpop.f32.mrf.mxu1  ;;  %v3019_v39 = vpop.f32.mrf.mxu0 }
 0x19c   : > { %2693 = vst [vmem:[%s3671_s20 + $0x60] sm:$0xff] %v2665_v44   ;;  %v2181_v40 = vadd.f32 %v2180_v37, %v2150_v30  ;;  %v1807_v6 = vadd.f32 %v3017_v1, %v1646_v36  ;;  %v2908_v0 = vadd.f32 %v2907_v31, %v2906_v25  ;;  %v3020_v2 = vadd.f32 %v3019_v39, %v3018_v19 }
 0x19d   : > { %v2909_v43 = vpop.f32.mrf.mxu1  ;;  %v3021_v41 = vpop.f32.mrf.mxu0 }
 0x19e   : > { %v2113_v45 = vadd.f32 %v2112_v46, %v1807_v6  ;;  %v2151_v33 = vmul.f32 %v1807_v6, %v1807_v6  ;;  %v1649_v35 = vadd.f32 %v2908_v0, %v3642_v17 }
 0x19f   : > { %v2910_v27 = vpop.f32.mrf.mxu1  ;;  %v3022_v21 = vpop.f32.mrf.mxu0 }
 0x1a0   : > { %v2182_v4 = vadd.f32 %v2181_v40, %v2151_v33  ;;  %v1810_v51 = vadd.f32 %v3020_v2, %v1649_v35  ;;  %v2911_v48 = vadd.f32 %v2910_v27, %v2909_v43  ;;  %v3023_v12 = vadd.f32 %v3022_v21, %v3021_v41 }
 0x1a1   : > { %v2912_v20 = vpop.f32.mrf.mxu1  ;;  %v3024_v22 = vpop.f32.mrf.mxu0 }
 0x1a2   : > { %v2670_v29 = vpack.c.bf16 %v1810_v51, %v1807_v6  ;;  %v2114_v34 = vadd.f32 %v2113_v45, %v1810_v51  ;;  %v2152_v56 = vmul.f32 %v1810_v51, %v1810_v51  ;;  %v1654_v60 = vadd.f32 %v2911_v48, %v3646_v28 }
 0x1a3   : > { %v2913_v24 = vpop.f32.mrf.mxu1  ;;  %v3025_v26 = vpop.f32.mrf.mxu0 }
 0x1a4   : > { %2694 = vst [vmem:[%s3671_s20 + $0x68] sm:$0xff] %v2670_v29   ;;  %v2183_v61 = vadd.f32 %v2182_v4, %v2152_v56  ;;  %v1815_v17 = vadd.f32 %v3023_v12, %v1654_v60  ;;  %v2914_v62 = vadd.f32 %v2913_v24, %v2912_v20  ;;  %v3026_v7 = vadd.f32 %v3025_v26, %v3024_v22 }
 0x1a5   : > { %v2915_v53 = vpop.f32.mrf.mxu1  ;;  %v3027_v63 = vpop.f32.mrf.mxu0 }
 0x1a6   : > { %v2115_v54 = vadd.f32 %v2114_v34, %v1815_v17  ;;  %v2153_v3 = vmul.f32 %v1815_v17, %v1815_v17  ;;  %v1657_v5 = vadd.f32 %v2914_v62, %v3652_v38 }
 0x1a7   : > { %v2916_v55 = vpop.f32.mrf.mxu1  ;;  %v3028_v57 = vpop.f32.mrf.mxu0 }
 0x1a8   : > { %v2184_v9 = vadd.f32 %v2183_v61, %v2153_v3  ;;  %v1818_v10 = vadd.f32 %v3026_v7, %v1657_v5  ;;  %v2917_v11 = vadd.f32 %v2916_v55, %v2915_v53  ;;  %v3029_v28 = vadd.f32 %v3028_v57, %v3027_v63 }
 0x1a9   : > { %v2918_v32 = vpop.f32.mrf.mxu1  ;;  %v3030_v59 = vpop.f32.mrf.mxu0 }
 0x1aa   : > { %v2675_v8 = vpack.c.bf16 %v1818_v10, %v1815_v17  ;;  %v2116_v14 = vadd.f32 %v2115_v54, %v1818_v10  ;;  %v2154_v47 = vmul.f32 %v1818_v10, %v1818_v10  ;;  %v1662_v16 = vadd.f32 %v2917_v11, %v3656_v49 }
 0x1ab   : > { %v2919_v42 = vpop.f32.mrf.mxu1  ;;  %v3031_v13 = vpop.f32.mrf.mxu0 }
 0x1ac   : > { %2695 = vst [vmem:[%s3671_s20 + $0x70] sm:$0xff] %v2675_v8   ;;  %v2185_v38 = vadd.f32 %v2184_v9, %v2154_v47  ;;  %v1823_v15 = vadd.f32 %v3029_v28, %v1662_v16  ;;  %v2920_v50 = vadd.f32 %v2919_v42, %v2918_v32  ;;  %v3032_v23 = vadd.f32 %v3031_v13, %v3030_v59 }
 0x1ae   : > { %v2117_v52 = vadd.f32 %v2116_v14, %v1823_v15  ;;  %v2155_v37 = vmul.f32 %v1823_v15, %v1823_v15  ;;  %v1665_v18 = vadd.f32 %v2920_v50, %v3662_v58 }
 0x1b0   : > { %v2186_v1 = vadd.f32 %v2185_v38, %v2155_v37  ;;  %v1826_v25 = vadd.f32 %v3032_v23, %v1665_v18 }
 0x1b2   : > { %v2680_v19 = vpack.c.bf16 %v1826_v25, %v1823_v15  ;;  %v2118_v44 = vadd.f32 %v2117_v52, %v1826_v25  ;;  %v2156_v46 = vmul.f32 %v1826_v25, %v1826_v25 }
 0x1b4   : > { %2696 = vst [vmem:[%s3671_s20 + $0x78] sm:$0xff] %v2680_v19   ;;  %v2119_v49 = vrot.slane %v2118_v44, 4  ;;  %v2187_v30 = vadd.f32 %v2186_v1, %v2156_v46 }
 0x1b6   : > { %v2120_v36 = vadd.f32 %v2119_v49, %v2118_v44  ;;  %v2188_v31 = vrot.slane %v2187_v30, 4 }
 0x1b8   : > { %v2121_v39 = vrot.slane %v2120_v36, 2  ;;  %v2189_v40 = vadd.f32 %v2188_v31, %v2187_v30 }
 0x1ba   : > { %v2122_v6 = vadd.f32 %v2121_v39, %v2120_v36  ;;  %v2190_v0 = vrot.slane %v2189_v40, 2 }
 0x1bc   : > { %v2123_v43 = vrot.slane %v2122_v6, 1  ;;  %v2191_v58 = vadd.f32 %v2190_v0, %v2189_v40 }
 0x1be   : > { %v2124_v41 = vadd.f32 %v2123_v43, %v2122_v6  ;;  %v2192_v45 = vrot.slane %v2191_v58, 1 }
 0x1c0   : > { %v2193_v33 = vadd.f32 %v2192_v45, %v2191_v58  ;;  %2194 = vst [vmem:[%s309_s24] sm:$0xff] %v2124_v41 }
 0x1c2   : > { %2195 = vst [vmem:[%s316_s27] sm:$0xff] %v2193_v33 }
 0x1c3 PF: > { %s15_s17 = sadd.s32 1, %s3288_s17   ;;  %s3748_s15 = smov %s3284_s16 }
 0x1c4   : > { %p12_p6 = scmp.ge.s32.totalorder %s15_s17, 4   ;;  %s3749_s16 = smov %s3751_s18 }
 0x1c6   :  { %14 = sbr.rel (!%p12_p6) target bundleno = 2 (0x2), region = 93 }

// kernel: generator_forward.28
= control target key start
LH: loop header
LB: loop body
LE: loop exit
PB: predicated region body
PF: predicated region fallthrough
CT: control target
= control target key end

     0   :  { %s1094_s15 = smov 0   ;;  %s1247_s0 = inlined_call_operand.vmem [shape: bf16[512,128], index: 0, kind: input, shape index: {}]   ;;  %s1248_s1 = inlined_call_operand.vmem [shape: bf16[512,128], index: 1, kind: input, shape index: {}]   ;;  %s1249_s2 = inlined_call_operand.vmem [shape: f32[1,128], index: 2, kind: input, shape index: {}]   ;;  %s1250_s3 = inlined_call_operand.vmem [shape: f32[1,128], index: 3, kind: input, shape index: {}]   ;;  %s1251_s4 = inlined_call_operand.vmem [shape: bf16[512,128], index: 4, kind: output, shape index: {}]  }
   0x1 LB: > { %s721_s16 = sadd.s32 4294967295, %s1067_s15   ;;  %p725_p0 = scmp.ge.s32.totalorder %s1067_s15, 1  ;;  %s1067_s15 = sphi %s1094_s15, %s14_s15  }
   0x2   : > { %p174_p1 = scmp.lt.s32.totalorder %s1067_s15, 3 }
   0x4   : > { %p175_p2 = pnand %p725_p0, %p174_p1 }
   0x5   : > { %s726_s17 = sshll.u32 (!%p175_p2), %s721_s16, 5 }
   0x6   : > { %178 = sbr.rel (%p175_p2) target bundleno = 74 (0x4a), region = 36  ;;  %p206_p3 = scmp.lt.s32.totalorder (!%p175_p2), %s726_s17, 63 }
   0xb   : > { %s1253_s17 = smov (!%p206_p3, %s726_s17), 63  ;;  %v1119_v0 = vld [vmem:[%s1249_s2] ss:$0 sm:$0xff] }
   0xc   : > { %s1102_s18 = sshll.u32 %s1253_s17, 2  ;;  %v1130_v11 = vld [vmem:[%s1250_s3] ss:$0 sm:$0xff] }
   0xd   : > { %s1108_s21 = scalar_lea.vmem %s1247_s0, %s1102_s18  ;;  %s1114_s24 = scalar_lea.vmem %s1248_s1, %s1102_s18 }
   0xe   : > { %v801_v1 = vld [vmem:[%s1108_s21] sm:$0xff]   ;;  %v1008_v3 = vld [vmem:[%s1108_s21 + $0x8] sm:$0xff]   ;;  %v1009_v9 = vld [vmem:[%s1108_s21 + $0x10] sm:$0xff]   ;;  %s1152_s5 = scalar_lea.vmem %s1251_s4, %s1102_s18 }
   0xf   : > { %v865_v2 = vld [vmem:[%s1114_s24] sm:$0xff]   ;;  %v802_v4 = vunpack.c.l.bf16 %v801_v1  ;;  %v803_v5 = vunpack.c.h.bf16 %v801_v1  ;;  %v1023_v8 = vld [vmem:[%s1114_s24 + $0x8] sm:$0xff]   ;;  %v1024_v10 = vld [vmem:[%s1114_s24 + $0x10] sm:$0xff]   ;;  %v806_v12 = vunpack.c.l.bf16 %v1008_v3  ;;  %v807_v13 = vunpack.c.h.bf16 %v1008_v3 }
  0x10   : > { %v866_v6 = vunpack.c.l.bf16 %v865_v2  ;;  %v867_v7 = vunpack.c.h.bf16 %v865_v2  ;;  %v870_v14 = vunpack.c.l.bf16 %v1023_v8  ;;  %v871_v15 = vunpack.c.h.bf16 %v1023_v8  ;;  %v1010_v20 = vld [vmem:[%s1108_s21 + $0x18] sm:$0xff]   ;;  %v1011_v50 = vld [vmem:[%s1108_s21 + $0x20] sm:$0xff]   ;;  %v1012_v56 = vld [vmem:[%s1108_s21 + $0x28] sm:$0xff]  }
  0x11   : > { %v294_v16 = vmul.f32 %v802_v4, %v1119_v0  ;;  %v295_v17 = vmul.f32 %v803_v5, %v1119_v0  ;;  %v810_v18 = vunpack.c.l.bf16 %v1009_v9  ;;  %v811_v19 = vunpack.c.h.bf16 %v1009_v9  ;;  %v1025_v41 = vld [vmem:[%s1114_s24 + $0x18] sm:$0xff]   ;;  %v1026_v51 = vld [vmem:[%s1114_s24 + $0x20] sm:$0xff]   ;;  %v1027_v61 = vld [vmem:[%s1114_s24 + $0x28] sm:$0xff]  }
  0x12   : > { %v296_v21 = vmul.f32 %v806_v12, %v1119_v0  ;;  %v297_v22 = vmul.f32 %v807_v13, %v1119_v0  ;;  %v874_v23 = vunpack.c.l.bf16 %v1024_v10  ;;  %v875_v24 = vunpack.c.h.bf16 %v1024_v10  ;;  %v1013_v3 = vld [vmem:[%s1108_s21 + $0x30] sm:$0xff]  }
  0x13   : > { %v333_v25 = vadd.f32 %v1130_v11, %v294_v16  ;;  %v334_v26 = vadd.f32 %v1130_v11, %v295_v17  ;;  %v298_v27 = vmul.f32 %v810_v18, %v1119_v0  ;;  %v299_v28 = vmul.f32 %v811_v19, %v1119_v0  ;;  %v1028_v13 = vld [vmem:[%s1114_s24 + $0x30] sm:$0xff]  }
  0x14   : > { %v335_v29 = vadd.f32 %v1130_v11, %v296_v21  ;;  %v336_v30 = vadd.f32 %v1130_v11, %v297_v22  ;;  %v814_v31 = vunpack.c.l.bf16 %v1010_v20  ;;  %v815_v32 = vunpack.c.h.bf16 %v1010_v20  ;;  %v1014_v22 = vld [vmem:[%s1108_s21 + $0x38] sm:$0xff]  }
  0x15   : > { %v429_v33 = vmax.f32 %v333_v25, 0.0  ;;  %v430_v34 = vmax.f32 %v334_v26, 0.0  ;;  %v337_v35 = vadd.f32 %v1130_v11, %v298_v27  ;;  %v338_v36 = vadd.f32 %v1130_v11, %v299_v28 }
  0x16   : > { %v431_v37 = vmax.f32 %v335_v29, 0.0  ;;  %v432_v38 = vmax.f32 %v336_v30, 0.0  ;;  %v300_v39 = vmul.f32 %v814_v31, %v1119_v0  ;;  %v301_v40 = vmul.f32 %v815_v32, %v1119_v0 }
  0x17   : > { %v461_v42 = vadd.f32 %v866_v6, %v429_v33  ;;  %v462_v43 = vadd.f32 %v867_v7, %v430_v34  ;;  %v433_v44 = vmax.f32 %v337_v35, 0.0  ;;  %v434_v45 = vmax.f32 %v338_v36, 0.0  ;;  %v1029_v35 = vld [vmem:[%s1114_s24 + $0x38] sm:$0xff]  }
  0x18   : > { %v463_v46 = vadd.f32 %v870_v14, %v431_v37  ;;  %v464_v47 = vadd.f32 %v871_v15, %v432_v38  ;;  %v339_v48 = vadd.f32 %v1130_v11, %v300_v39  ;;  %v340_v49 = vadd.f32 %v1130_v11, %v301_v40 }
  0x19   : > { %v931_v52 = vpack.c.bf16 %v462_v43, %v461_v42  ;;  %v465_v53 = vadd.f32 %v874_v23, %v433_v44  ;;  %v466_v54 = vadd.f32 %v875_v24, %v434_v45  ;;  %v878_v55 = vunpack.c.l.bf16 %v1025_v41  ;;  %v1015_v44 = vld [vmem:[%s1108_s21 + $0x40] sm:$0xff]  }
  0x1a   : > { %v936_v57 = vpack.c.bf16 %v464_v47, %v463_v46  ;;  %v879_v58 = vunpack.c.h.bf16 %v1025_v41  ;;  %v435_v59 = vmax.f32 %v339_v48, 0.0  ;;  %v436_v60 = vmax.f32 %v340_v49, 0.0  ;;  %v1030_v49 = vld [vmem:[%s1114_s24 + $0x40] sm:$0xff]  }
  0x1b   : > { %932 = vst [vmem:[%s1152_s5] sm:$0xff] %v931_v52   ;;  %v941_v62 = vpack.c.bf16 %v466_v54, %v465_v53  ;;  %v818_v63 = vunpack.c.l.bf16 %v1011_v50  ;;  %v819_v1 = vunpack.c.h.bf16 %v1011_v50  ;;  %v882_v2 = vunpack.c.l.bf16 %v1026_v51  ;;  %v1016_v54 = vld [vmem:[%s1108_s21 + $0x48] sm:$0xff]  }
  0x1c   : > { %1038 = vst [vmem:[%s1152_s5 + $0x8] sm:$0xff] %v936_v57   ;;  %v467_v4 = vadd.f32 %v878_v55, %v435_v59  ;;  %v468_v5 = vadd.f32 %v879_v58, %v436_v60  ;;  %v883_v6 = vunpack.c.h.bf16 %v1026_v51  ;;  %v822_v7 = vunpack.c.l.bf16 %v1012_v56  ;;  %v1031_v59 = vld [vmem:[%s1114_s24 + $0x48] sm:$0xff]  }
  0x1d   : > { %1039 = vst [vmem:[%s1152_s5 + $0x10] sm:$0xff] %v941_v62   ;;  %v302_v8 = vmul.f32 %v818_v63, %v1119_v0  ;;  %v303_v9 = vmul.f32 %v819_v1, %v1119_v0  ;;  %v823_v10 = vunpack.c.h.bf16 %v1012_v56  ;;  %v886_v12 = vunpack.c.l.bf16 %v1027_v61 }
  0x1e   : > { %v946_v14 = vpack.c.bf16 %v468_v5, %v467_v4  ;;  %v304_v15 = vmul.f32 %v822_v7, %v1119_v0  ;;  %v887_v16 = vunpack.c.h.bf16 %v1027_v61  ;;  %v826_v17 = vunpack.c.l.bf16 %v1013_v3  ;;  %v1017_v5 = vld [vmem:[%s1108_s21 + $0x50] sm:$0xff]  }
  0x1f   : > { %v341_v18 = vadd.f32 %v1130_v11, %v302_v8  ;;  %v342_v19 = vadd.f32 %v1130_v11, %v303_v9  ;;  %v305_v20 = vmul.f32 %v823_v10, %v1119_v0  ;;  %v827_v21 = vunpack.c.h.bf16 %v1013_v3  ;;  %v1032_v10 = vld [vmem:[%s1114_s24 + $0x50] sm:$0xff]  }
  0x20   : > { %1040 = vst [vmem:[%s1152_s5 + $0x18] sm:$0xff] %v946_v14   ;;  %v343_v23 = vadd.f32 %v1130_v11, %v304_v15  ;;  %v306_v24 = vmul.f32 %v826_v17, %v1119_v0  ;;  %v890_v25 = vunpack.c.l.bf16 %v1028_v13  ;;  %v891_v26 = vunpack.c.h.bf16 %v1028_v13 }
  0x21   : > { %v437_v27 = vmax.f32 %v341_v18, 0.0  ;;  %v438_v28 = vmax.f32 %v342_v19, 0.0  ;;  %v344_v29 = vadd.f32 %v1130_v11, %v305_v20  ;;  %v307_v30 = vmul.f32 %v827_v21, %v1119_v0  ;;  %v1018_v20 = vld [vmem:[%s1108_s21 + $0x58] sm:$0xff]  }
  0x22   : > { %v439_v31 = vmax.f32 %v343_v23, 0.0  ;;  %v345_v32 = vadd.f32 %v1130_v11, %v306_v24  ;;  %v830_v33 = vunpack.c.l.bf16 %v1014_v22  ;;  %v831_v34 = vunpack.c.h.bf16 %v1014_v22 }
  0x23   : > { %v469_v36 = vadd.f32 %v882_v2, %v437_v27  ;;  %v470_v37 = vadd.f32 %v883_v6, %v438_v28  ;;  %v440_v38 = vmax.f32 %v344_v29, 0.0  ;;  %v346_v39 = vadd.f32 %v1130_v11, %v307_v30  ;;  %v1033_v29 = vld [vmem:[%s1114_s24 + $0x58] sm:$0xff]  }
  0x24   : > { %v471_v40 = vadd.f32 %v886_v12, %v439_v31  ;;  %v441_v41 = vmax.f32 %v345_v32, 0.0  ;;  %v308_v42 = vmul.f32 %v830_v33, %v1119_v0  ;;  %v309_v43 = vmul.f32 %v831_v34, %v1119_v0 }
  0x25   : > { %v951_v45 = vpack.c.bf16 %v470_v37, %v469_v36  ;;  %v472_v46 = vadd.f32 %v887_v16, %v440_v38  ;;  %v442_v47 = vmax.f32 %v346_v39, 0.0  ;;  %v894_v48 = vunpack.c.l.bf16 %v1029_v35  ;;  %v1019_v38 = vld [vmem:[%s1108_s21 + $0x60] sm:$0xff]  }
  0x26   : > { %v473_v50 = vadd.f32 %v890_v25, %v441_v41  ;;  %v347_v51 = vadd.f32 %v1130_v11, %v308_v42  ;;  %v348_v52 = vadd.f32 %v1130_v11, %v309_v43  ;;  %v895_v53 = vunpack.c.h.bf16 %v1029_v35 }
  0x27   : > { %1041 = vst [vmem:[%s1152_s5 + $0x20] sm:$0xff] %v951_v45   ;;  %v956_v55 = vpack.c.bf16 %v472_v46, %v471_v40  ;;  %v474_v56 = vadd.f32 %v891_v26, %v442_v47  ;;  %v834_v57 = vunpack.c.l.bf16 %v1015_v44  ;;  %v835_v58 = vunpack.c.h.bf16 %v1015_v44  ;;  %v1034_v47 = vld [vmem:[%s1114_s24 + $0x60] sm:$0xff]  }
  0x28   : > { %v443_v60 = vmax.f32 %v347_v51, 0.0  ;;  %v444_v61 = vmax.f32 %v348_v52, 0.0  ;;  %v898_v62 = vunpack.c.l.bf16 %v1030_v49  ;;  %v899_v63 = vunpack.c.h.bf16 %v1030_v49  ;;  %v1020_v52 = vld [vmem:[%s1108_s21 + $0x68] sm:$0xff]  }
  0x29   : > { %1042 = vst [vmem:[%s1152_s5 + $0x28] sm:$0xff] %v956_v55   ;;  %v961_v1 = vpack.c.bf16 %v474_v56, %v473_v50  ;;  %v310_v2 = vmul.f32 %v834_v57, %v1119_v0  ;;  %v311_v3 = vmul.f32 %v835_v58, %v1119_v0  ;;  %v838_v4 = vunpack.c.l.bf16 %v1016_v54 }
  0x2a   : > { %v475_v6 = vadd.f32 %v894_v48, %v443_v60  ;;  %v476_v7 = vadd.f32 %v895_v53, %v444_v61  ;;  %v839_v8 = vunpack.c.h.bf16 %v1016_v54  ;;  %v902_v9 = vunpack.c.l.bf16 %v1031_v59  ;;  %v1035_v61 = vld [vmem:[%s1114_s24 + $0x68] sm:$0xff]  }
  0x2b   : > { %1043 = vst [vmem:[%s1152_s5 + $0x30] sm:$0xff] %v961_v1   ;;  %v349_v12 = vadd.f32 %v1130_v11, %v310_v2  ;;  %v350_v13 = vadd.f32 %v1130_v11, %v311_v3  ;;  %v312_v14 = vmul.f32 %v838_v4, %v1119_v0  ;;  %v903_v15 = vunpack.c.h.bf16 %v1031_v59  ;;  %v1021_v3 = vld [vmem:[%s1108_s21 + $0x70] sm:$0xff]  }
  0x2c   : > { %v966_v16 = vpack.c.bf16 %v476_v7, %v475_v6  ;;  %v313_v17 = vmul.f32 %v839_v8, %v1119_v0  ;;  %v842_v18 = vunpack.c.l.bf16 %v1017_v5  ;;  %v843_v19 = vunpack.c.h.bf16 %v1017_v5 }
  0x2d   : > { %v445_v21 = vmax.f32 %v349_v12, 0.0  ;;  %v446_v22 = vmax.f32 %v350_v13, 0.0  ;;  %v351_v23 = vadd.f32 %v1130_v11, %v312_v14  ;;  %v906_v24 = vunpack.c.l.bf16 %v1032_v10 }
  0x2e   : > { %1044 = vst [vmem:[%s1152_s5 + $0x38] sm:$0xff] %v966_v16   ;;  %v352_v25 = vadd.f32 %v1130_v11, %v313_v17  ;;  %v314_v26 = vmul.f32 %v842_v18, %v1119_v0  ;;  %v315_v27 = vmul.f32 %v843_v19, %v1119_v0  ;;  %v907_v28 = vunpack.c.h.bf16 %v1032_v10  ;;  %v1036_v16 = vld [vmem:[%s1114_s24 + $0x70] sm:$0xff]   ;;  %v1022_v17 = vld [vmem:[%s1108_s21 + $0x78] sm:$0xff]  }
  0x2f   : > { %v477_v30 = vadd.f32 %v898_v62, %v445_v21  ;;  %v478_v31 = vadd.f32 %v899_v63, %v446_v22  ;;  %v447_v32 = vmax.f32 %v351_v23, 0.0  ;;  %v846_v33 = vunpack.c.l.bf16 %v1018_v20 }
  0x30   : > { %v448_v34 = vmax.f32 %v352_v25, 0.0  ;;  %v353_v35 = vadd.f32 %v1130_v11, %v314_v26  ;;  %v354_v36 = vadd.f32 %v1130_v11, %v315_v27  ;;  %v847_v37 = vunpack.c.h.bf16 %v1018_v20 }
  0x31   : > { %v971_v39 = vpack.c.bf16 %v478_v31, %v477_v30  ;;  %v479_v40 = vadd.f32 %v902_v9, %v447_v32  ;;  %v316_v41 = vmul.f32 %v846_v33, %v1119_v0  ;;  %v910_v42 = vunpack.c.l.bf16 %v1033_v29 }
  0x32   : > { %v480_v43 = vadd.f32 %v903_v15, %v448_v34  ;;  %v449_v44 = vmax.f32 %v353_v35, 0.0  ;;  %v450_v45 = vmax.f32 %v354_v36, 0.0  ;;  %v317_v46 = vmul.f32 %v847_v37, %v1119_v0  ;;  %v1037_v34 = vld [vmem:[%s1114_s24 + $0x78] sm:$0xff]  }
  0x33   : > { %1045 = vst [vmem:[%s1152_s5 + $0x40] sm:$0xff] %v971_v39   ;;  %v355_v48 = vadd.f32 %v1130_v11, %v316_v41  ;;  %v911_v49 = vunpack.c.h.bf16 %v1033_v29  ;;  %v850_v50 = vunpack.c.l.bf16 %v1019_v38  ;;  %v851_v51 = vunpack.c.h.bf16 %v1019_v38 }
  0x34   : > { %v976_v53 = vpack.c.bf16 %v480_v43, %v479_v40  ;;  %v481_v54 = vadd.f32 %v906_v24, %v449_v44  ;;  %v482_v55 = vadd.f32 %v907_v28, %v450_v45  ;;  %v356_v56 = vadd.f32 %v1130_v11, %v317_v46 }
  0x35   : > { %v451_v57 = vmax.f32 %v355_v48, 0.0  ;;  %v318_v58 = vmul.f32 %v850_v50, %v1119_v0  ;;  %v319_v59 = vmul.f32 %v851_v51, %v1119_v0  ;;  %v914_v60 = vunpack.c.l.bf16 %v1034_v47 }
  0x36   : > { %1046 = vst [vmem:[%s1152_s5 + $0x48] sm:$0xff] %v976_v53   ;;  %v981_v62 = vpack.c.bf16 %v482_v55, %v481_v54  ;;  %v452_v63 = vmax.f32 %v356_v56, 0.0  ;;  %v915_v1 = vunpack.c.h.bf16 %v1034_v47  ;;  %v854_v2 = vunpack.c.l.bf16 %v1020_v52 }
  0x37   : > { %v483_v4 = vadd.f32 %v910_v42, %v451_v57  ;;  %v357_v5 = vadd.f32 %v1130_v11, %v318_v58  ;;  %v358_v6 = vadd.f32 %v1130_v11, %v319_v59  ;;  %v855_v7 = vunpack.c.h.bf16 %v1020_v52 }
  0x38   : > { %1047 = vst [vmem:[%s1152_s5 + $0x50] sm:$0xff] %v981_v62   ;;  %v484_v8 = vadd.f32 %v911_v49, %v452_v63  ;;  %v320_v9 = vmul.f32 %v854_v2, %v1119_v0  ;;  %v918_v10 = vunpack.c.l.bf16 %v1035_v61  ;;  %v858_v15 = vunpack.c.l.bf16 %v1021_v3 }
  0x39   : > { %v453_v12 = vmax.f32 %v357_v5, 0.0  ;;  %v454_v13 = vmax.f32 %v358_v6, 0.0  ;;  %v321_v14 = vmul.f32 %v855_v7, %v1119_v0  ;;  %v919_v20 = vunpack.c.h.bf16 %v1035_v61 }
  0x3a   : > { %v986_v18 = vpack.c.bf16 %v484_v8, %v483_v4  ;;  %v359_v19 = vadd.f32 %v1130_v11, %v320_v9  ;;  %v859_v21 = vunpack.c.h.bf16 %v1021_v3  ;;  %v322_v25 = vmul.f32 %v858_v15, %v1119_v0 }
  0x3b   : > { %v485_v22 = vadd.f32 %v914_v60, %v453_v12  ;;  %v486_v23 = vadd.f32 %v915_v1, %v454_v13  ;;  %v360_v24 = vadd.f32 %v1130_v11, %v321_v14  ;;  %v922_v28 = vunpack.c.l.bf16 %v1036_v16 }
  0x3c   : > { %1048 = vst [vmem:[%s1152_s5 + $0x58] sm:$0xff] %v986_v18   ;;  %v455_v26 = vmax.f32 %v359_v19, 0.0  ;;  %v323_v27 = vmul.f32 %v859_v21, %v1119_v0  ;;  %v862_v29 = vunpack.c.l.bf16 %v1022_v17  ;;  %v361_v32 = vadd.f32 %v1130_v11, %v322_v25 }
  0x3d   : > { %v991_v30 = vpack.c.bf16 %v486_v23, %v485_v22  ;;  %v456_v31 = vmax.f32 %v360_v24, 0.0  ;;  %v863_v33 = vunpack.c.h.bf16 %v1022_v17  ;;  %v923_v37 = vunpack.c.h.bf16 %v1036_v16 }
  0x3e   : > { %v487_v35 = vadd.f32 %v918_v10, %v455_v26  ;;  %v362_v36 = vadd.f32 %v1130_v11, %v323_v27  ;;  %v324_v38 = vmul.f32 %v862_v29, %v1119_v0  ;;  %v457_v40 = vmax.f32 %v361_v32, 0.0 }
  0x3f   : > { %1049 = vst [vmem:[%s1152_s5 + $0x60] sm:$0xff] %v991_v30   ;;  %v488_v39 = vadd.f32 %v919_v20, %v456_v31  ;;  %v325_v41 = vmul.f32 %v863_v33, %v1119_v0  ;;  %v926_v44 = vunpack.c.l.bf16 %v1037_v34  ;;  %v927_v48 = vunpack.c.h.bf16 %v1037_v34 }
  0x40   : > { %v458_v42 = vmax.f32 %v362_v36, 0.0  ;;  %v363_v43 = vadd.f32 %v1130_v11, %v324_v38  ;;  %v489_v46 = vadd.f32 %v922_v28, %v457_v40 }
  0x41   : > { %v996_v45 = vpack.c.bf16 %v488_v39, %v487_v35  ;;  %v364_v47 = vadd.f32 %v1130_v11, %v325_v41 }
  0x42   : > { %v490_v49 = vadd.f32 %v923_v37, %v458_v42  ;;  %v459_v50 = vmax.f32 %v363_v43, 0.0 }
  0x43   : > { %1050 = vst [vmem:[%s1152_s5 + $0x68] sm:$0xff] %v996_v45   ;;  %v460_v51 = vmax.f32 %v364_v47, 0.0 }
  0x44   : > { %v1001_v52 = vpack.c.bf16 %v490_v49, %v489_v46  ;;  %v491_v53 = vadd.f32 %v926_v44, %v459_v50 }
  0x45   : > { %v492_v54 = vadd.f32 %v927_v48, %v460_v51 }
  0x46   : > { %1051 = vst [vmem:[%s1152_s5 + $0x70] sm:$0xff] %v1001_v52  }
  0x47   : > { %v1006_v55 = vpack.c.bf16 %v492_v54, %v491_v53 }
  0x49   : > { %1052 = vst [vmem:[%s1152_s5 + $0x78] sm:$0xff] %v1006_v55  }
  0x4a PF: > { %s14_s15 = sadd.s32 1, %s1067_s15  }
  0x4b   : > { %p11_p4 = scmp.ge.s32.totalorder %s14_s15, 4  }
  0x4d   :  { %13 = sbr.rel (!%p11_p4) target bundleno = 1 (0x1), region = 69 }

// kernel: generator_forward.30
= control target key start
LH: loop header
LB: loop body
LE: loop exit
PB: predicated region body
PF: predicated region fallthrough
CT: control target
= control target key end

     0   :  { %s431_s12 = smov 0   ;;  %s461_s0 = inlined_call_operand.vmem [shape: bf16[128,128], index: 0, kind: input, shape index: {}]   ;;  %s462_s1 = inlined_call_operand.vmem [shape: f32[1,128], index: 1, kind: input, shape index: {}]   ;;  %s463_s2 = inlined_call_operand.vmem [shape: f32[1,128], index: 2, kind: input, shape index: {}]   ;;  %s464_s3 = inlined_call_operand.vmem [shape: bf16[128,128], index: 3, kind: output, shape index: {}]  }
   0x1 LB: > { %s324_s13 = sadd.s32 4294967295, %s409_s12   ;;  %p328_p0 = scmp.ge.s32.totalorder %s409_s12, 1  ;;  %s409_s12 = sphi %s431_s12, %s13_s12  }
   0x2   : > { %p138_p1 = scmp.lt.s32.totalorder %s409_s12, 3 }
   0x4   : > { %p139_p2 = pnand %p328_p0, %p138_p1 }
   0x5   : > { %s329_s14 = sshll.u32 (!%p139_p2), %s324_s13, 3 }
   0x6   : > { %142 = sbr.rel (%p139_p2) target bundleno = 27 (0x1b), region = 32  ;;  %p163_p3 = scmp.lt.s32.totalorder (!%p139_p2), %s329_s14, 15 }
   0xb   : > { %s466_s14 = smov (!%p163_p3, %s329_s14), 15  ;;  %v333_v0 = vld [vmem:[%s462_s1] ss:$0 sm:$0xff] }
   0xc   : > { %s330_s15 = sshll.u32 %s466_s14, 2  ;;  %v334_v9 = vld [vmem:[%s463_s2] ss:$0 sm:$0xff] }
   0xd   : > { %s166_s18 = scalar_lea.vmem %s461_s0, %s330_s15  ;;  %s172_s25 = scalar_lea.vmem %s464_s3, %s330_s15 }
   0xe   : > { %v354_v1 = vld [vmem:[%s166_s18] sm:$0xff]   ;;  %v389_v2 = vld [vmem:[%s166_s18 + $0x8] sm:$0xff]   ;;  %v390_v3 = vld [vmem:[%s166_s18 + $0x10] sm:$0xff]  }
   0xf   : > { %v355_v4 = vunpack.c.l.bf16 %v354_v1  ;;  %v356_v5 = vunpack.c.h.bf16 %v354_v1  ;;  %v359_v6 = vunpack.c.l.bf16 %v389_v2  ;;  %v360_v7 = vunpack.c.h.bf16 %v389_v2  ;;  %v391_v8 = vld [vmem:[%s166_s18 + $0x18] sm:$0xff]  }
  0x10   : > { %v363_v10 = vunpack.c.l.bf16 %v390_v3  ;;  %v364_v11 = vunpack.c.h.bf16 %v390_v3  ;;  %v367_v12 = vunpack.c.l.bf16 %v391_v8  ;;  %v368_v13 = vunpack.c.h.bf16 %v391_v8 }
  0x11   : > { %v197_v14 = vmul.f32 %v355_v4, %v333_v0  ;;  %v198_v15 = vmul.f32 %v356_v5, %v333_v0  ;;  %v199_v16 = vmul.f32 %v359_v6, %v333_v0  ;;  %v200_v17 = vmul.f32 %v360_v7, %v333_v0 }
  0x12   : > { %v201_v18 = vmul.f32 %v363_v10, %v333_v0  ;;  %v202_v19 = vmul.f32 %v364_v11, %v333_v0  ;;  %v203_v20 = vmul.f32 %v367_v12, %v333_v0  ;;  %v204_v21 = vmul.f32 %v368_v13, %v333_v0 }
  0x13   : > { %v212_v22 = vadd.f32 %v334_v9, %v197_v14  ;;  %v213_v23 = vadd.f32 %v334_v9, %v198_v15  ;;  %v214_v24 = vadd.f32 %v334_v9, %v199_v16  ;;  %v215_v25 = vadd.f32 %v334_v9, %v200_v17 }
  0x14   : > { %v216_v26 = vadd.f32 %v334_v9, %v201_v18  ;;  %v217_v27 = vadd.f32 %v334_v9, %v202_v19  ;;  %v218_v28 = vadd.f32 %v334_v9, %v203_v20  ;;  %v219_v29 = vadd.f32 %v334_v9, %v204_v21 }
  0x15   : > { %v220_v30 = vmax.f32 %v212_v22, 0.0  ;;  %v221_v31 = vmax.f32 %v213_v23, 0.0  ;;  %v222_v32 = vmax.f32 %v214_v24, 0.0  ;;  %v223_v33 = vmax.f32 %v215_v25, 0.0 }
  0x16   : > { %v224_v34 = vmax.f32 %v216_v26, 0.0  ;;  %v225_v35 = vmax.f32 %v217_v27, 0.0  ;;  %v226_v36 = vmax.f32 %v218_v28, 0.0  ;;  %v227_v37 = vmax.f32 %v219_v29, 0.0 }
  0x17   : > { %v372_v38 = vpack.c.bf16 %v221_v31, %v220_v30  ;;  %v377_v39 = vpack.c.bf16 %v223_v33, %v222_v32 }
  0x18   : > { %v382_v40 = vpack.c.bf16 %v225_v35, %v224_v34  ;;  %v387_v41 = vpack.c.bf16 %v227_v37, %v226_v36 }
  0x19   : > { %373 = vst [vmem:[%s172_s25] sm:$0xff] %v372_v38   ;;  %392 = vst [vmem:[%s172_s25 + $0x8] sm:$0xff] %v377_v39  }
  0x1a   : > { %393 = vst [vmem:[%s172_s25 + $0x10] sm:$0xff] %v382_v40   ;;  %394 = vst [vmem:[%s172_s25 + $0x18] sm:$0xff] %v387_v41  }
  0x1b PF: > { %s13_s12 = sadd.s32 1, %s409_s12  }
  0x1c   : > { %p10_p4 = scmp.ge.s32.totalorder %s13_s12, 4  }
  0x1e   :  { %12 = sbr.rel (!%p10_p4) target bundleno = 1 (0x1), region = 62 }

// kernel: generator_forward.29
= control target key start
LH: loop header
LB: loop body
LE: loop exit
PB: predicated region body
PF: predicated region fallthrough
CT: control target
= control target key end

     0   :  { %s1767_s15 = smov 0   ;;  %s1769_s16 = smov 0   ;;  %s1991_s0 = inlined_call_operand.vmem [shape: bf16[128,768], index: 0, kind: input, shape index: {}]   ;;  %s1992_s1 = inlined_call_operand.vmem [shape: bf16[768,128], index: 1, kind: input, shape index: {}]   ;;  %s1993_s2 = inlined_call_operand.vmem [shape: bf16[128,128], index: 2, kind: output, shape index: {0}]   ;;  %s1994_s3 = inlined_call_operand.vmem [shape: f32[16,128], index: 3, kind: output, shape index: {1}]   ;;  %s1995_s4 = inlined_call_operand.vmem [shape: f32[16,128], index: 4, kind: output, shape index: {2}]  }
   0x1   :  { %s1771_s17 = smov 0  }
   0x2 LB: > { %s34_s18 = sadd.s32 1, %s1736_s16  ;;  %p1353_p0 = scmp.ge.s32.totalorder %s1740_s17, 1  ;;  %s1740_s17 = sphi %s1771_s17, %s15_s17   ;;  %s1736_s16 = sphi %s1769_s16, %s1997_s16   ;;  %s1732_s15 = sphi %s1767_s15, %s1996_s15  }
   0x3   : > { %p36_p1 = scmp.ge.s32.totalorder %s34_s18, 2  ;;  %p217_p2 = scmp.lt.s32.totalorder %s1740_s17, 3 }
   0x5   : > { %s1999_s18 = smov (%p36_p1, %s34_s18), 0  ;;  %p218_p3 = pnand %p1353_p0, %p217_p2 }
   0x6   : > { %s1354_s27 = sshll.u32 (!%p218_p3), %s1732_s15, 3  ;;  %p303_p5 = scmp.lt.s32.totalorder (!%p218_p3), %s1732_s15, 1 }
   0x7   : > { %221 = sbr.rel (%p218_p3) target bundleno = 315 (0x13b), region = 28  ;;  %p275_p4 = scmp.lt.s32.totalorder (!%p218_p3), %s1354_s27, 15 }
   0xc   : > { %v1634_v0 = vld [vmem:[%s1992_s1 + $0x78] sm:$0xff]   ;;  %v1638_v4 = vld [vmem:[%s1992_s1 + $0x70] sm:$0xff]   ;;  %v1642_v8 = vld [vmem:[%s1992_s1 + $0x68] sm:$0xff]   ;;  %s2001_s27 = smov (!%p275_p4, %s1354_s27), 15  ;;  %s2003_s15 = smov (!%p303_p5, %s1732_s15), 1 }
   0xd   : > { %v1635_v1 = vld [vmem:[%s1992_s1 + $0xf8] sm:$0xff]   ;;  %1473 = vmatprep.subr.bf16.mxu0 %v1634_v0  ;;  %v1639_v5 = vld [vmem:[%s1992_s1 + $0xf0] sm:$0xff]   ;;  %v1643_v9 = vld [vmem:[%s1992_s1 + $0xe8] sm:$0xff]   ;;  %s1609_s29 = smul.u32 24, %s2001_s27 }
   0xe   : > { %v1636_v2 = vld [vmem:[%s1992_s1 + $0x38] sm:$0xff]   ;;  %1513 = vmatprep.subr.bf16.mxu1 %v1635_v1  ;;  %v1640_v6 = vld [vmem:[%s1992_s1 + $0x30] sm:$0xff]   ;;  %v1644_v10 = vld [vmem:[%s1992_s1 + $0x28] sm:$0xff]  }
   0xf   : > { %v1637_v3 = vld [vmem:[%s1992_s1 + $0xb8] sm:$0xff]   ;;  %1474 = vmatpush3.bf16.msra.mxu0 %v1636_v2  ;;  %v1641_v7 = vld [vmem:[%s1992_s1 + $0xb0] sm:$0xff]   ;;  %v1645_v11 = vld [vmem:[%s1992_s1 + $0xa8] sm:$0xff]   ;;  %s1884_s14 = scalar_lea.vmem %s1991_s0, %s1609_s29 }
  0x10   : > { %1514 = vmatpush3.bf16.msra.mxu1 %v1637_v3  ;;  %1475 = vmatprep.subr.bf16.mxu0 %v1638_v4  ;;  %v1646_v12 = vld [vmem:[%s1992_s1 + $0x60] sm:$0xff]   ;;  %v1650_v16 = vld [vmem:[%s1992_s1 + $0x58] sm:$0xff]   ;;  %v1654_v20 = vld [vmem:[%s1992_s1 + $0x50] sm:$0xff]  }
  0x11   : > { %1515 = vmatprep.subr.bf16.mxu1 %v1639_v5  ;;  %v1647_v13 = vld [vmem:[%s1992_s1 + $0xe0] sm:$0xff]   ;;  %v1651_v17 = vld [vmem:[%s1992_s1 + $0xd8] sm:$0xff]   ;;  %v1655_v21 = vld [vmem:[%s1992_s1 + $0xd0] sm:$0xff]  }
  0x12   : > { %v1648_v14 = vld [vmem:[%s1992_s1 + $0x20] sm:$0xff]   ;;  %v1652_v18 = vld [vmem:[%s1992_s1 + $0x18] sm:$0xff]   ;;  %v1656_v22 = vld [vmem:[%s1992_s1 + $0x10] sm:$0xff]  }
  0x13   : > { %1476 = vmatpush3.bf16.msra.mxu0 %v1640_v6  ;;  %v1649_v15 = vld [vmem:[%s1992_s1 + $0xa0] sm:$0xff]   ;;  %v1653_v19 = vld [vmem:[%s1992_s1 + $0x98] sm:$0xff]   ;;  %v1657_v23 = vld [vmem:[%s1992_s1 + $0x90] sm:$0xff]  }
  0x14   : > { %1516 = vmatpush3.bf16.msra.mxu1 %v1641_v7  ;;  %1477 = vmatprep.subr.bf16.mxu0 %v1642_v8  ;;  %v1658_v24 = vld [vmem:[%s1992_s1 + $0x48] sm:$0xff]   ;;  %v1662_v28 = vld [vmem:[%s1992_s1 + $0x40] sm:$0xff]   ;;  %v1672_v36 = vld [vmem:[%s1992_s1 + $0x178] sm:$0xff]  }
  0x15   : > { %1517 = vmatprep.subr.bf16.mxu1 %v1643_v9  ;;  %v1659_v25 = vld [vmem:[%s1992_s1 + $0xc8] sm:$0xff]   ;;  %v1663_v29 = vld [vmem:[%s1992_s1 + $0xc0] sm:$0xff]   ;;  %v1673_v37 = vld [vmem:[%s1992_s1 + $0x138] sm:$0xff]  }
  0x16   : > { %v1660_v26 = vld [vmem:[%s1992_s1 + $0x8] sm:$0xff]   ;;  %v1664_v30 = vld [vmem:[%s1992_s1] sm:$0xff]   ;;  %v1674_v38 = vld [vmem:[%s1992_s1 + $0x170] sm:$0xff]  }
  0x17   : > { %1478 = vmatpush3.bf16.msra.mxu0 %v1644_v10  ;;  %v1661_v27 = vld [vmem:[%s1992_s1 + $0x88] sm:$0xff]   ;;  %v1665_v31 = vld [vmem:[%s1992_s1 + $0x80] sm:$0xff]   ;;  %v1675_v39 = vld [vmem:[%s1992_s1 + $0x130] sm:$0xff]  }
  0x18   : > { %1518 = vmatpush3.bf16.msra.mxu1 %v1645_v11  ;;  %1479 = vmatprep.subr.bf16.mxu0 %v1646_v12  ;;  %v1666_v32 = vld [vmem:[%s1884_s14] ss:$24 sps:$4 sm:$0xff]   ;;  %v1668_v33 = vld [vmem:[%s1884_s14 + $0x4] ss:$24 sps:$4 sm:$0xff]   ;;  %v1676_v40 = vld [vmem:[%s1884_s14 + $0x34] ss:$24 sps:$4 sm:$0xff]  }
  0x19   : > { %1519 = vmatprep.subr.bf16.mxu1 %v1647_v13  ;;  %v1669_v34 = vld [vmem:[%s1884_s14 + $0x8] ss:$24 sps:$4 sm:$0xff]   ;;  %v1671_v35 = vld [vmem:[%s1884_s14 + $0xc] ss:$24 sps:$4 sm:$0xff]   ;;  %898 = vmatprep.mubr.bf16.mxu0 %v1668_v33  ;;  %v1678_v41 = vld [vmem:[%s1884_s14 + $0x3c] ss:$24 sps:$4 sm:$0xff]  }
  0x1a   : > { %963 = vmatprep.mubr.bf16.mxu1 %v1671_v35  ;;  %v1680_v42 = vld [vmem:[%s1884_s14 + $0x30] ss:$24 sps:$4 sm:$0xff]   ;;  %v1684_v46 = vld [vmem:[%s1992_s1 + $0x160] sm:$0xff]   ;;  %v1692_v51 = vld [vmem:[%s1992_s1 + $0x158] sm:$0xff]  }
  0x1b   : > { %1480 = vmatpush3.bf16.msra.mxu0 %v1648_v14  ;;  %v1681_v43 = vld [vmem:[%s1884_s14 + $0x38] ss:$24 sps:$4 sm:$0xff]   ;;  %v1682_v44 = vld [vmem:[%s1992_s1 + $0x168] sm:$0xff]   ;;  %v1685_v47 = vld [vmem:[%s1992_s1 + $0x120] sm:$0xff]  }
  0x1c   : > { %1520 = vmatpush3.bf16.msra.mxu1 %v1649_v15  ;;  %1481 = vmatprep.subr.bf16.mxu0 %v1650_v16  ;;  %v1683_v45 = vld [vmem:[%s1992_s1 + $0x128] sm:$0xff]   ;;  %v1686_v48 = vld [vmem:[%s1884_s14 + $0x64] ss:$24 sps:$4 sm:$0xff]   ;;  %v1690_v50 = vld [vmem:[%s1884_s14 + $0x60] ss:$24 sps:$4 sm:$0xff]  }
  0x1d   : > { %1521 = vmatprep.subr.bf16.mxu1 %v1651_v17  ;;  %v1688_v49 = vld [vmem:[%s1884_s14 + $0x6c] ss:$24 sps:$4 sm:$0xff]   ;;  %v1691_v52 = vld [vmem:[%s1884_s14 + $0x68] ss:$24 sps:$4 sm:$0xff]   ;;  %v1693_v53 = vld [vmem:[%s1992_s1 + $0x118] sm:$0xff]  }
  0x1e   : > { %v1694_v54 = vld [vmem:[%s1992_s1 + $0x150] sm:$0xff]   ;;  %v1702_v58 = vld [vmem:[%s1992_s1 + $0x148] sm:$0xff]   ;;  %v1704_v62 = vld [vmem:[%s1992_s1 + $0x140] sm:$0xff]  }
  0x1f   : > { %1482 = vmatpush3.bf16.msra.mxu0 %v1652_v18  ;;  %v1696_v55 = vld [vmem:[%s1884_s14 + $0x94] ss:$24 sps:$4 sm:$0xff]   ;;  %v1700_v59 = vld [vmem:[%s1884_s14 + $0x90] ss:$24 sps:$4 sm:$0xff]   ;;  %v1705_v1 = vld [vmem:[%s1992_s1 + $0x100] sm:$0xff]  }
  0x20   : > { %1522 = vmatpush3.bf16.msra.mxu1 %v1653_v19  ;;  %1483 = vmatprep.subr.bf16.mxu0 %v1654_v20  ;;  %v1698_v56 = vld [vmem:[%s1884_s14 + $0x9c] ss:$24 sps:$4 sm:$0xff]   ;;  %v1701_v60 = vld [vmem:[%s1884_s14 + $0x98] ss:$24 sps:$4 sm:$0xff]   ;;  %v1703_v61 = vld [vmem:[%s1992_s1 + $0x108] sm:$0xff]  }
  0x21   : > { %1523 = vmatprep.subr.bf16.mxu1 %v1655_v21  ;;  %v1695_v57 = vld [vmem:[%s1992_s1 + $0x110] sm:$0xff]   ;;  %v1712_v4 = vld [vmem:[%s1884_s14 + $0x44] ss:$24 sps:$4 sm:$0xff]   ;;  %v1716_v6 = vld [vmem:[%s1884_s14 + $0x40] ss:$24 sps:$4 sm:$0xff]  }
  0x22   : > { %v1708_v63 = vld [vmem:[%s1884_s14 + $0x14] ss:$24 sps:$4 sm:$0xff]   ;;  %v1706_v2 = vld [vmem:[%s1884_s14 + $0x10] ss:$24 sps:$4 sm:$0xff]   ;;  %v1714_v5 = vld [vmem:[%s1884_s14 + $0xa4] ss:$24 sps:$4 sm:$0xff]  }
  0x23   : > { %1484 = vmatpush3.bf16.msra.mxu0 %v1656_v22  ;;  %v1711_v0 = vld [vmem:[%s1884_s14 + $0x74] ss:$24 sps:$4 sm:$0xff]   ;;  %v1709_v3 = vld [vmem:[%s1884_s14 + $0x70] ss:$24 sps:$4 sm:$0xff]   ;;  %v1717_v7 = vld [vmem:[%s1884_s14 + $0xa0] ss:$24 sps:$4 sm:$0xff]  }
  0x24   : > { %1524 = vmatpush3.bf16.msra.mxu1 %v1657_v23  ;;  %1485 = vmatprep.subr.bf16.mxu0 %v1658_v24  ;;  %s1357_s14 = sshll.u32 %s2001_s27, 2  ;;  %s1358_s27 = sshll.u32 %s2003_s15, 3 }
  0x25   : > { %1525 = vmatprep.subr.bf16.mxu1 %v1659_v25  ;;  %s1968_s12 = scalar_lea.vmem %s1993_s2, %s1357_s14  ;;  %s309_s20 = scalar_lea.vmem %s1994_s3, %s1358_s27 }
  0x26   : > { %s316_s23 = scalar_lea.vmem %s1995_s4, %s1358_s27 }
  0x27   : > { %1486 = vmatpush3.bf16.msra.mxu0 %v1660_v26 }
  0x28   : > { %1526 = vmatpush3.bf16.msra.mxu1 %v1661_v27  ;;  %1487 = vmatprep.subr.bf16.mxu0 %v1662_v28 }
  0x29   : > { %1527 = vmatprep.subr.bf16.mxu1 %v1663_v29 }
  0x2b   : > { %1488 = vmatpush3.bf16.msra.mxu0 %v1664_v30 }
  0x2c   : > { %1528 = vmatpush3.bf16.msra.mxu1 %v1665_v31  ;;  %1553 = vmatprep.subr.bf16.mxu0 %v1672_v36 }
  0x2d   : > { %1593 = vmatprep.subr.bf16.mxu1 %v1672_v36 }
  0x2e   : > { %899 = vmatmul.mubr.bf16.vlgmr.msra.gmra.mxu0 %v1666_v32 }
  0x2f   : > { %964 = vmatmul.mubr.bf16.vlgmr.msra.gmra.mxu1 %v1669_v34  ;;  %1554 = vmatpush3.bf16.msra.mxu0 %v1673_v37 }
  0x30   : > { %1601 = vmatpush3.bf16.msra.mxu1 %v1673_v37  ;;  %1555 = vmatprep.subr.bf16.mxu0 %v1674_v38 }
  0x31   : > { %1594 = vmatprep.subr.bf16.mxu1 %v1674_v38  ;;  %906 = vmatprep.mubr.bf16.mxu0 %v1676_v40 }
  0x32   : > { %971 = vmatprep.mubr.bf16.mxu1 %v1678_v41 }
  0x33   : > { %1556 = vmatpush3.bf16.msra.mxu0 %v1675_v39 }
  0x34   : > { %1602 = vmatpush3.bf16.msra.mxu1 %v1675_v39  ;;  %1557 = vmatprep.subr.bf16.mxu0 %v1682_v44 }
  0x35   : > { %1595 = vmatprep.subr.bf16.mxu1 %v1682_v44 }
  0x36   : > { %907 = vmatmul.mubr.bf16.gmra.mxu0 %v1680_v42 }
  0x37   : > { %972 = vmatmul.mubr.bf16.gmra.mxu1 %v1681_v43  ;;  %1558 = vmatpush3.bf16.msra.mxu0 %v1683_v45 }
  0x38   : > { %1603 = vmatpush3.bf16.msra.mxu1 %v1683_v45  ;;  %1559 = vmatprep.subr.bf16.mxu0 %v1684_v46 }
  0x39   : > { %1596 = vmatprep.subr.bf16.mxu1 %v1684_v46  ;;  %914 = vmatprep.mubr.bf16.mxu0 %v1686_v48 }
  0x3a   : > { %979 = vmatprep.mubr.bf16.mxu1 %v1688_v49 }
  0x3b   : > { %1560 = vmatpush3.bf16.msra.mxu0 %v1685_v47 }
  0x3c   : > { %1604 = vmatpush3.bf16.msra.mxu1 %v1685_v47  ;;  %1561 = vmatprep.subr.bf16.mxu0 %v1692_v51 }
  0x3d   : > { %1597 = vmatprep.subr.bf16.mxu1 %v1692_v51 }
  0x3e   : > { %915 = vmatmul.mubr.bf16.gmra.mxu0 %v1690_v50 }
  0x3f   : > { %980 = vmatmul.mubr.bf16.gmra.mxu1 %v1691_v52  ;;  %1562 = vmatpush3.bf16.msra.mxu0 %v1693_v53 }
  0x40   : > { %922 = vmatprep.mubr.bf16.mxu0 %v1696_v55  ;;  %1605 = vmatpush3.bf16.msra.mxu1 %v1693_v53 }
  0x41   : > { %1563 = vmatprep.subr.bf16.mxu0 %v1694_v54  ;;  %1598 = vmatprep.subr.bf16.mxu1 %v1694_v54 }
  0x42   : > { %987 = vmatprep.mubr.bf16.mxu1 %v1698_v56 }
  0x43   : > { %1564 = vmatpush3.bf16.msra.mxu0 %v1695_v57 }
  0x44   : > { %1606 = vmatpush3.bf16.msra.mxu1 %v1695_v57  ;;  %1565 = vmatprep.subr.bf16.mxu0 %v1702_v58 }
  0x45   : > { %1599 = vmatprep.subr.bf16.mxu1 %v1702_v58 }
  0x46   : > { %923 = vmatmul.mubr.bf16.gmra.mxu0 %v1700_v59 }
  0x47   : > { %988 = vmatmul.mubr.bf16.gmra.mxu1 %v1701_v60  ;;  %1028 = vmatprep.mubr.bf16.mxu0 %v1708_v63 }
  0x48   : > { %1566 = vmatpush3.bf16.msra.mxu0 %v1703_v61  ;;  %1607 = vmatpush3.bf16.msra.mxu1 %v1703_v61 }
  0x49   : > { %1567 = vmatprep.subr.bf16.mxu0 %v1704_v62  ;;  %1600 = vmatprep.subr.bf16.mxu1 %v1704_v62 }
  0x4a   : > { %1044 = vmatprep.mubr.bf16.mxu1 %v1711_v0 }
  0x4c   : > { %1568 = vmatpush3.bf16.msra.mxu0 %v1705_v1  ;;  %1608 = vmatpush3.bf16.msra.mxu1 %v1705_v1 }
  0x4f   : > { %1029 = vmatmul.mubr.bf16.vlgmr.msra.gmra.mxu0 %v1706_v2  ;;  %1045 = vmatmul.mubr.bf16.vlgmr.msra.gmra.mxu1 %v1709_v3 }
  0x50   : > { %1036 = vmatprep.mubr.bf16.mxu0 %v1712_v4  ;;  %1052 = vmatprep.mubr.bf16.mxu1 %v1714_v5 }
  0x57   : > { %1037 = vmatmul.mubr.bf16.gmra.mxu0 %v1716_v6  ;;  %1053 = vmatmul.mubr.bf16.gmra.mxu1 %v1717_v7 }
  0xee   : > { %v1489_v8 = vpop.f32.mrf.mxu0 }
  0xef   : > { %v1529_v9 = vpop.f32.mrf.mxu1 }
  0xf0   : > { %v1490_v10 = vpop.f32.mrf.mxu0 }
  0xf1   : > { %v1530_v11 = vpop.f32.mrf.mxu1  ;;  %v1491_v42 = vadd.f32 %v1490_v10, %v1489_v8 }
  0xf2   : > { %v1492_v12 = vpop.f32.mrf.mxu0  ;;  %v1531_v43 = vadd.f32 %v1530_v11, %v1529_v9 }
  0xf3   : > { %v1532_v13 = vpop.f32.mrf.mxu1 }
  0xf4   : > { %v1493_v14 = vpop.f32.mrf.mxu0  ;;  %v966_v55 = vadd.f32 %v1531_v43, %v1491_v42 }
  0xf5   : > { %v1533_v15 = vpop.f32.mrf.mxu1  ;;  %v1494_v45 = vadd.f32 %v1493_v14, %v1492_v12 }
  0xf6   : > { %v1495_v16 = vpop.f32.mrf.mxu0  ;;  %v1534_v46 = vadd.f32 %v1533_v15, %v1532_v13 }
  0xf7   : > { %v1535_v17 = vpop.f32.mrf.mxu1 }
  0xf8   : > { %v1496_v18 = vpop.f32.mrf.mxu0  ;;  %v969_v58 = vadd.f32 %v1534_v46, %v1494_v45 }
  0xf9   : > { %v1536_v19 = vpop.f32.mrf.mxu1  ;;  %v1497_v59 = vadd.f32 %v1496_v18, %v1495_v16 }
  0xfa   : > { %v1498_v20 = vpop.f32.mrf.mxu0  ;;  %v1537_v60 = vadd.f32 %v1536_v19, %v1535_v17 }
  0xfb   : > { %v1538_v21 = vpop.f32.mrf.mxu1 }
  0xfc   : > { %v1499_v22 = vpop.f32.mrf.mxu0  ;;  %v974_v11 = vadd.f32 %v1537_v60, %v1497_v59 }
  0xfd   : > { %v1539_v23 = vpop.f32.mrf.mxu1  ;;  %v1500_v6 = vadd.f32 %v1499_v22, %v1498_v20 }
  0xfe   : > { %v1501_v24 = vpop.f32.mrf.mxu0  ;;  %v1540_v7 = vadd.f32 %v1539_v23, %v1538_v21 }
  0xff   : > { %v1541_v25 = vpop.f32.mrf.mxu1 }
 0x100   : > { %v1502_v26 = vpop.f32.mrf.mxu0 }
 0x101   : > { %v1542_v27 = vpop.f32.mrf.mxu1  ;;  %v1503_v48 = vadd.f32 %v1502_v26, %v1501_v24  ;;  %v977_v24 = vadd.f32 %v1540_v7, %v1500_v6 }
 0x102   : > { %v1504_v28 = vpop.f32.mrf.mxu0  ;;  %v1543_v49 = vadd.f32 %v1542_v27, %v1541_v25 }
 0x103   : > { %v1544_v29 = vpop.f32.mrf.mxu1 }
 0x104   : > { %v1505_v30 = vpop.f32.mrf.mxu0  ;;  %v982_v63 = vadd.f32 %v1543_v49, %v1503_v48 }
 0x105   : > { %v1545_v31 = vpop.f32.mrf.mxu1  ;;  %v1506_v50 = vadd.f32 %v1505_v30, %v1504_v28 }
 0x106   : > { %v1507_v32 = vpop.f32.mrf.mxu0  ;;  %v1546_v51 = vadd.f32 %v1545_v31, %v1544_v29 }
 0x107   : > { %v1547_v33 = vpop.f32.mrf.mxu1 }
 0x108   : > { %v1508_v34 = vpop.f32.mrf.mxu0  ;;  %v985_v0 = vadd.f32 %v1546_v51, %v1506_v50 }
 0x109   : > { %v1548_v35 = vpop.f32.mrf.mxu1  ;;  %v1509_v12 = vadd.f32 %v1508_v34, %v1507_v32 }
 0x10a   : > { %v1510_v36 = vpop.f32.mrf.mxu0  ;;  %v1549_v16 = vadd.f32 %v1548_v35, %v1547_v33 }
 0x10b   : > { %v1550_v37 = vpop.f32.mrf.mxu1 }
 0x10c   : > { %v1511_v38 = vpop.f32.mrf.mxu0  ;;  %v990_v32 = vadd.f32 %v1549_v16, %v1509_v12 }
 0x10d   : > { %v1551_v39 = vpop.f32.mrf.mxu1  ;;  %v1512_v17 = vadd.f32 %v1511_v38, %v1510_v36 }
 0x10e   : > { %v1552_v18 = vadd.f32 %v1551_v39, %v1550_v37 }
 0x10f   : > { %v1569_v40 = vpop.f32.mrf.mxu0  ;;  %v1581_v41 = vpop.f32.mrf.mxu1 }
 0x110   : > { %v993_v33 = vadd.f32 %v1552_v18, %v1512_v17 }
 0x111   : > { %v1570_v44 = vpop.f32.mrf.mxu0  ;;  %v1582_v47 = vpop.f32.mrf.mxu1 }
 0x112   : > { %v1571_v53 = vadd.f32 %v1570_v44, %v1569_v40  ;;  %v1583_v56 = vadd.f32 %v1582_v47, %v1581_v41 }
 0x113   : > { %v1572_v52 = vpop.f32.mrf.mxu0  ;;  %v1584_v54 = vpop.f32.mrf.mxu1 }
 0x114   : > { %v1031_v3 = vadd.f32 %v1571_v53, %v966_v55  ;;  %v1047_v8 = vadd.f32 %v1583_v56, %v982_v63 }
 0x115   : > { %v1573_v57 = vpop.f32.mrf.mxu0  ;;  %v1585_v62 = vpop.f32.mrf.mxu1 }
 0x116   : > { %v1574_v61 = vadd.f32 %v1573_v57, %v1572_v52  ;;  %v1586_v1 = vadd.f32 %v1585_v62, %v1584_v54  ;;  %v1141_v27 = vmul.f32 %v1031_v3, %v1031_v3  ;;  %v1145_v45 = vmul.f32 %v1047_v8, %v1047_v8 }
 0x117   : > { %v1575_v2 = vpop.f32.mrf.mxu0  ;;  %v1587_v5 = vpop.f32.mrf.mxu1 }
 0x118   : > { %v1034_v4 = vadd.f32 %v1574_v61, %v969_v58  ;;  %v1050_v9 = vadd.f32 %v1586_v1, %v985_v0 }
 0x119   : > { %v1576_v10 = vpop.f32.mrf.mxu0  ;;  %v1588_v15 = vpop.f32.mrf.mxu1 }
 0x11a   : > { %v1453_v13 = vpack.c.bf16 %v1034_v4, %v1031_v3  ;;  %v1577_v14 = vadd.f32 %v1576_v10, %v1575_v2  ;;  %v1463_v19 = vpack.c.bf16 %v1050_v9, %v1047_v8  ;;  %v1142_v21 = vmul.f32 %v1034_v4, %v1034_v4 }
 0x11b   : > { %v1578_v20 = vpop.f32.mrf.mxu0  ;;  %v1590_v23 = vpop.f32.mrf.mxu1  ;;  %v1589_v25 = vadd.f32 %v1588_v15, %v1587_v5  ;;  %v1128_v28 = vadd.f32 %v1034_v4, %v1031_v3  ;;  %v1146_v48 = vmul.f32 %v1050_v9, %v1050_v9 }
 0x11c   : > { %1454 = vst [vmem:[%s1968_s12] sm:$0xff] %v1453_v13   ;;  %v1039_v22 = vadd.f32 %v1577_v14, %v974_v11  ;;  %1471 = vst [vmem:[%s1968_s12 + $0x10] sm:$0xff] %v1463_v19   ;;  %v1149_v35 = vadd.f32 %v1142_v21, %v1141_v27 }
 0x11d   : > { %v1579_v26 = vpop.f32.mrf.mxu0  ;;  %v1591_v31 = vpop.f32.mrf.mxu1  ;;  %v1055_v38 = vadd.f32 %v1589_v25, %v990_v32 }
 0x11e   : > { %v1143_v29 = vmul.f32 %v1039_v22, %v1039_v22  ;;  %v1580_v30 = vadd.f32 %v1579_v26, %v1578_v20  ;;  %v1592_v34 = vadd.f32 %v1591_v31, %v1590_v23  ;;  %v1129_v36 = vadd.f32 %v1128_v28, %v1039_v22 }
 0x11f   : > { %v1147_v51 = vmul.f32 %v1055_v38, %v1055_v38 }
 0x120   : > { %v1042_v37 = vadd.f32 %v1580_v30, %v977_v24  ;;  %v1058_v39 = vadd.f32 %v1592_v34, %v993_v33  ;;  %v1150_v40 = vadd.f32 %v1149_v35, %v1143_v29 }
 0x122   : > { %v1458_v41 = vpack.c.bf16 %v1042_v37, %v1039_v22  ;;  %v1130_v42 = vadd.f32 %v1129_v36, %v1042_v37  ;;  %v1144_v43 = vmul.f32 %v1042_v37, %v1042_v37  ;;  %v1468_v44 = vpack.c.bf16 %v1058_v39, %v1055_v38 }
 0x123   : > { %v1148_v55 = vmul.f32 %v1058_v39, %v1058_v39 }
 0x124   : > { %1470 = vst [vmem:[%s1968_s12 + $0x8] sm:$0xff] %v1458_v41   ;;  %v1131_v46 = vadd.f32 %v1130_v42, %v1047_v8  ;;  %v1151_v47 = vadd.f32 %v1150_v40, %v1144_v43  ;;  %1472 = vst [vmem:[%s1968_s12 + $0x18] sm:$0xff] %v1468_v44  }
 0x126   : > { %v1152_v49 = vadd.f32 %v1151_v47, %v1145_v45  ;;  %v1132_v50 = vadd.f32 %v1131_v46, %v1050_v9 }
 0x128   : > { %v1133_v52 = vadd.f32 %v1132_v50, %v1055_v38  ;;  %v1153_v53 = vadd.f32 %v1152_v49, %v1146_v48 }
 0x12a   : > { %v1134_v54 = vadd.f32 %v1133_v52, %v1058_v39  ;;  %v1154_v56 = vadd.f32 %v1153_v53, %v1147_v51 }
 0x12c   : > { %v1135_v57 = vrot.slane %v1134_v54, 4  ;;  %v1155_v58 = vadd.f32 %v1154_v56, %v1148_v55 }
 0x12e   : > { %v1136_v59 = vadd.f32 %v1135_v57, %v1134_v54  ;;  %v1156_v60 = vrot.slane %v1155_v58, 4 }
 0x130   : > { %v1137_v61 = vrot.slane %v1136_v59, 2  ;;  %v1157_v62 = vadd.f32 %v1156_v60, %v1155_v58 }
 0x132   : > { %v1138_v63 = vadd.f32 %v1137_v61, %v1136_v59  ;;  %v1158_v0 = vrot.slane %v1157_v62, 2 }
 0x134   : > { %v1139_v1 = vrot.slane %v1138_v63, 1  ;;  %v1159_v2 = vadd.f32 %v1158_v0, %v1157_v62 }
 0x136   : > { %v1140_v3 = vadd.f32 %v1139_v1, %v1138_v63  ;;  %v1160_v4 = vrot.slane %v1159_v2, 1 }
 0x138   : > { %v1161_v5 = vadd.f32 %v1160_v4, %v1159_v2  ;;  %1162 = vst [vmem:[%s309_s20] sm:$0xff] %v1140_v3 }
 0x13a   : > { %1163 = vst [vmem:[%s316_s23] sm:$0xff] %v1161_v5 }
 0x13b PF: > { %s15_s17 = sadd.s32 1, %s1740_s17   ;;  %s1996_s15 = smov %s1736_s16 }
 0x13c   : > { %p12_p6 = scmp.ge.s32.totalorder %s15_s17, 4   ;;  %s1997_s16 = smov %s1999_s18 }
 0x13e   :  { %14 = sbr.rel (!%p12_p6) target bundleno = 2 (0x2), region = 93 }

// kernel: generator_forward.32
= control target key start
LH: loop header
LB: loop body
LE: loop exit
PB: predicated region body
PF: predicated region fallthrough
CT: control target
= control target key end

     0   :  { %s348_s12 = smov 0   ;;  %s374_s0 = inlined_call_operand.vmem [shape: bf16[32,256], index: 0, kind: input, shape index: {}]   ;;  %s375_s1 = inlined_call_operand.vmem [shape: f32[1,256], index: 1, kind: input, shape index: {}]   ;;  %s376_s2 = inlined_call_operand.vmem [shape: f32[1,256], index: 2, kind: input, shape index: {}]   ;;  %s377_s3 = inlined_call_operand.vmem [shape: bf16[32,256], index: 3, kind: output, shape index: {}]  }
   0x1 LB: > { %s293_s13 = sadd.s32 4294967295, %s326_s12   ;;  %p297_p0 = scmp.ge.s32.totalorder %s326_s12, 1  ;;  %s326_s12 = sphi %s348_s12, %s13_s12  }
   0x2   : > { %p139_p1 = scmp.lt.s32.totalorder %s326_s12, 3 }
   0x4   : > { %p140_p2 = pnand %p297_p0, %p139_p1 }
   0x5   : > { %s298_s14 = sshll.u32 (!%p140_p2), %s293_s13, 1 }
   0x6   : > { %143 = sbr.rel (%p140_p2) target bundleno = 28 (0x1c), region = 32  ;;  %p166_p3 = scmp.lt.s32.totalorder (!%p140_p2), %s298_s14, 3 }
   0xb   : > { %v187_v0 = vlaneseq  ;;  %s379_s14 = smov (!%p166_p3, %s298_s14), 3  ;;  %v185_v2 = vld [vmem:[%s375_s1] sm:$0x3] }
   0xc   : > { %v201_v5 = vld [vmem:[%s376_s2] sm:$0x3]  ;;  %s308_s19 = sshll.u32 %s379_s14, 3 }
   0xd   : > { %v188_v1 = vshrl.u32 %v187_v0, 7  ;;  %s170_s22 = scalar_lea.vmem %s374_s0, %s308_s19  ;;  %s177_s25 = scalar_lea.vmem %s377_s3, %s308_s19 }
   0xe   : > { %v179_v8 = vld [vmem:[%s170_s22] sm:$0xff]  ;;  %v180_v9 = vld [vmem:[%s170_s22 + $0x8] sm:$0xff] }
   0xf   : > { %v189_v3 = vsub.s32 0, %v188_v1  ;;  %v193_v4 = vsub.s32 1, %v188_v1  ;;  %v181_v12 = vunpack.c.l.bf16 %v179_v8  ;;  %v182_v13 = vunpack.c.h.bf16 %v179_v8 }
  0x10   : > { %v183_v14 = vunpack.c.l.bf16 %v180_v9  ;;  %v184_v15 = vunpack.c.h.bf16 %v180_v9 }
  0x11   : > { %v190_v6 = vrot.slane %v185_v2, %v189_v3  ;;  %v194_v7 = vrot.slane %v185_v2, %v193_v4  ;;  %v206_v10 = vrot.slane %v201_v5, %v189_v3  ;;  %v210_v11 = vrot.slane %v201_v5, %v193_v4 }
  0x13   : > { %v197_v16 = vmul.f32 %v190_v6, %v181_v12  ;;  %v198_v17 = vmul.f32 %v194_v7, %v182_v13  ;;  %v199_v18 = vmul.f32 %v190_v6, %v183_v14  ;;  %v200_v19 = vmul.f32 %v194_v7, %v184_v15 }
  0x15   : > { %v213_v20 = vadd.f32 %v206_v10, %v197_v16  ;;  %v214_v21 = vadd.f32 %v210_v11, %v198_v17  ;;  %v215_v22 = vadd.f32 %v206_v10, %v199_v18  ;;  %v216_v23 = vadd.f32 %v210_v11, %v200_v19 }
  0x17   : > { %v217_v24 = vmax.f32 %v213_v20, 0.0  ;;  %v218_v25 = vmax.f32 %v214_v21, 0.0  ;;  %v219_v26 = vmax.f32 %v215_v22, 0.0  ;;  %v220_v27 = vmax.f32 %v216_v23, 0.0 }
  0x19   : > { %v310_v28 = vpack.c.bf16 %v218_v25, %v217_v24  ;;  %v311_v29 = vpack.c.bf16 %v220_v27, %v219_v26 }
  0x1b   : > { %233 = vst [vmem:[%s177_s25] sm:$0xff] %v310_v28  ;;  %234 = vst [vmem:[%s177_s25 + $0x8] sm:$0xff] %v311_v29 }
  0x1c PF: > { %s13_s12 = sadd.s32 1, %s326_s12  }
  0x1d   : > { %p10_p4 = scmp.ge.s32.totalorder %s13_s12, 4  }
  0x1f   :  { %12 = sbr.rel (!%p10_p4) target bundleno = 1 (0x1), region = 62 }

// kernel: generator_forward.31
= control target key start
LH: loop header
LB: loop body
LE: loop exit
PB: predicated region body
PF: predicated region fallthrough
CT: control target
= control target key end

     0   :  { %s1614_s0 = inlined_call_operand.vmem [shape: bf16[32,1280], index: 0, kind: input, shape index: {}]   ;;  %s1615_s1 = inlined_call_operand.vmem [shape: bf16[1280,256], index: 1, kind: input, shape index: {}]   ;;  %s1616_s2 = inlined_call_operand.vmem [shape: bf16[32,256], index: 2, kind: output, shape index: {0}]   ;;  %s1617_s3 = inlined_call_operand.vmem [shape: f32[16,256], index: 3, kind: output, shape index: {1}]   ;;  %s1618_s4 = inlined_call_operand.vmem [shape: f32[16,256], index: 4, kind: output, shape index: {2}]  }
   0x1   :  { %1624 = sst [smem:[#allocation12_spill]] %s1614_s0 }
   0x2   :  { %1625 = sst [smem:[#allocation13_spill]] %s1615_s1 }
   0x3   :  { %1626 = sst [smem:[#allocation14_spill]] %s1616_s2 }
   0x4   :  { %1627 = sst [smem:[#allocation15_spill]] %s1618_s4 }
   0x5   :  { %s1308_s15 = smov 0   ;;  %s1310_s16 = smov 0  }
   0x6   :  { %s1312_s17 = smov 0   ;;  %s1314_s18 = smov 0  }
   0x7   :  { %s1316_s19 = smov 0   ;;  %s1318_s20 = smov 0  }
   0x8   :  { %s1320_s21 = smov 0   ;;  %s1322_s22 = smov 0  }
   0x9   :  { %s1324_s23 = smov 0   ;;  %s1326_s24 = smov 0  }
   0xa   :  { %s1328_s25 = smov 0   ;;  %s1330_s26 = smov 0  }
   0xb   :  { %s1332_s27 = smov 0  }
   0xc LB: > { %1628 = sst [smem:[#allocation6_spill]] %s1256_s21  ;;  %s27_s29 = sadd.s32 1, %s1268_s24  ;;  %s1280_s27 = sphi %s1332_s27, %s15_s27   ;;  %s1276_s26 = sphi %s1330_s26, %s1649_s26   ;;  %s1272_s25 = sphi %s1328_s25, %s1648_s25   ;;  %s1268_s24 = sphi %s1326_s24, %s1657_s24   ;;  %s1264_s23 = sphi %s1324_s23, %s1646_s23   ;;  %s1260_s22 = sphi %s1322_s22, %s1645_s22   ;;  %s1256_s21 = sphi %s1320_s21, %s1656_s21   ;;  %s1252_s20 = sphi %s1318_s20, %s1655_s20   ;;  %s1248_s19 = sphi %s1316_s19, %s1654_s19   ;;  %s1244_s18 = sphi %s1314_s18, %s1653_s18   ;;  %s1240_s17 = sphi %s1312_s17, %s1652_s17   ;;  %s1236_s16 = sphi %s1310_s16, %s1651_s16   ;;  %s1232_s15 = sphi %s1308_s15, %s1650_s15  }
   0xd   : > { %1629 = sst [smem:[#allocation7_spill]] %s1272_s25  ;;  %p28_p0 = scmp.ge.s32.totalorder %s27_s29, 5 }
   0xe   : > { %1630 = sst [smem:[#allocation8_spill]] %s1276_s26  ;;  %s30_s30 = sadd.s32 1, %s1272_s25 }
   0xf   : > { %s34_s5 = sadd.s32 1, %s1276_s26  ;;  %s43_s6 = sadd.s32 1, %s1252_s20 }
  0x10   : > { %s1659_s29 = smov (%p28_p0, %s27_s29), 0  ;;  %s1661_s30 = smov (!%p28_p0, %s30_s30), %s1272_s25 }
  0x11   : > { %1631 = sst [smem:[#allocation9_spill]] %s1659_s29  ;;  %s39_s7 = ssub.s32 %s1268_s24, %s1659_s29 }
  0x12   : > { %p50_p1 = scmp.ne.s32.totalorder %s1252_s20, %s1248_s19  ;;  %p32_p2 = scmp.ge.s32.totalorder %s1661_s30, 2 }
  0x13   : > { %p51_p3 = scmp.eq.s32.totalorder %s1280_s27, 0  ;;  %s71_s8 = sadd.s32 1, %s1244_s18 }
  0x14   : > { %p78_p4 = scmp.ne.s32.totalorder %s1244_s18, %s1240_s17  ;;  %s1663_s30 = smov (%p32_p2, %s1661_s30), 0 }
  0x15   : > { %1632 = sst [smem:[#allocation10_spill]] %s1663_s30  ;;  %s1665_s5 = smov (!%p32_p2, %s34_s5), %s1276_s26 }
  0x16   : > { %p1392_p5 = por %p51_p3, %p50_p1  ;;  %s67_s10 = ssub.s32 %s1272_s25, %s1663_s30 }
  0x17   : > { %p36_p6 = scmp.ge.s32.totalorder %s1665_s5, 2  ;;  %s68_s11 = sor.u32 %s67_s10, %s39_s7 }
  0x18   : > { %p69_p7 = scmp.eq.s32.totalorder %s68_s11, 0  ;;  %p1398_p8 = por %p78_p4, %p51_p3 }
  0x19   : > { %s1667_s5 = smov (%p36_p6, %s1665_s5), 0  ;;  %s99_s28 = sadd.s32 1, %s1236_s16 }
  0x1a   : > { %1635 = sst [smem:[#allocation11_spill]] %s1667_s5  ;;  %s38_s14 = ssub.s32 %s1276_s26, %s1667_s5 }
  0x1b   : > { %s1405_s13 = scalar_select %p69_p7, %s1244_s18, %s71_s8  }
  0x1c   : > { %s40_s29 = sor.u32 %s39_s7, %s38_s14  ;;  %s96_s2 = sor.u32 %s67_s10, %s38_s14 }
  0x1d   : > { %p41_p9 = scmp.eq.s32.totalorder %s40_s29, 0  ;;  %p97_p10 = scmp.eq.s32.totalorder %s96_s2, 0 }
  0x1e   : > { %p109_p11 = scmp.ne.s32.totalorder %s1236_s16, %s1232_s15  ;;  %s1636_s30 = sadd.s32 4294967295, %s1280_s27  }
  0x1f   : > { %p110_p12 = scmp.eq.s32.totalorder %s1636_s30, 19  ;;  %p976_p0 = scmp.ge.s32.totalorder %s1280_s27, 20 }
  0x20   : > { %s1415_s21 = scalar_select %p41_p9, %s1252_s20, %s43_s6  }
  0x21   : > { %s1418_s11 = scalar_select %p97_p10, %s1236_s16, %s99_s28  }
  0x22   : > { %p1420_p13 = por %p110_p12, %p109_p11  ;;  %188 = sbr.rel (%p976_p0) target bundleno = 81 (0x51), region = 16 }
  0x27   : > { %191 = sbr.rel (!%p1392_p5) target bundleno = 50 (0x32), region = 20  ;;  %s193_s2 = sand.u32 (%p1392_p5), 1, %s1252_s20  }
  0x28   : > { %s979_s29 = sshll.u32 (%p1392_p5), %s1268_s24, 1  ;;  %s977_s30 = sshll.u32 (%p1392_p5), %s193_s2, 4 }
  0x29   : > { %s1053_s6 = smul.u32 (%p1392_p5), 20, %s1276_s26  ;;  %s1638_s0 = sld [smem:[#allocation12_spill]] (%p1392_p5) }
  0x2a   : > { %s195_s5 = scalar_lea.vmem (%p1392_p5), [#allocation3], %s977_s30 }
  0x2b   : > { %s199_s7 = sadd.s32 (%p1392_p5), %s1053_s6, %s979_s29 }
  0x2c   : > { %s981_s28 = sshll.u32 %s199_s7, 2 }
  0x2f   : > { %s201_s14 = scalar_lea.vmem %s1638_s0, %s981_s28 }
  0x30   : > { %v232_v0 = vld [vmem:[%s201_s14] sm:$0xff]  ;;  %v234_v1 = vld [vmem:[%s201_s14 + $0x28] sm:$0xff] }
  0x31   : > { %233 = vst [vmem:[%s195_s5] sm:$0xff] %v232_v0  ;;  %235 = vst [vmem:[%s195_s5 + $0x8] sm:$0xff] %v234_v1 }
  0x32 PF: > { %241 = sbr.rel (!%p1398_p8) target bundleno = 81 (0x51), region = 58  ;;  %s243_s9 = sand.u32 (%p1398_p8), 1, %s1244_s18  }
  0x33   : > { %s1022_s2 = sshll.u32 (%p1398_p8), %s1268_s24, 6  ;;  %s982_s29 = sshll.u32 (%p1398_p8), %s243_s9, 7 }
  0x34   : > { %s248_s6 = sadd.s32 (%p1398_p8), %s1272_s25, %s1022_s2  ;;  %s1639_s1 = sld [smem:[#allocation13_spill]] (%p1398_p8) }
  0x35   : > { %s985_s7 = sshll.u32 (%p1398_p8), %s248_s6, 2  ;;  %s1446_s5 = scalar_lea.vmem (%p1398_p8), [#allocation4], %s982_s29 }
  0x3a   : > { %s1441_s28 = scalar_lea.vmem %s1639_s1, %s985_s7 }
  0x3b   : > { %v267_v2 = vld [vmem:[%s1441_s28] sm:$0xf]  ;;  %v269_v3 = vld [vmem:[%s1441_s28 + $0x8] sm:$0xf]  ;;  %v271_v4 = vld [vmem:[%s1441_s28 + $0x10] sm:$0xf] }
  0x3c   : > { %268 = vst [vmem:[%s1446_s5] sm:$0xf] %v267_v2  ;;  %270 = vst [vmem:[%s1446_s5 + $0x4] sm:$0xf] %v269_v3  ;;  %v273_v5 = vld [vmem:[%s1441_s28 + $0x18] sm:$0xf] }
  0x3d   : > { %272 = vst [vmem:[%s1446_s5 + $0x8] sm:$0xf] %v271_v4  ;;  %v275_v6 = vld [vmem:[%s1441_s28 + $0x20] sm:$0xf]  ;;  %v277_v7 = vld [vmem:[%s1441_s28 + $0x28] sm:$0xf] }
  0x3e   : > { %274 = vst [vmem:[%s1446_s5 + $0xc] sm:$0xf] %v273_v5  ;;  %276 = vst [vmem:[%s1446_s5 + $0x10] sm:$0xf] %v275_v6  ;;  %v279_v8 = vld [vmem:[%s1441_s28 + $0x30] sm:$0xf] }
  0x3f   : > { %278 = vst [vmem:[%s1446_s5 + $0x14] sm:$0xf] %v277_v7  ;;  %v281_v9 = vld [vmem:[%s1441_s28 + $0x38] sm:$0xf]  ;;  %v283_v10 = vld [vmem:[%s1441_s28 + $0x40] sm:$0xf] }
  0x40   : > { %280 = vst [vmem:[%s1446_s5 + $0x18] sm:$0xf] %v279_v8  ;;  %282 = vst [vmem:[%s1446_s5 + $0x1c] sm:$0xf] %v281_v9  ;;  %v285_v11 = vld [vmem:[%s1441_s28 + $0x48] sm:$0xf] }
  0x41   : > { %284 = vst [vmem:[%s1446_s5 + $0x20] sm:$0xf] %v283_v10  ;;  %v287_v12 = vld [vmem:[%s1441_s28 + $0x50] sm:$0xf]  ;;  %v289_v13 = vld [vmem:[%s1441_s28 + $0x58] sm:$0xf] }
  0x42   : > { %286 = vst [vmem:[%s1446_s5 + $0x24] sm:$0xf] %v285_v11  ;;  %288 = vst [vmem:[%s1446_s5 + $0x28] sm:$0xf] %v287_v12  ;;  %v291_v14 = vld [vmem:[%s1441_s28 + $0x60] sm:$0xf] }
  0x43   : > { %290 = vst [vmem:[%s1446_s5 + $0x2c] sm:$0xf] %v289_v13  ;;  %v293_v15 = vld [vmem:[%s1441_s28 + $0x68] sm:$0xf]  ;;  %v295_v16 = vld [vmem:[%s1441_s28 + $0x70] sm:$0xf] }
  0x44   : > { %292 = vst [vmem:[%s1446_s5 + $0x30] sm:$0xf] %v291_v14  ;;  %294 = vst [vmem:[%s1446_s5 + $0x34] sm:$0xf] %v293_v15  ;;  %v297_v17 = vld [vmem:[%s1441_s28 + $0x78] sm:$0xf] }
  0x45   : > { %296 = vst [vmem:[%s1446_s5 + $0x38] sm:$0xf] %v295_v16  ;;  %v299_v18 = vld [vmem:[%s1441_s28 + $0x80] sm:$0xf]  ;;  %v301_v19 = vld [vmem:[%s1441_s28 + $0x88] sm:$0xf] }
  0x46   : > { %298 = vst [vmem:[%s1446_s5 + $0x3c] sm:$0xf] %v297_v17  ;;  %300 = vst [vmem:[%s1446_s5 + $0x40] sm:$0xf] %v299_v18  ;;  %v303_v20 = vld [vmem:[%s1441_s28 + $0x90] sm:$0xf] }
  0x47   : > { %302 = vst [vmem:[%s1446_s5 + $0x44] sm:$0xf] %v301_v19  ;;  %v305_v21 = vld [vmem:[%s1441_s28 + $0x98] sm:$0xf]  ;;  %v307_v22 = vld [vmem:[%s1441_s28 + $0xa0] sm:$0xf] }
  0x48   : > { %304 = vst [vmem:[%s1446_s5 + $0x48] sm:$0xf] %v303_v20  ;;  %306 = vst [vmem:[%s1446_s5 + $0x4c] sm:$0xf] %v305_v21  ;;  %v309_v23 = vld [vmem:[%s1441_s28 + $0xa8] sm:$0xf] }
  0x49   : > { %308 = vst [vmem:[%s1446_s5 + $0x50] sm:$0xf] %v307_v22  ;;  %v311_v24 = vld [vmem:[%s1441_s28 + $0xb0] sm:$0xf]  ;;  %v313_v25 = vld [vmem:[%s1441_s28 + $0xb8] sm:$0xf] }
  0x4a   : > { %310 = vst [vmem:[%s1446_s5 + $0x54] sm:$0xf] %v309_v23  ;;  %312 = vst [vmem:[%s1446_s5 + $0x58] sm:$0xf] %v311_v24  ;;  %v315_v26 = vld [vmem:[%s1441_s28 + $0xc0] sm:$0xf] }
  0x4b   : > { %314 = vst [vmem:[%s1446_s5 + $0x5c] sm:$0xf] %v313_v25  ;;  %v317_v27 = vld [vmem:[%s1441_s28 + $0xc8] sm:$0xf]  ;;  %v319_v28 = vld [vmem:[%s1441_s28 + $0xd0] sm:$0xf] }
  0x4c   : > { %316 = vst [vmem:[%s1446_s5 + $0x60] sm:$0xf] %v315_v26  ;;  %318 = vst [vmem:[%s1446_s5 + $0x64] sm:$0xf] %v317_v27  ;;  %v321_v29 = vld [vmem:[%s1441_s28 + $0xd8] sm:$0xf] }
  0x4d   : > { %320 = vst [vmem:[%s1446_s5 + $0x68] sm:$0xf] %v319_v28  ;;  %v323_v30 = vld [vmem:[%s1441_s28 + $0xe0] sm:$0xf]  ;;  %v325_v31 = vld [vmem:[%s1441_s28 + $0xe8] sm:$0xf] }
  0x4e   : > { %322 = vst [vmem:[%s1446_s5 + $0x6c] sm:$0xf] %v321_v29  ;;  %324 = vst [vmem:[%s1446_s5 + $0x70] sm:$0xf] %v323_v30  ;;  %v327_v32 = vld [vmem:[%s1441_s28 + $0xf0] sm:$0xf] }
  0x4f   : > { %326 = vst [vmem:[%s1446_s5 + $0x74] sm:$0xf] %v325_v31  ;;  %v329_v33 = vld [vmem:[%s1441_s28 + $0xf8] sm:$0xf]  ;;  %328 = vst [vmem:[%s1446_s5 + $0x78] sm:$0xf] %v327_v32 }
  0x50   : > { %330 = vst [vmem:[%s1446_s5 + $0x7c] sm:$0xf] %v329_v33 }
  0x51 PF: > { %p986_p1 = scmp.ge.s32.totalorder %s1280_s27, 1  ;;  %p417_p2 = scmp.lt.s32.totalorder %s1280_s27, 21 }
  0x53   : > { %p418_p3 = pnand %p986_p1, %p417_p2 }
  0x54   : > { %s424_s26 = sand.u32 (!%p418_p3), 1, %s1248_s19   ;;  %s431_s12 = sand.u32 (!%p418_p3), 1, %s1240_s17  }
  0x55   : > { %421 = sbr.rel (%p418_p3) target bundleno = 378 (0x17a), region = 99  ;;  %s1513_s30 = sshll.u32 (!%p418_p3), %s424_s26, 4 }
  0x56   : > { %s988_s10 = sshll.u32 (!%p418_p3), %s431_s12, 7  ;;  %s452_s14 = sand.u32 (!%p418_p3), 1, %s1232_s15  }
  0x57   : > { %p479_p4 = scmp.lt.s32.totalorder (!%p418_p3), %s1264_s23, 1  ;;  %s989_s9 = sshll.u32 (!%p418_p3), %s452_s14, 3 }
  0x58   : > { %p481_p5 = scmp.lt.s32.totalorder (!%p418_p3), %s1260_s22, 1  ;;  %s1640_s26 = sld [smem:[#allocation15_spill]] (!%p418_p3) }
  0x59   : > { %s426_s12 = scalar_lea.vmem (!%p418_p3), [#allocation3], %s1513_s30  ;;  %s1531_s15 = scalar_lea.vmem (!%p418_p3), [#allocation4], %s988_s10 }
  0x5a   : > { %s480_s2 = scalar_select %p479_p4, %s1264_s23, 1 }
  0x5b   : > { %s482_s29 = scalar_select %p481_p5, %s1260_s22, 1 }
  0x5c   : > { %s990_s6 = sshll.u32 %s480_s2, 1  ;;  %s1533_s14 = scalar_lea.vmem [#allocation5], %s989_s9 }
  0x5d   : > { %s484_s7 = sadd.s32 %s990_s6, %s482_s29  ;;  %s1641_s25 = sld [smem:[#allocation6_spill]] }
  0x5e   : > { %s991_s8 = sshll.u32 %s484_s7, 3 }
  0x5f   : > { %s1523_s0 = scalar_lea.vmem %s1617_s3, %s991_s8  ;;  %s1528_s1 = scalar_lea.vmem %s1640_s26, %s991_s8 }
  0x63   : > { %p994_p6 = scmp.ne.s32.totalorder %s1641_s25, 0 }
  0x65   : > { %499 = sbr.rel (%p994_p6) target bundleno = 108 (0x6c), region = 111 }
  0x6a   : > { %v1282_v34 = vmov 0.0  }
  0x6b   : > { %500 = vst [vmem:[#allocation2] sm:$0xff] %v1282_v34  ;;  %501 = vst [vmem:[#allocation2 + $0x8] sm:$0xff] %v1282_v34 }
  0x6c PF: > { %v1159_v35 = vld [vmem:[%s1531_s15 + $0x78] sm:$0xff]   ;;  %v1161_v37 = vld [vmem:[%s1531_s15 + $0x70] sm:$0xff]   ;;  %v1163_v39 = vld [vmem:[%s1531_s15 + $0x68] sm:$0xff]   ;;  %s1642_s25 = sld [smem:[#allocation6_spill]] }
  0x6d   : > { %v1160_v36 = vld [vmem:[%s1531_s15 + $0x38] sm:$0xff]   ;;  %1031 = vmatprep.subr.bf16.mxu0 %v1159_v35  ;;  %v1162_v38 = vld [vmem:[%s1531_s15 + $0x30] sm:$0xff]   ;;  %v1164_v40 = vld [vmem:[%s1531_s15 + $0x28] sm:$0xff]  }
  0x6e   : > { %1032 = vmatpush3.bf16.msra.mxu0 %v1160_v36  ;;  %v1165_v41 = vld [vmem:[%s1531_s15 + $0x60] sm:$0xff]   ;;  %v1167_v43 = vld [vmem:[%s1531_s15 + $0x58] sm:$0xff]   ;;  %v1169_v45 = vld [vmem:[%s1531_s15 + $0x50] sm:$0xff]  }
  0x6f   : > { %1033 = vmatprep.subr.bf16.mxu0 %v1161_v37  ;;  %v1166_v42 = vld [vmem:[%s1531_s15 + $0x20] sm:$0xff]   ;;  %v1168_v44 = vld [vmem:[%s1531_s15 + $0x18] sm:$0xff]   ;;  %v1170_v47 = vld [vmem:[%s1531_s15 + $0x10] sm:$0xff]  }
  0x70   : > { %v1177_v46 = vld [vmem:[%s426_s12 + $0x4] ss:$8 sps:$4 sm:$0xff]   ;;  %v1175_v52 = vld [vmem:[%s426_s12] ss:$8 sps:$4 sm:$0xff]  }
  0x71   : > { %676 = vmatprep.mubr.bf16.mxu0 %v1177_v46  ;;  %v1171_v48 = vld [vmem:[%s1531_s15 + $0x48] sm:$0xff]   ;;  %v1173_v50 = vld [vmem:[%s1531_s15 + $0x40] sm:$0xff]  }
  0x72   : > { %1034 = vmatpush3.bf16.msra.mxu0 %v1162_v38  ;;  %v1172_v49 = vld [vmem:[%s1531_s15 + $0x8] sm:$0xff]   ;;  %v1174_v51 = vld [vmem:[%s1531_s15] sm:$0xff]   ;;  %v502_v54 = vld [vmem:[#allocation2] sm:$0xff]  ;;  %p1013_p7 = scmp.ne.s32.totalorder %s1642_s25, 4 }
  0x73   : > { %1035 = vmatprep.subr.bf16.mxu0 %v1163_v39  ;;  %v503_v59 = vld [vmem:[#allocation2 + $0x8] sm:$0xff] }
  0x76   : > { %1036 = vmatpush3.bf16.msra.mxu0 %v1164_v40 }
  0x77   : > { %1037 = vmatprep.subr.bf16.mxu0 %v1165_v41 }
  0x7a   : > { %1038 = vmatpush3.bf16.msra.mxu0 %v1166_v42 }
  0x7b   : > { %1039 = vmatprep.subr.bf16.mxu0 %v1167_v43 }
  0x7e   : > { %1040 = vmatpush3.bf16.msra.mxu0 %v1168_v44 }
  0x7f   : > { %1041 = vmatprep.subr.bf16.mxu0 %v1169_v45 }
  0x82   : > { %1042 = vmatpush3.bf16.msra.mxu0 %v1170_v47 }
  0x83   : > { %1043 = vmatprep.subr.bf16.mxu0 %v1171_v48 }
  0x86   : > { %1044 = vmatpush3.bf16.msra.mxu0 %v1172_v49 }
  0x87   : > { %1045 = vmatprep.subr.bf16.mxu0 %v1173_v50 }
  0x8a   : > { %1046 = vmatpush3.bf16.msra.mxu0 %v1174_v51 }
  0x8d   : > { %677 = vmatmul.mubr.bf16.vlgmr.msra.gmra.mxu0 %v1175_v52 }
 0x14d   : > { %v1047_v53 = vpop.f32.mrf.mxu0 }
 0x14f   : > { %v1048_v55 = vpop.f32.mrf.mxu0 }
 0x150   : > { %v1049_v56 = vadd.f32 %v1048_v55, %v1047_v53 }
 0x151   : > { %v1050_v57 = vpop.f32.mrf.mxu0 }
 0x152   : > { %v685_v58 = vadd.f32 %v1049_v56, %v502_v54 }
 0x153   : > { %v1051_v60 = vpop.f32.mrf.mxu0 }
 0x154   : > { %687 = vst [vmem:[#allocation2] sm:$0xff] %v685_v58  ;;  %v1052_v61 = vadd.f32 %v1051_v60, %v1050_v57  ;;  %692 = sbr.rel (%p1013_p7) target bundleno = 369 (0x171), region = 115 }
 0x156   : > { %v686_v62 = vadd.f32 %v1052_v61, %v503_v59 }
 0x158   : > { %688 = vst [vmem:[#allocation2 + $0x8] sm:$0xff] %v686_v62 }
 0x15b   : > { %v693_v63 = vld [vmem:[#allocation2] sm:$0xff] }
 0x15c   : > { %v712_v3 = vmul.f32 %v693_v63, %v693_v63 }
 0x15f   : > { %v694_v0 = vld [vmem:[#allocation2 + $0x8] sm:$0xff] }
 0x160   : > { %v1029_v1 = vpack.c.bf16 %v694_v0, %v693_v63  ;;  %v705_v2 = vadd.f32 %v694_v0, %v693_v63  ;;  %v713_v4 = vmul.f32 %v694_v0, %v694_v0 }
 0x162   : > { %1030 = vst [vmem:[%s1533_s14] sm:$0xff] %v1029_v1   ;;  %v706_v5 = vrot.slane %v705_v2, 4  ;;  %v714_v6 = vadd.f32 %v713_v4, %v712_v3 }
 0x164   : > { %v707_v7 = vadd.f32 %v706_v5, %v705_v2  ;;  %v715_v8 = vrot.slane %v714_v6, 4 }
 0x166   : > { %v708_v9 = vrot.slane %v707_v7, 2  ;;  %v716_v10 = vadd.f32 %v715_v8, %v714_v6 }
 0x168   : > { %v709_v11 = vadd.f32 %v708_v9, %v707_v7  ;;  %v717_v12 = vrot.slane %v716_v10, 2 }
 0x16a   : > { %v710_v13 = vrot.slane %v709_v11, 1  ;;  %v718_v14 = vadd.f32 %v717_v12, %v716_v10 }
 0x16c   : > { %v711_v15 = vadd.f32 %v710_v13, %v709_v11  ;;  %v719_v16 = vrot.slane %v718_v14, 1 }
 0x16e   : > { %721 = vst [vmem:[%s1523_s0] sm:$0xff] %v711_v15  ;;  %v720_v17 = vadd.f32 %v719_v16, %v718_v14 }
 0x170   : > { %722 = vst [vmem:[%s1528_s1] sm:$0xff] %v720_v17 }
 0x171 PF: > { %745 = sbr.rel (!%p1420_p13) target bundleno = 378 (0x17a), region = 119  ;;  %s1025_s30 = sshll.u32 (%p1420_p13), %s1264_s23, 2  ;;  %v767_v18 = vld [vmem:[%s1533_s14] sm:$0xf] (%p1420_p13)  ;;  %v769_v19 = vld [vmem:[%s1533_s14 + $0x4] sm:$0xf] (%p1420_p13) }
 0x172   : > { %s748_s10 = sadd.s32 (%p1420_p13), %s1260_s22, %s1025_s30  ;;  %s1643_s6 = sld [smem:[#allocation14_spill]] (%p1420_p13) }
 0x173   : > { %s1019_s9 = sshll.u32 (%p1420_p13), %s748_s10, 2 }
 0x178   : > { %s750_s7 = scalar_lea.vmem %s1643_s6, %s1019_s9 }
 0x179   : > { %768 = vst [vmem:[%s750_s7] sm:$0xf] %v767_v18  ;;  %770 = vst [vmem:[%s750_s7 + $0x8] sm:$0xf] %v769_v19 }
 0x17a PF: > { %s15_s27 = sadd.s32 1, %s1280_s27   ;;  %s1645_s22 = sld [smem:[#allocation7_spill]] }
 0x17b   : > { %p1570_p8 = scmp.ge.s32.totalorder %s15_s27, 22   ;;  %s1646_s23 = sld [smem:[#allocation8_spill]] }
 0x17c   : > { %s1647_s1 = sld [smem:[#allocation9_spill]]  ;;  %s1650_s15 = smov %s1236_s16 }
 0x17d   : > { %s1648_s25 = sld [smem:[#allocation10_spill]]  ;;  %s1651_s16 = smov %s1418_s11 }
 0x17e   : > { %s1649_s26 = sld [smem:[#allocation11_spill]]  ;;  %s1652_s17 = smov %s1244_s18 }
 0x17f   : > { %s1653_s18 = smov %s1405_s13  ;;  %s1654_s19 = smov %s1252_s20 }
 0x180   : > { %s1655_s20 = smov %s1415_s21  ;;  %s1656_s21 = smov %s1268_s24 }
 0x181   :  { %14 = sbr.rel (!%p1570_p8) target bundleno = 12 (0xc), region = 223 }
 0x182   : > { %s1657_s24 = smov %s1647_s1 }

// kernel: generator_forward.36
= control target key start
LH: loop header
LB: loop body
LE: loop exit
PB: predicated region body
PF: predicated region fallthrough
CT: control target
= control target key end

     0   :  { %s431_s15 = smov 0   ;;  %s462_s0 = inlined_call_operand.vmem [shape: bf16[32,256], index: 0, kind: input, shape index: {}]   ;;  %s463_s1 = inlined_call_operand.vmem [shape: bf16[32,256], index: 1, kind: input, shape index: {}]   ;;  %s464_s2 = inlined_call_operand.vmem [shape: f32[1,256], index: 2, kind: input, shape index: {}]   ;;  %s465_s3 = inlined_call_operand.vmem [shape: f32[1,256], index: 3, kind: input, shape index: {}]   ;;  %s466_s4 = inlined_call_operand.vmem [shape: bf16[32,256], index: 4, kind: output, shape index: {}]  }
   0x1 LB: > { %s367_s16 = sadd.s32 4294967295, %s404_s15   ;;  %p371_p0 = scmp.ge.s32.totalorder %s404_s15, 1  ;;  %s404_s15 = sphi %s431_s15, %s14_s15  }
   0x2   : > { %p176_p1 = scmp.lt.s32.totalorder %s404_s15, 3 }
   0x4   : > { %p177_p2 = pnand %p371_p0, %p176_p1 }
   0x5   : > { %s372_s17 = sshll.u32 (!%p177_p2), %s367_s16, 1 }
   0x6   : > { %180 = sbr.rel (%p177_p2) target bundleno = 30 (0x1e), region = 36  ;;  %p211_p3 = scmp.lt.s32.totalorder (!%p177_p2), %s372_s17, 3 }
   0xb   : > { %v239_v0 = vlaneseq  ;;  %s468_s17 = smov (!%p211_p3, %s372_s17), 3  ;;  %v237_v2 = vld [vmem:[%s464_s2] sm:$0x3] }
   0xc   : > { %v253_v5 = vld [vmem:[%s465_s3] sm:$0x3]  ;;  %s445_s22 = sshll.u32 %s468_s17, 3 }
   0xd   : > { %v240_v1 = vshrl.u32 %v239_v0, 7  ;;  %s215_s25 = scalar_lea.vmem %s462_s0, %s445_s22  ;;  %s222_s28 = scalar_lea.vmem %s463_s1, %s445_s22 }
   0xe   : > { %v231_v8 = vld [vmem:[%s215_s25] sm:$0xff]  ;;  %v232_v9 = vld [vmem:[%s215_s25 + $0x8] sm:$0xff]  ;;  %s229_s5 = scalar_lea.vmem %s466_s4, %s445_s22 }
   0xf   : > { %v241_v3 = vsub.s32 0, %v240_v1  ;;  %v245_v4 = vsub.s32 1, %v240_v1  ;;  %v269_v12 = vld [vmem:[%s222_s28] sm:$0xff]  ;;  %v233_v13 = vunpack.c.l.bf16 %v231_v8  ;;  %v234_v14 = vunpack.c.h.bf16 %v231_v8  ;;  %v270_v17 = vld [vmem:[%s222_s28 + $0x8] sm:$0xff] }
  0x10   : > { %v235_v15 = vunpack.c.l.bf16 %v232_v9  ;;  %v236_v16 = vunpack.c.h.bf16 %v232_v9  ;;  %v271_v18 = vunpack.c.l.bf16 %v269_v12  ;;  %v272_v19 = vunpack.c.h.bf16 %v269_v12 }
  0x11   : > { %v242_v6 = vrot.slane %v237_v2, %v241_v3  ;;  %v246_v7 = vrot.slane %v237_v2, %v245_v4  ;;  %v258_v10 = vrot.slane %v253_v5, %v241_v3  ;;  %v262_v11 = vrot.slane %v253_v5, %v245_v4 }
  0x12   : > { %v273_v20 = vunpack.c.l.bf16 %v270_v17  ;;  %v274_v21 = vunpack.c.h.bf16 %v270_v17 }
  0x13   : > { %v249_v22 = vmul.f32 %v242_v6, %v233_v13  ;;  %v250_v23 = vmul.f32 %v246_v7, %v234_v14  ;;  %v251_v24 = vmul.f32 %v242_v6, %v235_v15  ;;  %v252_v25 = vmul.f32 %v246_v7, %v236_v16 }
  0x15   : > { %v265_v26 = vadd.f32 %v258_v10, %v249_v22  ;;  %v266_v27 = vadd.f32 %v262_v11, %v250_v23  ;;  %v267_v28 = vadd.f32 %v258_v10, %v251_v24  ;;  %v268_v29 = vadd.f32 %v262_v11, %v252_v25 }
  0x17   : > { %v275_v30 = vadd.f32 %v271_v18, %v265_v26  ;;  %v276_v31 = vadd.f32 %v272_v19, %v266_v27  ;;  %v277_v32 = vadd.f32 %v273_v20, %v267_v28  ;;  %v278_v33 = vadd.f32 %v274_v21, %v268_v29 }
  0x19   : > { %v279_v34 = vmax.f32 %v275_v30, 0.0  ;;  %v280_v35 = vmax.f32 %v276_v31, 0.0  ;;  %v281_v36 = vmax.f32 %v277_v32, 0.0  ;;  %v282_v37 = vmax.f32 %v278_v33, 0.0 }
  0x1b   : > { %v388_v38 = vpack.c.bf16 %v280_v35, %v279_v34  ;;  %v389_v39 = vpack.c.bf16 %v282_v37, %v281_v36 }
  0x1d   : > { %295 = vst [vmem:[%s229_s5] sm:$0xff] %v388_v38  ;;  %296 = vst [vmem:[%s229_s5 + $0x8] sm:$0xff] %v389_v39 }
  0x1e PF: > { %s14_s15 = sadd.s32 1, %s404_s15  }
  0x1f   : > { %p11_p4 = scmp.ge.s32.totalorder %s14_s15, 4  }
  0x21   :  { %13 = sbr.rel (!%p11_p4) target bundleno = 1 (0x1), region = 69 }

// kernel: tile.23
= control target key start
LH: loop header
LB: loop body
LE: loop exit
PB: predicated region body
PF: predicated region fallthrough
CT: control target
= control target key end

     0   :  { %s22_s0 = inlined_call_operand.vmem [shape: f32[128], index: 0, kind: input, shape index: {}]   ;;  %s23_s1 = inlined_call_operand.vmem [shape: f32[4,128], index: 1, kind: output, shape index: {}]  }
   0x1   :  { %v4_v0 = vld [vmem:[%s22_s0] ss:$0 sm:$0xff] }
   0x2   :  { %5 = vst [vmem:[%s23_s1] sm:$0xf] %v4_v0 }

// kernel: generator_forward.33
= control target key start
LH: loop header
LB: loop body
LE: loop exit
PB: predicated region body
PF: predicated region fallthrough
CT: control target
= control target key end

     0   :  { %s2499_s0 = inlined_call_operand.vmem [shape: bf16[32,2304], index: 0, kind: input, shape index: {}]   ;;  %s2500_s1 = inlined_call_operand.vmem [shape: bf16[2304,256], index: 1, kind: input, shape index: {}]   ;;  %s2501_s2 = inlined_call_operand.vmem [shape: bf16[32,256], index: 2, kind: output, shape index: {0}]   ;;  %s2502_s3 = inlined_call_operand.vmem [shape: f32[16,256], index: 3, kind: output, shape index: {1}]   ;;  %s2503_s4 = inlined_call_operand.vmem [shape: f32[16,256], index: 4, kind: output, shape index: {2}]  }
   0x1   :  { %2509 = sst [smem:[#allocation12_spill]] %s2499_s0 }
   0x2   :  { %2510 = sst [smem:[#allocation13_spill]] %s2500_s1 }
   0x3   :  { %2511 = sst [smem:[#allocation14_spill]] %s2501_s2 }
   0x4   :  { %2512 = sst [smem:[#allocation15_spill]] %s2503_s4 }
   0x5   :  { %s2032_s15 = smov 0   ;;  %s2034_s16 = smov 0  }
   0x6   :  { %s2036_s17 = smov 0   ;;  %s2038_s18 = smov 0  }
   0x7   :  { %s2040_s19 = smov 0   ;;  %s2042_s20 = smov 0  }
   0x8   :  { %s2044_s21 = smov 0   ;;  %s2046_s22 = smov 0  }
   0x9   :  { %s2048_s23 = smov 0   ;;  %s2050_s24 = smov 0  }
   0xa   :  { %s2052_s25 = smov 0   ;;  %s2054_s26 = smov 0  }
   0xb   :  { %s2056_s27 = smov 0  }
   0xc LB: > { %2513 = sst [smem:[#allocation6_spill]] %s1980_s21  ;;  %s27_s29 = sadd.s32 1, %s1992_s24  ;;  %s2004_s27 = sphi %s2056_s27, %s15_s27   ;;  %s2000_s26 = sphi %s2054_s26, %s2534_s26   ;;  %s1996_s25 = sphi %s2052_s25, %s2533_s25   ;;  %s1992_s24 = sphi %s2050_s24, %s2542_s24   ;;  %s1988_s23 = sphi %s2048_s23, %s2531_s23   ;;  %s1984_s22 = sphi %s2046_s22, %s2530_s22   ;;  %s1980_s21 = sphi %s2044_s21, %s2541_s21   ;;  %s1976_s20 = sphi %s2042_s20, %s2540_s20   ;;  %s1972_s19 = sphi %s2040_s19, %s2539_s19   ;;  %s1968_s18 = sphi %s2038_s18, %s2538_s18   ;;  %s1964_s17 = sphi %s2036_s17, %s2537_s17   ;;  %s1960_s16 = sphi %s2034_s16, %s2536_s16   ;;  %s1956_s15 = sphi %s2032_s15, %s2535_s15  }
   0xd   : > { %2514 = sst [smem:[#allocation7_spill]] %s1996_s25  ;;  %p28_p0 = scmp.ge.s32.totalorder %s27_s29, 3 }
   0xe   : > { %2515 = sst [smem:[#allocation8_spill]] %s2000_s26  ;;  %s30_s30 = sadd.s32 1, %s1996_s25 }
   0xf   : > { %s34_s5 = sadd.s32 1, %s2000_s26  ;;  %s43_s6 = sadd.s32 1, %s1976_s20 }
  0x10   : > { %s2544_s29 = smov (%p28_p0, %s27_s29), 0  ;;  %s2546_s30 = smov (!%p28_p0, %s30_s30), %s1996_s25 }
  0x11   : > { %2516 = sst [smem:[#allocation9_spill]] %s2544_s29  ;;  %s39_s7 = ssub.s32 %s1992_s24, %s2544_s29 }
  0x12   : > { %p50_p1 = scmp.ne.s32.totalorder %s1976_s20, %s1972_s19  ;;  %p32_p2 = scmp.ge.s32.totalorder %s2546_s30, 2 }
  0x13   : > { %p51_p3 = scmp.eq.s32.totalorder %s2004_s27, 0  ;;  %s71_s8 = sadd.s32 1, %s1968_s18 }
  0x14   : > { %p78_p4 = scmp.ne.s32.totalorder %s1968_s18, %s1964_s17  ;;  %s2548_s30 = smov (%p32_p2, %s2546_s30), 0 }
  0x15   : > { %2517 = sst [smem:[#allocation10_spill]] %s2548_s30  ;;  %s2550_s5 = smov (!%p32_p2, %s34_s5), %s2000_s26 }
  0x16   : > { %p2116_p5 = por %p51_p3, %p50_p1  ;;  %s67_s10 = ssub.s32 %s1996_s25, %s2548_s30 }
  0x17   : > { %p36_p6 = scmp.ge.s32.totalorder %s2550_s5, 2  ;;  %s68_s11 = sor.u32 %s67_s10, %s39_s7 }
  0x18   : > { %p69_p7 = scmp.eq.s32.totalorder %s68_s11, 0  ;;  %p2122_p8 = por %p78_p4, %p51_p3 }
  0x19   : > { %s2552_s5 = smov (%p36_p6, %s2550_s5), 0  ;;  %s99_s28 = sadd.s32 1, %s1960_s16 }
  0x1a   : > { %2520 = sst [smem:[#allocation11_spill]] %s2552_s5  ;;  %s38_s14 = ssub.s32 %s2000_s26, %s2552_s5 }
  0x1b   : > { %s2129_s13 = scalar_select %p69_p7, %s1968_s18, %s71_s8  }
  0x1c   : > { %s40_s29 = sor.u32 %s39_s7, %s38_s14  ;;  %s96_s2 = sor.u32 %s67_s10, %s38_s14 }
  0x1d   : > { %p41_p9 = scmp.eq.s32.totalorder %s40_s29, 0  ;;  %p97_p10 = scmp.eq.s32.totalorder %s96_s2, 0 }
  0x1e   : > { %p109_p11 = scmp.ne.s32.totalorder %s1960_s16, %s1956_s15  ;;  %s2521_s30 = sadd.s32 4294967295, %s2004_s27  }
  0x1f   : > { %p110_p12 = scmp.eq.s32.totalorder %s2521_s30, 11  ;;  %p1584_p0 = scmp.ge.s32.totalorder %s2004_s27, 12 }
  0x20   : > { %s2139_s21 = scalar_select %p41_p9, %s1976_s20, %s43_s6  }
  0x21   : > { %s2142_s11 = scalar_select %p97_p10, %s1960_s16, %s99_s28  }
  0x22   : > { %p2144_p13 = por %p110_p12, %p109_p11  ;;  %188 = sbr.rel (%p1584_p0) target bundleno = 124 (0x7c), region = 16 }
  0x27   : > { %191 = sbr.rel (!%p2116_p5) target bundleno = 51 (0x33), region = 20  ;;  %s193_s2 = sand.u32 (%p2116_p5), 1, %s1976_s20  }
  0x28   : > { %s197_s29 = smul.u32 (%p2116_p5), 6, %s1992_s24  ;;  %s2523_s0 = sld [smem:[#allocation12_spill]] (%p2116_p5) }
  0x29   : > { %s1735_s30 = smul.u32 (%p2116_p5), 48, %s193_s2 }
  0x2a   : > { %s1736_s6 = smul.u32 (%p2116_p5), 36, %s2000_s26 }
  0x2b   : > { %s195_s5 = scalar_lea.vmem (%p2116_p5), [#allocation3], %s1735_s30 }
  0x2c   : > { %s199_s7 = sadd.s32 %s1736_s6, %s197_s29 }
  0x2d   : > { %s1587_s28 = sshll.u32 %s199_s7, 2 }
  0x2e   : > { %s201_s14 = scalar_lea.vmem %s2523_s0, %s1587_s28 }
  0x2f   : > { %v214_v0 = vld [vmem:[%s201_s14] sm:$0xff]  ;;  %v216_v1 = vld [vmem:[%s201_s14 + $0x8] sm:$0xff]  ;;  %v218_v2 = vld [vmem:[%s201_s14 + $0x10] sm:$0xff] }
  0x30   : > { %215 = vst [vmem:[%s195_s5] sm:$0xff] %v214_v0  ;;  %217 = vst [vmem:[%s195_s5 + $0x8] sm:$0xff] %v216_v1  ;;  %v220_v3 = vld [vmem:[%s201_s14 + $0x48] sm:$0xff]  ;;  %v222_v4 = vld [vmem:[%s201_s14 + $0x50] sm:$0xff] }
  0x31   : > { %219 = vst [vmem:[%s195_s5 + $0x10] sm:$0xff] %v218_v2  ;;  %v224_v5 = vld [vmem:[%s201_s14 + $0x58] sm:$0xff]  ;;  %221 = vst [vmem:[%s195_s5 + $0x18] sm:$0xff] %v220_v3 }
  0x32   : > { %223 = vst [vmem:[%s195_s5 + $0x20] sm:$0xff] %v222_v4  ;;  %225 = vst [vmem:[%s195_s5 + $0x28] sm:$0xff] %v224_v5 }
  0x33 PF: > { %231 = sbr.rel (!%p2122_p8) target bundleno = 124 (0x7c), region = 43  ;;  %s233_s9 = sand.u32 (%p2122_p8), 1, %s1968_s18  }
  0x34   : > { %s1660_s2 = smul.u32 (%p2122_p8), 192, %s1992_s24  ;;  %s2524_s1 = sld [smem:[#allocation13_spill]] (%p2122_p8) }
  0x35   : > { %s1737_s29 = smul.u32 (%p2122_p8), 384, %s233_s9 }
  0x36   : > { %s238_s30 = sadd.s32 (%p2122_p8), %s1996_s25, %s1660_s2 }
  0x37   : > { %s1589_s6 = sshll.u32 (%p2122_p8), %s238_s30, 2  ;;  %s2170_s5 = scalar_lea.vmem (%p2122_p8), [#allocation4], %s1737_s29 }
  0x3a   : > { %s2165_s8 = scalar_lea.vmem %s2524_s1, %s1589_s6 }
  0x3b   : > { %v257_v6 = vld [vmem:[%s2165_s8] sm:$0xf]  ;;  %v259_v7 = vld [vmem:[%s2165_s8 + $0x8] sm:$0xf]  ;;  %v261_v8 = vld [vmem:[%s2165_s8 + $0x10] sm:$0xf] }
  0x3c   : > { %258 = vst [vmem:[%s2170_s5] sm:$0xf] %v257_v6  ;;  %260 = vst [vmem:[%s2170_s5 + $0x4] sm:$0xf] %v259_v7  ;;  %v263_v9 = vld [vmem:[%s2165_s8 + $0x18] sm:$0xf] }
  0x3d   : > { %262 = vst [vmem:[%s2170_s5 + $0x8] sm:$0xf] %v261_v8  ;;  %v265_v10 = vld [vmem:[%s2165_s8 + $0x20] sm:$0xf]  ;;  %v267_v11 = vld [vmem:[%s2165_s8 + $0x28] sm:$0xf] }
  0x3e   : > { %264 = vst [vmem:[%s2170_s5 + $0xc] sm:$0xf] %v263_v9  ;;  %266 = vst [vmem:[%s2170_s5 + $0x10] sm:$0xf] %v265_v10  ;;  %v269_v12 = vld [vmem:[%s2165_s8 + $0x30] sm:$0xf] }
  0x3f   : > { %268 = vst [vmem:[%s2170_s5 + $0x14] sm:$0xf] %v267_v11  ;;  %v271_v13 = vld [vmem:[%s2165_s8 + $0x38] sm:$0xf]  ;;  %v273_v14 = vld [vmem:[%s2165_s8 + $0x40] sm:$0xf] }
  0x40   : > { %270 = vst [vmem:[%s2170_s5 + $0x18] sm:$0xf] %v269_v12  ;;  %272 = vst [vmem:[%s2170_s5 + $0x1c] sm:$0xf] %v271_v13  ;;  %v275_v15 = vld [vmem:[%s2165_s8 + $0x48] sm:$0xf] }
  0x41   : > { %274 = vst [vmem:[%s2170_s5 + $0x20] sm:$0xf] %v273_v14  ;;  %v277_v16 = vld [vmem:[%s2165_s8 + $0x50] sm:$0xf]  ;;  %v279_v17 = vld [vmem:[%s2165_s8 + $0x58] sm:$0xf] }
  0x42   : > { %276 = vst [vmem:[%s2170_s5 + $0x24] sm:$0xf] %v275_v15  ;;  %278 = vst [vmem:[%s2170_s5 + $0x28] sm:$0xf] %v277_v16  ;;  %v281_v18 = vld [vmem:[%s2165_s8 + $0x60] sm:$0xf] }
  0x43   : > { %280 = vst [vmem:[%s2170_s5 + $0x2c] sm:$0xf] %v279_v17  ;;  %v283_v19 = vld [vmem:[%s2165_s8 + $0x68] sm:$0xf]  ;;  %v285_v20 = vld [vmem:[%s2165_s8 + $0x70] sm:$0xf] }
  0x44   : > { %282 = vst [vmem:[%s2170_s5 + $0x30] sm:$0xf] %v281_v18  ;;  %284 = vst [vmem:[%s2170_s5 + $0x34] sm:$0xf] %v283_v19  ;;  %v287_v21 = vld [vmem:[%s2165_s8 + $0x78] sm:$0xf] }
  0x45   : > { %286 = vst [vmem:[%s2170_s5 + $0x38] sm:$0xf] %v285_v20  ;;  %v289_v22 = vld [vmem:[%s2165_s8 + $0x80] sm:$0xf]  ;;  %v291_v23 = vld [vmem:[%s2165_s8 + $0x88] sm:$0xf] }
  0x46   : > { %288 = vst [vmem:[%s2170_s5 + $0x3c] sm:$0xf] %v287_v21  ;;  %290 = vst [vmem:[%s2170_s5 + $0x40] sm:$0xf] %v289_v22  ;;  %v293_v24 = vld [vmem:[%s2165_s8 + $0x90] sm:$0xf] }
  0x47   : > { %292 = vst [vmem:[%s2170_s5 + $0x44] sm:$0xf] %v291_v23  ;;  %v295_v25 = vld [vmem:[%s2165_s8 + $0x98] sm:$0xf]  ;;  %v297_v26 = vld [vmem:[%s2165_s8 + $0xa0] sm:$0xf] }
  0x48   : > { %294 = vst [vmem:[%s2170_s5 + $0x48] sm:$0xf] %v293_v24  ;;  %296 = vst [vmem:[%s2170_s5 + $0x4c] sm:$0xf] %v295_v25  ;;  %v299_v27 = vld [vmem:[%s2165_s8 + $0xa8] sm:$0xf] }
  0x49   : > { %298 = vst [vmem:[%s2170_s5 + $0x50] sm:$0xf] %v297_v26  ;;  %v301_v28 = vld [vmem:[%s2165_s8 + $0xb0] sm:$0xf]  ;;  %v303_v29 = vld [vmem:[%s2165_s8 + $0xb8] sm:$0xf] }
  0x4a   : > { %300 = vst [vmem:[%s2170_s5 + $0x54] sm:$0xf] %v299_v27  ;;  %302 = vst [vmem:[%s2170_s5 + $0x58] sm:$0xf] %v301_v28  ;;  %v305_v30 = vld [vmem:[%s2165_s8 + $0xc0] sm:$0xf] }
  0x4b   : > { %304 = vst [vmem:[%s2170_s5 + $0x5c] sm:$0xf] %v303_v29  ;;  %v307_v31 = vld [vmem:[%s2165_s8 + $0xc8] sm:$0xf]  ;;  %v309_v32 = vld [vmem:[%s2165_s8 + $0xd0] sm:$0xf] }
  0x4c   : > { %306 = vst [vmem:[%s2170_s5 + $0x60] sm:$0xf] %v305_v30  ;;  %308 = vst [vmem:[%s2170_s5 + $0x64] sm:$0xf] %v307_v31  ;;  %v311_v33 = vld [vmem:[%s2165_s8 + $0xd8] sm:$0xf] }
  0x4d   : > { %310 = vst [vmem:[%s2170_s5 + $0x68] sm:$0xf] %v309_v32  ;;  %v313_v34 = vld [vmem:[%s2165_s8 + $0xe0] sm:$0xf]  ;;  %v315_v35 = vld [vmem:[%s2165_s8 + $0xe8] sm:$0xf] }
  0x4e   : > { %312 = vst [vmem:[%s2170_s5 + $0x6c] sm:$0xf] %v311_v33  ;;  %314 = vst [vmem:[%s2170_s5 + $0x70] sm:$0xf] %v313_v34  ;;  %v317_v36 = vld [vmem:[%s2165_s8 + $0xf0] sm:$0xf] }
  0x4f   : > { %316 = vst [vmem:[%s2170_s5 + $0x74] sm:$0xf] %v315_v35  ;;  %v319_v37 = vld [vmem:[%s2165_s8 + $0xf8] sm:$0xf]  ;;  %v321_v38 = vld [vmem:[%s2165_s8 + $0x100] sm:$0xf] }
  0x50   : > { %318 = vst [vmem:[%s2170_s5 + $0x78] sm:$0xf] %v317_v36  ;;  %320 = vst [vmem:[%s2170_s5 + $0x7c] sm:$0xf] %v319_v37  ;;  %v323_v39 = vld [vmem:[%s2165_s8 + $0x108] sm:$0xf] }
  0x51   : > { %322 = vst [vmem:[%s2170_s5 + $0x80] sm:$0xf] %v321_v38  ;;  %v325_v40 = vld [vmem:[%s2165_s8 + $0x110] sm:$0xf]  ;;  %v327_v41 = vld [vmem:[%s2165_s8 + $0x118] sm:$0xf] }
  0x52   : > { %324 = vst [vmem:[%s2170_s5 + $0x84] sm:$0xf] %v323_v39  ;;  %326 = vst [vmem:[%s2170_s5 + $0x88] sm:$0xf] %v325_v40  ;;  %v329_v42 = vld [vmem:[%s2165_s8 + $0x120] sm:$0xf] }
  0x53   : > { %328 = vst [vmem:[%s2170_s5 + $0x8c] sm:$0xf] %v327_v41  ;;  %v331_v43 = vld [vmem:[%s2165_s8 + $0x128] sm:$0xf]  ;;  %v333_v44 = vld [vmem:[%s2165_s8 + $0x130] sm:$0xf] }
  0x54   : > { %330 = vst [vmem:[%s2170_s5 + $0x90] sm:$0xf] %v329_v42  ;;  %332 = vst [vmem:[%s2170_s5 + $0x94] sm:$0xf] %v331_v43  ;;  %v335_v45 = vld [vmem:[%s2165_s8 + $0x138] sm:$0xf] }
  0x55   : > { %334 = vst [vmem:[%s2170_s5 + $0x98] sm:$0xf] %v333_v44  ;;  %v337_v46 = vld [vmem:[%s2165_s8 + $0x140] sm:$0xf]  ;;  %v339_v47 = vld [vmem:[%s2165_s8 + $0x148] sm:$0xf] }
  0x56   : > { %336 = vst [vmem:[%s2170_s5 + $0x9c] sm:$0xf] %v335_v45  ;;  %338 = vst [vmem:[%s2170_s5 + $0xa0] sm:$0xf] %v337_v46  ;;  %v341_v48 = vld [vmem:[%s2165_s8 + $0x150] sm:$0xf] }
  0x57   : > { %340 = vst [vmem:[%s2170_s5 + $0xa4] sm:$0xf] %v339_v47  ;;  %v343_v49 = vld [vmem:[%s2165_s8 + $0x158] sm:$0xf]  ;;  %v345_v50 = vld [vmem:[%s2165_s8 + $0x160] sm:$0xf] }
  0x58   : > { %342 = vst [vmem:[%s2170_s5 + $0xa8] sm:$0xf] %v341_v48  ;;  %344 = vst [vmem:[%s2170_s5 + $0xac] sm:$0xf] %v343_v49  ;;  %v347_v51 = vld [vmem:[%s2165_s8 + $0x168] sm:$0xf] }
  0x59   : > { %346 = vst [vmem:[%s2170_s5 + $0xb0] sm:$0xf] %v345_v50  ;;  %v349_v52 = vld [vmem:[%s2165_s8 + $0x170] sm:$0xf]  ;;  %v351_v53 = vld [vmem:[%s2165_s8 + $0x178] sm:$0xf] }
  0x5a   : > { %348 = vst [vmem:[%s2170_s5 + $0xb4] sm:$0xf] %v347_v51  ;;  %350 = vst [vmem:[%s2170_s5 + $0xb8] sm:$0xf] %v349_v52  ;;  %v353_v54 = vld [vmem:[%s2165_s8 + $0x180] sm:$0xf] }
  0x5b   : > { %352 = vst [vmem:[%s2170_s5 + $0xbc] sm:$0xf] %v351_v53  ;;  %v355_v55 = vld [vmem:[%s2165_s8 + $0x188] sm:$0xf]  ;;  %v357_v56 = vld [vmem:[%s2165_s8 + $0x190] sm:$0xf] }
  0x5c   : > { %354 = vst [vmem:[%s2170_s5 + $0xc0] sm:$0xf] %v353_v54  ;;  %356 = vst [vmem:[%s2170_s5 + $0xc4] sm:$0xf] %v355_v55  ;;  %v359_v57 = vld [vmem:[%s2165_s8 + $0x198] sm:$0xf] }
  0x5d   : > { %358 = vst [vmem:[%s2170_s5 + $0xc8] sm:$0xf] %v357_v56  ;;  %v361_v58 = vld [vmem:[%s2165_s8 + $0x1a0] sm:$0xf]  ;;  %v363_v59 = vld [vmem:[%s2165_s8 + $0x1a8] sm:$0xf] }
  0x5e   : > { %360 = vst [vmem:[%s2170_s5 + $0xcc] sm:$0xf] %v359_v57  ;;  %362 = vst [vmem:[%s2170_s5 + $0xd0] sm:$0xf] %v361_v58  ;;  %v365_v60 = vld [vmem:[%s2165_s8 + $0x1b0] sm:$0xf] }
  0x5f   : > { %364 = vst [vmem:[%s2170_s5 + $0xd4] sm:$0xf] %v363_v59  ;;  %v367_v61 = vld [vmem:[%s2165_s8 + $0x1b8] sm:$0xf]  ;;  %v369_v62 = vld [vmem:[%s2165_s8 + $0x1c0] sm:$0xf] }
  0x60   : > { %366 = vst [vmem:[%s2170_s5 + $0xd8] sm:$0xf] %v365_v60  ;;  %368 = vst [vmem:[%s2170_s5 + $0xdc] sm:$0xf] %v367_v61  ;;  %v371_v63 = vld [vmem:[%s2165_s8 + $0x1c8] sm:$0xf] }
  0x61   : > { %370 = vst [vmem:[%s2170_s5 + $0xe0] sm:$0xf] %v369_v62  ;;  %v373_v0 = vld [vmem:[%s2165_s8 + $0x1d0] sm:$0xf]  ;;  %v375_v1 = vld [vmem:[%s2165_s8 + $0x1d8] sm:$0xf] }
  0x62   : > { %372 = vst [vmem:[%s2170_s5 + $0xe4] sm:$0xf] %v371_v63  ;;  %374 = vst [vmem:[%s2170_s5 + $0xe8] sm:$0xf] %v373_v0  ;;  %v377_v2 = vld [vmem:[%s2165_s8 + $0x1e0] sm:$0xf] }
  0x63   : > { %376 = vst [vmem:[%s2170_s5 + $0xec] sm:$0xf] %v375_v1  ;;  %v379_v3 = vld [vmem:[%s2165_s8 + $0x1e8] sm:$0xf]  ;;  %v381_v4 = vld [vmem:[%s2165_s8 + $0x1f0] sm:$0xf] }
  0x64   : > { %378 = vst [vmem:[%s2170_s5 + $0xf0] sm:$0xf] %v377_v2  ;;  %380 = vst [vmem:[%s2170_s5 + $0xf4] sm:$0xf] %v379_v3  ;;  %v383_v5 = vld [vmem:[%s2165_s8 + $0x1f8] sm:$0xf] }
  0x65   : > { %382 = vst [vmem:[%s2170_s5 + $0xf8] sm:$0xf] %v381_v4  ;;  %v385_v6 = vld [vmem:[%s2165_s8 + $0x200] sm:$0xf]  ;;  %v387_v7 = vld [vmem:[%s2165_s8 + $0x208] sm:$0xf] }
  0x66   : > { %384 = vst [vmem:[%s2170_s5 + $0xfc] sm:$0xf] %v383_v5  ;;  %386 = vst [vmem:[%s2170_s5 + $0x100] sm:$0xf] %v385_v6  ;;  %v389_v8 = vld [vmem:[%s2165_s8 + $0x210] sm:$0xf] }
  0x67   : > { %388 = vst [vmem:[%s2170_s5 + $0x104] sm:$0xf] %v387_v7  ;;  %v391_v9 = vld [vmem:[%s2165_s8 + $0x218] sm:$0xf]  ;;  %v393_v10 = vld [vmem:[%s2165_s8 + $0x220] sm:$0xf] }
  0x68   : > { %390 = vst [vmem:[%s2170_s5 + $0x108] sm:$0xf] %v389_v8  ;;  %392 = vst [vmem:[%s2170_s5 + $0x10c] sm:$0xf] %v391_v9  ;;  %v395_v11 = vld [vmem:[%s2165_s8 + $0x228] sm:$0xf] }
  0x69   : > { %394 = vst [vmem:[%s2170_s5 + $0x110] sm:$0xf] %v393_v10  ;;  %v397_v12 = vld [vmem:[%s2165_s8 + $0x230] sm:$0xf]  ;;  %v399_v13 = vld [vmem:[%s2165_s8 + $0x238] sm:$0xf] }
  0x6a   : > { %396 = vst [vmem:[%s2170_s5 + $0x114] sm:$0xf] %v395_v11  ;;  %398 = vst [vmem:[%s2170_s5 + $0x118] sm:$0xf] %v397_v12  ;;  %v401_v14 = vld [vmem:[%s2165_s8 + $0x240] sm:$0xf] }
  0x6b   : > { %400 = vst [vmem:[%s2170_s5 + $0x11c] sm:$0xf] %v399_v13  ;;  %v403_v15 = vld [vmem:[%s2165_s8 + $0x248] sm:$0xf]  ;;  %v405_v16 = vld [vmem:[%s2165_s8 + $0x250] sm:$0xf] }
  0x6c   : > { %402 = vst [vmem:[%s2170_s5 + $0x120] sm:$0xf] %v401_v14  ;;  %404 = vst [vmem:[%s2170_s5 + $0x124] sm:$0xf] %v403_v15  ;;  %v407_v17 = vld [vmem:[%s2165_s8 + $0x258] sm:$0xf] }
  0x6d   : > { %406 = vst [vmem:[%s2170_s5 + $0x128] sm:$0xf] %v405_v16  ;;  %v409_v18 = vld [vmem:[%s2165_s8 + $0x260] sm:$0xf]  ;;  %v411_v19 = vld [vmem:[%s2165_s8 + $0x268] sm:$0xf] }
  0x6e   : > { %408 = vst [vmem:[%s2170_s5 + $0x12c] sm:$0xf] %v407_v17  ;;  %410 = vst [vmem:[%s2170_s5 + $0x130] sm:$0xf] %v409_v18  ;;  %v413_v20 = vld [vmem:[%s2165_s8 + $0x270] sm:$0xf] }
  0x6f   : > { %412 = vst [vmem:[%s2170_s5 + $0x134] sm:$0xf] %v411_v19  ;;  %v415_v21 = vld [vmem:[%s2165_s8 + $0x278] sm:$0xf]  ;;  %v417_v22 = vld [vmem:[%s2165_s8 + $0x280] sm:$0xf] }
  0x70   : > { %414 = vst [vmem:[%s2170_s5 + $0x138] sm:$0xf] %v413_v20  ;;  %416 = vst [vmem:[%s2170_s5 + $0x13c] sm:$0xf] %v415_v21  ;;  %v419_v23 = vld [vmem:[%s2165_s8 + $0x288] sm:$0xf] }
  0x71   : > { %418 = vst [vmem:[%s2170_s5 + $0x140] sm:$0xf] %v417_v22  ;;  %v421_v24 = vld [vmem:[%s2165_s8 + $0x290] sm:$0xf]  ;;  %v423_v25 = vld [vmem:[%s2165_s8 + $0x298] sm:$0xf] }
  0x72   : > { %420 = vst [vmem:[%s2170_s5 + $0x144] sm:$0xf] %v419_v23  ;;  %422 = vst [vmem:[%s2170_s5 + $0x148] sm:$0xf] %v421_v24  ;;  %v425_v26 = vld [vmem:[%s2165_s8 + $0x2a0] sm:$0xf] }
  0x73   : > { %424 = vst [vmem:[%s2170_s5 + $0x14c] sm:$0xf] %v423_v25  ;;  %v427_v27 = vld [vmem:[%s2165_s8 + $0x2a8] sm:$0xf]  ;;  %v429_v28 = vld [vmem:[%s2165_s8 + $0x2b0] sm:$0xf] }
  0x74   : > { %426 = vst [vmem:[%s2170_s5 + $0x150] sm:$0xf] %v425_v26  ;;  %428 = vst [vmem:[%s2170_s5 + $0x154] sm:$0xf] %v427_v27  ;;  %v431_v29 = vld [vmem:[%s2165_s8 + $0x2b8] sm:$0xf] }
  0x75   : > { %430 = vst [vmem:[%s2170_s5 + $0x158] sm:$0xf] %v429_v28  ;;  %v433_v30 = vld [vmem:[%s2165_s8 + $0x2c0] sm:$0xf]  ;;  %v435_v31 = vld [vmem:[%s2165_s8 + $0x2c8] sm:$0xf] }
  0x76   : > { %432 = vst [vmem:[%s2170_s5 + $0x15c] sm:$0xf] %v431_v29  ;;  %434 = vst [vmem:[%s2170_s5 + $0x160] sm:$0xf] %v433_v30  ;;  %v437_v32 = vld [vmem:[%s2165_s8 + $0x2d0] sm:$0xf] }
  0x77   : > { %436 = vst [vmem:[%s2170_s5 + $0x164] sm:$0xf] %v435_v31  ;;  %v439_v33 = vld [vmem:[%s2165_s8 + $0x2d8] sm:$0xf]  ;;  %v441_v34 = vld [vmem:[%s2165_s8 + $0x2e0] sm:$0xf] }
  0x78   : > { %438 = vst [vmem:[%s2170_s5 + $0x168] sm:$0xf] %v437_v32  ;;  %440 = vst [vmem:[%s2170_s5 + $0x16c] sm:$0xf] %v439_v33  ;;  %v443_v35 = vld [vmem:[%s2165_s8 + $0x2e8] sm:$0xf] }
  0x79   : > { %442 = vst [vmem:[%s2170_s5 + $0x170] sm:$0xf] %v441_v34  ;;  %v445_v36 = vld [vmem:[%s2165_s8 + $0x2f0] sm:$0xf]  ;;  %v447_v37 = vld [vmem:[%s2165_s8 + $0x2f8] sm:$0xf] }
  0x7a   : > { %444 = vst [vmem:[%s2170_s5 + $0x174] sm:$0xf] %v443_v35  ;;  %446 = vst [vmem:[%s2170_s5 + $0x178] sm:$0xf] %v445_v36 }
  0x7b   : > { %448 = vst [vmem:[%s2170_s5 + $0x17c] sm:$0xf] %v447_v37 }
  0x7c PF: > { %p1590_p1 = scmp.ge.s32.totalorder %s2004_s27, 1  ;;  %p663_p2 = scmp.lt.s32.totalorder %s2004_s27, 13 }
  0x7e   : > { %p664_p3 = pnand %p1590_p1, %p663_p2 }
  0x7f   : > { %s670_s12 = sand.u32 (!%p664_p3), 1, %s1972_s19   ;;  %s677_s10 = sand.u32 (!%p664_p3), 1, %s1964_s17  }
  0x80   : > { %667 = sbr.rel (%p664_p3) target bundleno = 456 (0x1c8), region = 84  ;;  %s698_s9 = sand.u32 (!%p664_p3), 1, %s1956_s15  }
  0x81   : > { %s1738_s14 = smul.u32 (!%p664_p3), 48, %s670_s12  ;;  %s1591_s29 = sshll.u32 (!%p664_p3), %s698_s9, 3 }
  0x82   : > { %s1739_s2 = smul.u32 (!%p664_p3), 384, %s677_s10  ;;  %p725_p4 = scmp.lt.s32.totalorder (!%p664_p3), %s1988_s23, 1 }
  0x83   : > { %p727_p5 = scmp.lt.s32.totalorder (!%p664_p3), %s1984_s22, 1  ;;  %s2525_s19 = sld [smem:[#allocation15_spill]] (!%p664_p3) }
  0x84   : > { %s2380_s15 = scalar_lea.vmem (!%p664_p3), [#allocation3], %s1738_s14  ;;  %s2382_s12 = scalar_lea.vmem (!%p664_p3), [#allocation4], %s1739_s2 }
  0x85   : > { %s726_s30 = scalar_select %p725_p4, %s1988_s23, 1 }
  0x86   : > { %s728_s6 = scalar_select %p727_p5, %s1984_s22, 1 }
  0x87   : > { %s1592_s7 = sshll.u32 %s726_s30, 1  ;;  %s2384_s10 = scalar_lea.vmem [#allocation5], %s1591_s29 }
  0x88   : > { %s730_s28 = sadd.s32 %s1592_s7, %s728_s6  ;;  %s2526_s9 = sld [smem:[#allocation6_spill]] }
  0x89   : > { %s1593_s8 = sshll.u32 %s730_s28, 3 }
  0x8a   : > { %s2373_s1 = scalar_lea.vmem %s2502_s3, %s1593_s8  ;;  %s2378_s17 = scalar_lea.vmem %s2525_s19, %s1593_s8 }
  0x8e   : > { %p1596_p6 = scmp.ne.s32.totalorder %s2526_s9, 0 }
  0x90   : > { %745 = sbr.rel (%p1596_p6) target bundleno = 151 (0x97), region = 96 }
  0x95   : > { %v2006_v38 = vmov 0.0  }
  0x96   : > { %746 = vst [vmem:[#allocation2] sm:$0xff] %v2006_v38  ;;  %747 = vst [vmem:[#allocation2 + $0x8] sm:$0xff] %v2006_v38 }
  0x97 PF: > { %v1845_v39 = vld [vmem:[%s2382_s12 + $0x78] sm:$0xff]   ;;  %v1849_v43 = vld [vmem:[%s2382_s12 + $0x70] sm:$0xff]   ;;  %v1853_v47 = vld [vmem:[%s2382_s12 + $0x68] sm:$0xff]   ;;  %s2527_s0 = sld [smem:[#allocation6_spill]] }
  0x98   : > { %v1846_v40 = vld [vmem:[%s2382_s12 + $0xf8] sm:$0xff]   ;;  %1669 = vmatprep.subr.bf16.mxu0 %v1845_v39  ;;  %v1850_v44 = vld [vmem:[%s2382_s12 + $0xf0] sm:$0xff]   ;;  %v1854_v48 = vld [vmem:[%s2382_s12 + $0xe8] sm:$0xff]  }
  0x99   : > { %v1847_v41 = vld [vmem:[%s2382_s12 + $0x38] sm:$0xff]   ;;  %1691 = vmatprep.subr.bf16.mxu1 %v1846_v40  ;;  %v1851_v45 = vld [vmem:[%s2382_s12 + $0x30] sm:$0xff]   ;;  %v1855_v49 = vld [vmem:[%s2382_s12 + $0x28] sm:$0xff]  }
  0x9a   : > { %v1848_v42 = vld [vmem:[%s2382_s12 + $0xb8] sm:$0xff]   ;;  %1670 = vmatpush3.bf16.msra.mxu0 %v1847_v41  ;;  %v1852_v46 = vld [vmem:[%s2382_s12 + $0xb0] sm:$0xff]   ;;  %v1856_v50 = vld [vmem:[%s2382_s12 + $0xa8] sm:$0xff]  }
  0x9b   : > { %1692 = vmatpush3.bf16.msra.mxu1 %v1848_v42  ;;  %1671 = vmatprep.subr.bf16.mxu0 %v1849_v43  ;;  %v1857_v51 = vld [vmem:[%s2382_s12 + $0x60] sm:$0xff]   ;;  %v1861_v55 = vld [vmem:[%s2382_s12 + $0x58] sm:$0xff]   ;;  %v1865_v59 = vld [vmem:[%s2382_s12 + $0x50] sm:$0xff]  }
  0x9c   : > { %1693 = vmatprep.subr.bf16.mxu1 %v1850_v44  ;;  %v1858_v52 = vld [vmem:[%s2382_s12 + $0xe0] sm:$0xff]   ;;  %v1862_v56 = vld [vmem:[%s2382_s12 + $0xd8] sm:$0xff]   ;;  %v1866_v60 = vld [vmem:[%s2382_s12 + $0xd0] sm:$0xff]  }
  0x9d   : > { %v1859_v53 = vld [vmem:[%s2382_s12 + $0x20] sm:$0xff]   ;;  %v1863_v57 = vld [vmem:[%s2382_s12 + $0x18] sm:$0xff]   ;;  %v1867_v61 = vld [vmem:[%s2382_s12 + $0x10] sm:$0xff]   ;;  %p1651_p7 = scmp.ne.s32.totalorder %s2527_s0, 2 }
  0x9e   : > { %1672 = vmatpush3.bf16.msra.mxu0 %v1851_v45  ;;  %v1860_v54 = vld [vmem:[%s2382_s12 + $0xa0] sm:$0xff]   ;;  %v1864_v58 = vld [vmem:[%s2382_s12 + $0x98] sm:$0xff]   ;;  %v1868_v62 = vld [vmem:[%s2382_s12 + $0x90] sm:$0xff]  }
  0x9f   : > { %1694 = vmatpush3.bf16.msra.mxu1 %v1852_v46  ;;  %1673 = vmatprep.subr.bf16.mxu0 %v1853_v47  ;;  %v1869_v63 = vld [vmem:[%s2382_s12 + $0x48] sm:$0xff]   ;;  %v1873_v3 = vld [vmem:[%s2382_s12 + $0x40] sm:$0xff]   ;;  %v1883_v11 = vld [vmem:[%s2382_s12 + $0x178] sm:$0xff]  }
  0xa0   : > { %1695 = vmatprep.subr.bf16.mxu1 %v1854_v48  ;;  %v1870_v0 = vld [vmem:[%s2382_s12 + $0xc8] sm:$0xff]   ;;  %v1874_v4 = vld [vmem:[%s2382_s12 + $0xc0] sm:$0xff]   ;;  %v1884_v12 = vld [vmem:[%s2382_s12 + $0x138] sm:$0xff]  }
  0xa1   : > { %v1871_v1 = vld [vmem:[%s2382_s12 + $0x8] sm:$0xff]   ;;  %v1875_v5 = vld [vmem:[%s2382_s12] sm:$0xff]   ;;  %v1885_v13 = vld [vmem:[%s2382_s12 + $0x170] sm:$0xff]  }
  0xa2   : > { %1674 = vmatpush3.bf16.msra.mxu0 %v1855_v49  ;;  %v1872_v2 = vld [vmem:[%s2382_s12 + $0x88] sm:$0xff]   ;;  %v1876_v6 = vld [vmem:[%s2382_s12 + $0x80] sm:$0xff]   ;;  %v1886_v14 = vld [vmem:[%s2382_s12 + $0x130] sm:$0xff]  }
  0xa3   : > { %1696 = vmatpush3.bf16.msra.mxu1 %v1856_v50  ;;  %1675 = vmatprep.subr.bf16.mxu0 %v1857_v51  ;;  %v1877_v7 = vld [vmem:[%s2380_s15] ss:$24 sps:$4 sm:$0xff]   ;;  %v1879_v8 = vld [vmem:[%s2380_s15 + $0x4] ss:$24 sps:$4 sm:$0xff]   ;;  %v1901_v22 = vld [vmem:[%s2380_s15 + $0x14] ss:$24 sps:$4 sm:$0xff]  }
  0xa4   : > { %1697 = vmatprep.subr.bf16.mxu1 %v1858_v52  ;;  %v1880_v9 = vld [vmem:[%s2380_s15 + $0x8] ss:$24 sps:$4 sm:$0xff]   ;;  %v1882_v10 = vld [vmem:[%s2380_s15 + $0xc] ss:$24 sps:$4 sm:$0xff]   ;;  %1202 = vmatprep.mubr.bf16.mxu0 %v1879_v8 }
  0xa5   : > { %1243 = vmatprep.mubr.bf16.mxu1 %v1882_v10  ;;  %v1887_v15 = vld [vmem:[%s2382_s12 + $0x168] sm:$0xff]   ;;  %v1889_v17 = vld [vmem:[%s2382_s12 + $0x160] sm:$0xff]   ;;  %v1891_v19 = vld [vmem:[%s2382_s12 + $0x158] sm:$0xff]  }
  0xa6   : > { %1676 = vmatpush3.bf16.msra.mxu0 %v1859_v53  ;;  %v1888_v16 = vld [vmem:[%s2382_s12 + $0x128] sm:$0xff]   ;;  %v1890_v18 = vld [vmem:[%s2382_s12 + $0x120] sm:$0xff]   ;;  %v1892_v20 = vld [vmem:[%s2382_s12 + $0x118] sm:$0xff]  }
  0xa7   : > { %1698 = vmatpush3.bf16.msra.mxu1 %v1860_v54  ;;  %1677 = vmatprep.subr.bf16.mxu0 %v1861_v55  ;;  %v1893_v21 = vld [vmem:[%s2382_s12 + $0x150] sm:$0xff]   ;;  %v1895_v24 = vld [vmem:[%s2382_s12 + $0x148] sm:$0xff]   ;;  %v1897_v26 = vld [vmem:[%s2382_s12 + $0x140] sm:$0xff]  }
  0xa8   : > { %1699 = vmatprep.subr.bf16.mxu1 %v1862_v56  ;;  %v1894_v23 = vld [vmem:[%s2382_s12 + $0x110] sm:$0xff]   ;;  %v1896_v25 = vld [vmem:[%s2382_s12 + $0x108] sm:$0xff]   ;;  %v1898_v27 = vld [vmem:[%s2382_s12 + $0x100] sm:$0xff]  }
  0xa9   : > { %v1899_v28 = vld [vmem:[%s2380_s15 + $0x10] ss:$24 sps:$4 sm:$0xff]  }
  0xaa   : > { %1678 = vmatpush3.bf16.msra.mxu0 %v1863_v57  ;;  %v748_v45 = vld [vmem:[#allocation2] sm:$0xff]  ;;  %v749_v52 = vld [vmem:[#allocation2 + $0x8] sm:$0xff] }
  0xab   : > { %1700 = vmatpush3.bf16.msra.mxu1 %v1864_v58  ;;  %1679 = vmatprep.subr.bf16.mxu0 %v1865_v59 }
  0xac   : > { %1701 = vmatprep.subr.bf16.mxu1 %v1866_v60 }
  0xae   : > { %1680 = vmatpush3.bf16.msra.mxu0 %v1867_v61 }
  0xaf   : > { %1702 = vmatpush3.bf16.msra.mxu1 %v1868_v62  ;;  %1681 = vmatprep.subr.bf16.mxu0 %v1869_v63 }
  0xb0   : > { %1703 = vmatprep.subr.bf16.mxu1 %v1870_v0 }
  0xb2   : > { %1682 = vmatpush3.bf16.msra.mxu0 %v1871_v1 }
  0xb3   : > { %1704 = vmatpush3.bf16.msra.mxu1 %v1872_v2  ;;  %1683 = vmatprep.subr.bf16.mxu0 %v1873_v3 }
  0xb4   : > { %1705 = vmatprep.subr.bf16.mxu1 %v1874_v4 }
  0xb6   : > { %1684 = vmatpush3.bf16.msra.mxu0 %v1875_v5 }
  0xb7   : > { %1706 = vmatpush3.bf16.msra.mxu1 %v1876_v6  ;;  %1713 = vmatprep.subr.bf16.mxu0 %v1883_v11 }
  0xb9   : > { %1203 = vmatmul.mubr.bf16.vlgmr.msra.gmra.mxu0 %v1877_v7 }
  0xba   : > { %1244 = vmatmul.mubr.bf16.vlgmr.msra.gmra.mxu1 %v1880_v9  ;;  %1714 = vmatpush3.bf16.msra.mxu0 %v1884_v12 }
  0xbb   : > { %1715 = vmatprep.subr.bf16.mxu0 %v1885_v13  ;;  %1284 = vmatprep.mubr.bf16.mxu0 %v1901_v22 }
  0xbe   : > { %1716 = vmatpush3.bf16.msra.mxu0 %v1886_v14 }
  0xbf   : > { %1717 = vmatprep.subr.bf16.mxu0 %v1887_v15 }
  0xc2   : > { %1718 = vmatpush3.bf16.msra.mxu0 %v1888_v16 }
  0xc3   : > { %1719 = vmatprep.subr.bf16.mxu0 %v1889_v17 }
  0xc6   : > { %1720 = vmatpush3.bf16.msra.mxu0 %v1890_v18 }
  0xc7   : > { %1721 = vmatprep.subr.bf16.mxu0 %v1891_v19 }
  0xca   : > { %1722 = vmatpush3.bf16.msra.mxu0 %v1892_v20 }
  0xcb   : > { %1723 = vmatprep.subr.bf16.mxu0 %v1893_v21 }
  0xce   : > { %1724 = vmatpush3.bf16.msra.mxu0 %v1894_v23 }
  0xcf   : > { %1725 = vmatprep.subr.bf16.mxu0 %v1895_v24 }
  0xd2   : > { %1726 = vmatpush3.bf16.msra.mxu0 %v1896_v25 }
  0xd3   : > { %1727 = vmatprep.subr.bf16.mxu0 %v1897_v26 }
  0xd6   : > { %1728 = vmatpush3.bf16.msra.mxu0 %v1898_v27 }
  0xd9   : > { %1285 = vmatmul.mubr.bf16.vlgmr.msra.gmra.mxu0 %v1899_v28 }
 0x179   : > { %v1685_v29 = vpop.f32.mrf.mxu0 }
 0x17a   : > { %v1707_v30 = vpop.f32.mrf.mxu1 }
 0x17b   : > { %v1686_v31 = vpop.f32.mrf.mxu0 }
 0x17c   : > { %v1708_v32 = vpop.f32.mrf.mxu1  ;;  %v1687_v36 = vadd.f32 %v1686_v31, %v1685_v29 }
 0x17d   : > { %v1688_v33 = vpop.f32.mrf.mxu0  ;;  %v1709_v37 = vadd.f32 %v1708_v32, %v1707_v30 }
 0x17e   : > { %v1710_v34 = vpop.f32.mrf.mxu1 }
 0x17f   : > { %v1689_v35 = vpop.f32.mrf.mxu0  ;;  %v1246_v41 = vadd.f32 %v1709_v37, %v1687_v36 }
 0x180   : > { %v1711_v38 = vpop.f32.mrf.mxu1  ;;  %v1690_v42 = vadd.f32 %v1689_v35, %v1688_v33 }
 0x181   : > { %v1712_v43 = vadd.f32 %v1711_v38, %v1710_v34 }
 0x183   : > { %v1249_v49 = vadd.f32 %v1712_v43, %v1690_v42 }
 0x199   : > { %v1729_v39 = vpop.f32.mrf.mxu0 }
 0x19b   : > { %v1730_v40 = vpop.f32.mrf.mxu0 }
 0x19c   : > { %v1731_v44 = vadd.f32 %v1730_v40, %v1729_v39 }
 0x19d   : > { %v1732_v46 = vpop.f32.mrf.mxu0 }
 0x19e   : > { %v1287_v47 = vadd.f32 %v1731_v44, %v1246_v41 }
 0x19f   : > { %v1733_v48 = vpop.f32.mrf.mxu0 }
 0x1a0   : > { %v1293_v50 = vadd.f32 %v1287_v47, %v748_v45  ;;  %v1734_v51 = vadd.f32 %v1733_v48, %v1732_v46 }
 0x1a2   : > { %1295 = vst [vmem:[#allocation2] sm:$0xff] %v1293_v50  ;;  %v1290_v53 = vadd.f32 %v1734_v51, %v1249_v49  ;;  %1300 = sbr.rel (%p1651_p7) target bundleno = 447 (0x1bf), region = 100 }
 0x1a4   : > { %v1294_v54 = vadd.f32 %v1290_v53, %v749_v52 }
 0x1a6   : > { %1296 = vst [vmem:[#allocation2 + $0x8] sm:$0xff] %v1294_v54 }
 0x1a9   : > { %v1301_v55 = vld [vmem:[#allocation2] sm:$0xff] }
 0x1aa   : > { %v1320_v59 = vmul.f32 %v1301_v55, %v1301_v55 }
 0x1ad   : > { %v1302_v56 = vld [vmem:[#allocation2 + $0x8] sm:$0xff] }
 0x1ae   : > { %v1667_v57 = vpack.c.bf16 %v1302_v56, %v1301_v55  ;;  %v1313_v58 = vadd.f32 %v1302_v56, %v1301_v55  ;;  %v1321_v60 = vmul.f32 %v1302_v56, %v1302_v56 }
 0x1b0   : > { %1668 = vst [vmem:[%s2384_s10] sm:$0xff] %v1667_v57   ;;  %v1314_v61 = vrot.slane %v1313_v58, 4  ;;  %v1322_v62 = vadd.f32 %v1321_v60, %v1320_v59 }
 0x1b2   : > { %v1315_v63 = vadd.f32 %v1314_v61, %v1313_v58  ;;  %v1323_v0 = vrot.slane %v1322_v62, 4 }
 0x1b4   : > { %v1316_v1 = vrot.slane %v1315_v63, 2  ;;  %v1324_v2 = vadd.f32 %v1323_v0, %v1322_v62 }
 0x1b6   : > { %v1317_v3 = vadd.f32 %v1316_v1, %v1315_v63  ;;  %v1325_v4 = vrot.slane %v1324_v2, 2 }
 0x1b8   : > { %v1318_v5 = vrot.slane %v1317_v3, 1  ;;  %v1326_v6 = vadd.f32 %v1325_v4, %v1324_v2 }
 0x1ba   : > { %v1319_v7 = vadd.f32 %v1318_v5, %v1317_v3  ;;  %v1327_v8 = vrot.slane %v1326_v6, 1 }
 0x1bc   : > { %1329 = vst [vmem:[%s2373_s1] sm:$0xff] %v1319_v7  ;;  %v1328_v9 = vadd.f32 %v1327_v8, %v1326_v6 }
 0x1be   : > { %1330 = vst [vmem:[%s2378_s17] sm:$0xff] %v1328_v9 }
 0x1bf PF: > { %1353 = sbr.rel (!%p2144_p13) target bundleno = 456 (0x1c8), region = 104  ;;  %s1663_s25 = sshll.u32 (%p2144_p13), %s1988_s23, 2  ;;  %v1375_v10 = vld [vmem:[%s2384_s10] sm:$0xf] (%p2144_p13)  ;;  %v1377_v11 = vld [vmem:[%s2384_s10 + $0x4] sm:$0xf] (%p2144_p13) }
 0x1c0   : > { %s1356_s26 = sadd.s32 (%p2144_p13), %s1984_s22, %s1663_s25  ;;  %s2528_s30 = sld [smem:[#allocation14_spill]] (%p2144_p13) }
 0x1c1   : > { %s1657_s14 = sshll.u32 (%p2144_p13), %s1356_s26, 2 }
 0x1c6   : > { %s1358_s6 = scalar_lea.vmem %s2528_s30, %s1657_s14 }
 0x1c7   : > { %1376 = vst [vmem:[%s1358_s6] sm:$0xf] %v1375_v10  ;;  %1378 = vst [vmem:[%s1358_s6 + $0x8] sm:$0xf] %v1377_v11 }
 0x1c8 PF: > { %s15_s27 = sadd.s32 1, %s2004_s27   ;;  %s2530_s22 = sld [smem:[#allocation7_spill]] }
 0x1c9   : > { %p2455_p8 = scmp.ge.s32.totalorder %s15_s27, 14   ;;  %s2531_s23 = sld [smem:[#allocation8_spill]] }
 0x1ca   : > { %s2532_s4 = sld [smem:[#allocation9_spill]]  ;;  %s2535_s15 = smov %s1960_s16 }
 0x1cb   : > { %s2533_s25 = sld [smem:[#allocation10_spill]]  ;;  %s2536_s16 = smov %s2142_s11 }
 0x1cc   : > { %s2534_s26 = sld [smem:[#allocation11_spill]]  ;;  %s2537_s17 = smov %s1968_s18 }
 0x1cd   : > { %s2538_s18 = smov %s2129_s13  ;;  %s2539_s19 = smov %s1976_s20 }
 0x1ce   : > { %s2540_s20 = smov %s2139_s21  ;;  %s2541_s21 = smov %s1992_s24 }
 0x1cf   :  { %14 = sbr.rel (!%p2455_p8) target bundleno = 12 (0xc), region = 208 }
 0x1d0   : > { %s2542_s24 = smov %s2532_s4 }

// kernel: generator_forward.46
= control target key start
LH: loop header
LB: loop body
LE: loop exit
PB: predicated region body
PF: predicated region fallthrough
CT: control target
= control target key end

     0   :  { %s404_s12 = smov 0   ;;  %s434_s0 = inlined_call_operand.vmem [shape: bf16[32,512], index: 0, kind: input, shape index: {}]   ;;  %s435_s1 = inlined_call_operand.vmem [shape: f32[1,512], index: 1, kind: input, shape index: {}]   ;;  %s436_s2 = inlined_call_operand.vmem [shape: f32[1,512], index: 2, kind: input, shape index: {}]   ;;  %s437_s3 = inlined_call_operand.vmem [shape: bf16[32,512], index: 3, kind: output, shape index: {}]  }
   0x1 LB: > { %s345_s13 = sadd.s32 4294967295, %s382_s12   ;;  %p349_p0 = scmp.ge.s32.totalorder %s382_s12, 1  ;;  %s382_s12 = sphi %s404_s12, %s13_s12  }
   0x2   : > { %p139_p1 = scmp.lt.s32.totalorder %s382_s12, 3 }
   0x4   : > { %p140_p2 = pnand %p349_p0, %p139_p1 }
   0x5   : > { %s350_s14 = sshll.u32 (!%p140_p2), %s345_s13, 1 }
   0x6   : > { %143 = sbr.rel (%p140_p2) target bundleno = 30 (0x1e), region = 32  ;;  %p166_p3 = scmp.lt.s32.totalorder (!%p140_p2), %s350_s14, 3 }
   0xb   : > { %v193_v0 = vlaneseq  ;;  %s439_s14 = smov (!%p166_p3, %s350_s14), 3  ;;  %v191_v2 = vld [vmem:[%s435_s1] sm:$0xf] }
   0xc   : > { %v221_v3 = vld [vmem:[%s436_s2] sm:$0xf]  ;;  %s362_s19 = sshll.u32 %s439_s14, 4 }
   0xd   : > { %v194_v1 = vshrl.u32 %v193_v0, 7  ;;  %s170_s22 = scalar_lea.vmem %s434_s0, %s362_s19  ;;  %s177_s25 = scalar_lea.vmem %s437_s3, %s362_s19 }
   0xe   : > { %v179_v12 = vld [vmem:[%s170_s22] sm:$0xff]  ;;  %v181_v13 = vld [vmem:[%s170_s22 + $0x10] sm:$0xff]  ;;  %v182_v14 = vld [vmem:[%s170_s22 + $0x18] sm:$0xff] }
   0xf   : > { %v195_v4 = vsub.s32 0, %v194_v1  ;;  %v199_v5 = vsub.s32 1, %v194_v1  ;;  %v203_v6 = vsub.s32 2, %v194_v1  ;;  %v207_v7 = vsub.s32 3, %v194_v1  ;;  %v180_v21 = vld [vmem:[%s170_s22 + $0x8] sm:$0xff] }
  0x10   : > { %v183_v19 = vunpack.c.l.bf16 %v179_v12  ;;  %v184_v20 = vunpack.c.h.bf16 %v179_v12  ;;  %v187_v22 = vunpack.c.l.bf16 %v181_v13  ;;  %v188_v23 = vunpack.c.h.bf16 %v181_v13 }
  0x11   : > { %v196_v8 = vrot.slane %v191_v2, %v195_v4  ;;  %v200_v9 = vrot.slane %v191_v2, %v199_v5  ;;  %v226_v10 = vrot.slane %v221_v3, %v195_v4  ;;  %v230_v11 = vrot.slane %v221_v3, %v199_v5 }
  0x12   : > { %v204_v15 = vrot.slane %v191_v2, %v203_v6  ;;  %v208_v16 = vrot.slane %v191_v2, %v207_v7  ;;  %v234_v17 = vrot.slane %v221_v3, %v203_v6  ;;  %v238_v18 = vrot.slane %v221_v3, %v207_v7 }
  0x13   : > { %v185_v24 = vunpack.c.l.bf16 %v180_v21  ;;  %v186_v25 = vunpack.c.h.bf16 %v180_v21  ;;  %v189_v26 = vunpack.c.l.bf16 %v182_v14  ;;  %v190_v27 = vunpack.c.h.bf16 %v182_v14 }
  0x14   : > { %v213_v28 = vmul.f32 %v196_v8, %v183_v19  ;;  %v214_v29 = vmul.f32 %v200_v9, %v184_v20  ;;  %v217_v30 = vmul.f32 %v196_v8, %v187_v22  ;;  %v218_v31 = vmul.f32 %v200_v9, %v188_v23 }
  0x15   : > { %v215_v32 = vmul.f32 %v204_v15, %v185_v24  ;;  %v216_v33 = vmul.f32 %v208_v16, %v186_v25  ;;  %v219_v34 = vmul.f32 %v204_v15, %v189_v26  ;;  %v220_v35 = vmul.f32 %v208_v16, %v190_v27 }
  0x16   : > { %v243_v36 = vadd.f32 %v226_v10, %v213_v28  ;;  %v244_v37 = vadd.f32 %v230_v11, %v214_v29  ;;  %v247_v38 = vadd.f32 %v226_v10, %v217_v30  ;;  %v248_v39 = vadd.f32 %v230_v11, %v218_v31 }
  0x17   : > { %v245_v40 = vadd.f32 %v234_v17, %v215_v32  ;;  %v246_v41 = vadd.f32 %v238_v18, %v216_v33  ;;  %v249_v42 = vadd.f32 %v234_v17, %v219_v34  ;;  %v250_v43 = vadd.f32 %v238_v18, %v220_v35 }
  0x18   : > { %v251_v44 = vmax.f32 %v243_v36, 0.0  ;;  %v252_v45 = vmax.f32 %v244_v37, 0.0  ;;  %v255_v46 = vmax.f32 %v247_v38, 0.0  ;;  %v256_v47 = vmax.f32 %v248_v39, 0.0 }
  0x19   : > { %v253_v48 = vmax.f32 %v245_v40, 0.0  ;;  %v254_v49 = vmax.f32 %v246_v41, 0.0  ;;  %v257_v50 = vmax.f32 %v249_v42, 0.0  ;;  %v258_v51 = vmax.f32 %v250_v43, 0.0 }
  0x1a   : > { %v364_v52 = vpack.c.bf16 %v252_v45, %v251_v44  ;;  %v366_v53 = vpack.c.bf16 %v256_v47, %v255_v46 }
  0x1b   : > { %v365_v54 = vpack.c.bf16 %v254_v49, %v253_v48  ;;  %v367_v55 = vpack.c.bf16 %v258_v51, %v257_v50 }
  0x1c   : > { %283 = vst [vmem:[%s177_s25] sm:$0xff] %v364_v52  ;;  %285 = vst [vmem:[%s177_s25 + $0x10] sm:$0xff] %v366_v53 }
  0x1d   : > { %284 = vst [vmem:[%s177_s25 + $0x8] sm:$0xff] %v365_v54  ;;  %286 = vst [vmem:[%s177_s25 + $0x18] sm:$0xff] %v367_v55 }
  0x1e PF: > { %s13_s12 = sadd.s32 1, %s382_s12  }
  0x1f   : > { %p10_p4 = scmp.ge.s32.totalorder %s13_s12, 4  }
  0x21   :  { %12 = sbr.rel (!%p10_p4) target bundleno = 1 (0x1), region = 62 }

// kernel: generator_forward.45
= control target key start
LH: loop header
LB: loop body
LE: loop exit
PB: predicated region body
PF: predicated region fallthrough
CT: control target
= control target key end

     0   :  { %s2301_s0 = inlined_call_operand.vmem [shape: bf16[32,1024], index: 0, kind: input, shape index: {}]   ;;  %s2302_s1 = inlined_call_operand.vmem [shape: bf16[1024,512], index: 1, kind: input, shape index: {}]   ;;  %s2303_s2 = inlined_call_operand.vmem [shape: bf16[32,512], index: 2, kind: output, shape index: {0}]   ;;  %s2304_s3 = inlined_call_operand.vmem [shape: f32[16,512], index: 3, kind: output, shape index: {1}]   ;;  %s2305_s4 = inlined_call_operand.vmem [shape: f32[16,512], index: 4, kind: output, shape index: {2}]  }
   0x1   :  { %2311 = sst [smem:[#allocation12_spill]] %s2301_s0 }
   0x2   :  { %2312 = sst [smem:[#allocation13_spill]] %s2302_s1 }
   0x3   :  { %2313 = sst [smem:[#allocation14_spill]] %s2303_s2 }
   0x4   :  { %2314 = sst [smem:[#allocation15_spill]] %s2305_s4 }
   0x5   :  { %s1878_s15 = smov 0   ;;  %s1880_s16 = smov 0  }
   0x6   :  { %s1882_s17 = smov 0   ;;  %s1884_s18 = smov 0  }
   0x7   :  { %s1886_s19 = smov 0   ;;  %s1888_s20 = smov 0  }
   0x8   :  { %s1890_s21 = smov 0   ;;  %s1892_s22 = smov 0  }
   0x9   :  { %s1894_s23 = smov 0   ;;  %s1896_s24 = smov 0  }
   0xa   :  { %s1898_s25 = smov 0   ;;  %s1900_s26 = smov 0  }
   0xb   :  { %s1902_s27 = smov 0  }
   0xc LB: > { %2315 = sst [smem:[#allocation6_spill]] %s1826_s21  ;;  %s27_s29 = sadd.s32 1, %s1838_s24  ;;  %s1850_s27 = sphi %s1902_s27, %s15_s27   ;;  %s1846_s26 = sphi %s1900_s26, %s2345_s26   ;;  %s1842_s25 = sphi %s1898_s25, %s2335_s25   ;;  %s1838_s24 = sphi %s1896_s24, %s2344_s24   ;;  %s1834_s23 = sphi %s1894_s23, %s2333_s23   ;;  %s1830_s22 = sphi %s1892_s22, %s2332_s22   ;;  %s1826_s21 = sphi %s1890_s21, %s2343_s21   ;;  %s1822_s20 = sphi %s1888_s20, %s2342_s20   ;;  %s1818_s19 = sphi %s1886_s19, %s2341_s19   ;;  %s1814_s18 = sphi %s1884_s18, %s2340_s18   ;;  %s1810_s17 = sphi %s1882_s17, %s2339_s17   ;;  %s1806_s16 = sphi %s1880_s16, %s2338_s16   ;;  %s1802_s15 = sphi %s1878_s15, %s2337_s15  }
   0xd   : > { %2316 = sst [smem:[#allocation7_spill]] %s1842_s25  ;;  %p28_p0 = scmp.ge.s32.totalorder %s27_s29, 2 }
   0xe   : > { %2317 = sst [smem:[#allocation8_spill]] %s1846_s26  ;;  %s30_s30 = sadd.s32 1, %s1842_s25 }
   0xf   : > { %s34_s5 = sadd.s32 1, %s1846_s26  ;;  %s43_s6 = sadd.s32 1, %s1822_s20 }
  0x10   : > { %s2347_s29 = smov (%p28_p0, %s27_s29), 0  ;;  %s2349_s30 = smov (!%p28_p0, %s30_s30), %s1842_s25 }
  0x11   : > { %2318 = sst [smem:[#allocation9_spill]] %s2347_s29  ;;  %s39_s7 = ssub.s32 %s1838_s24, %s2347_s29 }
  0x12   : > { %p50_p1 = scmp.ne.s32.totalorder %s1822_s20, %s1818_s19  ;;  %p32_p2 = scmp.ge.s32.totalorder %s2349_s30, 2 }
  0x13   : > { %p51_p3 = scmp.eq.s32.totalorder %s1850_s27, 0  ;;  %s71_s8 = sadd.s32 1, %s1814_s18 }
  0x14   : > { %p78_p4 = scmp.ne.s32.totalorder %s1814_s18, %s1810_s17  ;;  %s2351_s30 = smov (%p32_p2, %s2349_s30), 0 }
  0x15   : > { %2319 = sst [smem:[#allocation10_spill]] %s2351_s30  ;;  %s2353_s5 = smov (!%p32_p2, %s34_s5), %s1846_s26 }
  0x16   : > { %p1962_p5 = por %p51_p3, %p50_p1  ;;  %s67_s10 = ssub.s32 %s1842_s25, %s2351_s30 }
  0x17   : > { %p36_p6 = scmp.ge.s32.totalorder %s2353_s5, 2  ;;  %s68_s11 = sor.u32 %s67_s10, %s39_s7 }
  0x18   : > { %p69_p7 = scmp.eq.s32.totalorder %s68_s11, 0  ;;  %p1968_p8 = por %p78_p4, %p51_p3 }
  0x19   : > { %s2355_s5 = smov (%p36_p6, %s2353_s5), 0  ;;  %s99_s28 = sadd.s32 1, %s1806_s16 }
  0x1a   : > { %2322 = sst [smem:[#allocation11_spill]] %s2355_s5  ;;  %s38_s14 = ssub.s32 %s1846_s26, %s2355_s5 }
  0x1b   : > { %s1975_s13 = scalar_select %p69_p7, %s1814_s18, %s71_s8  }
  0x1c   : > { %s40_s29 = sor.u32 %s39_s7, %s38_s14  ;;  %s96_s2 = sor.u32 %s67_s10, %s38_s14 }
  0x1d   : > { %p41_p9 = scmp.eq.s32.totalorder %s40_s29, 0  ;;  %p97_p10 = scmp.eq.s32.totalorder %s96_s2, 0 }
  0x1e   : > { %p109_p11 = scmp.ne.s32.totalorder %s1806_s16, %s1802_s15  ;;  %s2323_s30 = sadd.s32 4294967295, %s1850_s27  }
  0x1f   : > { %p110_p12 = scmp.eq.s32.totalorder %s2323_s30, 7  ;;  %p1436_p0 = scmp.ge.s32.totalorder %s1850_s27, 8 }
  0x20   : > { %s1985_s21 = scalar_select %p41_p9, %s1822_s20, %s43_s6  }
  0x21   : > { %s1988_s11 = scalar_select %p97_p10, %s1806_s16, %s99_s28  }
  0x22   : > { %p1990_p13 = por %p110_p12, %p109_p11  ;;  %188 = sbr.rel (%p1436_p0) target bundleno = 93 (0x5d), region = 16 }
  0x27   : > { %191 = sbr.rel (!%p1962_p5) target bundleno = 51 (0x33), region = 20  ;;  %s193_s2 = sand.u32 (%p1962_p5), 1, %s1822_s20  }
  0x28   : > { %s1439_s29 = sshll.u32 (%p1962_p5), %s1838_s24, 2  ;;  %s1437_s30 = sshll.u32 (%p1962_p5), %s193_s2, 5 }
  0x29   : > { %s1536_s6 = sshll.u32 (%p1962_p5), %s1846_s26, 4  ;;  %s2325_s0 = sld [smem:[#allocation12_spill]] (%p1962_p5) }
  0x2a   : > { %s199_s7 = sadd.s32 (%p1962_p5), %s1536_s6, %s1439_s29  ;;  %s195_s5 = scalar_lea.vmem (%p1962_p5), [#allocation3], %s1437_s30 }
  0x2b   : > { %s1441_s28 = sshll.u32 (%p1962_p5), %s199_s7, 2 }
  0x2f   : > { %s201_s14 = scalar_lea.vmem %s2325_s0, %s1441_s28 }
  0x30   : > { %v214_v0 = vld [vmem:[%s201_s14] sm:$0xff]  ;;  %v216_v1 = vld [vmem:[%s201_s14 + $0x8] sm:$0xff] }
  0x31   : > { %v218_v2 = vld [vmem:[%s201_s14 + $0x20] sm:$0xff]  ;;  %215 = vst [vmem:[%s195_s5] sm:$0xff] %v214_v0  ;;  %217 = vst [vmem:[%s195_s5 + $0x8] sm:$0xff] %v216_v1  ;;  %v220_v3 = vld [vmem:[%s201_s14 + $0x28] sm:$0xff] }
  0x32   : > { %219 = vst [vmem:[%s195_s5 + $0x10] sm:$0xff] %v218_v2  ;;  %221 = vst [vmem:[%s195_s5 + $0x18] sm:$0xff] %v220_v3 }
  0x33 PF: > { %227 = sbr.rel (!%p1968_p8) target bundleno = 93 (0x5d), region = 43  ;;  %s229_s9 = sand.u32 (%p1968_p8), 1, %s1814_s18  }
  0x34   : > { %s1444_s2 = sshll.u32 (%p1968_p8), %s1842_s25, 1  ;;  %s1442_s29 = sshll.u32 (%p1968_p8), %s229_s9, 9 }
  0x35   : > { %s1537_s6 = sshll.u32 (%p1968_p8), %s1838_s24, 8  ;;  %s2326_s1 = sld [smem:[#allocation13_spill]] (%p1968_p8) }
  0x36   : > { %s235_s7 = sadd.s32 (%p1968_p8), %s1537_s6, %s1444_s2  ;;  %s2016_s5 = scalar_lea.vmem (%p1968_p8), [#allocation4], %s1442_s29 }
  0x37   : > { %s1446_s28 = sshll.u32 (%p1968_p8), %s235_s7, 2 }
  0x3b   : > { %s2011_s10 = scalar_lea.vmem %s2326_s1, %s1446_s28 }
  0x3c   : > { %v392_v4 = vld [vmem:[%s2011_s10] sm:$0xff]  ;;  %v394_v5 = vld [vmem:[%s2011_s10 + $0x10] sm:$0xff] }
  0x3d   : > { %v396_v6 = vld [vmem:[%s2011_s10 + $0x20] sm:$0xff]  ;;  %393 = vst [vmem:[%s2016_s5] sm:$0xff] %v392_v4  ;;  %395 = vst [vmem:[%s2016_s5 + $0x8] sm:$0xff] %v394_v5  ;;  %v398_v7 = vld [vmem:[%s2011_s10 + $0x30] sm:$0xff] }
  0x3e   : > { %397 = vst [vmem:[%s2016_s5 + $0x10] sm:$0xff] %v396_v6  ;;  %v400_v8 = vld [vmem:[%s2011_s10 + $0x40] sm:$0xff]  ;;  %v402_v9 = vld [vmem:[%s2011_s10 + $0x50] sm:$0xff]  ;;  %399 = vst [vmem:[%s2016_s5 + $0x18] sm:$0xff] %v398_v7 }
  0x3f   : > { %401 = vst [vmem:[%s2016_s5 + $0x20] sm:$0xff] %v400_v8  ;;  %403 = vst [vmem:[%s2016_s5 + $0x28] sm:$0xff] %v402_v9  ;;  %v404_v10 = vld [vmem:[%s2011_s10 + $0x60] sm:$0xff]  ;;  %v406_v11 = vld [vmem:[%s2011_s10 + $0x70] sm:$0xff] }
  0x40   : > { %v408_v12 = vld [vmem:[%s2011_s10 + $0x80] sm:$0xff]  ;;  %405 = vst [vmem:[%s2016_s5 + $0x30] sm:$0xff] %v404_v10  ;;  %407 = vst [vmem:[%s2016_s5 + $0x38] sm:$0xff] %v406_v11  ;;  %v410_v13 = vld [vmem:[%s2011_s10 + $0x90] sm:$0xff] }
  0x41   : > { %409 = vst [vmem:[%s2016_s5 + $0x40] sm:$0xff] %v408_v12  ;;  %v412_v14 = vld [vmem:[%s2011_s10 + $0xa0] sm:$0xff]  ;;  %v414_v15 = vld [vmem:[%s2011_s10 + $0xb0] sm:$0xff]  ;;  %411 = vst [vmem:[%s2016_s5 + $0x48] sm:$0xff] %v410_v13 }
  0x42   : > { %413 = vst [vmem:[%s2016_s5 + $0x50] sm:$0xff] %v412_v14  ;;  %415 = vst [vmem:[%s2016_s5 + $0x58] sm:$0xff] %v414_v15  ;;  %v416_v16 = vld [vmem:[%s2011_s10 + $0xc0] sm:$0xff]  ;;  %v418_v17 = vld [vmem:[%s2011_s10 + $0xd0] sm:$0xff] }
  0x43   : > { %v420_v18 = vld [vmem:[%s2011_s10 + $0xe0] sm:$0xff]  ;;  %417 = vst [vmem:[%s2016_s5 + $0x60] sm:$0xff] %v416_v16  ;;  %419 = vst [vmem:[%s2016_s5 + $0x68] sm:$0xff] %v418_v17  ;;  %v422_v19 = vld [vmem:[%s2011_s10 + $0xf0] sm:$0xff] }
  0x44   : > { %421 = vst [vmem:[%s2016_s5 + $0x70] sm:$0xff] %v420_v18  ;;  %v424_v20 = vld [vmem:[%s2011_s10 + $0x100] sm:$0xff]  ;;  %v426_v21 = vld [vmem:[%s2011_s10 + $0x110] sm:$0xff]  ;;  %423 = vst [vmem:[%s2016_s5 + $0x78] sm:$0xff] %v422_v19 }
  0x45   : > { %425 = vst [vmem:[%s2016_s5 + $0x80] sm:$0xff] %v424_v20  ;;  %427 = vst [vmem:[%s2016_s5 + $0x88] sm:$0xff] %v426_v21  ;;  %v428_v22 = vld [vmem:[%s2011_s10 + $0x120] sm:$0xff]  ;;  %v430_v23 = vld [vmem:[%s2011_s10 + $0x130] sm:$0xff] }
  0x46   : > { %v432_v24 = vld [vmem:[%s2011_s10 + $0x140] sm:$0xff]  ;;  %429 = vst [vmem:[%s2016_s5 + $0x90] sm:$0xff] %v428_v22  ;;  %431 = vst [vmem:[%s2016_s5 + $0x98] sm:$0xff] %v430_v23  ;;  %v434_v25 = vld [vmem:[%s2011_s10 + $0x150] sm:$0xff] }
  0x47   : > { %433 = vst [vmem:[%s2016_s5 + $0xa0] sm:$0xff] %v432_v24  ;;  %v436_v26 = vld [vmem:[%s2011_s10 + $0x160] sm:$0xff]  ;;  %v438_v27 = vld [vmem:[%s2011_s10 + $0x170] sm:$0xff]  ;;  %435 = vst [vmem:[%s2016_s5 + $0xa8] sm:$0xff] %v434_v25 }
  0x48   : > { %437 = vst [vmem:[%s2016_s5 + $0xb0] sm:$0xff] %v436_v26  ;;  %439 = vst [vmem:[%s2016_s5 + $0xb8] sm:$0xff] %v438_v27  ;;  %v440_v28 = vld [vmem:[%s2011_s10 + $0x180] sm:$0xff]  ;;  %v442_v29 = vld [vmem:[%s2011_s10 + $0x190] sm:$0xff] }
  0x49   : > { %v444_v30 = vld [vmem:[%s2011_s10 + $0x1a0] sm:$0xff]  ;;  %441 = vst [vmem:[%s2016_s5 + $0xc0] sm:$0xff] %v440_v28  ;;  %443 = vst [vmem:[%s2016_s5 + $0xc8] sm:$0xff] %v442_v29  ;;  %v446_v31 = vld [vmem:[%s2011_s10 + $0x1b0] sm:$0xff] }
  0x4a   : > { %445 = vst [vmem:[%s2016_s5 + $0xd0] sm:$0xff] %v444_v30  ;;  %v448_v32 = vld [vmem:[%s2011_s10 + $0x1c0] sm:$0xff]  ;;  %v450_v33 = vld [vmem:[%s2011_s10 + $0x1d0] sm:$0xff]  ;;  %447 = vst [vmem:[%s2016_s5 + $0xd8] sm:$0xff] %v446_v31 }
  0x4b   : > { %449 = vst [vmem:[%s2016_s5 + $0xe0] sm:$0xff] %v448_v32  ;;  %451 = vst [vmem:[%s2016_s5 + $0xe8] sm:$0xff] %v450_v33  ;;  %v452_v34 = vld [vmem:[%s2011_s10 + $0x1e0] sm:$0xff]  ;;  %v454_v35 = vld [vmem:[%s2011_s10 + $0x1f0] sm:$0xff] }
  0x4c   : > { %v456_v36 = vld [vmem:[%s2011_s10 + $0x200] sm:$0xff]  ;;  %453 = vst [vmem:[%s2016_s5 + $0xf0] sm:$0xff] %v452_v34  ;;  %455 = vst [vmem:[%s2016_s5 + $0xf8] sm:$0xff] %v454_v35  ;;  %v458_v37 = vld [vmem:[%s2011_s10 + $0x210] sm:$0xff] }
  0x4d   : > { %457 = vst [vmem:[%s2016_s5 + $0x100] sm:$0xff] %v456_v36  ;;  %v460_v38 = vld [vmem:[%s2011_s10 + $0x220] sm:$0xff]  ;;  %v462_v39 = vld [vmem:[%s2011_s10 + $0x230] sm:$0xff]  ;;  %459 = vst [vmem:[%s2016_s5 + $0x108] sm:$0xff] %v458_v37 }
  0x4e   : > { %461 = vst [vmem:[%s2016_s5 + $0x110] sm:$0xff] %v460_v38  ;;  %463 = vst [vmem:[%s2016_s5 + $0x118] sm:$0xff] %v462_v39  ;;  %v464_v40 = vld [vmem:[%s2011_s10 + $0x240] sm:$0xff]  ;;  %v466_v41 = vld [vmem:[%s2011_s10 + $0x250] sm:$0xff] }
  0x4f   : > { %v468_v42 = vld [vmem:[%s2011_s10 + $0x260] sm:$0xff]  ;;  %465 = vst [vmem:[%s2016_s5 + $0x120] sm:$0xff] %v464_v40  ;;  %467 = vst [vmem:[%s2016_s5 + $0x128] sm:$0xff] %v466_v41  ;;  %v470_v43 = vld [vmem:[%s2011_s10 + $0x270] sm:$0xff] }
  0x50   : > { %469 = vst [vmem:[%s2016_s5 + $0x130] sm:$0xff] %v468_v42  ;;  %v472_v44 = vld [vmem:[%s2011_s10 + $0x280] sm:$0xff]  ;;  %v474_v45 = vld [vmem:[%s2011_s10 + $0x290] sm:$0xff]  ;;  %471 = vst [vmem:[%s2016_s5 + $0x138] sm:$0xff] %v470_v43 }
  0x51   : > { %473 = vst [vmem:[%s2016_s5 + $0x140] sm:$0xff] %v472_v44  ;;  %475 = vst [vmem:[%s2016_s5 + $0x148] sm:$0xff] %v474_v45  ;;  %v476_v46 = vld [vmem:[%s2011_s10 + $0x2a0] sm:$0xff]  ;;  %v478_v47 = vld [vmem:[%s2011_s10 + $0x2b0] sm:$0xff] }
  0x52   : > { %v480_v48 = vld [vmem:[%s2011_s10 + $0x2c0] sm:$0xff]  ;;  %477 = vst [vmem:[%s2016_s5 + $0x150] sm:$0xff] %v476_v46  ;;  %479 = vst [vmem:[%s2016_s5 + $0x158] sm:$0xff] %v478_v47  ;;  %v482_v49 = vld [vmem:[%s2011_s10 + $0x2d0] sm:$0xff] }
  0x53   : > { %481 = vst [vmem:[%s2016_s5 + $0x160] sm:$0xff] %v480_v48  ;;  %v484_v50 = vld [vmem:[%s2011_s10 + $0x2e0] sm:$0xff]  ;;  %v486_v51 = vld [vmem:[%s2011_s10 + $0x2f0] sm:$0xff]  ;;  %483 = vst [vmem:[%s2016_s5 + $0x168] sm:$0xff] %v482_v49 }
  0x54   : > { %485 = vst [vmem:[%s2016_s5 + $0x170] sm:$0xff] %v484_v50  ;;  %487 = vst [vmem:[%s2016_s5 + $0x178] sm:$0xff] %v486_v51  ;;  %v488_v52 = vld [vmem:[%s2011_s10 + $0x300] sm:$0xff]  ;;  %v490_v53 = vld [vmem:[%s2011_s10 + $0x310] sm:$0xff] }
  0x55   : > { %v492_v54 = vld [vmem:[%s2011_s10 + $0x320] sm:$0xff]  ;;  %489 = vst [vmem:[%s2016_s5 + $0x180] sm:$0xff] %v488_v52  ;;  %491 = vst [vmem:[%s2016_s5 + $0x188] sm:$0xff] %v490_v53  ;;  %v494_v55 = vld [vmem:[%s2011_s10 + $0x330] sm:$0xff] }
  0x56   : > { %493 = vst [vmem:[%s2016_s5 + $0x190] sm:$0xff] %v492_v54  ;;  %v496_v56 = vld [vmem:[%s2011_s10 + $0x340] sm:$0xff]  ;;  %v498_v57 = vld [vmem:[%s2011_s10 + $0x350] sm:$0xff]  ;;  %495 = vst [vmem:[%s2016_s5 + $0x198] sm:$0xff] %v494_v55 }
  0x57   : > { %497 = vst [vmem:[%s2016_s5 + $0x1a0] sm:$0xff] %v496_v56  ;;  %499 = vst [vmem:[%s2016_s5 + $0x1a8] sm:$0xff] %v498_v57  ;;  %v500_v58 = vld [vmem:[%s2011_s10 + $0x360] sm:$0xff]  ;;  %v502_v59 = vld [vmem:[%s2011_s10 + $0x370] sm:$0xff] }
  0x58   : > { %v504_v60 = vld [vmem:[%s2011_s10 + $0x380] sm:$0xff]  ;;  %501 = vst [vmem:[%s2016_s5 + $0x1b0] sm:$0xff] %v500_v58  ;;  %503 = vst [vmem:[%s2016_s5 + $0x1b8] sm:$0xff] %v502_v59  ;;  %v506_v61 = vld [vmem:[%s2011_s10 + $0x390] sm:$0xff] }
  0x59   : > { %505 = vst [vmem:[%s2016_s5 + $0x1c0] sm:$0xff] %v504_v60  ;;  %v508_v62 = vld [vmem:[%s2011_s10 + $0x3a0] sm:$0xff]  ;;  %v510_v63 = vld [vmem:[%s2011_s10 + $0x3b0] sm:$0xff]  ;;  %507 = vst [vmem:[%s2016_s5 + $0x1c8] sm:$0xff] %v506_v61 }
  0x5a   : > { %509 = vst [vmem:[%s2016_s5 + $0x1d0] sm:$0xff] %v508_v62  ;;  %511 = vst [vmem:[%s2016_s5 + $0x1d8] sm:$0xff] %v510_v63  ;;  %v512_v0 = vld [vmem:[%s2011_s10 + $0x3c0] sm:$0xff]  ;;  %v514_v1 = vld [vmem:[%s2011_s10 + $0x3d0] sm:$0xff] }
  0x5b   : > { %v516_v2 = vld [vmem:[%s2011_s10 + $0x3e0] sm:$0xff]  ;;  %513 = vst [vmem:[%s2016_s5 + $0x1e0] sm:$0xff] %v512_v0  ;;  %515 = vst [vmem:[%s2016_s5 + $0x1e8] sm:$0xff] %v514_v1  ;;  %v518_v3 = vld [vmem:[%s2011_s10 + $0x3f0] sm:$0xff] }
  0x5c   : > { %517 = vst [vmem:[%s2016_s5 + $0x1f0] sm:$0xff] %v516_v2  ;;  %519 = vst [vmem:[%s2016_s5 + $0x1f8] sm:$0xff] %v518_v3 }
  0x5d PF: > { %p1447_p1 = scmp.ge.s32.totalorder %s1850_s27, 1  ;;  %p524_p2 = scmp.lt.s32.totalorder %s1850_s27, 9 }
  0x5f   : > { %p525_p3 = pnand %p1447_p1, %p524_p2 }
  0x60   : > { %s531_s12 = sand.u32 (!%p525_p3), 1, %s1818_s19   ;;  %s538_s14 = sand.u32 (!%p525_p3), 1, %s1810_s17  }
  0x61   : > { %528 = sbr.rel (%p525_p3) target bundleno = 425 (0x1a9), region = 81  ;;  %s1448_s9 = sshll.u32 (!%p525_p3), %s531_s12, 5 }
  0x62   : > { %s1449_s2 = sshll.u32 (!%p525_p3), %s538_s14, 9  ;;  %s559_s29 = sand.u32 (!%p525_p3), 1, %s1802_s15  }
  0x63   : > { %s2149_s6 = sshll.u32 (!%p525_p3), %s1830_s22, 1  ;;  %s1450_s7 = sshll.u32 (!%p525_p3), %s559_s29, 4 }
  0x64   : > { %p591_p4 = scmp.lt.s32.totalorder (!%p525_p3), %s1834_s23, 1  ;;  %p593_p5 = scmp.lt.s32.totalorder (!%p525_p3), %s2149_s6, 3 }
  0x65   : > { %s2327_s15 = sld [smem:[#allocation15_spill]] (!%p525_p3)  ;;  %s2165_s14 = scalar_lea.vmem (!%p525_p3), [#allocation3], %s1448_s9 }
  0x66   : > { %s592_s28 = scalar_select %p591_p4, %s1834_s23, 1 }
  0x67   : > { %s594_s8 = scalar_select %p593_p5, %s2149_s6, 3 }
  0x68   : > { %s1452_s30 = sshll.u32 %s592_s28, 2  ;;  %s2167_s29 = scalar_lea.vmem [#allocation4], %s1449_s2 }
  0x69   : > { %s596_s10 = sadd.s32 %s1452_s30, %s594_s8  ;;  %s2169_s26 = scalar_lea.vmem [#allocation5], %s1450_s7 }
  0x6a   : > { %s1453_s5 = sshll.u32 %s596_s10, 3  ;;  %s2328_s25 = sld [smem:[#allocation6_spill]] }
  0x6b   : > { %s2158_s19 = scalar_lea.vmem %s2304_s3, %s1453_s5  ;;  %s2163_s22 = scalar_lea.vmem %s2327_s15, %s1453_s5 }
  0x70   : > { %p1457_p6 = scmp.ne.s32.totalorder %s2328_s25, 0 }
  0x72   : > { %613 = sbr.rel (%p1457_p6) target bundleno = 122 (0x7a), region = 93 }
  0x77   : > { %v1852_v4 = vmov 0.0  }
  0x78   : > { %614 = vst [vmem:[#allocation2 + $0x10] sm:$0xff] %v1852_v4  ;;  %615 = vst [vmem:[#allocation2] sm:$0xff] %v1852_v4 }
  0x79   : > { %616 = vst [vmem:[#allocation2 + $0x18] sm:$0xff] %v1852_v4  ;;  %617 = vst [vmem:[#allocation2 + $0x8] sm:$0xff] %v1852_v4 }
  0x7a PF: > { %v1646_v5 = vld [vmem:[%s2167_s29 + $0x74] ss:$8 sps:$4 sm:$0xff]   ;;  %v1650_v7 = vld [vmem:[%s2167_s29 + $0x70] ss:$8 sps:$4 sm:$0xff]   ;;  %v1652_v9 = vld [vmem:[%s2167_s29 + $0x64] ss:$8 sps:$4 sm:$0xff]  }
  0x7b   : > { %v1648_v6 = vld [vmem:[%s2167_s29 + $0x174] ss:$8 sps:$4 sm:$0xff]   ;;  %1030 = vmatprep.subr.bf16.mxu0 %v1646_v5  ;;  %v1651_v8 = vld [vmem:[%s2167_s29 + $0x170] ss:$8 sps:$4 sm:$0xff]   ;;  %v1654_v10 = vld [vmem:[%s2167_s29 + $0x164] ss:$8 sps:$4 sm:$0xff]  }
  0x7c   : > { %1073 = vmatprep.subr.bf16.mxu1 %v1648_v6  ;;  %1031 = vmatpush1.bf16.msra.mxu0 %v1650_v7  ;;  %v1656_v11 = vld [vmem:[%s2167_s29 + $0x60] ss:$8 sps:$4 sm:$0xff]   ;;  %v1658_v13 = vld [vmem:[%s2167_s29 + $0x54] ss:$8 sps:$4 sm:$0xff]   ;;  %v1662_v15 = vld [vmem:[%s2167_s29 + $0x50] ss:$8 sps:$4 sm:$0xff]  }
  0x7d   : > { %1074 = vmatpush1.bf16.msra.mxu1 %v1651_v8  ;;  %1032 = vmatprep.subr.bf16.mxu0 %v1652_v9  ;;  %v1657_v12 = vld [vmem:[%s2167_s29 + $0x160] ss:$8 sps:$4 sm:$0xff]   ;;  %v1660_v14 = vld [vmem:[%s2167_s29 + $0x154] ss:$8 sps:$4 sm:$0xff]   ;;  %v1663_v16 = vld [vmem:[%s2167_s29 + $0x150] ss:$8 sps:$4 sm:$0xff]  }
  0x7e   : > { %1075 = vmatprep.subr.bf16.mxu1 %v1654_v10  ;;  %v1664_v17 = vld [vmem:[%s2167_s29 + $0x44] ss:$8 sps:$4 sm:$0xff]   ;;  %v1668_v19 = vld [vmem:[%s2167_s29 + $0x40] ss:$8 sps:$4 sm:$0xff]   ;;  %v1670_v21 = vld [vmem:[%s2167_s29 + $0x34] ss:$8 sps:$4 sm:$0xff]  }
  0x7f   : > { %v1666_v18 = vld [vmem:[%s2167_s29 + $0x144] ss:$8 sps:$4 sm:$0xff]   ;;  %v1669_v20 = vld [vmem:[%s2167_s29 + $0x140] ss:$8 sps:$4 sm:$0xff]   ;;  %v1672_v22 = vld [vmem:[%s2167_s29 + $0x134] ss:$8 sps:$4 sm:$0xff]  }
  0x80   : > { %1033 = vmatpush1.bf16.msra.mxu0 %v1656_v11  ;;  %v1674_v23 = vld [vmem:[%s2167_s29 + $0x30] ss:$8 sps:$4 sm:$0xff]   ;;  %v1676_v25 = vld [vmem:[%s2167_s29 + $0x24] ss:$8 sps:$4 sm:$0xff]   ;;  %v1680_v27 = vld [vmem:[%s2167_s29 + $0x20] ss:$8 sps:$4 sm:$0xff]  }
  0x81   : > { %1076 = vmatpush1.bf16.msra.mxu1 %v1657_v12  ;;  %1034 = vmatprep.subr.bf16.mxu0 %v1658_v13  ;;  %v1675_v24 = vld [vmem:[%s2167_s29 + $0x130] ss:$8 sps:$4 sm:$0xff]   ;;  %v1678_v26 = vld [vmem:[%s2167_s29 + $0x124] ss:$8 sps:$4 sm:$0xff]   ;;  %v1681_v28 = vld [vmem:[%s2167_s29 + $0x120] ss:$8 sps:$4 sm:$0xff]  }
  0x82   : > { %1077 = vmatprep.subr.bf16.mxu1 %v1660_v14  ;;  %v1682_v29 = vld [vmem:[%s2167_s29 + $0x14] ss:$8 sps:$4 sm:$0xff]   ;;  %v1686_v31 = vld [vmem:[%s2167_s29 + $0x10] ss:$8 sps:$4 sm:$0xff]   ;;  %v1688_v33 = vld [vmem:[%s2167_s29 + $0x4] ss:$8 sps:$4 sm:$0xff]  }
  0x83   : > { %v1684_v30 = vld [vmem:[%s2167_s29 + $0x114] ss:$8 sps:$4 sm:$0xff]   ;;  %v1687_v32 = vld [vmem:[%s2167_s29 + $0x110] ss:$8 sps:$4 sm:$0xff]   ;;  %v1690_v34 = vld [vmem:[%s2167_s29 + $0x104] ss:$8 sps:$4 sm:$0xff]  }
  0x84   : > { %1035 = vmatpush1.bf16.msra.mxu0 %v1662_v15  ;;  %v1692_v35 = vld [vmem:[%s2167_s29] ss:$8 sps:$4 sm:$0xff]   ;;  %v1694_v37 = vld [vmem:[%s2167_s29 + $0xf4] ss:$8 sps:$4 sm:$0xff]   ;;  %v1698_v39 = vld [vmem:[%s2167_s29 + $0xf0] ss:$8 sps:$4 sm:$0xff]  }
  0x85   : > { %1078 = vmatpush1.bf16.msra.mxu1 %v1663_v16  ;;  %1036 = vmatprep.subr.bf16.mxu0 %v1664_v17  ;;  %v1693_v36 = vld [vmem:[%s2167_s29 + $0x100] ss:$8 sps:$4 sm:$0xff]   ;;  %v1696_v38 = vld [vmem:[%s2167_s29 + $0x1f4] ss:$8 sps:$4 sm:$0xff]   ;;  %v1699_v40 = vld [vmem:[%s2167_s29 + $0x1f0] ss:$8 sps:$4 sm:$0xff]  }
  0x86   : > { %1079 = vmatprep.subr.bf16.mxu1 %v1666_v18  ;;  %v1700_v41 = vld [vmem:[%s2167_s29 + $0xe4] ss:$8 sps:$4 sm:$0xff]   ;;  %v1704_v43 = vld [vmem:[%s2167_s29 + $0xe0] ss:$8 sps:$4 sm:$0xff]   ;;  %v1706_v45 = vld [vmem:[%s2167_s29 + $0xd4] ss:$8 sps:$4 sm:$0xff]  }
  0x87   : > { %v1702_v42 = vld [vmem:[%s2167_s29 + $0x1e4] ss:$8 sps:$4 sm:$0xff]   ;;  %v1705_v44 = vld [vmem:[%s2167_s29 + $0x1e0] ss:$8 sps:$4 sm:$0xff]   ;;  %v1708_v46 = vld [vmem:[%s2167_s29 + $0x1d4] ss:$8 sps:$4 sm:$0xff]  }
  0x88   : > { %1037 = vmatpush1.bf16.msra.mxu0 %v1668_v19  ;;  %v1710_v47 = vld [vmem:[%s2167_s29 + $0xd0] ss:$8 sps:$4 sm:$0xff]   ;;  %v1712_v49 = vld [vmem:[%s2167_s29 + $0xc4] ss:$8 sps:$4 sm:$0xff]   ;;  %v1716_v51 = vld [vmem:[%s2167_s29 + $0xc0] ss:$8 sps:$4 sm:$0xff]  }
  0x89   : > { %1080 = vmatpush1.bf16.msra.mxu1 %v1669_v20  ;;  %1038 = vmatprep.subr.bf16.mxu0 %v1670_v21  ;;  %v1711_v48 = vld [vmem:[%s2167_s29 + $0x1d0] ss:$8 sps:$4 sm:$0xff]   ;;  %v1714_v50 = vld [vmem:[%s2167_s29 + $0x1c4] ss:$8 sps:$4 sm:$0xff]   ;;  %v1717_v53 = vld [vmem:[%s2167_s29 + $0x1c0] ss:$8 sps:$4 sm:$0xff]  }
  0x8a   : > { %1081 = vmatprep.subr.bf16.mxu1 %v1672_v22  ;;  %v1744_v52 = vld [vmem:[%s2165_s14 + $0x4] ss:$16 sps:$4 sm:$0xff]   ;;  %v1747_v56 = vld [vmem:[%s2165_s14 + $0xc] ss:$16 sps:$4 sm:$0xff]   ;;  %v1722_v57 = vld [vmem:[%s2167_s29 + $0xb0] ss:$8 sps:$4 sm:$0xff]  }
  0x8b   : > { %v1718_v54 = vld [vmem:[%s2167_s29 + $0xb4] ss:$8 sps:$4 sm:$0xff]   ;;  %1062 = vmatprep.mubr.bf16.mxu0 %v1744_v52  ;;  %1105 = vmatprep.mubr.bf16.mxu1 %v1747_v56  ;;  %v1723_v58 = vld [vmem:[%s2167_s29 + $0x1b0] ss:$8 sps:$4 sm:$0xff]   ;;  %v1724_v59 = vld [vmem:[%s2167_s29 + $0xa4] ss:$8 sps:$4 sm:$0xff]  }
  0x8c   : > { %1039 = vmatpush1.bf16.msra.mxu0 %v1674_v23  ;;  %v1720_v55 = vld [vmem:[%s2167_s29 + $0x1b4] ss:$8 sps:$4 sm:$0xff]   ;;  %v1726_v60 = vld [vmem:[%s2167_s29 + $0x1a4] ss:$8 sps:$4 sm:$0xff]   ;;  %v1728_v61 = vld [vmem:[%s2167_s29 + $0xa0] ss:$8 sps:$4 sm:$0xff]  }
  0x8d   : > { %1082 = vmatpush1.bf16.msra.mxu1 %v1675_v24  ;;  %1040 = vmatprep.subr.bf16.mxu0 %v1676_v25  ;;  %v1729_v62 = vld [vmem:[%s2167_s29 + $0x1a0] ss:$8 sps:$4 sm:$0xff]   ;;  %v1730_v63 = vld [vmem:[%s2167_s29 + $0x94] ss:$8 sps:$4 sm:$0xff]   ;;  %v1734_v1 = vld [vmem:[%s2167_s29 + $0x90] ss:$8 sps:$4 sm:$0xff]  }
  0x8e   : > { %1083 = vmatprep.subr.bf16.mxu1 %v1678_v26  ;;  %v1732_v0 = vld [vmem:[%s2167_s29 + $0x194] ss:$8 sps:$4 sm:$0xff]   ;;  %v1735_v2 = vld [vmem:[%s2167_s29 + $0x190] ss:$8 sps:$4 sm:$0xff]   ;;  %v1736_v3 = vld [vmem:[%s2167_s29 + $0x84] ss:$8 sps:$4 sm:$0xff]  }
  0x8f   : > { %v1738_v4 = vld [vmem:[%s2167_s29 + $0x184] ss:$8 sps:$4 sm:$0xff]   ;;  %v1740_v5 = vld [vmem:[%s2167_s29 + $0x80] ss:$8 sps:$4 sm:$0xff]   ;;  %v618_v10 = vld [vmem:[#allocation2 + $0x10] sm:$0xff]  ;;  %s2329_s0 = sld [smem:[#allocation6_spill]] }
  0x90   : > { %1041 = vmatpush1.bf16.msra.mxu0 %v1680_v27  ;;  %v1741_v6 = vld [vmem:[%s2167_s29 + $0x180] ss:$8 sps:$4 sm:$0xff]   ;;  %v620_v19 = vld [vmem:[#allocation2 + $0x18] sm:$0xff] }
  0x91   : > { %1084 = vmatpush1.bf16.msra.mxu1 %v1681_v28  ;;  %1042 = vmatprep.subr.bf16.mxu0 %v1682_v29  ;;  %v1742_v7 = vld [vmem:[%s2165_s14] ss:$16 sps:$4 sm:$0xff]   ;;  %v1745_v8 = vld [vmem:[%s2165_s14 + $0x8] ss:$16 sps:$4 sm:$0xff]  }
  0x92   : > { %1085 = vmatprep.subr.bf16.mxu1 %v1684_v30  ;;  %v619_v14 = vld [vmem:[#allocation2] sm:$0xff]  ;;  %v621_v24 = vld [vmem:[#allocation2 + $0x8] sm:$0xff] }
  0x94   : > { %1043 = vmatpush1.bf16.msra.mxu0 %v1686_v31 }
  0x95   : > { %1086 = vmatpush1.bf16.msra.mxu1 %v1687_v32  ;;  %1044 = vmatprep.subr.bf16.mxu0 %v1688_v33  ;;  %p1526_p7 = scmp.ne.s32.totalorder %s2329_s0, 1 }
  0x96   : > { %1087 = vmatprep.subr.bf16.mxu1 %v1690_v34 }
  0x98   : > { %1045 = vmatpush1.bf16.msra.mxu0 %v1692_v35 }
  0x99   : > { %1088 = vmatpush1.bf16.msra.mxu1 %v1693_v36  ;;  %1046 = vmatprep.subr.bf16.mxu0 %v1694_v37 }
  0x9a   : > { %1089 = vmatprep.subr.bf16.mxu1 %v1696_v38 }
  0x9c   : > { %1047 = vmatpush2.bf16.msra.mxu0 %v1698_v39 }
  0x9d   : > { %1090 = vmatpush2.bf16.msra.mxu1 %v1699_v40  ;;  %1048 = vmatprep.subr.bf16.mxu0 %v1700_v41 }
  0x9e   : > { %1091 = vmatprep.subr.bf16.mxu1 %v1702_v42 }
  0xa0   : > { %1049 = vmatpush2.bf16.msra.mxu0 %v1704_v43 }
  0xa1   : > { %1092 = vmatpush2.bf16.msra.mxu1 %v1705_v44  ;;  %1050 = vmatprep.subr.bf16.mxu0 %v1706_v45 }
  0xa2   : > { %1093 = vmatprep.subr.bf16.mxu1 %v1708_v46 }
  0xa4   : > { %1051 = vmatpush2.bf16.msra.mxu0 %v1710_v47 }
  0xa5   : > { %1094 = vmatpush2.bf16.msra.mxu1 %v1711_v48  ;;  %1052 = vmatprep.subr.bf16.mxu0 %v1712_v49 }
  0xa6   : > { %1095 = vmatprep.subr.bf16.mxu1 %v1714_v50 }
  0xa8   : > { %1053 = vmatpush2.bf16.msra.mxu0 %v1716_v51 }
  0xa9   : > { %1096 = vmatpush2.bf16.msra.mxu1 %v1717_v53  ;;  %1054 = vmatprep.subr.bf16.mxu0 %v1718_v54 }
  0xaa   : > { %1097 = vmatprep.subr.bf16.mxu1 %v1720_v55 }
  0xac   : > { %1055 = vmatpush2.bf16.msra.mxu0 %v1722_v57 }
  0xad   : > { %1098 = vmatpush2.bf16.msra.mxu1 %v1723_v58  ;;  %1056 = vmatprep.subr.bf16.mxu0 %v1724_v59 }
  0xae   : > { %1099 = vmatprep.subr.bf16.mxu1 %v1726_v60 }
  0xb0   : > { %1057 = vmatpush2.bf16.msra.mxu0 %v1728_v61 }
  0xb1   : > { %1100 = vmatpush2.bf16.msra.mxu1 %v1729_v62  ;;  %1058 = vmatprep.subr.bf16.mxu0 %v1730_v63 }
  0xb2   : > { %1101 = vmatprep.subr.bf16.mxu1 %v1732_v0 }
  0xb4   : > { %1059 = vmatpush2.bf16.msra.mxu0 %v1734_v1 }
  0xb5   : > { %1102 = vmatpush2.bf16.msra.mxu1 %v1735_v2  ;;  %1060 = vmatprep.subr.bf16.mxu0 %v1736_v3 }
  0xb6   : > { %1103 = vmatprep.subr.bf16.mxu1 %v1738_v4 }
  0xb8   : > { %1061 = vmatpush2.bf16.msra.mxu0 %v1740_v5 }
  0xb9   : > { %1104 = vmatpush2.bf16.msra.mxu1 %v1741_v6 }
  0xbb   : > { %1063 = vmatmul.mubr.bf16.vlgmr.msra.gmra.mxu0 %v1742_v7 }
  0xbc   : > { %1106 = vmatmul.mubr.bf16.vlgmr.msra.gmra.mxu1 %v1745_v8 }
 0x17b   : > { %v1064_v9 = vpop.f32.mrf.mxu0 }
 0x17c   : > { %v1107_v11 = vpop.f32.mrf.mxu1 }
 0x17d   : > { %v1108_v12 = vadd.f32 %v1107_v11, %v1064_v9  ;;  %v1066_v13 = vpop.f32.mrf.mxu0 }
 0x17e   : > { %v1109_v15 = vpop.f32.mrf.mxu1 }
 0x17f   : > { %v1116_v16 = vadd.f32 %v1108_v12, %v618_v10  ;;  %v1110_v17 = vadd.f32 %v1109_v15, %v1066_v13  ;;  %v1068_v18 = vpop.f32.mrf.mxu0 }
 0x180   : > { %v1111_v20 = vpop.f32.mrf.mxu1 }
 0x181   : > { %1120 = vst [vmem:[#allocation2 + $0x10] sm:$0xff] %v1116_v16  ;;  %v1117_v21 = vadd.f32 %v1110_v17, %v619_v14  ;;  %v1112_v22 = vadd.f32 %v1111_v20, %v1068_v18  ;;  %v1070_v23 = vpop.f32.mrf.mxu0 }
 0x182   : > { %v1113_v25 = vpop.f32.mrf.mxu1 }
 0x183   : > { %1121 = vst [vmem:[#allocation2] sm:$0xff] %v1117_v21  ;;  %v1118_v26 = vadd.f32 %v1112_v22, %v620_v19  ;;  %v1114_v27 = vadd.f32 %v1113_v25, %v1070_v23  ;;  %1127 = sbr.rel (%p1526_p7) target bundleno = 416 (0x1a0), region = 97 }
 0x185   : > { %1122 = vst [vmem:[#allocation2 + $0x18] sm:$0xff] %v1118_v26  ;;  %v1119_v28 = vadd.f32 %v1114_v27, %v621_v24 }
 0x187   : > { %1123 = vst [vmem:[#allocation2 + $0x8] sm:$0xff] %v1119_v28 }
 0x188   : > { %v1128_v29 = vld [vmem:[#allocation2 + $0x10] sm:$0xff] }
 0x189   : > { %v1160_v33 = vmul.f32 %v1128_v29, %v1128_v29 }
 0x18a   : > { %v1129_v30 = vld [vmem:[#allocation2] sm:$0xff] }
 0x18b   : > { %v1538_v32 = vpack.c.bf16 %v1129_v30, %v1128_v29  ;;  %v1161_v34 = vmul.f32 %v1129_v30, %v1129_v30 }
 0x18c   : > { %v1130_v31 = vld [vmem:[#allocation2 + $0x18] sm:$0xff] }
 0x18d   : > { %v1146_v36 = vadd.f32 %v1130_v31, %v1128_v29  ;;  %v1162_v39 = vmul.f32 %v1130_v31, %v1130_v31  ;;  %1144 = vst [vmem:[%s2169_s26] sm:$0xff] %v1538_v32 }
 0x18e   : > { %v1131_v35 = vld [vmem:[#allocation2 + $0x8] sm:$0xff] }
 0x18f   : > { %v1539_v37 = vpack.c.bf16 %v1131_v35, %v1130_v31  ;;  %v1153_v38 = vadd.f32 %v1131_v35, %v1129_v30  ;;  %v1163_v40 = vmul.f32 %v1131_v35, %v1131_v35  ;;  %v1147_v41 = vrot.slane %v1146_v36, 4 }
 0x190   : > { %v1164_v43 = vadd.f32 %v1162_v39, %v1160_v33 }
 0x191   : > { %1145 = vst [vmem:[%s2169_s26 + $0x8] sm:$0xff] %v1539_v37  ;;  %v1154_v42 = vrot.slane %v1153_v38, 4  ;;  %v1171_v44 = vadd.f32 %v1163_v40, %v1161_v34  ;;  %v1148_v45 = vadd.f32 %v1147_v41, %v1146_v36 }
 0x192   : > { %v1165_v47 = vrot.slane %v1164_v43, 4 }
 0x193   : > { %v1155_v46 = vadd.f32 %v1154_v42, %v1153_v38  ;;  %v1172_v48 = vrot.slane %v1171_v44, 4  ;;  %v1149_v49 = vrot.slane %v1148_v45, 2 }
 0x194   : > { %v1166_v51 = vadd.f32 %v1165_v47, %v1164_v43 }
 0x195   : > { %v1156_v50 = vrot.slane %v1155_v46, 2  ;;  %v1173_v52 = vadd.f32 %v1172_v48, %v1171_v44  ;;  %v1150_v53 = vadd.f32 %v1149_v49, %v1148_v45 }
 0x196   : > { %v1167_v55 = vrot.slane %v1166_v51, 2 }
 0x197   : > { %v1157_v54 = vadd.f32 %v1156_v50, %v1155_v46  ;;  %v1174_v56 = vrot.slane %v1173_v52, 2  ;;  %v1151_v57 = vrot.slane %v1150_v53, 1 }
 0x198   : > { %v1168_v59 = vadd.f32 %v1167_v55, %v1166_v51 }
 0x199   : > { %v1158_v58 = vrot.slane %v1157_v54, 1  ;;  %v1175_v60 = vadd.f32 %v1174_v56, %v1173_v52  ;;  %v1152_v61 = vadd.f32 %v1151_v57, %v1150_v53 }
 0x19a   : > { %v1169_v63 = vrot.slane %v1168_v59, 1 }
 0x19b   : > { %v1159_v62 = vadd.f32 %v1158_v58, %v1157_v54  ;;  %v1176_v0 = vrot.slane %v1175_v60, 1  ;;  %1178 = vst [vmem:[%s2158_s19] sm:$0xff] %v1152_v61 }
 0x19c   : > { %v1170_v1 = vadd.f32 %v1169_v63, %v1168_v59 }
 0x19d   : > { %1179 = vst [vmem:[%s2158_s19 + $0x8] sm:$0xff] %v1159_v62  ;;  %v1177_v2 = vadd.f32 %v1176_v0, %v1175_v60 }
 0x19e   : > { %1180 = vst [vmem:[%s2163_s22] sm:$0xff] %v1170_v1 }
 0x19f   : > { %1181 = vst [vmem:[%s2163_s22 + $0x8] sm:$0xff] %v1177_v2 }
 0x1a0 PF: > { %1206 = sbr.rel (!%p1990_p13) target bundleno = 425 (0x1a9), region = 101  ;;  %s1540_s1 = sshll.u32 (%p1990_p13), %s1834_s23, 3  ;;  %v1243_v3 = vld [vmem:[%s2169_s26] sm:$0xff] (%p1990_p13)  ;;  %v1245_v4 = vld [vmem:[%s2169_s26 + $0x8] sm:$0xff] (%p1990_p13) }
 0x1a1   : > { %s1210_s25 = sadd.s32 (%p1990_p13), %s1540_s1, %s2149_s6  ;;  %s2330_s28 = sld [smem:[#allocation14_spill]] (%p1990_p13) }
 0x1a2   : > { %s1533_s9 = sshll.u32 (%p1990_p13), %s1210_s25, 2 }
 0x1a7   : > { %s1212_s8 = scalar_lea.vmem %s2330_s28, %s1533_s9 }
 0x1a8   : > { %1244 = vst [vmem:[%s1212_s8] sm:$0xff] %v1243_v3  ;;  %1246 = vst [vmem:[%s1212_s8 + $0x10] sm:$0xff] %v1245_v4 }
 0x1a9 PF: > { %s15_s27 = sadd.s32 1, %s1850_s27   ;;  %s2332_s22 = sld [smem:[#allocation7_spill]] }
 0x1aa   : > { %p2257_p8 = scmp.ge.s32.totalorder %s15_s27, 10   ;;  %s2333_s23 = sld [smem:[#allocation8_spill]] }
 0x1ab   : > { %s2334_s26 = sld [smem:[#allocation9_spill]]  ;;  %s2337_s15 = smov %s1806_s16 }
 0x1ac   : > { %s2335_s25 = sld [smem:[#allocation10_spill]]  ;;  %s2338_s16 = smov %s1988_s11 }
 0x1ad   : > { %s2336_s6 = sld [smem:[#allocation11_spill]]  ;;  %s2339_s17 = smov %s1814_s18 }
 0x1ae   : > { %s2340_s18 = smov %s1975_s13  ;;  %s2341_s19 = smov %s1822_s20 }
 0x1af   : > { %s2342_s20 = smov %s1985_s21  ;;  %s2343_s21 = smov %s1838_s24 }
 0x1b0   :  { %14 = sbr.rel (!%p2257_p8) target bundleno = 12 (0xc), region = 202 }
 0x1b1   : > { %s2344_s24 = smov %s2334_s26 }
 0x1b3   : > { %s2345_s26 = smov %s2336_s6 }

// kernel: tile.33
= control target key start
LH: loop header
LB: loop body
LE: loop exit
PB: predicated region body
PF: predicated region fallthrough
CT: control target
= control target key end

     0   :  { %s22_s0 = inlined_call_operand.vmem [shape: f32[64], index: 0, kind: input, shape index: {}]   ;;  %s23_s1 = inlined_call_operand.vmem [shape: f32[4,64], index: 1, kind: output, shape index: {}]  }
   0x1   :  { %v4_v0 = vld [vmem:[%s22_s0] ss:$0 sm:$0xff] }
   0x2   :  { %5 = vst [vmem:[%s23_s1] sm:$0xf] %v4_v0 }

// kernel: tile.38
= control target key start
LH: loop header
LB: loop body
LE: loop exit
PB: predicated region body
PF: predicated region fallthrough
CT: control target
= control target key end

     0   :  { %s7_s8 = smov 3  ;;  %vm9_vm0 = vcmask 523264   ;;  %s34_s9 = smov 64   ;;  %vm16_vm1 = vcmask 1048064   ;;  %s54_s0 = inlined_call_operand.vmem [shape: f32[4,64], index: 0, kind: input, shape index: {}]   ;;  %s55_s1 = inlined_call_operand.vmem [shape: f32[1,256], index: 1, kind: output, shape index: {}]  }
   0x1   :  { %v5_v0 = vld [vmem:[%s54_s0] sm:$0xf]  ;;  %s12_s0 = smov 3 }
   0x2   :  { %6 = vst [vmem:[#allocation1] sm:$0xf] %v5_v0 }
   0x9   :  { %v13_v1 = vld [vmem:[#allocation1 + $0x1] ss:$2 sm:%s12_s0]   ;;  %v8_v2 = vld [vmem:[#allocation1] ss:$2 sm:%s7_s8]  }
   0xa   :  { %14 = vrot.lane.b32.xlu0 %v13_v1, %s34_s9  ;;  %10 = vst.msk [vmem:[#allocation0] ss:$8 sm:$0x3] %vm9_vm0, %v8_v2  }
  0x7c   :  { %v15_v3 = vpop.permute.xlu0 %14  }
  0x7d   :  { %17 = vst.msk [vmem:[#allocation0] ss:$8 sm:$0x3] %vm16_vm1, %v15_v3  }
  0x84   :  { %v22_v4 = vld [vmem:[#allocation0] sm:$0x1]  ;;  %v27_v5 = vld [vmem:[#allocation0 + $0x8] sm:$0x1] }
  0x85   :  { %25 = vst [vmem:[%s55_s1] sm:$0x1] %v22_v4  ;;  %32 = vst [vmem:[%s55_s1 + $0x1] sm:$0x1] %v27_v5 }

// kernel: generator_forward.48
= control target key start
LH: loop header
LB: loop body
LE: loop exit
PB: predicated region body
PF: predicated region fallthrough
CT: control target
= control target key end

     0   :  { %s456_s12 = smov 0   ;;  %s546_s0 = inlined_call_operand.vmem [shape: bf16[128,256], index: 0, kind: input, shape index: {}]   ;;  %s547_s1 = inlined_call_operand.vmem [shape: f32[1,256], index: 1, kind: input, shape index: {}]   ;;  %s548_s2 = inlined_call_operand.vmem [shape: f32[1,256], index: 2, kind: input, shape index: {}]   ;;  %s549_s3 = inlined_call_operand.vmem [shape: bf16[128,256], index: 3, kind: output, shape index: {}]  }
   0x1 LB: > { %s389_s13 = sadd.s32 4294967295, %s434_s12   ;;  %p393_p0 = scmp.ge.s32.totalorder %s434_s12, 1  ;;  %s434_s12 = sphi %s456_s12, %s13_s12  }
   0x2   : > { %p139_p1 = scmp.lt.s32.totalorder %s434_s12, 3 }
   0x4   : > { %p140_p2 = pnand %p393_p0, %p139_p1 }
   0x5   : > { %s394_s14 = sshll.u32 (!%p140_p2), %s389_s13, 3 }
   0x6   : > { %143 = sbr.rel (%p140_p2) target bundleno = 39 (0x27), region = 32  ;;  %p166_p3 = scmp.lt.s32.totalorder (!%p140_p2), %s394_s14, 15 }
   0xb   : > { %v205_v0 = vlaneseq  ;;  %s551_s14 = smov (!%p166_p3, %s394_s14), 15  ;;  %v203_v2 = vld [vmem:[%s547_s1] sm:$0x3] }
   0xc   : > { %v231_v5 = vld [vmem:[%s548_s2] sm:$0x3]  ;;  %s410_s19 = sshll.u32 %s551_s14, 3 }
   0xd   : > { %v206_v1 = vshrl.u32 %v205_v0, 7  ;;  %s478_s22 = scalar_lea.vmem %s546_s0, %s410_s19  ;;  %s515_s25 = scalar_lea.vmem %s549_s3, %s410_s19 }
   0xe   : > { %v179_v8 = vld [vmem:[%s478_s22] sm:$0xff]  ;;  %v180_v11 = vld [vmem:[%s478_s22 + $0x8] sm:$0xff]  ;;  %v181_v12 = vld [vmem:[%s478_s22 + $0x10] sm:$0xff] }
   0xf   : > { %v207_v3 = vsub.s32 0, %v206_v1  ;;  %v211_v4 = vsub.s32 1, %v206_v1  ;;  %v187_v13 = vunpack.c.l.bf16 %v179_v8  ;;  %v188_v14 = vunpack.c.h.bf16 %v179_v8  ;;  %v182_v17 = vld [vmem:[%s478_s22 + $0x18] sm:$0xff]  ;;  %v183_v38 = vld [vmem:[%s478_s22 + $0x20] sm:$0xff]  ;;  %v184_v43 = vld [vmem:[%s478_s22 + $0x28] sm:$0xff] }
  0x10   : > { %v189_v15 = vunpack.c.l.bf16 %v180_v11  ;;  %v190_v16 = vunpack.c.h.bf16 %v180_v11  ;;  %v191_v18 = vunpack.c.l.bf16 %v181_v12  ;;  %v192_v19 = vunpack.c.h.bf16 %v181_v12  ;;  %v185_v48 = vld [vmem:[%s478_s22 + $0x30] sm:$0xff]  ;;  %v186_v53 = vld [vmem:[%s478_s22 + $0x38] sm:$0xff] }
  0x11   : > { %v480_v6 = vrot.slane %v203_v2, %v207_v3  ;;  %v482_v7 = vrot.slane %v203_v2, %v211_v4  ;;  %v485_v9 = vrot.slane %v231_v5, %v207_v3  ;;  %v487_v10 = vrot.slane %v231_v5, %v211_v4 }
  0x12   : > { %v193_v20 = vunpack.c.l.bf16 %v182_v17  ;;  %v194_v21 = vunpack.c.h.bf16 %v182_v17  ;;  %v195_v51 = vunpack.c.l.bf16 %v183_v38  ;;  %v196_v52 = vunpack.c.h.bf16 %v183_v38 }
  0x13   : > { %v215_v22 = vmul.f32 %v480_v6, %v187_v13  ;;  %v216_v23 = vmul.f32 %v482_v7, %v188_v14  ;;  %v217_v24 = vmul.f32 %v480_v6, %v189_v15  ;;  %v218_v25 = vmul.f32 %v482_v7, %v190_v16 }
  0x14   : > { %v219_v26 = vmul.f32 %v480_v6, %v191_v18  ;;  %v220_v27 = vmul.f32 %v482_v7, %v192_v19  ;;  %v221_v28 = vmul.f32 %v480_v6, %v193_v20  ;;  %v222_v29 = vmul.f32 %v482_v7, %v194_v21 }
  0x15   : > { %v243_v30 = vadd.f32 %v485_v9, %v215_v22  ;;  %v244_v31 = vadd.f32 %v487_v10, %v216_v23  ;;  %v245_v32 = vadd.f32 %v485_v9, %v217_v24  ;;  %v246_v33 = vadd.f32 %v487_v10, %v218_v25 }
  0x16   : > { %v247_v34 = vadd.f32 %v485_v9, %v219_v26  ;;  %v248_v35 = vadd.f32 %v487_v10, %v220_v27  ;;  %v249_v36 = vadd.f32 %v485_v9, %v221_v28  ;;  %v250_v37 = vadd.f32 %v487_v10, %v222_v29 }
  0x17   : > { %v259_v39 = vmax.f32 %v243_v30, 0.0  ;;  %v260_v40 = vmax.f32 %v244_v31, 0.0  ;;  %v261_v41 = vmax.f32 %v245_v32, 0.0  ;;  %v262_v42 = vmax.f32 %v246_v33, 0.0 }
  0x18   : > { %v263_v44 = vmax.f32 %v247_v34, 0.0  ;;  %v264_v45 = vmax.f32 %v248_v35, 0.0  ;;  %v265_v46 = vmax.f32 %v249_v36, 0.0  ;;  %v266_v47 = vmax.f32 %v250_v37, 0.0 }
  0x19   : > { %v412_v49 = vpack.c.bf16 %v260_v40, %v259_v39  ;;  %v413_v50 = vpack.c.bf16 %v262_v42, %v261_v41  ;;  %v197_v56 = vunpack.c.l.bf16 %v184_v43  ;;  %v198_v57 = vunpack.c.h.bf16 %v184_v43 }
  0x1a   : > { %v414_v54 = vpack.c.bf16 %v264_v45, %v263_v44  ;;  %v415_v55 = vpack.c.bf16 %v266_v47, %v265_v46  ;;  %v223_v58 = vmul.f32 %v480_v6, %v195_v51  ;;  %v224_v59 = vmul.f32 %v482_v7, %v196_v52 }
  0x1b   : > { %323 = vst [vmem:[%s515_s25] sm:$0xff] %v412_v49  ;;  %324 = vst [vmem:[%s515_s25 + $0x8] sm:$0xff] %v413_v50  ;;  %v199_v60 = vunpack.c.l.bf16 %v185_v48  ;;  %v200_v61 = vunpack.c.h.bf16 %v185_v48  ;;  %v225_v62 = vmul.f32 %v480_v6, %v197_v56  ;;  %v226_v63 = vmul.f32 %v482_v7, %v198_v57 }
  0x1c   : > { %325 = vst [vmem:[%s515_s25 + $0x10] sm:$0xff] %v414_v54  ;;  %326 = vst [vmem:[%s515_s25 + $0x18] sm:$0xff] %v415_v55  ;;  %v201_v0 = vunpack.c.l.bf16 %v186_v53  ;;  %v202_v1 = vunpack.c.h.bf16 %v186_v53  ;;  %v251_v2 = vadd.f32 %v485_v9, %v223_v58  ;;  %v252_v3 = vadd.f32 %v487_v10, %v224_v59 }
  0x1d   : > { %v227_v4 = vmul.f32 %v480_v6, %v199_v60  ;;  %v228_v5 = vmul.f32 %v482_v7, %v200_v61  ;;  %v253_v8 = vadd.f32 %v485_v9, %v225_v62  ;;  %v254_v11 = vadd.f32 %v487_v10, %v226_v63 }
  0x1e   : > { %v229_v12 = vmul.f32 %v480_v6, %v201_v0  ;;  %v230_v13 = vmul.f32 %v482_v7, %v202_v1  ;;  %v267_v14 = vmax.f32 %v251_v2, 0.0  ;;  %v268_v15 = vmax.f32 %v252_v3, 0.0 }
  0x1f   : > { %v255_v16 = vadd.f32 %v485_v9, %v227_v4  ;;  %v256_v17 = vadd.f32 %v487_v10, %v228_v5  ;;  %v269_v18 = vmax.f32 %v253_v8, 0.0  ;;  %v270_v19 = vmax.f32 %v254_v11, 0.0 }
  0x20   : > { %v257_v20 = vadd.f32 %v485_v9, %v229_v12  ;;  %v258_v21 = vadd.f32 %v487_v10, %v230_v13  ;;  %v416_v22 = vpack.c.bf16 %v268_v15, %v267_v14 }
  0x21   : > { %v271_v6 = vmax.f32 %v255_v16, 0.0  ;;  %v272_v23 = vmax.f32 %v256_v17, 0.0  ;;  %v417_v24 = vpack.c.bf16 %v270_v19, %v269_v18 }
  0x22   : > { %v273_v7 = vmax.f32 %v257_v20, 0.0  ;;  %v274_v25 = vmax.f32 %v258_v21, 0.0  ;;  %327 = vst [vmem:[%s515_s25 + $0x20] sm:$0xff] %v416_v22 }
  0x23   : > { %v418_v26 = vpack.c.bf16 %v272_v23, %v271_v6  ;;  %328 = vst [vmem:[%s515_s25 + $0x28] sm:$0xff] %v417_v24 }
  0x24   : > { %v419_v27 = vpack.c.bf16 %v274_v25, %v273_v7 }
  0x25   : > { %329 = vst [vmem:[%s515_s25 + $0x30] sm:$0xff] %v418_v26 }
  0x26   : > { %330 = vst [vmem:[%s515_s25 + $0x38] sm:$0xff] %v419_v27 }
  0x27 PF: > { %s13_s12 = sadd.s32 1, %s434_s12  }
  0x28   : > { %p10_p4 = scmp.ge.s32.totalorder %s13_s12, 4  }
  0x2a   :  { %12 = sbr.rel (!%p10_p4) target bundleno = 1 (0x1), region = 62 }

// kernel: generator_forward.47
= control target key start
LH: loop header
LB: loop body
LE: loop exit
PB: predicated region body
PF: predicated region fallthrough
CT: control target
= control target key end

     0   :  { %s1887_s15 = smov 0   ;;  %s1889_s16 = smov 0   ;;  %s2217_s0 = inlined_call_operand.vmem [shape: bf16[128,512], index: 0, kind: input, shape index: {}]   ;;  %s2218_s1 = inlined_call_operand.vmem [shape: bf16[512,256], index: 1, kind: input, shape index: {}]   ;;  %s2219_s2 = inlined_call_operand.vmem [shape: bf16[128,256], index: 2, kind: output, shape index: {0}]   ;;  %s2220_s3 = inlined_call_operand.vmem [shape: f32[16,256], index: 3, kind: output, shape index: {1}]   ;;  %s2221_s4 = inlined_call_operand.vmem [shape: f32[16,256], index: 4, kind: output, shape index: {2}]  }
   0x1   :  { %s1891_s17 = smov 0   ;;  %s1893_s18 = smov 0  }
   0x2   :  { %s1895_s19 = smov 0   ;;  %s1897_s20 = smov 0  }
   0x3   :  { %s1899_s21 = smov 0   ;;  %s1901_s22 = smov 0  }
   0x4   :  { %s1903_s23 = smov 0  }
   0x5 LB: > { %s1471_s24 = sadd.s32 4294967295, %s1860_s23   ;;  %s30_s25 = sadd.s32 1, %s1852_s21  ;;  %s1860_s23 = sphi %s1903_s23, %s15_s23   ;;  %s1856_s22 = sphi %s1901_s22, %s2230_s22   ;;  %s1852_s21 = sphi %s1899_s21, %s2229_s21   ;;  %s1848_s20 = sphi %s1897_s20, %s2228_s20   ;;  %s1844_s19 = sphi %s1895_s19, %s2227_s19   ;;  %s1840_s18 = sphi %s1893_s18, %s2226_s18   ;;  %s1836_s17 = sphi %s1891_s17, %s2225_s17   ;;  %s1832_s16 = sphi %s1889_s16, %s2224_s16   ;;  %s1828_s15 = sphi %s1887_s15, %s2223_s15  }
   0x6   : > { %p32_p0 = scmp.ge.s32.totalorder %s30_s25, 2  ;;  %s34_s26 = sadd.s32 1, %s1856_s22 }
   0x7   : > { %s71_s27 = sadd.s32 1, %s1840_s18  ;;  %p78_p1 = scmp.ne.s32.totalorder %s1840_s18, %s1836_s17 }
   0x8   : > { %s2232_s25 = smov (%p32_p0, %s30_s25), 0  ;;  %s2234_s26 = smov (!%p32_p0, %s34_s26), %s1856_s22 }
   0x9   : > { %s67_s28 = ssub.s32 %s1852_s21, %s2232_s25  ;;  %p79_p2 = scmp.eq.s32.totalorder %s1860_s23, 0 }
   0xa   : > { %p36_p3 = scmp.ge.s32.totalorder %s2234_s26, 2  ;;  %p69_p4 = scmp.eq.s32.totalorder %s67_s28, 0 }
   0xb   : > { %p80_p5 = por %p79_p2, %p78_p1  ;;  %s99_s29 = sadd.s32 1, %s1832_s16 }
   0xc   : > { %s2236_s26 = smov (%p36_p3, %s2234_s26), 0  ;;  %p109_p6 = scmp.ne.s32.totalorder %s1832_s16, %s1828_s15 }
   0xd   : > { %s1948_s30 = scalar_select %p69_p4, %s1840_s18, %s71_s27  }
   0xe   : > { %s94_s5 = ssub.s32 %s1856_s22, %s2236_s26  ;;  %p110_p7 = scmp.eq.s32.totalorder %s1471_s24, 3 }
   0xf   : > { %s96_s6 = sor.u32 %s94_s5, %s67_s28  ;;  %p1474_p10 = scmp.ge.s32.totalorder %s1860_s23, 4 }
  0x10   : > { %p97_p8 = scmp.eq.s32.totalorder %s96_s6, 0  ;;  %p1954_p9 = por %p110_p7, %p109_p6 }
  0x11   : > { %188 = sbr.rel (%p1474_p10) target bundleno = 68 (0x44), region = 16 }
  0x12   : > { %s1959_s8 = scalar_select %p97_p8, %s1832_s16, %s99_s29  }
  0x16   : > { %206 = sbr.rel (!%p80_p5) target bundleno = 68 (0x44), region = 24  ;;  %s208_s9 = sand.u32 (%p80_p5), 1, %s1840_s18  }
  0x17   : > { %s1476_s10 = sshll.u32 (%p80_p5), %s1852_s21, 2  ;;  %s1475_s11 = sshll.u32 (%p80_p5), %s208_s9, 8 }
  0x18   : > { %s1967_s14 = scalar_lea.vmem (%p80_p5), %s2218_s1, %s1476_s10  ;;  %s1971_s24 = scalar_lea.vmem (%p80_p5), [#allocation3], %s1475_s11 }
  0x19   : > { %v232_v0 = vld [vmem:[%s1967_s14] sm:$0xf] (%p80_p5)  ;;  %v234_v1 = vld [vmem:[%s1967_s14 + $0x8] sm:$0xf] (%p80_p5)  ;;  %v236_v2 = vld [vmem:[%s1967_s14 + $0x10] sm:$0xf] (%p80_p5) }
  0x1a   : > { %233 = vst [vmem:[%s1971_s24] sm:$0xf] (%p80_p5), %v232_v0  ;;  %235 = vst [vmem:[%s1971_s24 + $0x4] sm:$0xf] (%p80_p5), %v234_v1  ;;  %v238_v3 = vld [vmem:[%s1967_s14 + $0x18] sm:$0xf] (%p80_p5) }
  0x1b   : > { %v240_v4 = vld [vmem:[%s1967_s14 + $0x20] sm:$0xf]  ;;  %237 = vst [vmem:[%s1971_s24 + $0x8] sm:$0xf] %v236_v2  ;;  %239 = vst [vmem:[%s1971_s24 + $0xc] sm:$0xf] %v238_v3 }
  0x1c   : > { %241 = vst [vmem:[%s1971_s24 + $0x10] sm:$0xf] %v240_v4  ;;  %v242_v5 = vld [vmem:[%s1967_s14 + $0x28] sm:$0xf]  ;;  %v244_v6 = vld [vmem:[%s1967_s14 + $0x30] sm:$0xf] }
  0x1d   : > { %v246_v7 = vld [vmem:[%s1967_s14 + $0x38] sm:$0xf]  ;;  %243 = vst [vmem:[%s1971_s24 + $0x14] sm:$0xf] %v242_v5  ;;  %245 = vst [vmem:[%s1971_s24 + $0x18] sm:$0xf] %v244_v6 }
  0x1e   : > { %247 = vst [vmem:[%s1971_s24 + $0x1c] sm:$0xf] %v246_v7  ;;  %v248_v8 = vld [vmem:[%s1967_s14 + $0x40] sm:$0xf]  ;;  %v250_v9 = vld [vmem:[%s1967_s14 + $0x48] sm:$0xf] }
  0x1f   : > { %v252_v10 = vld [vmem:[%s1967_s14 + $0x50] sm:$0xf]  ;;  %249 = vst [vmem:[%s1971_s24 + $0x20] sm:$0xf] %v248_v8  ;;  %251 = vst [vmem:[%s1971_s24 + $0x24] sm:$0xf] %v250_v9 }
  0x20   : > { %253 = vst [vmem:[%s1971_s24 + $0x28] sm:$0xf] %v252_v10  ;;  %v254_v11 = vld [vmem:[%s1967_s14 + $0x58] sm:$0xf]  ;;  %v256_v12 = vld [vmem:[%s1967_s14 + $0x60] sm:$0xf] }
  0x21   : > { %v258_v13 = vld [vmem:[%s1967_s14 + $0x68] sm:$0xf]  ;;  %255 = vst [vmem:[%s1971_s24 + $0x2c] sm:$0xf] %v254_v11  ;;  %257 = vst [vmem:[%s1971_s24 + $0x30] sm:$0xf] %v256_v12 }
  0x22   : > { %259 = vst [vmem:[%s1971_s24 + $0x34] sm:$0xf] %v258_v13  ;;  %v260_v14 = vld [vmem:[%s1967_s14 + $0x70] sm:$0xf]  ;;  %v262_v15 = vld [vmem:[%s1967_s14 + $0x78] sm:$0xf] }
  0x23   : > { %v264_v16 = vld [vmem:[%s1967_s14 + $0x80] sm:$0xf]  ;;  %261 = vst [vmem:[%s1971_s24 + $0x38] sm:$0xf] %v260_v14  ;;  %263 = vst [vmem:[%s1971_s24 + $0x3c] sm:$0xf] %v262_v15 }
  0x24   : > { %265 = vst [vmem:[%s1971_s24 + $0x40] sm:$0xf] %v264_v16  ;;  %v266_v17 = vld [vmem:[%s1967_s14 + $0x88] sm:$0xf]  ;;  %v268_v18 = vld [vmem:[%s1967_s14 + $0x90] sm:$0xf] }
  0x25   : > { %v270_v19 = vld [vmem:[%s1967_s14 + $0x98] sm:$0xf]  ;;  %267 = vst [vmem:[%s1971_s24 + $0x44] sm:$0xf] %v266_v17  ;;  %269 = vst [vmem:[%s1971_s24 + $0x48] sm:$0xf] %v268_v18 }
  0x26   : > { %271 = vst [vmem:[%s1971_s24 + $0x4c] sm:$0xf] %v270_v19  ;;  %v272_v20 = vld [vmem:[%s1967_s14 + $0xa0] sm:$0xf]  ;;  %v274_v21 = vld [vmem:[%s1967_s14 + $0xa8] sm:$0xf] }
  0x27   : > { %v276_v22 = vld [vmem:[%s1967_s14 + $0xb0] sm:$0xf]  ;;  %273 = vst [vmem:[%s1971_s24 + $0x50] sm:$0xf] %v272_v20  ;;  %275 = vst [vmem:[%s1971_s24 + $0x54] sm:$0xf] %v274_v21 }
  0x28   : > { %277 = vst [vmem:[%s1971_s24 + $0x58] sm:$0xf] %v276_v22  ;;  %v278_v23 = vld [vmem:[%s1967_s14 + $0xb8] sm:$0xf]  ;;  %v280_v24 = vld [vmem:[%s1967_s14 + $0xc0] sm:$0xf] }
  0x29   : > { %v282_v25 = vld [vmem:[%s1967_s14 + $0xc8] sm:$0xf]  ;;  %279 = vst [vmem:[%s1971_s24 + $0x5c] sm:$0xf] %v278_v23  ;;  %281 = vst [vmem:[%s1971_s24 + $0x60] sm:$0xf] %v280_v24 }
  0x2a   : > { %283 = vst [vmem:[%s1971_s24 + $0x64] sm:$0xf] %v282_v25  ;;  %v284_v26 = vld [vmem:[%s1967_s14 + $0xd0] sm:$0xf]  ;;  %v286_v27 = vld [vmem:[%s1967_s14 + $0xd8] sm:$0xf] }
  0x2b   : > { %v288_v28 = vld [vmem:[%s1967_s14 + $0xe0] sm:$0xf]  ;;  %285 = vst [vmem:[%s1971_s24 + $0x68] sm:$0xf] %v284_v26  ;;  %287 = vst [vmem:[%s1971_s24 + $0x6c] sm:$0xf] %v286_v27 }
  0x2c   : > { %289 = vst [vmem:[%s1971_s24 + $0x70] sm:$0xf] %v288_v28  ;;  %v290_v29 = vld [vmem:[%s1967_s14 + $0xe8] sm:$0xf]  ;;  %v292_v30 = vld [vmem:[%s1967_s14 + $0xf0] sm:$0xf] }
  0x2d   : > { %v294_v31 = vld [vmem:[%s1967_s14 + $0xf8] sm:$0xf]  ;;  %291 = vst [vmem:[%s1971_s24 + $0x74] sm:$0xf] %v290_v29  ;;  %293 = vst [vmem:[%s1971_s24 + $0x78] sm:$0xf] %v292_v30 }
  0x2e   : > { %295 = vst [vmem:[%s1971_s24 + $0x7c] sm:$0xf] %v294_v31  ;;  %v296_v32 = vld [vmem:[%s1967_s14 + $0x100] sm:$0xf]  ;;  %v298_v33 = vld [vmem:[%s1967_s14 + $0x108] sm:$0xf] }
  0x2f   : > { %v300_v34 = vld [vmem:[%s1967_s14 + $0x110] sm:$0xf]  ;;  %297 = vst [vmem:[%s1971_s24 + $0x80] sm:$0xf] %v296_v32  ;;  %299 = vst [vmem:[%s1971_s24 + $0x84] sm:$0xf] %v298_v33 }
  0x30   : > { %301 = vst [vmem:[%s1971_s24 + $0x88] sm:$0xf] %v300_v34  ;;  %v302_v35 = vld [vmem:[%s1967_s14 + $0x118] sm:$0xf]  ;;  %v304_v36 = vld [vmem:[%s1967_s14 + $0x120] sm:$0xf] }
  0x31   : > { %v306_v37 = vld [vmem:[%s1967_s14 + $0x128] sm:$0xf]  ;;  %303 = vst [vmem:[%s1971_s24 + $0x8c] sm:$0xf] %v302_v35  ;;  %305 = vst [vmem:[%s1971_s24 + $0x90] sm:$0xf] %v304_v36 }
  0x32   : > { %307 = vst [vmem:[%s1971_s24 + $0x94] sm:$0xf] %v306_v37  ;;  %v308_v38 = vld [vmem:[%s1967_s14 + $0x130] sm:$0xf]  ;;  %v310_v39 = vld [vmem:[%s1967_s14 + $0x138] sm:$0xf] }
  0x33   : > { %v312_v40 = vld [vmem:[%s1967_s14 + $0x140] sm:$0xf]  ;;  %309 = vst [vmem:[%s1971_s24 + $0x98] sm:$0xf] %v308_v38  ;;  %311 = vst [vmem:[%s1971_s24 + $0x9c] sm:$0xf] %v310_v39 }
  0x34   : > { %313 = vst [vmem:[%s1971_s24 + $0xa0] sm:$0xf] %v312_v40  ;;  %v314_v41 = vld [vmem:[%s1967_s14 + $0x148] sm:$0xf]  ;;  %v316_v42 = vld [vmem:[%s1967_s14 + $0x150] sm:$0xf] }
  0x35   : > { %v318_v43 = vld [vmem:[%s1967_s14 + $0x158] sm:$0xf]  ;;  %315 = vst [vmem:[%s1971_s24 + $0xa4] sm:$0xf] %v314_v41  ;;  %317 = vst [vmem:[%s1971_s24 + $0xa8] sm:$0xf] %v316_v42 }
  0x36   : > { %319 = vst [vmem:[%s1971_s24 + $0xac] sm:$0xf] %v318_v43  ;;  %v320_v44 = vld [vmem:[%s1967_s14 + $0x160] sm:$0xf]  ;;  %v322_v45 = vld [vmem:[%s1967_s14 + $0x168] sm:$0xf] }
  0x37   : > { %v324_v46 = vld [vmem:[%s1967_s14 + $0x170] sm:$0xf]  ;;  %321 = vst [vmem:[%s1971_s24 + $0xb0] sm:$0xf] %v320_v44  ;;  %323 = vst [vmem:[%s1971_s24 + $0xb4] sm:$0xf] %v322_v45 }
  0x38   : > { %325 = vst [vmem:[%s1971_s24 + $0xb8] sm:$0xf] %v324_v46  ;;  %v326_v47 = vld [vmem:[%s1967_s14 + $0x178] sm:$0xf]  ;;  %v328_v48 = vld [vmem:[%s1967_s14 + $0x180] sm:$0xf] }
  0x39   : > { %v330_v49 = vld [vmem:[%s1967_s14 + $0x188] sm:$0xf]  ;;  %327 = vst [vmem:[%s1971_s24 + $0xbc] sm:$0xf] %v326_v47  ;;  %329 = vst [vmem:[%s1971_s24 + $0xc0] sm:$0xf] %v328_v48 }
  0x3a   : > { %331 = vst [vmem:[%s1971_s24 + $0xc4] sm:$0xf] %v330_v49  ;;  %v332_v50 = vld [vmem:[%s1967_s14 + $0x190] sm:$0xf]  ;;  %v334_v51 = vld [vmem:[%s1967_s14 + $0x198] sm:$0xf] }
  0x3b   : > { %v336_v52 = vld [vmem:[%s1967_s14 + $0x1a0] sm:$0xf]  ;;  %333 = vst [vmem:[%s1971_s24 + $0xc8] sm:$0xf] %v332_v50  ;;  %335 = vst [vmem:[%s1971_s24 + $0xcc] sm:$0xf] %v334_v51 }
  0x3c   : > { %337 = vst [vmem:[%s1971_s24 + $0xd0] sm:$0xf] %v336_v52  ;;  %v338_v53 = vld [vmem:[%s1967_s14 + $0x1a8] sm:$0xf]  ;;  %v340_v54 = vld [vmem:[%s1967_s14 + $0x1b0] sm:$0xf] }
  0x3d   : > { %v342_v55 = vld [vmem:[%s1967_s14 + $0x1b8] sm:$0xf]  ;;  %339 = vst [vmem:[%s1971_s24 + $0xd4] sm:$0xf] %v338_v53  ;;  %341 = vst [vmem:[%s1971_s24 + $0xd8] sm:$0xf] %v340_v54 }
  0x3e   : > { %343 = vst [vmem:[%s1971_s24 + $0xdc] sm:$0xf] %v342_v55  ;;  %v344_v56 = vld [vmem:[%s1967_s14 + $0x1c0] sm:$0xf]  ;;  %v346_v57 = vld [vmem:[%s1967_s14 + $0x1c8] sm:$0xf] }
  0x3f   : > { %v348_v58 = vld [vmem:[%s1967_s14 + $0x1d0] sm:$0xf]  ;;  %345 = vst [vmem:[%s1971_s24 + $0xe0] sm:$0xf] %v344_v56  ;;  %347 = vst [vmem:[%s1971_s24 + $0xe4] sm:$0xf] %v346_v57 }
  0x40   : > { %349 = vst [vmem:[%s1971_s24 + $0xe8] sm:$0xf] %v348_v58  ;;  %v350_v59 = vld [vmem:[%s1967_s14 + $0x1d8] sm:$0xf]  ;;  %v352_v60 = vld [vmem:[%s1967_s14 + $0x1e0] sm:$0xf] }
  0x41   : > { %v354_v61 = vld [vmem:[%s1967_s14 + $0x1e8] sm:$0xf]  ;;  %351 = vst [vmem:[%s1971_s24 + $0xec] sm:$0xf] %v350_v59  ;;  %353 = vst [vmem:[%s1971_s24 + $0xf0] sm:$0xf] %v352_v60 }
  0x42   : > { %355 = vst [vmem:[%s1971_s24 + $0xf4] sm:$0xf] %v354_v61  ;;  %v356_v62 = vld [vmem:[%s1967_s14 + $0x1f0] sm:$0xf]  ;;  %v358_v63 = vld [vmem:[%s1967_s14 + $0x1f8] sm:$0xf] }
  0x43   : > { %357 = vst [vmem:[%s1971_s24 + $0xf8] sm:$0xf] %v356_v62  ;;  %359 = vst [vmem:[%s1971_s24 + $0xfc] sm:$0xf] %v358_v63 }
  0x44 PF: > { %p1477_p11 = scmp.ge.s32.totalorder %s1860_s23, 1  ;;  %p510_p12 = scmp.lt.s32.totalorder %s1860_s23, 5 }
  0x46   : > { %p511_p13 = pnand %p1477_p11, %p510_p12 }
  0x47   : > { %s517_s27 = sand.u32 (!%p511_p13), 1, %s1836_s17   ;;  %s1480_s17 = sshll.u32 (!%p511_p13), %s1848_s20, 3 }
  0x48   : > { %514 = sbr.rel (%p511_p13) target bundleno = 356 (0x164), region = 65  ;;  %s1478_s28 = sshll.u32 (!%p511_p13), %s517_s27, 8 }
  0x49   : > { %s2102_s29 = scalar_lea.vmem (!%p511_p13), [#allocation3], %s1478_s28  ;;  %p569_p0 = scmp.lt.s32.totalorder (!%p511_p13), %s1480_s17, 15 }
  0x4a   : > { %s544_s11 = sand.u32 (!%p511_p13), 1, %s1828_s15   ;;  %p581_p1 = scmp.lt.s32.totalorder (!%p511_p13), %s1848_s20, 1 }
  0x4b   : > { %s1479_s12 = sshll.u32 (!%p511_p13), %s544_s11, 5  ;;  %p583_p2 = scmp.lt.s32.totalorder (!%p511_p13), %s1844_s19, 1 }
  0x4c   : > { %s2159_s13 = scalar_lea.vmem (!%p511_p13), [#allocation4], %s1479_s12 }
  0x4d   : > { %v1734_v0 = vld [vmem:[%s2102_s29 + $0x78] sm:$0xff]   ;;  %v1738_v4 = vld [vmem:[%s2102_s29 + $0x70] sm:$0xff]   ;;  %v1742_v8 = vld [vmem:[%s2102_s29 + $0x68] sm:$0xff]   ;;  %s2238_s17 = smov (!%p569_p0, %s1480_s17), 15  ;;  %s1558_s11 = sshll.u32 (%p1954_p9), %s1848_s20, 4 }
  0x4e   : > { %v1735_v1 = vld [vmem:[%s2102_s29 + $0xf8] sm:$0xff]   ;;  %1582 = vmatprep.subr.bf16.mxu0 %v1734_v0  ;;  %v1739_v5 = vld [vmem:[%s2102_s29 + $0xf0] sm:$0xff]   ;;  %v1743_v9 = vld [vmem:[%s2102_s29 + $0xe8] sm:$0xff]   ;;  %s1549_s5 = sshll.u32 %s2238_s17, 4  ;;  %s1228_s12 = sadd.s32 (%p1954_p9), %s1844_s19, %s1558_s11 }
  0x4f   : > { %v1736_v2 = vld [vmem:[%s2102_s29 + $0x38] sm:$0xff]   ;;  %1622 = vmatprep.subr.bf16.mxu1 %v1735_v1  ;;  %v1740_v6 = vld [vmem:[%s2102_s29 + $0x30] sm:$0xff]   ;;  %v1744_v10 = vld [vmem:[%s2102_s29 + $0x28] sm:$0xff]   ;;  %s2138_s10 = scalar_lea.vmem %s2217_s0, %s1549_s5 }
  0x50   : > { %v1737_v3 = vld [vmem:[%s2102_s29 + $0xb8] sm:$0xff]   ;;  %1583 = vmatpush3.bf16.msra.mxu0 %v1736_v2  ;;  %v1741_v7 = vld [vmem:[%s2102_s29 + $0xb0] sm:$0xff]   ;;  %v1745_v11 = vld [vmem:[%s2102_s29 + $0xa8] sm:$0xff]   ;;  %s582_s15 = scalar_select %p581_p1, %s1848_s20, 1 }
  0x51   : > { %1623 = vmatpush3.bf16.msra.mxu1 %v1737_v3  ;;  %1584 = vmatprep.subr.bf16.mxu0 %v1738_v4  ;;  %v1746_v12 = vld [vmem:[%s2102_s29 + $0x60] sm:$0xff]   ;;  %v1750_v16 = vld [vmem:[%s2102_s29 + $0x58] sm:$0xff]   ;;  %v1754_v20 = vld [vmem:[%s2102_s29 + $0x50] sm:$0xff]   ;;  %s584_s14 = scalar_select %p583_p2, %s1844_s19, 1 }
  0x52   : > { %1624 = vmatprep.subr.bf16.mxu1 %v1739_v5  ;;  %v1747_v13 = vld [vmem:[%s2102_s29 + $0xe0] sm:$0xff]   ;;  %v1751_v17 = vld [vmem:[%s2102_s29 + $0xd8] sm:$0xff]   ;;  %v1755_v21 = vld [vmem:[%s2102_s29 + $0xd0] sm:$0xff]   ;;  %s1483_s24 = sshll.u32 %s582_s15, 1  ;;  %s1546_s15 = sshll.u32 (%p1954_p9), %s1228_s12, 2 }
  0x53   : > { %v1748_v14 = vld [vmem:[%s2102_s29 + $0x20] sm:$0xff]   ;;  %v1752_v18 = vld [vmem:[%s2102_s29 + $0x18] sm:$0xff]   ;;  %v1756_v22 = vld [vmem:[%s2102_s29 + $0x10] sm:$0xff]   ;;  %s586_s27 = sadd.s32 %s1483_s24, %s584_s14  ;;  %s1230_s24 = scalar_lea.vmem (%p1954_p9), %s2219_s2, %s1546_s15 }
  0x54   : > { %1585 = vmatpush3.bf16.msra.mxu0 %v1740_v6  ;;  %v1749_v15 = vld [vmem:[%s2102_s29 + $0xa0] sm:$0xff]   ;;  %v1753_v19 = vld [vmem:[%s2102_s29 + $0x98] sm:$0xff]   ;;  %v1757_v23 = vld [vmem:[%s2102_s29 + $0x90] sm:$0xff]   ;;  %s1484_s28 = sshll.u32 %s586_s27, 3 }
  0x55   : > { %1625 = vmatpush3.bf16.msra.mxu1 %v1741_v7  ;;  %1586 = vmatprep.subr.bf16.mxu0 %v1742_v8  ;;  %v1758_v24 = vld [vmem:[%s2102_s29 + $0x48] sm:$0xff]   ;;  %v1762_v28 = vld [vmem:[%s2102_s29 + $0x40] sm:$0xff]   ;;  %s588_s5 = scalar_lea.vmem %s2220_s3, %s1484_s28 }
  0x56   : > { %1626 = vmatprep.subr.bf16.mxu1 %v1743_v9  ;;  %v1759_v25 = vld [vmem:[%s2102_s29 + $0xc8] sm:$0xff]   ;;  %v1763_v29 = vld [vmem:[%s2102_s29 + $0xc0] sm:$0xff]  }
  0x57   : > { %v1760_v26 = vld [vmem:[%s2102_s29 + $0x8] sm:$0xff]   ;;  %v1764_v30 = vld [vmem:[%s2102_s29] sm:$0xff]  }
  0x58   : > { %1587 = vmatpush3.bf16.msra.mxu0 %v1744_v10  ;;  %v1761_v27 = vld [vmem:[%s2102_s29 + $0x88] sm:$0xff]   ;;  %v1765_v31 = vld [vmem:[%s2102_s29 + $0x80] sm:$0xff]  }
  0x59   : > { %1627 = vmatpush3.bf16.msra.mxu1 %v1745_v11  ;;  %1588 = vmatprep.subr.bf16.mxu0 %v1746_v12  ;;  %v1766_v32 = vld [vmem:[%s2138_s10] ss:$16 sps:$4 sm:$0xff]   ;;  %v1768_v33 = vld [vmem:[%s2138_s10 + $0x4] ss:$16 sps:$4 sm:$0xff]   ;;  %v1769_v34 = vld [vmem:[%s2138_s10 + $0x8] ss:$16 sps:$4 sm:$0xff]  }
  0x5a   : > { %1628 = vmatprep.subr.bf16.mxu1 %v1747_v13  ;;  %v1771_v35 = vld [vmem:[%s2138_s10 + $0xc] ss:$16 sps:$4 sm:$0xff]   ;;  %1002 = vmatprep.mubr.bf16.mxu0 %v1768_v33  ;;  %v1772_v36 = vld [vmem:[%s2138_s10 + $0x24] ss:$16 sps:$4 sm:$0xff]   ;;  %v1776_v38 = vld [vmem:[%s2138_s10 + $0x20] ss:$16 sps:$4 sm:$0xff]  }
  0x5b   : > { %1067 = vmatprep.mubr.bf16.mxu1 %v1771_v35  ;;  %v1774_v37 = vld [vmem:[%s2138_s10 + $0x2c] ss:$16 sps:$4 sm:$0xff]   ;;  %v1777_v39 = vld [vmem:[%s2138_s10 + $0x28] ss:$16 sps:$4 sm:$0xff]   ;;  %v1778_v40 = vld [vmem:[%s2138_s10 + $0x44] ss:$16 sps:$4 sm:$0xff]  }
  0x5c   : > { %1589 = vmatpush3.bf16.msra.mxu0 %v1748_v14  ;;  %v1780_v41 = vld [vmem:[%s2138_s10 + $0x4c] ss:$16 sps:$4 sm:$0xff]   ;;  %v1782_v42 = vld [vmem:[%s2138_s10 + $0x40] ss:$16 sps:$4 sm:$0xff]   ;;  %v1783_v43 = vld [vmem:[%s2138_s10 + $0x48] ss:$16 sps:$4 sm:$0xff]  }
  0x5d   : > { %1629 = vmatpush3.bf16.msra.mxu1 %v1749_v15  ;;  %1590 = vmatprep.subr.bf16.mxu0 %v1750_v16  ;;  %v1784_v44 = vld [vmem:[%s2138_s10 + $0x64] ss:$16 sps:$4 sm:$0xff]   ;;  %v1786_v45 = vld [vmem:[%s2138_s10 + $0x6c] ss:$16 sps:$4 sm:$0xff]   ;;  %v1788_v46 = vld [vmem:[%s2138_s10 + $0x60] ss:$16 sps:$4 sm:$0xff]  }
  0x5e   : > { %1630 = vmatprep.subr.bf16.mxu1 %v1751_v17  ;;  %v1789_v47 = vld [vmem:[%s2138_s10 + $0x68] ss:$16 sps:$4 sm:$0xff]   ;;  %s596_s10 = scalar_lea.vmem %s2221_s4, %s1484_s28 }
  0x60   : > { %1591 = vmatpush3.bf16.msra.mxu0 %v1752_v18 }
  0x61   : > { %1631 = vmatpush3.bf16.msra.mxu1 %v1753_v19  ;;  %1592 = vmatprep.subr.bf16.mxu0 %v1754_v20 }
  0x62   : > { %1632 = vmatprep.subr.bf16.mxu1 %v1755_v21 }
  0x64   : > { %1593 = vmatpush3.bf16.msra.mxu0 %v1756_v22 }
  0x65   : > { %1633 = vmatpush3.bf16.msra.mxu1 %v1757_v23  ;;  %1594 = vmatprep.subr.bf16.mxu0 %v1758_v24 }
  0x66   : > { %1634 = vmatprep.subr.bf16.mxu1 %v1759_v25 }
  0x68   : > { %1595 = vmatpush3.bf16.msra.mxu0 %v1760_v26 }
  0x69   : > { %1635 = vmatpush3.bf16.msra.mxu1 %v1761_v27  ;;  %1596 = vmatprep.subr.bf16.mxu0 %v1762_v28 }
  0x6a   : > { %1636 = vmatprep.subr.bf16.mxu1 %v1763_v29 }
  0x6c   : > { %1597 = vmatpush3.bf16.msra.mxu0 %v1764_v30 }
  0x6d   : > { %1637 = vmatpush3.bf16.msra.mxu1 %v1765_v31 }
  0x6f   : > { %1003 = vmatmul.mubr.bf16.vlgmr.msra.gmra.mxu0 %v1766_v32 }
  0x70   : > { %1068 = vmatmul.mubr.bf16.vlgmr.msra.gmra.mxu1 %v1769_v34  ;;  %1010 = vmatprep.mubr.bf16.mxu0 %v1772_v36 }
  0x71   : > { %1075 = vmatprep.mubr.bf16.mxu1 %v1774_v37 }
  0x77   : > { %1011 = vmatmul.mubr.bf16.gmra.mxu0 %v1776_v38 }
  0x78   : > { %1076 = vmatmul.mubr.bf16.gmra.mxu1 %v1777_v39  ;;  %1018 = vmatprep.mubr.bf16.mxu0 %v1778_v40 }
  0x79   : > { %1083 = vmatprep.mubr.bf16.mxu1 %v1780_v41 }
  0x7f   : > { %1019 = vmatmul.mubr.bf16.gmra.mxu0 %v1782_v42 }
  0x80   : > { %1084 = vmatmul.mubr.bf16.gmra.mxu1 %v1783_v43  ;;  %1026 = vmatprep.mubr.bf16.mxu0 %v1784_v44 }
  0x81   : > { %1091 = vmatprep.mubr.bf16.mxu1 %v1786_v45 }
  0x87   : > { %1027 = vmatmul.mubr.bf16.gmra.mxu0 %v1788_v46 }
  0x88   : > { %1092 = vmatmul.mubr.bf16.gmra.mxu1 %v1789_v47 }
 0x12f   : > { %v1598_v48 = vpop.f32.mrf.mxu0 }
 0x130   : > { %v1638_v49 = vpop.f32.mrf.mxu1 }
 0x131   : > { %v1599_v50 = vpop.f32.mrf.mxu0 }
 0x132   : > { %v1639_v51 = vpop.f32.mrf.mxu1  ;;  %v1600_v54 = vadd.f32 %v1599_v50, %v1598_v48 }
 0x133   : > { %v1601_v52 = vpop.f32.mrf.mxu0  ;;  %v1640_v55 = vadd.f32 %v1639_v51, %v1638_v49 }
 0x134   : > { %v1641_v53 = vpop.f32.mrf.mxu1 }
 0x135   : > { %v1602_v56 = vpop.f32.mrf.mxu0  ;;  %v1070_v62 = vadd.f32 %v1640_v55, %v1600_v54 }
 0x136   : > { %v1603_v57 = vadd.f32 %v1602_v56, %v1601_v52  ;;  %v1642_v58 = vpop.f32.mrf.mxu1 }
 0x137   : > { %v1643_v59 = vadd.f32 %v1642_v58, %v1641_v53  ;;  %v1604_v60 = vpop.f32.mrf.mxu0  ;;  %v1180_v24 = vmul.f32 %v1070_v62, %v1070_v62 }
 0x138   : > { %v1644_v61 = vpop.f32.mrf.mxu1 }
 0x139   : > { %v1073_v63 = vadd.f32 %v1643_v59, %v1603_v57  ;;  %v1605_v0 = vpop.f32.mrf.mxu0 }
 0x13a   : > { %v1645_v1 = vpop.f32.mrf.mxu1  ;;  %v1606_v5 = vadd.f32 %v1605_v0, %v1604_v60 }
 0x13b   : > { %v1562_v2 = vpack.c.bf16 %v1073_v63, %v1070_v62  ;;  %v1607_v3 = vpop.f32.mrf.mxu0  ;;  %v1646_v6 = vadd.f32 %v1645_v1, %v1644_v61  ;;  %v1181_v21 = vmul.f32 %v1073_v63, %v1073_v63  ;;  %v1167_v28 = vadd.f32 %v1073_v63, %v1070_v62 }
 0x13c   : > { %v1647_v4 = vpop.f32.mrf.mxu1 }
 0x13d   : > { %1563 = vst [vmem:[%s2159_s13] sm:$0xff] %v1562_v2   ;;  %v1608_v7 = vpop.f32.mrf.mxu0  ;;  %v1078_v13 = vadd.f32 %v1646_v6, %v1606_v5  ;;  %v1188_v32 = vadd.f32 %v1181_v21, %v1180_v24 }
 0x13e   : > { %v1609_v8 = vadd.f32 %v1608_v7, %v1607_v3  ;;  %v1648_v9 = vpop.f32.mrf.mxu1 }
 0x13f   : > { %v1649_v10 = vadd.f32 %v1648_v9, %v1647_v4  ;;  %v1610_v11 = vpop.f32.mrf.mxu0  ;;  %v1182_v25 = vmul.f32 %v1078_v13, %v1078_v13  ;;  %v1168_v34 = vadd.f32 %v1167_v28, %v1078_v13 }
 0x140   : > { %v1650_v12 = vpop.f32.mrf.mxu1 }
 0x141   : > { %v1081_v14 = vadd.f32 %v1649_v10, %v1609_v8  ;;  %v1611_v15 = vpop.f32.mrf.mxu0  ;;  %v1189_v38 = vadd.f32 %v1188_v32, %v1182_v25 }
 0x142   : > { %v1651_v16 = vpop.f32.mrf.mxu1  ;;  %v1612_v18 = vadd.f32 %v1611_v15, %v1610_v11 }
 0x143   : > { %v1567_v17 = vpack.c.bf16 %v1081_v14, %v1078_v13  ;;  %v1652_v19 = vadd.f32 %v1651_v16, %v1650_v12  ;;  %v1613_v20 = vpop.f32.mrf.mxu0  ;;  %v1183_v35 = vmul.f32 %v1081_v14, %v1081_v14  ;;  %v1169_v41 = vadd.f32 %v1168_v34, %v1081_v14 }
 0x144   : > { %v1653_v22 = vpop.f32.mrf.mxu1  ;;  %v1247_v14 = vld [vmem:[%s2159_s13] sm:$0xf] (%p1954_p9)  ;;  %v1249_v15 = vld [vmem:[%s2159_s13 + $0x4] sm:$0xf] (%p1954_p9) }
 0x145   : > { %1579 = vst [vmem:[%s2159_s13 + $0x8] sm:$0xff] %v1567_v17   ;;  %v1614_v23 = vpop.f32.mrf.mxu0  ;;  %v1086_v29 = vadd.f32 %v1652_v19, %v1612_v18  ;;  %v1190_v47 = vadd.f32 %v1189_v38, %v1183_v35  ;;  %1248 = vst [vmem:[%s1230_s24] sm:$0xf] (%p1954_p9), %v1247_v14 }
 0x146   : > { %v1615_v26 = vadd.f32 %v1614_v23, %v1613_v20  ;;  %v1654_v27 = vpop.f32.mrf.mxu1  ;;  %1250 = vst [vmem:[%s1230_s24 + $0x8] sm:$0xf] (%p1954_p9), %v1249_v15 }
 0x147   : > { %v1655_v30 = vadd.f32 %v1654_v27, %v1653_v22  ;;  %v1616_v31 = vpop.f32.mrf.mxu0  ;;  %v1184_v42 = vmul.f32 %v1086_v29, %v1086_v29  ;;  %v1170_v48 = vadd.f32 %v1169_v41, %v1086_v29 }
 0x148   : > { %v1656_v33 = vpop.f32.mrf.mxu1 }
 0x149   : > { %v1089_v36 = vadd.f32 %v1655_v30, %v1615_v26  ;;  %v1617_v37 = vpop.f32.mrf.mxu0  ;;  %v1191_v54 = vadd.f32 %v1190_v47, %v1184_v42 }
 0x14a   : > { %v1618_v39 = vadd.f32 %v1617_v37, %v1616_v31  ;;  %v1657_v40 = vpop.f32.mrf.mxu1 }
 0x14b   : > { %v1572_v43 = vpack.c.bf16 %v1089_v36, %v1086_v29  ;;  %v1658_v44 = vadd.f32 %v1657_v40, %v1656_v33  ;;  %v1619_v45 = vpop.f32.mrf.mxu0  ;;  %v1185_v49 = vmul.f32 %v1089_v36, %v1089_v36  ;;  %v1171_v55 = vadd.f32 %v1170_v48, %v1089_v36 }
 0x14c   : > { %v1659_v46 = vpop.f32.mrf.mxu1  ;;  %v1251_v16 = vld [vmem:[%s2159_s13 + $0x8] sm:$0xf] (%p1954_p9)  ;;  %v1253_v17 = vld [vmem:[%s2159_s13 + $0xc] sm:$0xf] (%p1954_p9) }
 0x14d   : > { %1580 = vst [vmem:[%s2159_s13 + $0x10] sm:$0xff] %v1572_v43   ;;  %v1094_v50 = vadd.f32 %v1658_v44, %v1618_v39  ;;  %v1620_v51 = vpop.f32.mrf.mxu0  ;;  %v1192_v58 = vadd.f32 %v1191_v54, %v1185_v49  ;;  %1252 = vst [vmem:[%s1230_s24 + $0x10] sm:$0xf] (%p1954_p9), %v1251_v16 }
 0x14e   : > { %v1621_v52 = vadd.f32 %v1620_v51, %v1619_v45  ;;  %v1660_v53 = vpop.f32.mrf.mxu1  ;;  %1254 = vst [vmem:[%s1230_s24 + $0x18] sm:$0xf] (%p1954_p9), %v1253_v17 }
 0x14f   : > { %v1186_v56 = vmul.f32 %v1094_v50, %v1094_v50  ;;  %v1661_v57 = vadd.f32 %v1660_v53, %v1659_v46  ;;  %v1172_v59 = vadd.f32 %v1171_v55, %v1094_v50 }
 0x151   : > { %v1097_v60 = vadd.f32 %v1661_v57, %v1621_v52  ;;  %v1193_v61 = vadd.f32 %v1192_v58, %v1186_v56 }
 0x153   : > { %v1577_v62 = vpack.c.bf16 %v1097_v60, %v1094_v50  ;;  %v1173_v63 = vadd.f32 %v1172_v59, %v1097_v60  ;;  %v1187_v0 = vmul.f32 %v1097_v60, %v1097_v60 }
 0x154   : > { %v1255_v18 = vld [vmem:[%s2159_s13 + $0x10] sm:$0xf] (%p1954_p9)  ;;  %v1257_v19 = vld [vmem:[%s2159_s13 + $0x14] sm:$0xf] (%p1954_p9) }
 0x155   : > { %1581 = vst [vmem:[%s2159_s13 + $0x18] sm:$0xff] %v1577_v62   ;;  %v1174_v1 = vrot.slane %v1173_v63, 4  ;;  %v1194_v2 = vadd.f32 %v1193_v61, %v1187_v0  ;;  %1256 = vst [vmem:[%s1230_s24 + $0x20] sm:$0xf] (%p1954_p9), %v1255_v18 }
 0x156   : > { %1258 = vst [vmem:[%s1230_s24 + $0x28] sm:$0xf] (%p1954_p9), %v1257_v19 }
 0x157   : > { %v1175_v3 = vadd.f32 %v1174_v1, %v1173_v63  ;;  %v1195_v4 = vrot.slane %v1194_v2, 4 }
 0x159   : > { %v1176_v5 = vrot.slane %v1175_v3, 2  ;;  %v1196_v6 = vadd.f32 %v1195_v4, %v1194_v2 }
 0x15b   : > { %v1177_v7 = vadd.f32 %v1176_v5, %v1175_v3  ;;  %v1197_v8 = vrot.slane %v1196_v6, 2 }
 0x15c   : > { %v1259_v20 = vld [vmem:[%s2159_s13 + $0x18] sm:$0xf] (%p1954_p9)  ;;  %v1261_v21 = vld [vmem:[%s2159_s13 + $0x1c] sm:$0xf] (%p1954_p9) }
 0x15d   : > { %v1178_v9 = vrot.slane %v1177_v7, 1  ;;  %v1198_v10 = vadd.f32 %v1197_v8, %v1196_v6  ;;  %1260 = vst [vmem:[%s1230_s24 + $0x30] sm:$0xf] (%p1954_p9), %v1259_v20  ;;  %1262 = vst [vmem:[%s1230_s24 + $0x38] sm:$0xf] (%p1954_p9), %v1261_v21 }
 0x15f   : > { %v1179_v11 = vadd.f32 %v1178_v9, %v1177_v7  ;;  %v1199_v12 = vrot.slane %v1198_v10, 1  ;;  %1225 = sbr.rel (!%p1954_p9) target bundleno = 356 (0x164), region = 81 }
 0x161   : > { %v1200_v13 = vadd.f32 %v1199_v12, %v1198_v10  ;;  %1201 = vst [vmem:[%s588_s5] sm:$0xff] %v1179_v11 }
 0x163   : > { %1202 = vst [vmem:[%s596_s10] sm:$0xff] %v1200_v13 }
 0x164 PF: > { %s15_s23 = sadd.s32 1, %s1860_s23   ;;  %s2223_s15 = smov %s1832_s16 }
 0x165   : > { %p12_p3 = scmp.ge.s32.totalorder %s15_s23, 6   ;;  %s2224_s16 = smov %s1959_s8 }
 0x166   : > { %s2225_s17 = smov %s1840_s18  ;;  %s2226_s18 = smov %s1948_s30 }
 0x167   : > { %s2227_s19 = smov %s1852_s21  ;;  %s2228_s20 = smov %s1856_s22 }
 0x168   : > { %s2229_s21 = smov %s2232_s25  ;;  %s2230_s22 = smov %s2236_s26 }
 0x169   :  { %14 = sbr.rel (!%p12_p3) target bundleno = 5 (0x5), region = 180 }

// kernel: generator_forward.49
= control target key start
LH: loop header
LB: loop body
LE: loop exit
PB: predicated region body
PF: predicated region fallthrough
CT: control target
= control target key end

     0   :  { %s1743_s12 = smov 0   ;;  %s1745_s13 = smov 0   ;;  %s2028_s0 = inlined_call_operand.vmem [shape: bf16[512,3328], index: 0, kind: input, shape index: {}]   ;;  %s2029_s1 = inlined_call_operand.vmem [shape: bf16[3328,128], index: 1, kind: input, shape index: {}]   ;;  %s2030_s2 = inlined_call_operand.vmem [shape: f32[1,128], index: 2, kind: input, shape index: {}]   ;;  %s2031_s3 = inlined_call_operand.vmem [shape: f32[512,128], index: 3, kind: output, shape index: {}]  }
   0x1   :  { %s1747_s14 = smov 0   ;;  %s1749_s15 = smov 0  }
   0x2   :  { %s1751_s16 = smov 0   ;;  %s1753_s17 = smov 0  }
   0x3   :  { %s1755_s18 = smov 0  }
   0x4 LB: > { %s25_s19 = sadd.s32 1, %s1712_s16  ;;  %s32_s20 = sadd.s32 1, %s1716_s17  ;;  %s1720_s18 = sphi %s1755_s18, %s13_s18   ;;  %s1716_s17 = sphi %s1753_s17, %s2037_s17   ;;  %s1712_s16 = sphi %s1751_s16, %s2036_s16   ;;  %s1708_s15 = sphi %s1749_s15, %s2035_s15   ;;  %s1704_s14 = sphi %s1747_s14, %s2034_s14   ;;  %s1700_s13 = sphi %s1745_s13, %s2033_s13   ;;  %s1696_s12 = sphi %s1743_s12, %s2032_s12  }
   0x5   : > { %p26_p0 = scmp.ge.s32.totalorder %s25_s19, 13  ;;  %p48_p1 = scmp.ne.s32.totalorder %s1700_s13, %s1696_s12 }
   0x6   : > { %p49_p2 = scmp.eq.s32.totalorder %s1720_s18, 0  ;;  %s41_s24 = sadd.s32 1, %s1700_s13 }
   0x7   : > { %s2039_s19 = smov (%p26_p0, %s25_s19), 0  ;;  %s2041_s20 = smov (!%p26_p0, %s32_s20), %s1716_s17 }
   0x8   : > { %p50_p3 = por %p49_p2, %p48_p1  ;;  %p34_p4 = scmp.ge.s32.totalorder %s2041_s20, 2 }
   0x9   : > { %s37_s21 = ssub.s32 %s1712_s16, %s2039_s19  ;;  %p1287_p6 = scmp.ge.s32.totalorder %s1720_s18, 26 }
   0xa   : > { %s2043_s20 = smov (%p34_p4, %s2041_s20), 0 }
   0xb   : > { %s36_s22 = ssub.s32 %s1716_s17, %s2043_s20  ;;  %162 = sbr.rel (%p1287_p6) target bundleno = 40 (0x28), region = 20 }
   0xc   : > { %s38_s23 = sor.u32 %s37_s21, %s36_s22 }
   0xd   : > { %p39_p5 = scmp.eq.s32.totalorder %s38_s23, 0 }
   0xf   : > { %s1794_s25 = scalar_select %p39_p5, %s1700_s13, %s41_s24  }
  0x10   : > { %165 = sbr.rel (!%p50_p3) target bundleno = 40 (0x28), region = 24  ;;  %s167_s26 = sand.u32 (%p50_p3), 1, %s1700_s13  }
  0x11   : > { %s1290_s27 = sshll.u32 (%p50_p3), %s1712_s16, 1  ;;  %s1288_s28 = sshll.u32 (%p50_p3), %s167_s26, 8 }
  0x12   : > { %s1480_s29 = smul.u32 (%p50_p3), 832, %s1716_s17  ;;  %s1808_s8 = scalar_lea.vmem (%p50_p3), [#allocation3], %s1288_s28 }
  0x14   : > { %s173_s30 = sadd.s32 (%p50_p3), %s1480_s29, %s1290_s27 }
  0x15   : > { %s1292_s4 = sshll.u32 %s173_s30, 2 }
  0x16   : > { %s1803_s7 = scalar_lea.vmem %s2028_s0, %s1292_s4 }
  0x17   : > { %v266_v0 = vld [vmem:[%s1803_s7] sm:$0xff]  ;;  %v268_v1 = vld [vmem:[%s1803_s7 + $0x68] sm:$0xff]  ;;  %v270_v2 = vld [vmem:[%s1803_s7 + $0xd0] sm:$0xff] }
  0x18   : > { %267 = vst [vmem:[%s1808_s8] sm:$0xff] %v266_v0  ;;  %269 = vst [vmem:[%s1808_s8 + $0x8] sm:$0xff] %v268_v1  ;;  %v272_v3 = vld [vmem:[%s1803_s7 + $0x138] sm:$0xff]  ;;  %v274_v4 = vld [vmem:[%s1803_s7 + $0x1a0] sm:$0xff] }
  0x19   : > { %271 = vst [vmem:[%s1808_s8 + $0x10] sm:$0xff] %v270_v2  ;;  %v276_v5 = vld [vmem:[%s1803_s7 + $0x208] sm:$0xff]  ;;  %273 = vst [vmem:[%s1808_s8 + $0x18] sm:$0xff] %v272_v3  ;;  %v278_v6 = vld [vmem:[%s1803_s7 + $0x270] sm:$0xff] }
  0x1a   : > { %275 = vst [vmem:[%s1808_s8 + $0x20] sm:$0xff] %v274_v4  ;;  %277 = vst [vmem:[%s1808_s8 + $0x28] sm:$0xff] %v276_v5  ;;  %v280_v7 = vld [vmem:[%s1803_s7 + $0x2d8] sm:$0xff]  ;;  %v282_v8 = vld [vmem:[%s1803_s7 + $0x340] sm:$0xff] }
  0x1b   : > { %279 = vst [vmem:[%s1808_s8 + $0x30] sm:$0xff] %v278_v6  ;;  %281 = vst [vmem:[%s1808_s8 + $0x38] sm:$0xff] %v280_v7  ;;  %v284_v9 = vld [vmem:[%s1803_s7 + $0x3a8] sm:$0xff]  ;;  %v286_v10 = vld [vmem:[%s1803_s7 + $0x410] sm:$0xff] }
  0x1c   : > { %283 = vst [vmem:[%s1808_s8 + $0x40] sm:$0xff] %v282_v8  ;;  %v288_v11 = vld [vmem:[%s1803_s7 + $0x478] sm:$0xff]  ;;  %285 = vst [vmem:[%s1808_s8 + $0x48] sm:$0xff] %v284_v9  ;;  %v290_v12 = vld [vmem:[%s1803_s7 + $0x4e0] sm:$0xff] }
  0x1d   : > { %287 = vst [vmem:[%s1808_s8 + $0x50] sm:$0xff] %v286_v10  ;;  %289 = vst [vmem:[%s1808_s8 + $0x58] sm:$0xff] %v288_v11  ;;  %v292_v13 = vld [vmem:[%s1803_s7 + $0x548] sm:$0xff]  ;;  %v294_v14 = vld [vmem:[%s1803_s7 + $0x5b0] sm:$0xff] }
  0x1e   : > { %291 = vst [vmem:[%s1808_s8 + $0x60] sm:$0xff] %v290_v12  ;;  %293 = vst [vmem:[%s1808_s8 + $0x68] sm:$0xff] %v292_v13  ;;  %v296_v15 = vld [vmem:[%s1803_s7 + $0x618] sm:$0xff]  ;;  %v298_v16 = vld [vmem:[%s1803_s7 + $0x680] sm:$0xff] }
  0x1f   : > { %295 = vst [vmem:[%s1808_s8 + $0x70] sm:$0xff] %v294_v14  ;;  %v300_v17 = vld [vmem:[%s1803_s7 + $0x6e8] sm:$0xff]  ;;  %297 = vst [vmem:[%s1808_s8 + $0x78] sm:$0xff] %v296_v15  ;;  %v302_v18 = vld [vmem:[%s1803_s7 + $0x750] sm:$0xff] }
  0x20   : > { %299 = vst [vmem:[%s1808_s8 + $0x80] sm:$0xff] %v298_v16  ;;  %301 = vst [vmem:[%s1808_s8 + $0x88] sm:$0xff] %v300_v17  ;;  %v304_v19 = vld [vmem:[%s1803_s7 + $0x7b8] sm:$0xff]  ;;  %v306_v20 = vld [vmem:[%s1803_s7 + $0x820] sm:$0xff] }
  0x21   : > { %303 = vst [vmem:[%s1808_s8 + $0x90] sm:$0xff] %v302_v18  ;;  %305 = vst [vmem:[%s1808_s8 + $0x98] sm:$0xff] %v304_v19  ;;  %v308_v21 = vld [vmem:[%s1803_s7 + $0x888] sm:$0xff]  ;;  %v310_v22 = vld [vmem:[%s1803_s7 + $0x8f0] sm:$0xff] }
  0x22   : > { %307 = vst [vmem:[%s1808_s8 + $0xa0] sm:$0xff] %v306_v20  ;;  %v312_v23 = vld [vmem:[%s1803_s7 + $0x958] sm:$0xff]  ;;  %309 = vst [vmem:[%s1808_s8 + $0xa8] sm:$0xff] %v308_v21  ;;  %v314_v24 = vld [vmem:[%s1803_s7 + $0x9c0] sm:$0xff] }
  0x23   : > { %311 = vst [vmem:[%s1808_s8 + $0xb0] sm:$0xff] %v310_v22  ;;  %313 = vst [vmem:[%s1808_s8 + $0xb8] sm:$0xff] %v312_v23  ;;  %v316_v25 = vld [vmem:[%s1803_s7 + $0xa28] sm:$0xff]  ;;  %v318_v26 = vld [vmem:[%s1803_s7 + $0xa90] sm:$0xff] }
  0x24   : > { %315 = vst [vmem:[%s1808_s8 + $0xc0] sm:$0xff] %v314_v24  ;;  %317 = vst [vmem:[%s1808_s8 + $0xc8] sm:$0xff] %v316_v25  ;;  %v320_v27 = vld [vmem:[%s1803_s7 + $0xaf8] sm:$0xff]  ;;  %v322_v28 = vld [vmem:[%s1803_s7 + $0xb60] sm:$0xff] }
  0x25   : > { %319 = vst [vmem:[%s1808_s8 + $0xd0] sm:$0xff] %v318_v26  ;;  %v324_v29 = vld [vmem:[%s1803_s7 + $0xbc8] sm:$0xff]  ;;  %321 = vst [vmem:[%s1808_s8 + $0xd8] sm:$0xff] %v320_v27  ;;  %v326_v30 = vld [vmem:[%s1803_s7 + $0xc30] sm:$0xff] }
  0x26   : > { %323 = vst [vmem:[%s1808_s8 + $0xe0] sm:$0xff] %v322_v28  ;;  %325 = vst [vmem:[%s1808_s8 + $0xe8] sm:$0xff] %v324_v29  ;;  %v328_v31 = vld [vmem:[%s1803_s7 + $0xc98] sm:$0xff] }
  0x27   : > { %327 = vst [vmem:[%s1808_s8 + $0xf0] sm:$0xff] %v326_v30  ;;  %329 = vst [vmem:[%s1808_s8 + $0xf8] sm:$0xff] %v328_v31 }
  0x28 PF: > { %p1293_p7 = scmp.ge.s32.totalorder %s1720_s18, 1  ;;  %p346_p8 = scmp.lt.s32.totalorder %s1720_s18, 27 }
  0x2a   : > { %p347_p9 = pnand %p1293_p7, %p346_p8 }
  0x2b   : > { %s353_s9 = sand.u32 (!%p347_p9), 1, %s1696_s12   ;;  %s1295_s10 = sshll.u32 (!%p347_p9), %s1704_s14, 5 }
  0x2c   : > { %350 = sbr.rel (%p347_p9) target bundleno = 416 (0x1a0), region = 66  ;;  %s1294_s11 = sshll.u32 (!%p347_p9), %s353_s9, 8 }
  0x2d   : > { %p393_p10 = scmp.lt.s32.totalorder (!%p347_p9), %s1295_s10, 415  ;;  %s1297_s21 = sshll.u32 (!%p347_p9), %s1708_s15, 5 }
  0x2e   : > { %p405_p11 = scmp.lt.s32.totalorder (!%p347_p9), %s1297_s21, 63  ;;  %s1886_s12 = scalar_lea.vmem (!%p347_p9), [#allocation3], %s1294_s11 }
  0x2f   : > { %p1299_p12 = scmp.ne.s32.totalorder (!%p347_p9), %s1704_s14, 0 }
  0x31   : > { %s2045_s10 = smov (!%p393_p10, %s1295_s10), 415  ;;  %s2047_s21 = smov (!%p405_p11, %s1297_s21), 63 }
  0x32   : > { %s1296_s22 = sshll.u32 %s2045_s10, 2  ;;  %s1298_s27 = sshll.u32 %s2047_s21, 3 }
  0x33   : > { %s1879_s26 = scalar_lea.vmem %s2029_s1, %s1296_s22  ;;  %s1884_s30 = scalar_lea.vmem %s2031_s3, %s1298_s27 }
  0x34   : > { %417 = sbr.rel (%p1299_p12) target bundleno = 74 (0x4a), region = 74 }
  0x39   : > { %v1722_v32 = vmov 0.0  }
  0x3a   : > { %418 = vst [vmem:[#allocation2 + $0xb0] sm:$0xff] %v1722_v32  ;;  %419 = vst [vmem:[#allocation2] sm:$0xff] %v1722_v32 }
  0x3b   : > { %420 = vst [vmem:[#allocation2 + $0xd8] sm:$0xff] %v1722_v32  ;;  %421 = vst [vmem:[#allocation2 + $0x18] sm:$0xff] %v1722_v32 }
  0x3c   : > { %422 = vst [vmem:[#allocation2 + $0x50] sm:$0xff] %v1722_v32  ;;  %423 = vst [vmem:[#allocation2 + $0x68] sm:$0xff] %v1722_v32 }
  0x3d   : > { %424 = vst [vmem:[#allocation2 + $0x30] sm:$0xff] %v1722_v32  ;;  %425 = vst [vmem:[#allocation2 + $0x48] sm:$0xff] %v1722_v32 }
  0x3e   : > { %426 = vst [vmem:[#allocation2 + $0x80] sm:$0xff] %v1722_v32  ;;  %427 = vst [vmem:[#allocation2 + $0x88] sm:$0xff] %v1722_v32 }
  0x3f   : > { %428 = vst [vmem:[#allocation2 + $0xe8] sm:$0xff] %v1722_v32  ;;  %429 = vst [vmem:[#allocation2 + $0xb8] sm:$0xff] %v1722_v32 }
  0x40   : > { %430 = vst [vmem:[#allocation2 + $0x60] sm:$0xff] %v1722_v32  ;;  %431 = vst [vmem:[#allocation2 + $0xf0] sm:$0xff] %v1722_v32 }
  0x41   : > { %432 = vst [vmem:[#allocation2 + $0x8] sm:$0xff] %v1722_v32  ;;  %433 = vst [vmem:[#allocation2 + $0x78] sm:$0xff] %v1722_v32 }
  0x42   : > { %434 = vst [vmem:[#allocation2 + $0x38] sm:$0xff] %v1722_v32  ;;  %435 = vst [vmem:[#allocation2 + $0x58] sm:$0xff] %v1722_v32 }
  0x43   : > { %436 = vst [vmem:[#allocation2 + $0x40] sm:$0xff] %v1722_v32  ;;  %437 = vst [vmem:[#allocation2 + $0xc8] sm:$0xff] %v1722_v32 }
  0x44   : > { %438 = vst [vmem:[#allocation2 + $0xe0] sm:$0xff] %v1722_v32  ;;  %439 = vst [vmem:[#allocation2 + $0x90] sm:$0xff] %v1722_v32 }
  0x45   : > { %440 = vst [vmem:[#allocation2 + $0x70] sm:$0xff] %v1722_v32  ;;  %441 = vst [vmem:[#allocation2 + $0xc0] sm:$0xff] %v1722_v32 }
  0x46   : > { %442 = vst [vmem:[#allocation2 + $0xa8] sm:$0xff] %v1722_v32  ;;  %443 = vst [vmem:[#allocation2 + $0xd0] sm:$0xff] %v1722_v32 }
  0x47   : > { %444 = vst [vmem:[#allocation2 + $0x10] sm:$0xff] %v1722_v32  ;;  %445 = vst [vmem:[#allocation2 + $0x28] sm:$0xff] %v1722_v32 }
  0x48   : > { %446 = vst [vmem:[#allocation2 + $0xa0] sm:$0xff] %v1722_v32  ;;  %447 = vst [vmem:[#allocation2 + $0xf8] sm:$0xff] %v1722_v32 }
  0x49   : > { %448 = vst [vmem:[#allocation2 + $0x20] sm:$0xff] %v1722_v32  ;;  %449 = vst [vmem:[#allocation2 + $0x98] sm:$0xff] %v1722_v32 }
  0x4a PF: > { %v1538_v33 = vld [vmem:[%s1879_s26 + $0x78] sm:$0xff]   ;;  %v1540_v35 = vld [vmem:[%s1879_s26 + $0x70] sm:$0xff]   ;;  %v1542_v37 = vld [vmem:[%s1879_s26 + $0x68] sm:$0xff]   ;;  %p1348_p13 = scmp.ne.s32.totalorder %s1704_s14, 12 }
  0x4b   : > { %v1539_v34 = vld [vmem:[%s1879_s26 + $0x38] sm:$0xff]   ;;  %1352 = vmatprep.subr.bf16.mxu0 %v1538_v33  ;;  %1464 = vmatprep.subr.bf16.mxu1 %v1538_v33  ;;  %v1541_v36 = vld [vmem:[%s1879_s26 + $0x30] sm:$0xff]   ;;  %v1543_v38 = vld [vmem:[%s1879_s26 + $0x28] sm:$0xff]  }
  0x4c   : > { %1353 = vmatpush3.bf16.msra.mxu0 %v1539_v34  ;;  %1472 = vmatpush3.bf16.msra.mxu1 %v1539_v34  ;;  %v1544_v39 = vld [vmem:[%s1879_s26 + $0x60] sm:$0xff]   ;;  %v1546_v41 = vld [vmem:[%s1879_s26 + $0x58] sm:$0xff]   ;;  %v1548_v43 = vld [vmem:[%s1879_s26 + $0x50] sm:$0xff]  }
  0x4d   : > { %1354 = vmatprep.subr.bf16.mxu0 %v1540_v35  ;;  %1465 = vmatprep.subr.bf16.mxu1 %v1540_v35  ;;  %v1545_v40 = vld [vmem:[%s1879_s26 + $0x20] sm:$0xff]   ;;  %v1547_v42 = vld [vmem:[%s1879_s26 + $0x18] sm:$0xff]   ;;  %v1549_v46 = vld [vmem:[%s1879_s26 + $0x10] sm:$0xff]  }
  0x4e   : > { %v1556_v44 = vld [vmem:[%s1886_s12 + $0x4] ss:$8 sps:$4 sm:$0xff]   ;;  %v1554_v51 = vld [vmem:[%s1886_s12] ss:$8 sps:$4 sm:$0xff]   ;;  %v1560_v53 = vld [vmem:[%s1886_s12 + $0x14] ss:$8 sps:$4 sm:$0xff]  }
  0x4f   : > { %v1559_v45 = vld [vmem:[%s1886_s12 + $0x84] ss:$8 sps:$4 sm:$0xff]   ;;  %834 = vmatprep.mubr.bf16.mxu0 %v1556_v44  ;;  %v1557_v52 = vld [vmem:[%s1886_s12 + $0x80] ss:$8 sps:$4 sm:$0xff]   ;;  %v1562_v54 = vld [vmem:[%s1886_s12 + $0x94] ss:$8 sps:$4 sm:$0xff]  }
  0x50   : > { %1355 = vmatpush3.bf16.msra.mxu0 %v1541_v36  ;;  %1473 = vmatpush3.bf16.msra.mxu1 %v1541_v36  ;;  %v1550_v47 = vld [vmem:[%s1879_s26 + $0x48] sm:$0xff]   ;;  %v1552_v49 = vld [vmem:[%s1879_s26 + $0x40] sm:$0xff]   ;;  %v1564_v55 = vld [vmem:[%s1886_s12 + $0x10] ss:$8 sps:$4 sm:$0xff]  }
  0x51   : > { %1356 = vmatprep.subr.bf16.mxu0 %v1542_v37  ;;  %1466 = vmatprep.subr.bf16.mxu1 %v1542_v37  ;;  %v1551_v48 = vld [vmem:[%s1879_s26 + $0x8] sm:$0xff]   ;;  %v1553_v50 = vld [vmem:[%s1879_s26] sm:$0xff]   ;;  %v1565_v56 = vld [vmem:[%s1886_s12 + $0x90] ss:$8 sps:$4 sm:$0xff]  }
  0x52   : > { %898 = vmatprep.mubr.bf16.mxu1 %v1559_v45  ;;  %v1566_v57 = vld [vmem:[%s1886_s12 + $0x24] ss:$8 sps:$4 sm:$0xff]   ;;  %v1570_v59 = vld [vmem:[%s1886_s12 + $0x20] ss:$8 sps:$4 sm:$0xff]   ;;  %v1572_v61 = vld [vmem:[%s1886_s12 + $0x34] ss:$8 sps:$4 sm:$0xff]  }
  0x53   : > { %v1568_v58 = vld [vmem:[%s1886_s12 + $0xa4] ss:$8 sps:$4 sm:$0xff]   ;;  %v1571_v60 = vld [vmem:[%s1886_s12 + $0xa0] ss:$8 sps:$4 sm:$0xff]   ;;  %v1574_v62 = vld [vmem:[%s1886_s12 + $0xb4] ss:$8 sps:$4 sm:$0xff]  }
  0x54   : > { %1357 = vmatpush3.bf16.msra.mxu0 %v1543_v38  ;;  %1474 = vmatpush3.bf16.msra.mxu1 %v1543_v38  ;;  %v1576_v63 = vld [vmem:[%s1886_s12 + $0x30] ss:$8 sps:$4 sm:$0xff]   ;;  %v1578_v1 = vld [vmem:[%s1886_s12 + $0x44] ss:$8 sps:$4 sm:$0xff]   ;;  %v1582_v3 = vld [vmem:[%s1886_s12 + $0x40] ss:$8 sps:$4 sm:$0xff]  }
  0x55   : > { %1358 = vmatprep.subr.bf16.mxu0 %v1544_v39  ;;  %1467 = vmatprep.subr.bf16.mxu1 %v1544_v39  ;;  %v1577_v0 = vld [vmem:[%s1886_s12 + $0xb0] ss:$8 sps:$4 sm:$0xff]   ;;  %v1580_v2 = vld [vmem:[%s1886_s12 + $0xc4] ss:$8 sps:$4 sm:$0xff]   ;;  %v1583_v4 = vld [vmem:[%s1886_s12 + $0xc0] ss:$8 sps:$4 sm:$0xff]  }
  0x56   : > { %v1584_v5 = vld [vmem:[%s1886_s12 + $0x54] ss:$8 sps:$4 sm:$0xff]   ;;  %v1588_v7 = vld [vmem:[%s1886_s12 + $0x50] ss:$8 sps:$4 sm:$0xff]   ;;  %v1590_v9 = vld [vmem:[%s1886_s12 + $0x64] ss:$8 sps:$4 sm:$0xff]  }
  0x57   : > { %v1586_v6 = vld [vmem:[%s1886_s12 + $0xd4] ss:$8 sps:$4 sm:$0xff]   ;;  %v1589_v8 = vld [vmem:[%s1886_s12 + $0xd0] ss:$8 sps:$4 sm:$0xff]   ;;  %v1592_v10 = vld [vmem:[%s1886_s12 + $0xe4] ss:$8 sps:$4 sm:$0xff]  }
  0x58   : > { %1359 = vmatpush3.bf16.msra.mxu0 %v1545_v40  ;;  %1475 = vmatpush3.bf16.msra.mxu1 %v1545_v40  ;;  %v1594_v11 = vld [vmem:[%s1886_s12 + $0x60] ss:$8 sps:$4 sm:$0xff]   ;;  %v1596_v13 = vld [vmem:[%s1886_s12 + $0x74] ss:$8 sps:$4 sm:$0xff]   ;;  %v1600_v15 = vld [vmem:[%s1886_s12 + $0x70] ss:$8 sps:$4 sm:$0xff]  }
  0x59   : > { %1360 = vmatprep.subr.bf16.mxu0 %v1546_v41  ;;  %1468 = vmatprep.subr.bf16.mxu1 %v1546_v41  ;;  %v1595_v12 = vld [vmem:[%s1886_s12 + $0xe0] ss:$8 sps:$4 sm:$0xff]   ;;  %v1598_v14 = vld [vmem:[%s1886_s12 + $0xf4] ss:$8 sps:$4 sm:$0xff]   ;;  %v1601_v16 = vld [vmem:[%s1886_s12 + $0xf0] ss:$8 sps:$4 sm:$0xff]  }
  0x5a   : > { %v450_v19 = vld [vmem:[#allocation2 + $0xb0] sm:$0xff]  ;;  %v466_v21 = vld [vmem:[#allocation2 + $0x38] sm:$0xff]  ;;  %v451_v29 = vld [vmem:[#allocation2] sm:$0xff] }
  0x5b   : > { %v467_v31 = vld [vmem:[#allocation2 + $0x58] sm:$0xff]  ;;  %v468_v41 = vld [vmem:[#allocation2 + $0x40] sm:$0xff] }
  0x5c   : > { %1361 = vmatpush3.bf16.msra.mxu0 %v1547_v42  ;;  %1476 = vmatpush3.bf16.msra.mxu1 %v1547_v42  ;;  %v452_v39 = vld [vmem:[#allocation2 + $0xd8] sm:$0xff] }
  0x5d   : > { %1362 = vmatprep.subr.bf16.mxu0 %v1548_v43  ;;  %1469 = vmatprep.subr.bf16.mxu1 %v1548_v43 }
  0x60   : > { %1363 = vmatpush3.bf16.msra.mxu0 %v1549_v46  ;;  %1477 = vmatpush3.bf16.msra.mxu1 %v1549_v46 }
  0x61   : > { %1364 = vmatprep.subr.bf16.mxu0 %v1550_v47  ;;  %1470 = vmatprep.subr.bf16.mxu1 %v1550_v47 }
  0x64   : > { %1365 = vmatpush3.bf16.msra.mxu0 %v1551_v48  ;;  %1478 = vmatpush3.bf16.msra.mxu1 %v1551_v48 }
  0x65   : > { %1366 = vmatprep.subr.bf16.mxu0 %v1552_v49  ;;  %1471 = vmatprep.subr.bf16.mxu1 %v1552_v49  ;;  %v453_v49 = vld [vmem:[#allocation2 + $0x18] sm:$0xff] }
  0x68   : > { %1367 = vmatpush3.bf16.msra.mxu0 %v1553_v50  ;;  %1479 = vmatpush3.bf16.msra.mxu1 %v1553_v50 }
  0x6b   : > { %835 = vmatmul.mubr.bf16.vlgmr.msra.gmra.mxu0 %v1554_v51  ;;  %899 = vmatmul.mubr.bf16.vlgmr.msra.gmra.mxu1 %v1557_v52  ;;  %v469_v51 = vld [vmem:[#allocation2 + $0xc8] sm:$0xff] }
  0x6c   : > { %842 = vmatprep.mubr.bf16.mxu0 %v1560_v53  ;;  %906 = vmatprep.mubr.bf16.mxu1 %v1562_v54 }
  0x73   : > { %843 = vmatmul.mubr.bf16.gmra.mxu0 %v1564_v55  ;;  %907 = vmatmul.mubr.bf16.gmra.mxu1 %v1565_v56 }
  0x74   : > { %850 = vmatprep.mubr.bf16.mxu0 %v1566_v57  ;;  %914 = vmatprep.mubr.bf16.mxu1 %v1568_v58 }
  0x7b   : > { %851 = vmatmul.mubr.bf16.gmra.mxu0 %v1570_v59  ;;  %915 = vmatmul.mubr.bf16.gmra.mxu1 %v1571_v60  ;;  %v454_v59 = vld [vmem:[#allocation2 + $0x50] sm:$0xff] }
  0x7c   : > { %858 = vmatprep.mubr.bf16.mxu0 %v1572_v61  ;;  %922 = vmatprep.mubr.bf16.mxu1 %v1574_v62  ;;  %v470_v61 = vld [vmem:[#allocation2 + $0xe0] sm:$0xff] }
  0x83   : > { %859 = vmatmul.mubr.bf16.gmra.mxu0 %v1576_v63  ;;  %923 = vmatmul.mubr.bf16.gmra.mxu1 %v1577_v0 }
  0x84   : > { %866 = vmatprep.mubr.bf16.mxu0 %v1578_v1  ;;  %930 = vmatprep.mubr.bf16.mxu1 %v1580_v2 }
  0x8b   : > { %867 = vmatmul.mubr.bf16.gmra.mxu0 %v1582_v3  ;;  %931 = vmatmul.mubr.bf16.gmra.mxu1 %v1583_v4 }
  0x8c   : > { %874 = vmatprep.mubr.bf16.mxu0 %v1584_v5  ;;  %938 = vmatprep.mubr.bf16.mxu1 %v1586_v6  ;;  %v455_v5 = vld [vmem:[#allocation2 + $0x68] sm:$0xff] }
  0x93   : > { %875 = vmatmul.mubr.bf16.gmra.mxu0 %v1588_v7  ;;  %939 = vmatmul.mubr.bf16.gmra.mxu1 %v1589_v8  ;;  %v471_v7 = vld [vmem:[#allocation2 + $0x90] sm:$0xff] }
  0x94   : > { %882 = vmatprep.mubr.bf16.mxu0 %v1590_v9  ;;  %946 = vmatprep.mubr.bf16.mxu1 %v1592_v10 }
  0x9b   : > { %883 = vmatmul.mubr.bf16.gmra.mxu0 %v1594_v11  ;;  %947 = vmatmul.mubr.bf16.gmra.mxu1 %v1595_v12 }
  0x9c   : > { %890 = vmatprep.mubr.bf16.mxu0 %v1596_v13  ;;  %954 = vmatprep.mubr.bf16.mxu1 %v1598_v14 }
  0xa3   : > { %891 = vmatmul.mubr.bf16.gmra.mxu0 %v1600_v15  ;;  %955 = vmatmul.mubr.bf16.gmra.mxu1 %v1601_v16  ;;  %v456_v15 = vld [vmem:[#allocation2 + $0x30] sm:$0xff] }
 0x12b   : > { %v1368_v17 = vpop.f32.mrf.mxu0  ;;  %v1416_v18 = vpop.f32.mrf.mxu1 }
 0x12d   : > { %v1369_v20 = vpop.f32.mrf.mxu0  ;;  %v1417_v22 = vpop.f32.mrf.mxu1 }
 0x12e   : > { %v1370_v23 = vadd.f32 %v1369_v20, %v1368_v17  ;;  %v1418_v24 = vadd.f32 %v1417_v22, %v1416_v18  ;;  %v472_v17 = vld [vmem:[#allocation2 + $0x70] sm:$0xff] }
 0x12f   : > { %v1371_v25 = vpop.f32.mrf.mxu0  ;;  %v1419_v26 = vpop.f32.mrf.mxu1 }
 0x130   : > { %v963_v27 = vadd.f32 %v1370_v23, %v450_v19  ;;  %v979_v28 = vadd.f32 %v1418_v24, %v466_v21 }
 0x131   : > { %v1372_v30 = vpop.f32.mrf.mxu0  ;;  %v1420_v32 = vpop.f32.mrf.mxu1 }
 0x132   : > { %995 = vst [vmem:[#allocation2 + $0xb0] sm:$0xff] %v963_v27  ;;  %1011 = vst [vmem:[#allocation2 + $0x38] sm:$0xff] %v979_v28  ;;  %v1373_v33 = vadd.f32 %v1372_v30, %v1371_v25  ;;  %v1421_v34 = vadd.f32 %v1420_v32, %v1419_v26  ;;  %v457_v25 = vld [vmem:[#allocation2 + $0x48] sm:$0xff]  ;;  %v473_v27 = vld [vmem:[#allocation2 + $0xc0] sm:$0xff] }
 0x133   : > { %v1374_v35 = vpop.f32.mrf.mxu0  ;;  %v1422_v36 = vpop.f32.mrf.mxu1 }
 0x134   : > { %v964_v37 = vadd.f32 %v1373_v33, %v451_v29  ;;  %v980_v38 = vadd.f32 %v1421_v34, %v467_v31 }
 0x135   : > { %v1375_v40 = vpop.f32.mrf.mxu0  ;;  %v1423_v42 = vpop.f32.mrf.mxu1 }
 0x136   : > { %996 = vst [vmem:[#allocation2] sm:$0xff] %v964_v37  ;;  %1012 = vst [vmem:[#allocation2 + $0x58] sm:$0xff] %v980_v38  ;;  %v1376_v43 = vadd.f32 %v1375_v40, %v1374_v35  ;;  %v1424_v44 = vadd.f32 %v1423_v42, %v1422_v36  ;;  %v458_v35 = vld [vmem:[#allocation2 + $0x80] sm:$0xff]  ;;  %v474_v37 = vld [vmem:[#allocation2 + $0xa8] sm:$0xff] }
 0x137   : > { %v1377_v45 = vpop.f32.mrf.mxu0  ;;  %v1425_v46 = vpop.f32.mrf.mxu1 }
 0x138   : > { %v965_v47 = vadd.f32 %v1376_v43, %v452_v39  ;;  %v981_v48 = vadd.f32 %v1424_v44, %v468_v41 }
 0x139   : > { %v1378_v50 = vpop.f32.mrf.mxu0  ;;  %v1426_v52 = vpop.f32.mrf.mxu1 }
 0x13a   : > { %997 = vst [vmem:[#allocation2 + $0xd8] sm:$0xff] %v965_v47  ;;  %1013 = vst [vmem:[#allocation2 + $0x40] sm:$0xff] %v981_v48  ;;  %v1379_v53 = vadd.f32 %v1378_v50, %v1377_v45  ;;  %v1427_v54 = vadd.f32 %v1426_v52, %v1425_v46  ;;  %v459_v45 = vld [vmem:[#allocation2 + $0x88] sm:$0xff]  ;;  %v475_v47 = vld [vmem:[#allocation2 + $0xd0] sm:$0xff] }
 0x13b   : > { %v1380_v55 = vpop.f32.mrf.mxu0  ;;  %v1428_v56 = vpop.f32.mrf.mxu1 }
 0x13c   : > { %v966_v57 = vadd.f32 %v1379_v53, %v453_v49  ;;  %v982_v58 = vadd.f32 %v1427_v54, %v469_v51 }
 0x13d   : > { %v1381_v60 = vpop.f32.mrf.mxu0  ;;  %v1429_v62 = vpop.f32.mrf.mxu1 }
 0x13e   : > { %998 = vst [vmem:[#allocation2 + $0x18] sm:$0xff] %v966_v57  ;;  %1014 = vst [vmem:[#allocation2 + $0xc8] sm:$0xff] %v982_v58  ;;  %v1382_v63 = vadd.f32 %v1381_v60, %v1380_v55  ;;  %v1430_v0 = vadd.f32 %v1429_v62, %v1428_v56  ;;  %v460_v55 = vld [vmem:[#allocation2 + $0xe8] sm:$0xff]  ;;  %v476_v57 = vld [vmem:[#allocation2 + $0x10] sm:$0xff] }
 0x13f   : > { %v1383_v1 = vpop.f32.mrf.mxu0  ;;  %v1431_v2 = vpop.f32.mrf.mxu1 }
 0x140   : > { %v967_v3 = vadd.f32 %v1382_v63, %v454_v59  ;;  %v983_v4 = vadd.f32 %v1430_v0, %v470_v61 }
 0x141   : > { %v1384_v6 = vpop.f32.mrf.mxu0  ;;  %v1432_v8 = vpop.f32.mrf.mxu1 }
 0x142   : > { %999 = vst [vmem:[#allocation2 + $0x50] sm:$0xff] %v967_v3  ;;  %1015 = vst [vmem:[#allocation2 + $0xe0] sm:$0xff] %v983_v4  ;;  %v1385_v9 = vadd.f32 %v1384_v6, %v1383_v1  ;;  %v1433_v10 = vadd.f32 %v1432_v8, %v1431_v2  ;;  %v461_v1 = vld [vmem:[#allocation2 + $0xb8] sm:$0xff]  ;;  %v477_v3 = vld [vmem:[#allocation2 + $0x28] sm:$0xff] }
 0x143   : > { %v1386_v11 = vpop.f32.mrf.mxu0  ;;  %v1434_v12 = vpop.f32.mrf.mxu1 }
 0x144   : > { %v968_v13 = vadd.f32 %v1385_v9, %v455_v5  ;;  %v984_v14 = vadd.f32 %v1433_v10, %v471_v7 }
 0x145   : > { %v1387_v16 = vpop.f32.mrf.mxu0  ;;  %v1435_v18 = vpop.f32.mrf.mxu1 }
 0x146   : > { %1000 = vst [vmem:[#allocation2 + $0x68] sm:$0xff] %v968_v13  ;;  %1016 = vst [vmem:[#allocation2 + $0x90] sm:$0xff] %v984_v14  ;;  %v1388_v19 = vadd.f32 %v1387_v16, %v1386_v11  ;;  %v1436_v20 = vadd.f32 %v1435_v18, %v1434_v12  ;;  %v462_v11 = vld [vmem:[#allocation2 + $0x60] sm:$0xff] }
 0x147   : > { %v1389_v21 = vpop.f32.mrf.mxu0  ;;  %v1437_v22 = vpop.f32.mrf.mxu1  ;;  %v478_v13 = vld [vmem:[#allocation2 + $0xa0] sm:$0xff] }
 0x148   : > { %v969_v23 = vadd.f32 %v1388_v19, %v456_v15  ;;  %v985_v24 = vadd.f32 %v1436_v20, %v472_v17 }
 0x149   : > { %v1390_v26 = vpop.f32.mrf.mxu0  ;;  %v1438_v28 = vpop.f32.mrf.mxu1 }
 0x14a   : > { %1001 = vst [vmem:[#allocation2 + $0x30] sm:$0xff] %v969_v23  ;;  %1017 = vst [vmem:[#allocation2 + $0x70] sm:$0xff] %v985_v24  ;;  %v1391_v29 = vadd.f32 %v1390_v26, %v1389_v21  ;;  %v1439_v30 = vadd.f32 %v1438_v28, %v1437_v22  ;;  %v463_v21 = vld [vmem:[#allocation2 + $0xf0] sm:$0xff]  ;;  %v479_v23 = vld [vmem:[#allocation2 + $0xf8] sm:$0xff] }
 0x14b   : > { %v1392_v31 = vpop.f32.mrf.mxu0  ;;  %v1440_v32 = vpop.f32.mrf.mxu1 }
 0x14c   : > { %v970_v33 = vadd.f32 %v1391_v29, %v457_v25  ;;  %v986_v34 = vadd.f32 %v1439_v30, %v473_v27 }
 0x14d   : > { %v1393_v36 = vpop.f32.mrf.mxu0  ;;  %v1441_v38 = vpop.f32.mrf.mxu1 }
 0x14e   : > { %1002 = vst [vmem:[#allocation2 + $0x48] sm:$0xff] %v970_v33  ;;  %1018 = vst [vmem:[#allocation2 + $0xc0] sm:$0xff] %v986_v34  ;;  %v1394_v39 = vadd.f32 %v1393_v36, %v1392_v31  ;;  %v1442_v40 = vadd.f32 %v1441_v38, %v1440_v32  ;;  %v464_v31 = vld [vmem:[#allocation2 + $0x8] sm:$0xff]  ;;  %v480_v33 = vld [vmem:[#allocation2 + $0x20] sm:$0xff] }
 0x14f   : > { %v1395_v41 = vpop.f32.mrf.mxu0  ;;  %v1443_v42 = vpop.f32.mrf.mxu1 }
 0x150   : > { %v971_v43 = vadd.f32 %v1394_v39, %v458_v35  ;;  %v987_v44 = vadd.f32 %v1442_v40, %v474_v37 }
 0x151   : > { %v1396_v46 = vpop.f32.mrf.mxu0  ;;  %v1444_v48 = vpop.f32.mrf.mxu1 }
 0x152   : > { %1003 = vst [vmem:[#allocation2 + $0x80] sm:$0xff] %v971_v43  ;;  %1019 = vst [vmem:[#allocation2 + $0xa8] sm:$0xff] %v987_v44  ;;  %v1397_v49 = vadd.f32 %v1396_v46, %v1395_v41  ;;  %v1445_v50 = vadd.f32 %v1444_v48, %v1443_v42  ;;  %v465_v41 = vld [vmem:[#allocation2 + $0x78] sm:$0xff] }
 0x153   : > { %v1398_v51 = vpop.f32.mrf.mxu0  ;;  %v1446_v52 = vpop.f32.mrf.mxu1  ;;  %v481_v43 = vld [vmem:[#allocation2 + $0x98] sm:$0xff] }
 0x154   : > { %v972_v53 = vadd.f32 %v1397_v49, %v459_v45  ;;  %v988_v54 = vadd.f32 %v1445_v50, %v475_v47 }
 0x155   : > { %v1399_v56 = vpop.f32.mrf.mxu0  ;;  %v1447_v58 = vpop.f32.mrf.mxu1 }
 0x156   : > { %1004 = vst [vmem:[#allocation2 + $0x88] sm:$0xff] %v972_v53  ;;  %1020 = vst [vmem:[#allocation2 + $0xd0] sm:$0xff] %v988_v54  ;;  %v1400_v59 = vadd.f32 %v1399_v56, %v1398_v51  ;;  %v1448_v60 = vadd.f32 %v1447_v58, %v1446_v52 }
 0x157   : > { %v1401_v61 = vpop.f32.mrf.mxu0  ;;  %v1449_v62 = vpop.f32.mrf.mxu1 }
 0x158   : > { %v973_v63 = vadd.f32 %v1400_v59, %v460_v55  ;;  %v989_v0 = vadd.f32 %v1448_v60, %v476_v57 }
 0x159   : > { %v1402_v2 = vpop.f32.mrf.mxu0  ;;  %v1450_v4 = vpop.f32.mrf.mxu1 }
 0x15a   : > { %1005 = vst [vmem:[#allocation2 + $0xe8] sm:$0xff] %v973_v63  ;;  %1021 = vst [vmem:[#allocation2 + $0x10] sm:$0xff] %v989_v0  ;;  %v1403_v5 = vadd.f32 %v1402_v2, %v1401_v61  ;;  %v1451_v6 = vadd.f32 %v1450_v4, %v1449_v62 }
 0x15b   : > { %v1404_v7 = vpop.f32.mrf.mxu0  ;;  %v1452_v8 = vpop.f32.mrf.mxu1 }
 0x15c   : > { %v974_v9 = vadd.f32 %v1403_v5, %v461_v1  ;;  %v990_v10 = vadd.f32 %v1451_v6, %v477_v3 }
 0x15d   : > { %v1405_v12 = vpop.f32.mrf.mxu0  ;;  %v1453_v14 = vpop.f32.mrf.mxu1 }
 0x15e   : > { %1006 = vst [vmem:[#allocation2 + $0xb8] sm:$0xff] %v974_v9  ;;  %1022 = vst [vmem:[#allocation2 + $0x28] sm:$0xff] %v990_v10  ;;  %v1406_v15 = vadd.f32 %v1405_v12, %v1404_v7  ;;  %v1454_v16 = vadd.f32 %v1453_v14, %v1452_v8 }
 0x15f   : > { %v1407_v17 = vpop.f32.mrf.mxu0  ;;  %v1455_v18 = vpop.f32.mrf.mxu1 }
 0x160   : > { %v975_v19 = vadd.f32 %v1406_v15, %v462_v11  ;;  %v991_v20 = vadd.f32 %v1454_v16, %v478_v13 }
 0x161   : > { %v1408_v22 = vpop.f32.mrf.mxu0  ;;  %v1456_v24 = vpop.f32.mrf.mxu1 }
 0x162   : > { %1007 = vst [vmem:[#allocation2 + $0x60] sm:$0xff] %v975_v19  ;;  %1023 = vst [vmem:[#allocation2 + $0xa0] sm:$0xff] %v991_v20  ;;  %v1409_v25 = vadd.f32 %v1408_v22, %v1407_v17  ;;  %v1457_v26 = vadd.f32 %v1456_v24, %v1455_v18 }
 0x163   : > { %v1410_v27 = vpop.f32.mrf.mxu0  ;;  %v1458_v28 = vpop.f32.mrf.mxu1 }
 0x164   : > { %v976_v29 = vadd.f32 %v1409_v25, %v463_v21  ;;  %v992_v30 = vadd.f32 %v1457_v26, %v479_v23 }
 0x165   : > { %v1411_v32 = vpop.f32.mrf.mxu0  ;;  %v1459_v34 = vpop.f32.mrf.mxu1 }
 0x166   : > { %1008 = vst [vmem:[#allocation2 + $0xf0] sm:$0xff] %v976_v29  ;;  %1024 = vst [vmem:[#allocation2 + $0xf8] sm:$0xff] %v992_v30  ;;  %v1412_v35 = vadd.f32 %v1411_v32, %v1410_v27  ;;  %v1460_v36 = vadd.f32 %v1459_v34, %v1458_v28 }
 0x167   : > { %v1413_v37 = vpop.f32.mrf.mxu0  ;;  %v1461_v38 = vpop.f32.mrf.mxu1 }
 0x168   : > { %v977_v39 = vadd.f32 %v1412_v35, %v464_v31  ;;  %v993_v40 = vadd.f32 %v1460_v36, %v480_v33 }
 0x169   : > { %v1414_v42 = vpop.f32.mrf.mxu0  ;;  %v1462_v44 = vpop.f32.mrf.mxu1 }
 0x16a   : > { %1009 = vst [vmem:[#allocation2 + $0x8] sm:$0xff] %v977_v39  ;;  %1025 = vst [vmem:[#allocation2 + $0x20] sm:$0xff] %v993_v40  ;;  %v1415_v45 = vadd.f32 %v1414_v42, %v1413_v37  ;;  %v1463_v46 = vadd.f32 %v1462_v44, %v1461_v38  ;;  %1030 = sbr.rel (%p1348_p13) target bundleno = 416 (0x1a0), region = 78 }
 0x16c   : > { %v978_v47 = vadd.f32 %v1415_v45, %v465_v41  ;;  %v994_v48 = vadd.f32 %v1463_v46, %v481_v43 }
 0x16e   : > { %1010 = vst [vmem:[#allocation2 + $0x78] sm:$0xff] %v978_v47  ;;  %1026 = vst [vmem:[#allocation2 + $0x98] sm:$0xff] %v994_v48 }
 0x16f   : > { %v1031_v49 = vld [vmem:[#allocation2 + $0xb0] sm:$0xff]  ;;  %v1941_v50 = vld [vmem:[%s2030_s2] ss:$0 sm:$0xff]  ;;  %v1033_v54 = vld [vmem:[#allocation2 + $0xd8] sm:$0xff] }
 0x170   : > { %v1032_v51 = vld [vmem:[#allocation2] sm:$0xff]  ;;  %v1070_v52 = vadd.f32 %v1941_v50, %v1031_v49  ;;  %v1034_v55 = vld [vmem:[#allocation2 + $0x18] sm:$0xff]  ;;  %v1035_v56 = vld [vmem:[#allocation2 + $0x50] sm:$0xff]  ;;  %v1072_v57 = vadd.f32 %v1941_v50, %v1033_v54 }
 0x171   : > { %v1071_v53 = vadd.f32 %v1941_v50, %v1032_v51  ;;  %v1073_v58 = vadd.f32 %v1941_v50, %v1034_v55  ;;  %v1036_v59 = vld [vmem:[#allocation2 + $0x68] sm:$0xff]  ;;  %v1037_v60 = vld [vmem:[#allocation2 + $0x30] sm:$0xff]  ;;  %v1074_v61 = vadd.f32 %v1941_v50, %v1035_v56  ;;  %v1039_v0 = vld [vmem:[#allocation2 + $0x80] sm:$0xff] }
 0x172   : > { %1602 = vtanh.f32 %v1070_v52  ;;  %v1038_v62 = vld [vmem:[#allocation2 + $0x48] sm:$0xff]  ;;  %v1075_v63 = vadd.f32 %v1941_v50, %v1036_v59  ;;  %v1076_v1 = vadd.f32 %v1941_v50, %v1037_v60  ;;  %v1078_v5 = vadd.f32 %v1941_v50, %v1039_v0  ;;  %v1042_v6 = vld [vmem:[#allocation2 + $0xb8] sm:$0xff]  ;;  %v1043_v8 = vld [vmem:[#allocation2 + $0x60] sm:$0xff] }
 0x173   : > { %1604 = vtanh.f32 %v1071_v53  ;;  %v1040_v2 = vld [vmem:[#allocation2 + $0x88] sm:$0xff]  ;;  %v1077_v3 = vadd.f32 %v1941_v50, %v1038_v62  ;;  %v1044_v10 = vld [vmem:[#allocation2 + $0xf0] sm:$0xff]  ;;  %v1081_v11 = vadd.f32 %v1941_v50, %v1042_v6  ;;  %v1082_v13 = vadd.f32 %v1941_v50, %v1043_v8  ;;  %v1047_v16 = vld [vmem:[#allocation2 + $0x38] sm:$0xff] }
 0x174   : > { %1606 = vtanh.f32 %v1072_v57  ;;  %v1041_v4 = vld [vmem:[#allocation2 + $0xe8] sm:$0xff]  ;;  %v1079_v7 = vadd.f32 %v1941_v50, %v1040_v2  ;;  %v1083_v15 = vadd.f32 %v1941_v50, %v1044_v10  ;;  %v1048_v18 = vld [vmem:[#allocation2 + $0x58] sm:$0xff]  ;;  %v1049_v20 = vld [vmem:[#allocation2 + $0x40] sm:$0xff]  ;;  %v1086_v21 = vadd.f32 %v1941_v50, %v1047_v16 }
 0x175   : > { %1608 = vtanh.f32 %v1073_v58  ;;  %v1080_v9 = vadd.f32 %v1941_v50, %v1041_v4  ;;  %v1045_v12 = vld [vmem:[#allocation2 + $0x8] sm:$0xff]  ;;  %v1046_v14 = vld [vmem:[#allocation2 + $0x78] sm:$0xff]  ;;  %v1087_v24 = vadd.f32 %v1941_v50, %v1048_v18  ;;  %v1051_v25 = vld [vmem:[#allocation2 + $0xe0] sm:$0xff]  ;;  %v1088_v27 = vadd.f32 %v1941_v50, %v1049_v20 }
 0x176   : > { %1610 = vtanh.f32 %v1074_v61  ;;  %v1084_v17 = vadd.f32 %v1941_v50, %v1045_v12  ;;  %v1085_v19 = vadd.f32 %v1941_v50, %v1046_v14  ;;  %v1050_v22 = vld [vmem:[#allocation2 + $0xc8] sm:$0xff]  ;;  %v1052_v28 = vld [vmem:[#allocation2 + $0x90] sm:$0xff]  ;;  %v1090_v33 = vadd.f32 %v1941_v50, %v1051_v25  ;;  %v1054_v34 = vld [vmem:[#allocation2 + $0xc0] sm:$0xff] }
 0x177   : > { %1612 = vtanh.f32 %v1075_v63  ;;  %v1089_v30 = vadd.f32 %v1941_v50, %v1050_v22  ;;  %v1053_v31 = vld [vmem:[#allocation2 + $0x70] sm:$0xff]  ;;  %v1091_v36 = vadd.f32 %v1941_v50, %v1052_v28  ;;  %v1055_v37 = vld [vmem:[#allocation2 + $0xa8] sm:$0xff]  ;;  %v1093_v42 = vadd.f32 %v1941_v50, %v1054_v34  ;;  %v1059_v49 = vld [vmem:[#allocation2 + $0xa0] sm:$0xff] }
 0x178   : > { %1614 = vtanh.f32 %v1076_v1  ;;  %v1092_v39 = vadd.f32 %v1941_v50, %v1053_v31  ;;  %v1056_v40 = vld [vmem:[#allocation2 + $0xd0] sm:$0xff]  ;;  %v1094_v45 = vadd.f32 %v1941_v50, %v1055_v37  ;;  %v1058_v46 = vld [vmem:[#allocation2 + $0x28] sm:$0xff]  ;;  %v1060_v53 = vld [vmem:[#allocation2 + $0xf8] sm:$0xff]  ;;  %v1098_v58 = vadd.f32 %v1941_v50, %v1059_v49 }
 0x179   : > { %1616 = vtanh.f32 %v1077_v3  ;;  %v1057_v43 = vld [vmem:[#allocation2 + $0x10] sm:$0xff]  ;;  %v1095_v48 = vadd.f32 %v1941_v50, %v1056_v40  ;;  %v1097_v55 = vadd.f32 %v1941_v50, %v1058_v46  ;;  %v1061_v56 = vld [vmem:[#allocation2 + $0x20] sm:$0xff]  ;;  %v1062_v59 = vld [vmem:[#allocation2 + $0x98] sm:$0xff]  ;;  %v1099_v61 = vadd.f32 %v1941_v50, %v1060_v53 }
 0x17a   : > { %1618 = vtanh.f32 %v1078_v5  ;;  %v1096_v52 = vadd.f32 %v1941_v50, %v1057_v43  ;;  %v1100_v63 = vadd.f32 %v1941_v50, %v1061_v56  ;;  %v1101_v1 = vadd.f32 %v1941_v50, %v1062_v59 }
 0x17b   : > { %1620 = vtanh.f32 %v1079_v7 }
 0x17c   : > { %1622 = vtanh.f32 %v1080_v9 }
 0x17d   : > { %1624 = vtanh.f32 %v1081_v11 }
 0x17e   : > { %1626 = vtanh.f32 %v1082_v13 }
 0x17f   : > { %v1603_v23 = vpop.eup %1602  ;;  %1628 = vtanh.f32 %v1083_v15 }
 0x180   : > { %v1605_v26 = vpop.eup %1604  ;;  %1134 = vst [vmem:[%s1884_s30] sm:$0xff] %v1603_v23  ;;  %1630 = vtanh.f32 %v1084_v17 }
 0x181   : > { %v1607_v29 = vpop.eup %1606  ;;  %1135 = vst [vmem:[%s1884_s30 + $0x8] sm:$0xff] %v1605_v26  ;;  %1632 = vtanh.f32 %v1085_v19 }
 0x182   : > { %v1609_v32 = vpop.eup %1608  ;;  %1136 = vst [vmem:[%s1884_s30 + $0x10] sm:$0xff] %v1607_v29  ;;  %1634 = vtanh.f32 %v1086_v21 }
 0x183   : > { %v1611_v35 = vpop.eup %1610  ;;  %1137 = vst [vmem:[%s1884_s30 + $0x18] sm:$0xff] %v1609_v32  ;;  %1636 = vtanh.f32 %v1087_v24 }
 0x184   : > { %v1613_v38 = vpop.eup %1612  ;;  %1138 = vst [vmem:[%s1884_s30 + $0x20] sm:$0xff] %v1611_v35  ;;  %1638 = vtanh.f32 %v1088_v27 }
 0x185   : > { %v1615_v41 = vpop.eup %1614  ;;  %1139 = vst [vmem:[%s1884_s30 + $0x28] sm:$0xff] %v1613_v38  ;;  %1640 = vtanh.f32 %v1089_v30 }
 0x186   : > { %v1617_v44 = vpop.eup %1616  ;;  %1140 = vst [vmem:[%s1884_s30 + $0x30] sm:$0xff] %v1615_v41  ;;  %1642 = vtanh.f32 %v1090_v33 }
 0x187   : > { %v1619_v47 = vpop.eup %1618  ;;  %1141 = vst [vmem:[%s1884_s30 + $0x38] sm:$0xff] %v1617_v44  ;;  %1644 = vtanh.f32 %v1091_v36 }
 0x188   : > { %v1621_v51 = vpop.eup %1620  ;;  %1142 = vst [vmem:[%s1884_s30 + $0x40] sm:$0xff] %v1619_v47  ;;  %1646 = vtanh.f32 %v1092_v39 }
 0x189   : > { %v1623_v54 = vpop.eup %1622  ;;  %1143 = vst [vmem:[%s1884_s30 + $0x48] sm:$0xff] %v1621_v51  ;;  %1648 = vtanh.f32 %v1093_v42 }
 0x18a   : > { %v1625_v57 = vpop.eup %1624  ;;  %1144 = vst [vmem:[%s1884_s30 + $0x50] sm:$0xff] %v1623_v54  ;;  %1650 = vtanh.f32 %v1094_v45 }
 0x18b   : > { %v1627_v60 = vpop.eup %1626  ;;  %1145 = vst [vmem:[%s1884_s30 + $0x58] sm:$0xff] %v1625_v57  ;;  %1652 = vtanh.f32 %v1095_v48 }
 0x18c   : > { %v1629_v62 = vpop.eup %1628  ;;  %1146 = vst [vmem:[%s1884_s30 + $0x60] sm:$0xff] %v1627_v60  ;;  %1654 = vtanh.f32 %v1096_v52 }
 0x18d   : > { %v1631_v0 = vpop.eup %1630  ;;  %1147 = vst [vmem:[%s1884_s30 + $0x68] sm:$0xff] %v1629_v62  ;;  %1656 = vtanh.f32 %v1097_v55 }
 0x18e   : > { %v1633_v2 = vpop.eup %1632  ;;  %1148 = vst [vmem:[%s1884_s30 + $0x70] sm:$0xff] %v1631_v0  ;;  %1658 = vtanh.f32 %v1098_v58 }
 0x18f   : > { %v1635_v3 = vpop.eup %1634  ;;  %1149 = vst [vmem:[%s1884_s30 + $0x78] sm:$0xff] %v1633_v2  ;;  %1660 = vtanh.f32 %v1099_v61 }
 0x190   : > { %v1637_v4 = vpop.eup %1636  ;;  %1150 = vst [vmem:[%s1884_s30 + $0x80] sm:$0xff] %v1635_v3  ;;  %1662 = vtanh.f32 %v1100_v63 }
 0x191   : > { %v1639_v5 = vpop.eup %1638  ;;  %1151 = vst [vmem:[%s1884_s30 + $0x88] sm:$0xff] %v1637_v4  ;;  %1664 = vtanh.f32 %v1101_v1 }
 0x192   : > { %v1641_v50 = vpop.eup %1640  ;;  %1152 = vst [vmem:[%s1884_s30 + $0x90] sm:$0xff] %v1639_v5 }
 0x193   : > { %v1643_v6 = vpop.eup %1642  ;;  %1153 = vst [vmem:[%s1884_s30 + $0x98] sm:$0xff] %v1641_v50 }
 0x194   : > { %v1645_v7 = vpop.eup %1644  ;;  %1154 = vst [vmem:[%s1884_s30 + $0xa0] sm:$0xff] %v1643_v6 }
 0x195   : > { %v1647_v8 = vpop.eup %1646  ;;  %1155 = vst [vmem:[%s1884_s30 + $0xa8] sm:$0xff] %v1645_v7 }
 0x196   : > { %v1649_v9 = vpop.eup %1648  ;;  %1156 = vst [vmem:[%s1884_s30 + $0xb0] sm:$0xff] %v1647_v8 }
 0x197   : > { %v1651_v10 = vpop.eup %1650  ;;  %1157 = vst [vmem:[%s1884_s30 + $0xb8] sm:$0xff] %v1649_v9 }
 0x198   : > { %v1653_v11 = vpop.eup %1652  ;;  %1158 = vst [vmem:[%s1884_s30 + $0xc0] sm:$0xff] %v1651_v10 }
 0x199   : > { %v1655_v12 = vpop.eup %1654  ;;  %1159 = vst [vmem:[%s1884_s30 + $0xc8] sm:$0xff] %v1653_v11 }
 0x19a   : > { %v1657_v13 = vpop.eup %1656  ;;  %1160 = vst [vmem:[%s1884_s30 + $0xd0] sm:$0xff] %v1655_v12 }
 0x19b   : > { %v1659_v14 = vpop.eup %1658  ;;  %1161 = vst [vmem:[%s1884_s30 + $0xd8] sm:$0xff] %v1657_v13 }
 0x19c   : > { %v1661_v15 = vpop.eup %1660  ;;  %1162 = vst [vmem:[%s1884_s30 + $0xe0] sm:$0xff] %v1659_v14 }
 0x19d   : > { %v1663_v16 = vpop.eup %1662  ;;  %1163 = vst [vmem:[%s1884_s30 + $0xe8] sm:$0xff] %v1661_v15 }
 0x19e   : > { %v1665_v17 = vpop.eup %1664  ;;  %1164 = vst [vmem:[%s1884_s30 + $0xf0] sm:$0xff] %v1663_v16 }
 0x19f   : > { %1165 = vst [vmem:[%s1884_s30 + $0xf8] sm:$0xff] %v1665_v17 }
 0x1a0 PF: > { %s13_s18 = sadd.s32 1, %s1720_s18   ;;  %s2032_s12 = smov %s1700_s13 }
 0x1a1   : > { %p10_p0 = scmp.ge.s32.totalorder %s13_s18, 28   ;;  %s2033_s13 = smov %s1794_s25 }
 0x1a2   : > { %s2034_s14 = smov %s1712_s16  ;;  %s2035_s15 = smov %s1716_s17 }
 0x1a3   : > { %s2036_s16 = smov %s2039_s19  ;;  %s2037_s17 = smov %s2043_s20 }
 0x1a4   :  { %12 = sbr.rel (!%p10_p0) target bundleno = 4 (0x4), region = 119 }

</bundles_post_ra>
